<compile_context>
chip_gen: v5e
topology: v5e:2x2
jax: 0.10.0
libtpu: 0.0.40
codegen_flags: <defaults>
</compile_context>

<pallas_src>
import functools

import jax
import jax.numpy as jnp
from jax import lax
from jax.experimental import pallas as pl
from jax.experimental.pallas import tpu as pltpu

EPS = 1e-5
LANE = 128


def _round_up(a, b):
    return (a + b - 1) // b * b


@functools.lru_cache(maxsize=None)
def _vmem_limit_bytes():
    cap = 128 * 1024 * 1024
    try:
        cap = int(pltpu.get_tpu_info().vmem_capacity_bytes)
    except Exception:
        pass
    return int(min((cap * 3) // 4, 100 * 1024 * 1024))


def _compiler_params():
    return pltpu.CompilerParams(
        dimension_semantics=("parallel",),
        vmem_limit_bytes=_vmem_limit_bytes(),
    )


# -----------------------------------------------------------------------------
# Shared conv core: halo fill -> 3x3 conv (3x3 shifted matmuls) -> BN stats
# -----------------------------------------------------------------------------
def _conv_core(v, w_ref, y_ref, stats_ref, h_pad, colbuf, *, compute_dtype):
    """v: (H, W, Cp) f32 preprocessed activation for the current image."""
    H, W, Cp = v.shape

    # Zero only the 1-pixel halo ring (interior is fully overwritten below).
    zrow = jnp.zeros((1, W + 2, Cp), compute_dtype)
    zcol = jnp.zeros((H + 2, 1, Cp), compute_dtype)
    h_pad[0:1, :, :] = zrow
    h_pad[H + 1:H + 2, :, :] = zrow
    h_pad[:, 0:1, :] = zcol
    h_pad[:, W + 1:W + 2, :] = zcol
    h_pad[1:H + 1, 1:W + 1, :] = v.astype(compute_dtype)

    # 3x3 conv as 9 shifted matmuls, accumulated in a traced f32 value.
    # The sublane (W-axis) shift is hoisted: one dx-shifted copy per dx, the
    # inner dy taps are leading-dim slices (cheap address offsets).
    acc = jnp.zeros((H * W, Cp), jnp.float32)
    for dx in range(3):
        colbuf[...] = h_pad[:, dx:dx + W, :]          # (H+2, W, Cp)
        for dy in range(3):
            tap = colbuf[dy:dy + H, :, :].reshape(H * W, Cp)
            acc = acc + jnp.dot(tap, w_ref[dy * 3 + dx],
                                preferred_element_type=jnp.float32)

    y_ref[0] = acc.reshape(H, W, Cp).astype(y_ref.dtype)

    # Per-image partial BN statistics: (sum, sum of squared deviations from the
    # per-image mean) -> folded outside the kernel with a parallel-variance
    # combine (numerically stable, no E[x^2]-E[x]^2 cancellation).
    s = jnp.sum(acc, axis=0, keepdims=True)           # (1, Cp)
    mu = s * (1.0 / (H * W))
    d = acc - mu
    stats_ref[0, 0:1, :] = s
    stats_ref[0, 1:2, :] = jnp.sum(d * d, axis=0, keepdims=True)


# -----------------------------------------------------------------------------
# Kernel 1: [optional affine (+relu)] -> 3x3 conv -> partial BN stats
# -----------------------------------------------------------------------------
def _conv_kernel(x_ref, scale_ref, shift_ref, w_ref,          # inputs
                 y_ref, stats_ref,                            # outputs
                 h_pad, colbuf,                               # scratch
                 *, apply_affine, apply_relu, compute_dtype):
    v = x_ref[0].astype(jnp.float32)                          # (H, W, Cp)
    if apply_affine:
        v = v * scale_ref[...] + shift_ref[...]
    if apply_relu:
        v = jnp.maximum(v, 0.0)
    _conv_core(v, w_ref, y_ref, stats_ref, h_pad, colbuf,
               compute_dtype=compute_dtype)


def _conv3x3_call(x, scale, shift, w_taps, *, apply_affine, apply_relu,
                  compute_dtype):
    N, H, W, Cp = x.shape
    kernel = functools.partial(_conv_kernel, apply_affine=apply_affine,
                               apply_relu=apply_relu,
                               compute_dtype=compute_dtype)
    return pl.pallas_call(
        kernel,
        out_shape=(
            jax.ShapeDtypeStruct((N, H, W, Cp), compute_dtype),   # conv output
            jax.ShapeDtypeStruct((N, 2, Cp), jnp.float32),        # BN partials
        ),
        grid=(N,),
        in_specs=[
            pl.BlockSpec((1, H, W, Cp), lambda i: (i, 0, 0, 0)),
            pl.BlockSpec((1, Cp), lambda i: (0, 0)),
            pl.BlockSpec((1, Cp), lambda i: (0, 0)),
            pl.BlockSpec((9, Cp, Cp), lambda i: (0, 0, 0)),
        ],
        out_specs=(
            pl.BlockSpec((1, H, W, Cp), lambda i: (i, 0, 0, 0)),
            pl.BlockSpec((1, 2, Cp), lambda i: (i, 0, 0)),
        ),
        scratch_shapes=[
            pltpu.VMEM((H + 2, W + 2, Cp), compute_dtype),  # halo-padded acts
            pltpu.VMEM((H + 2, W, Cp), compute_dtype),      # dx-shifted copy
        ],
        compiler_params=_compiler_params(),
    )(x, scale, shift, w_taps)


# -----------------------------------------------------------------------------
# Kernel 2 (fused): x_new = res + (y_prev*scale + shift); conv1(x_new); stats
# -----------------------------------------------------------------------------
def _fused_kernel(y_in_ref, res_ref, scale_ref, shift_ref, w_ref,   # inputs
                  y_ref, xnew_ref, stats_ref,                       # outputs
                  h_pad, colbuf,                                    # scratch
                  *, compute_dtype):
    v = res_ref[0] + (y_in_ref[0].astype(jnp.float32) * scale_ref[...]
                      + shift_ref[...])
    xnew_ref[0] = v                                   # new residual (f32)
    _conv_core(v, w_ref, y_ref, stats_ref, h_pad, colbuf,
               compute_dtype=compute_dtype)


def _fused_res_conv3x3_call(y_prev, res, scale, shift, w_taps, *,
                            compute_dtype):
    N, H, W, Cp = res.shape
    kernel = functools.partial(_fused_kernel, compute_dtype=compute_dtype)
    return pl.pallas_call(
        kernel,
        out_shape=(
            jax.ShapeDtypeStruct((N, H, W, Cp), compute_dtype),   # conv output
            jax.ShapeDtypeStruct((N, H, W, Cp), jnp.float32),     # new residual
            jax.ShapeDtypeStruct((N, 2, Cp), jnp.float32),        # BN partials
        ),
        grid=(N,),
        in_specs=[
            pl.BlockSpec((1, H, W, Cp), lambda i: (i, 0, 0, 0)),
            pl.BlockSpec((1, H, W, Cp), lambda i: (i, 0, 0, 0)),
            pl.BlockSpec((1, Cp), lambda i: (0, 0)),
            pl.BlockSpec((1, Cp), lambda i: (0, 0)),
            pl.BlockSpec((9, Cp, Cp), lambda i: (0, 0, 0)),
        ],
        out_specs=(
            pl.BlockSpec((1, H, W, Cp), lambda i: (i, 0, 0, 0)),
            pl.BlockSpec((1, H, W, Cp), lambda i: (i, 0, 0, 0)),
            pl.BlockSpec((1, 2, Cp), lambda i: (i, 0, 0)),
        ),
        scratch_shapes=[
            pltpu.VMEM((H + 2, W + 2, Cp), compute_dtype),
            pltpu.VMEM((H + 2, W, Cp), compute_dtype),
        ],
        compiler_params=_compiler_params(),
    )(y_prev, res, scale, shift, w_taps)


# -----------------------------------------------------------------------------
# Kernel 3: final epilogue  out = res + (y*scale + shift)   (last block only)
# -----------------------------------------------------------------------------
def _bn_residual_kernel(y_ref, res_ref, scale_ref, shift_ref, out_ref):
    out_ref[...] = res_ref[...] + (y_ref[...].astype(jnp.float32)
                                   * scale_ref[...] + shift_ref[...])


def _bn_residual_call(y, res, scale, shift):
    N, H, W, Cp = y.shape
    return pl.pallas_call(
        _bn_residual_kernel,
        out_shape=jax.ShapeDtypeStruct((N, H, W, Cp), jnp.float32),
        grid=(N,),
        in_specs=[
            pl.BlockSpec((1, H, W, Cp), lambda i: (i, 0, 0, 0)),
            pl.BlockSpec((1, H, W, Cp), lambda i: (i, 0, 0, 0)),
            pl.BlockSpec((1, Cp), lambda i: (0, 0)),
            pl.BlockSpec((1, Cp), lambda i: (0, 0)),
        ],
        out_specs=pl.BlockSpec((1, H, W, Cp), lambda i: (i, 0, 0, 0)),
        compiler_params=_compiler_params(),
    )(y, res, scale, shift)


# ------------------------------- JAX glue ------------------------------------
def _prep_weight(w_oihw, cp, compute_dtype):
    """(Cout, Cin, 3, 3) -> (9, Cp, Cp); tap t = kh*3+kw, layout [Cin, Cout]."""
    c_out, c_in = w_oihw.shape[0], w_oihw.shape[1]
    wt = jnp.transpose(w_oihw.astype(jnp.float32), (2, 3, 1, 0))
    wt = wt.reshape(9, c_in, c_out)
    wt = jnp.pad(wt, ((0, 0), (0, cp - c_in), (0, cp - c_out)))
    return wt.astype(compute_dtype)


def _pad_vec(v, cp):
    v = v.astype(jnp.float32)
    return jnp.pad(v, (0, cp - v.shape[0]))


def _bn_scale_shift(stats, gamma, beta, n_img):
    """(N, 2, Cp) per-image (sum, M2) -> per-channel scale/shift (training BN)."""
    count = stats.shape[0] * n_img
    sums = stats[:, 0, :]                             # (N, Cp)
    m2s = stats[:, 1, :]                              # (N, Cp)
    means = sums / n_img
    mean = jnp.sum(sums, axis=0) / count
    m2 = jnp.sum(m2s, axis=0) + n_img * jnp.sum((means - mean) ** 2, axis=0)
    var = m2 / count                                  # biased variance
    scale = gamma * lax.rsqrt(var + EPS)
    shift = beta - mean * scale
    return scale.reshape(1, -1), shift.reshape(1, -1)


def _residual_stack(x_p, block_params, compute_dtype):
    """ResidualBlock stack on channel-padded NHWC input (N, H, W, Cp) f32."""
    N, H, W, Cp = x_p.shape
    n_img = H * W

    res = x_p                  # f32 residual stream
    pending = None             # (y2, scale2, shift2) whose epilogue is deferred

    ones = jnp.ones((1, Cp), jnp.float32)
    zeros = jnp.zeros((1, Cp), jnp.float32)

    for (w1, g1, b1, w2, g2, b2) in block_params:
        w1_t = _prep_weight(w1, Cp, compute_dtype)
        w2_t = _prep_weight(w2, Cp, compute_dtype)
        g1_p, b1_p = _pad_vec(g1, Cp), _pad_vec(b1, Cp)
        g2_p, b2_p = _pad_vec(g2, Cp), _pad_vec(b2, Cp)

        if pending is None:
            # first block: conv1 reads the residual stream directly
            y1, st1 = _conv3x3_call(res, ones, zeros, w1_t,
                                    apply_affine=False, apply_relu=False,
                                    compute_dtype=compute_dtype)
        else:
            # previous block's epilogue fused into this block's conv1
            y2p, sc2p, sh2p = pending
            y1, res, st1 = _fused_res_conv3x3_call(
                y2p, res, sc2p, sh2p, w1_t, compute_dtype=compute_dtype)
        sc1, sh1 = _bn_scale_shift(st1, g1_p, b1_p, n_img)

        # conv2 with bn1 + relu fused into its preprocessing
        y2, st2 = _conv3x3_call(y1, sc1, sh1, w2_t,
                                apply_affine=True, apply_relu=True,
                                compute_dtype=compute_dtype)
        sc2, sh2 = _bn_scale_shift(st2, g2_p, b2_p, n_img)
        pending = (y2, sc2, sh2)

    y2, sc2, sh2 = pending
    return _bn_residual_call(y2, res, sc2, sh2)


@functools.partial(jax.jit, static_argnames=("compute_dtype",))
def residual_stack_forward(x_nchw, block_params, compute_dtype=jnp.bfloat16):
    """Sequence of CycleGAN ResidualBlocks (NCHW in / NCHW out)."""
    N, C, H, W = x_nchw.shape
    Cp = max(LANE, _round_up(C, LANE))

    x_p = jnp.transpose(x_nchw, (0, 2, 3, 1)).astype(jnp.float32)
    x_p = jnp.pad(x_p, ((0, 0), (0, 0), (0, 0), (0, Cp - C)))

    out_p = _residual_stack(x_p, block_params, compute_dtype)
    return jnp.transpose(out_p[..., :C], (0, 3, 1, 2))


# ----------------------------- pure-JAX reference ----------------------------
def _reference_stack(x, block_params, model_bf16=False):
    """model_bf16=True mirrors the kernel's bf16 path: bf16 conv operands and
    bf16-stored conv outputs, BN statistics / affine math in f32."""
    if model_bf16:
        q = lambda a: a.astype(jnp.bfloat16).astype(jnp.float32)
    else:
        q = lambda a: a

    def conv2d(v, w):
        return lax.conv_general_dilated(
            q(v), q(w), window_strides=(1, 1), padding=((1, 1), (1, 1)),
            dimension_numbers=("NCHW", "OIHW", "NCHW"),
            precision=lax.Precision.HIGHEST)

    def bn_affine(y, g, b):
        mean = jnp.mean(y, axis=(0, 2, 3), keepdims=True)
        var = jnp.mean((y - mean) ** 2, axis=(0, 2, 3), keepdims=True)
        scale = g.reshape(1, -1, 1, 1) * lax.rsqrt(var + EPS)
        shift = b.reshape(1, -1, 1, 1) - mean * scale
        return q(y) * scale + shift     # stats from exact y, affine on stored y

    for (w1, g1, b1, w2, g2, b2) in block_params:
        h = jax.nn.relu(bn_affine(conv2d(x, w1), g1, b1))
        x = x + bn_affine(conv2d(h, w2), g2, b2)
    return x


if __name__ == "__main__":
    key = jax.random.PRNGKey(0)
    N, C, H, W = 2, 4, 16, 16          # batch=2, conv_dim=4, spatial=16
    n_blocks = 2                       # small stand-in for CycleGenerator's 6

    key, kx = jax.random.split(key)
    x = jax.random.normal(kx, (N, C, H, W), dtype=jnp.float32)

    block_params = []
    for _ in range(n_blocks):
        key, k1, k2, k3, k4, k5, k6 = jax.random.split(key, 7)
        w1 = 0.1 * jax.random.normal(k1, (C, C, 3, 3), dtype=jnp.float32)
        w2 = 0.1 * jax.random.normal(k2, (C, C, 3, 3), dtype=jnp.float32)
        g1 = 1.0 + 0.1 * jax.random.normal(k3, (C,), dtype=jnp.float32)
        b1 = 0.1 * jax.random.normal(k4, (C,), dtype=jnp.float32)
        g2 = 1.0 + 0.1 * jax.random.normal(k5, (C,), dtype=jnp.float32)
        b2 = 0.1 * jax.random.normal(k6, (C,), dtype=jnp.float32)
        block_params.append((w1, g1, b1, w2, g2, b2))
    block_params = tuple(block_params)

    # Strict check: f32 kernel path vs full-precision reference.
    ref_f32 = _reference_stack(x, block_params, model_bf16=False)
    out_f32 = jax.block_until_ready(
        residual_stack_forward(x, block_params, compute_dtype=jnp.float32))
    assert out_f32.shape == (N, C, H, W), out_f32.shape
    err = float(jnp.max(jnp.abs(out_f32 - ref_f32)))
    assert err < 2e-3, f"f32 path max err {err}"

    # Default bf16 path vs a reference that models the same quantization points
    # (bf16 conv operands + bf16-stored conv outputs, f32 BN statistics).
    ref_bf16 = _reference_stack(x, block_params, model_bf16=True)
    out_bf16 = jax.block_until_ready(residual_stack_forward(x, block_params))
    assert out_bf16.shape == (N, C, H, W), out_bf16.shape
    err = float(jnp.max(jnp.abs(out_bf16 - ref_bf16)))
    assert err < 5e-2, f"bf16 path max err {err}"

    print("KERNEL_OK")
</pallas_src>

<mosaic_0001>
module attributes {stable_mosaic.version = 11 : i64} {
  func.func @_conv_kernel(%arg0: i32, %arg1: memref<1x16x16x128xf32, #tpu.memory_space<vmem>>, %arg2: memref<1x128xf32, #tpu.memory_space<vmem>>, %arg3: memref<1x128xf32, #tpu.memory_space<vmem>>, %arg4: memref<9x128x128xf32, #tpu.memory_space<vmem>>, %arg5: memref<1x16x16x128xf32, #tpu.memory_space<vmem>>, %arg6: memref<1x2x128xf32, #tpu.memory_space<vmem>>, %arg7: memref<18x18x128xf32, #tpu.memory_space<vmem>>, %arg8: memref<18x16x128xf32, #tpu.memory_space<vmem>>) attributes {dimension_semantics = [#tpu.dimension_semantics<parallel>], iteration_bounds = array<i64: 2>, scalar_prefetch = 0 : i64, scratch_operands = 2 : i64, tpu.core_type = #tpu.core_type<tc>, window_params = [{transform_indices = @transform_0, window_bounds = array<i64: 1, 16, 16, 128>}, {pipeline_mode = #tpu.pipeline_mode<synchronous>, transform_indices = @transform_1, window_bounds = array<i64: 1, 128>}, {pipeline_mode = #tpu.pipeline_mode<synchronous>, transform_indices = @transform_2, window_bounds = array<i64: 1, 128>}, {pipeline_mode = #tpu.pipeline_mode<synchronous>, transform_indices = @transform_3, window_bounds = array<i64: 9, 128, 128>}, {transform_indices = @transform_4, window_bounds = array<i64: 1, 16, 16, 128>}, {transform_indices = @transform_5, window_bounds = array<i64: 1, 2, 128>}]} {
    %c0 = arith.constant 0 : index
    %c0_0 = arith.constant 0 : index
    %c0_1 = arith.constant 0 : index
    %c0_2 = arith.constant 0 : index
    %0 = vector.load %arg1[%c0, %c0_0, %c0_1, %c0_2] : memref<1x16x16x128xf32, #tpu.memory_space<vmem>>, vector<1x16x16x128xf32>
    %1 = vector.shape_cast %0 : vector<1x16x16x128xf32> to vector<16x16x128xf32>
    %cst = arith.constant 0.000000e+00 : f32
    %2 = vector.broadcast %cst : f32 to vector<1x18x128xf32>
    %cst_3 = arith.constant 0.000000e+00 : f32
    %3 = vector.broadcast %cst_3 : f32 to vector<18x1x128xf32>
    %c0_4 = arith.constant 0 : index
    %c0_5 = arith.constant 0 : index
    %c0_6 = arith.constant 0 : index
    %4 = vector.load %arg7[%c0_4, %c0_5, %c0_6] : memref<18x18x128xf32, #tpu.memory_space<vmem>>, vector<1x18x128xf32>
    tpu.vector_store %arg7[%c0_4, %c0_5, %c0_6], %2 {strides = array<i32>} : memref<18x18x128xf32, #tpu.memory_space<vmem>>, vector<1x18x128xf32>,
    %c17 = arith.constant 17 : index
    %c0_7 = arith.constant 0 : index
    %c0_8 = arith.constant 0 : index
    %5 = vector.load %arg7[%c17, %c0_7, %c0_8] : memref<18x18x128xf32, #tpu.memory_space<vmem>>, vector<1x18x128xf32>
    tpu.vector_store %arg7[%c17, %c0_7, %c0_8], %2 {strides = array<i32>} : memref<18x18x128xf32, #tpu.memory_space<vmem>>, vector<1x18x128xf32>,
    %c0_9 = arith.constant 0 : index
    %c0_10 = arith.constant 0 : index
    %c0_11 = arith.constant 0 : index
    %6 = vector.load %arg7[%c0_9, %c0_10, %c0_11] : memref<18x18x128xf32, #tpu.memory_space<vmem>>, vector<18x1x128xf32>
    tpu.vector_store %arg7[%c0_9, %c0_10, %c0_11], %3 {strides = array<i32>} : memref<18x18x128xf32, #tpu.memory_space<vmem>>, vector<18x1x128xf32>,
    %c0_12 = arith.constant 0 : index
    %c17_13 = arith.constant 17 : index
    %c0_14 = arith.constant 0 : index
    %7 = vector.load %arg7[%c0_12, %c17_13, %c0_14] : memref<18x18x128xf32, #tpu.memory_space<vmem>>, vector<18x1x128xf32>
    tpu.vector_store %arg7[%c0_12, %c17_13, %c0_14], %3 {strides = array<i32>} : memref<18x18x128xf32, #tpu.memory_space<vmem>>, vector<18x1x128xf32>,
    %c1 = arith.constant 1 : index
    %c1_15 = arith.constant 1 : index
    %c0_16 = arith.constant 0 : index
    %8 = vector.load %arg7[%c1, %c1_15, %c0_16] : memref<18x18x128xf32, #tpu.memory_space<vmem>>, vector<16x16x128xf32>
    tpu.vector_store %arg7[%c1, %c1_15, %c0_16], %1 {strides = array<i32>} : memref<18x18x128xf32, #tpu.memory_space<vmem>>, vector<16x16x128xf32>,
    %cst_17 = arith.constant 0.000000e+00 : f32
    %9 = vector.broadcast %cst_17 : f32 to vector<256x128xf32>
    %c0_18 = arith.constant 0 : index
    %c0_19 = arith.constant 0 : index
    %c0_20 = arith.constant 0 : index
    %10 = vector.load %arg7[%c0_18, %c0_19, %c0_20] : memref<18x18x128xf32, #tpu.memory_space<vmem>>, vector<18x16x128xf32>
    %c0_21 = arith.constant 0 : index
    %c0_22 = arith.constant 0 : index
    %c0_23 = arith.constant 0 : index
    %11 = vector.load %arg8[%c0_21, %c0_22, %c0_23] : memref<18x16x128xf32, #tpu.memory_space<vmem>>, vector<18x16x128xf32>
    tpu.vector_store %arg8[%c0_21, %c0_22, %c0_23], %10 {strides = array<i32>} : memref<18x16x128xf32, #tpu.memory_space<vmem>>, vector<18x16x128xf32>,
    %c0_24 = arith.constant 0 : index
    %c0_25 = arith.constant 0 : index
    %c0_26 = arith.constant 0 : index
    %12 = vector.load %arg8[%c0_24, %c0_25, %c0_26] : memref<18x16x128xf32, #tpu.memory_space<vmem>>, vector<16x16x128xf32>
    %13 = vector.shape_cast %12 : vector<16x16x128xf32> to vector<256x128xf32>
    %c0_27 = arith.constant 0 : index
    %c0_28 = arith.constant 0 : index
    %c0_29 = arith.constant 0 : index
    %14 = vector.load %arg4[%c0_27, %c0_28, %c0_29] : memref<9x128x128xf32, #tpu.memory_space<vmem>>, vector<1x128x128xf32>
    %15 = vector.shape_cast %14 : vector<1x128x128xf32> to vector<128x128xf32>
    %cst_30 = arith.constant dense<0.000000e+00> : vector<256x128xf32>
    %16 = tpu.matmul %13, %15, %cst_30 {dimension_numbers = #tpu.dot_dimension_numbers<[1], [0], [0], [1], [0, 0, 1, 1], [], []>} : vector<256x128xf32>, vector<128x128xf32>, vector<256x128xf32> -> vector<256x128xf32>
    %17 = arith.addf %9, %16 : vector<256x128xf32>
    %c1_31 = arith.constant 1 : index
    %c0_32 = arith.constant 0 : index
    %c0_33 = arith.constant 0 : index
    %18 = vector.load %arg8[%c1_31, %c0_32, %c0_33] : memref<18x16x128xf32, #tpu.memory_space<vmem>>, vector<16x16x128xf32>
    %19 = vector.shape_cast %18 : vector<16x16x128xf32> to vector<256x128xf32>
    %c3 = arith.constant 3 : index
    %c0_34 = arith.constant 0 : index
    %c0_35 = arith.constant 0 : index
    %20 = vector.load %arg4[%c3, %c0_34, %c0_35] : memref<9x128x128xf32, #tpu.memory_space<vmem>>, vector<1x128x128xf32>
    %21 = vector.shape_cast %20 : vector<1x128x128xf32> to vector<128x128xf32>
    %cst_36 = arith.constant dense<0.000000e+00> : vector<256x128xf32>
    %22 = tpu.matmul %19, %21, %cst_36 {dimension_numbers = #tpu.dot_dimension_numbers<[1], [0], [0], [1], [0, 0, 1, 1], [], []>} : vector<256x128xf32>, vector<128x128xf32>, vector<256x128xf32> -> vector<256x128xf32>
    %23 = arith.addf %17, %22 : vector<256x128xf32>
    %c2 = arith.constant 2 : index
    %c0_37 = arith.constant 0 : index
    %c0_38 = arith.constant 0 : index
    %24 = vector.load %arg8[%c2, %c0_37, %c0_38] : memref<18x16x128xf32, #tpu.memory_space<vmem>>, vector<16x16x128xf32>
    %25 = vector.shape_cast %24 : vector<16x16x128xf32> to vector<256x128xf32>
    %c6 = arith.constant 6 : index
    %c0_39 = arith.constant 0 : index
    %c0_40 = arith.constant 0 : index
    %26 = vector.load %arg4[%c6, %c0_39, %c0_40] : memref<9x128x128xf32, #tpu.memory_space<vmem>>, vector<1x128x128xf32>
    %27 = vector.shape_cast %26 : vector<1x128x128xf32> to vector<128x128xf32>
    %cst_41 = arith.constant dense<0.000000e+00> : vector<256x128xf32>
    %28 = tpu.matmul %25, %27, %cst_41 {dimension_numbers = #tpu.dot_dimension_numbers<[1], [0], [0], [1], [0, 0, 1, 1], [], []>} : vector<256x128xf32>, vector<128x128xf32>, vector<256x128xf32> -> vector<256x128xf32>
    %29 = arith.addf %23, %28 : vector<256x128xf32>
    %c0_42 = arith.constant 0 : index
    %c1_43 = arith.constant 1 : index
    %c0_44 = arith.constant 0 : index
    %30 = vector.load %arg7[%c0_42, %c1_43, %c0_44] : memref<18x18x128xf32, #tpu.memory_space<vmem>>, vector<18x16x128xf32>
    %c0_45 = arith.constant 0 : index
    %c0_46 = arith.constant 0 : index
    %c0_47 = arith.constant 0 : index
    %31 = vector.load %arg8[%c0_45, %c0_46, %c0_47] : memref<18x16x128xf32, #tpu.memory_space<vmem>>, vector<18x16x128xf32>
    tpu.vector_store %arg8[%c0_45, %c0_46, %c0_47], %30 {strides = array<i32>} : memref<18x16x128xf32, #tpu.memory_space<vmem>>, vector<18x16x128xf32>,
    %c0_48 = arith.constant 0 : index
    %c0_49 = arith.constant 0 : index
    %c0_50 = arith.constant 0 : index
    %32 = vector.load %arg8[%c0_48, %c0_49, %c0_50] : memref<18x16x128xf32, #tpu.memory_space<vmem>>, vector<16x16x128xf32>
    %33 = vector.shape_cast %32 : vector<16x16x128xf32> to vector<256x128xf32>
    %c1_51 = arith.constant 1 : index
    %c0_52 = arith.constant 0 : index
    %c0_53 = arith.constant 0 : index
    %34 = vector.load %arg4[%c1_51, %c0_52, %c0_53] : memref<9x128x128xf32, #tpu.memory_space<vmem>>, vector<1x128x128xf32>
    %35 = vector.shape_cast %34 : vector<1x128x128xf32> to vector<128x128xf32>
    %cst_54 = arith.constant dense<0.000000e+00> : vector<256x128xf32>
    %36 = tpu.matmul %33, %35, %cst_54 {dimension_numbers = #tpu.dot_dimension_numbers<[1], [0], [0], [1], [0, 0, 1, 1], [], []>} : vector<256x128xf32>, vector<128x128xf32>, vector<256x128xf32> -> vector<256x128xf32>
    %37 = arith.addf %29, %36 : vector<256x128xf32>
    %c1_55 = arith.constant 1 : index
    %c0_56 = arith.constant 0 : index
    %c0_57 = arith.constant 0 : index
    %38 = vector.load %arg8[%c1_55, %c0_56, %c0_57] : memref<18x16x128xf32, #tpu.memory_space<vmem>>, vector<16x16x128xf32>
    %39 = vector.shape_cast %38 : vector<16x16x128xf32> to vector<256x128xf32>
    %c4 = arith.constant 4 : index
    %c0_58 = arith.constant 0 : index
    %c0_59 = arith.constant 0 : index
    %40 = vector.load %arg4[%c4, %c0_58, %c0_59] : memref<9x128x128xf32, #tpu.memory_space<vmem>>, vector<1x128x128xf32>
    %41 = vector.shape_cast %40 : vector<1x128x128xf32> to vector<128x128xf32>
    %cst_60 = arith.constant dense<0.000000e+00> : vector<256x128xf32>
    %42 = tpu.matmul %39, %41, %cst_60 {dimension_numbers = #tpu.dot_dimension_numbers<[1], [0], [0], [1], [0, 0, 1, 1], [], []>} : vector<256x128xf32>, vector<128x128xf32>, vector<256x128xf32> -> vector<256x128xf32>
    %43 = arith.addf %37, %42 : vector<256x128xf32>
    %c2_61 = arith.constant 2 : index
    %c0_62 = arith.constant 0 : index
    %c0_63 = arith.constant 0 : index
    %44 = vector.load %arg8[%c2_61, %c0_62, %c0_63] : memref<18x16x128xf32, #tpu.memory_space<vmem>>, vector<16x16x128xf32>
    %45 = vector.shape_cast %44 : vector<16x16x128xf32> to vector<256x128xf32>
    %c7 = arith.constant 7 : index
    %c0_64 = arith.constant 0 : index
    %c0_65 = arith.constant 0 : index
    %46 = vector.load %arg4[%c7, %c0_64, %c0_65] : memref<9x128x128xf32, #tpu.memory_space<vmem>>, vector<1x128x128xf32>
    %47 = vector.shape_cast %46 : vector<1x128x128xf32> to vector<128x128xf32>
    %cst_66 = arith.constant dense<0.000000e+00> : vector<256x128xf32>
    %48 = tpu.matmul %45, %47, %cst_66 {dimension_numbers = #tpu.dot_dimension_numbers<[1], [0], [0], [1], [0, 0, 1, 1], [], []>} : vector<256x128xf32>, vector<128x128xf32>, vector<256x128xf32> -> vector<256x128xf32>
    %49 = arith.addf %43, %48 : vector<256x128xf32>
    %c0_67 = arith.constant 0 : index
    %c2_68 = arith.constant 2 : index
    %c0_69 = arith.constant 0 : index
    %50 = vector.load %arg7[%c0_67, %c2_68, %c0_69] : memref<18x18x128xf32, #tpu.memory_space<vmem>>, vector<18x16x128xf32>
    %c0_70 = arith.constant 0 : index
    %c0_71 = arith.constant 0 : index
    %c0_72 = arith.constant 0 : index
    %51 = vector.load %arg8[%c0_70, %c0_71, %c0_72] : memref<18x16x128xf32, #tpu.memory_space<vmem>>, vector<18x16x128xf32>
    tpu.vector_store %arg8[%c0_70, %c0_71, %c0_72], %50 {strides = array<i32>} : memref<18x16x128xf32, #tpu.memory_space<vmem>>, vector<18x16x128xf32>,
    %c0_73 = arith.constant 0 : index
    %c0_74 = arith.constant 0 : index
    %c0_75 = arith.constant 0 : index
    %52 = vector.load %arg8[%c0_73, %c0_74, %c0_75] : memref<18x16x128xf32, #tpu.memory_space<vmem>>, vector<16x16x128xf32>
    %53 = vector.shape_cast %52 : vector<16x16x128xf32> to vector<256x128xf32>
    %c2_76 = arith.constant 2 : index
    %c0_77 = arith.constant 0 : index
    %c0_78 = arith.constant 0 : index
    %54 = vector.load %arg4[%c2_76, %c0_77, %c0_78] : memref<9x128x128xf32, #tpu.memory_space<vmem>>, vector<1x128x128xf32>
    %55 = vector.shape_cast %54 : vector<1x128x128xf32> to vector<128x128xf32>
    %cst_79 = arith.constant dense<0.000000e+00> : vector<256x128xf32>
    %56 = tpu.matmul %53, %55, %cst_79 {dimension_numbers = #tpu.dot_dimension_numbers<[1], [0], [0], [1], [0, 0, 1, 1], [], []>} : vector<256x128xf32>, vector<128x128xf32>, vector<256x128xf32> -> vector<256x128xf32>
    %57 = arith.addf %49, %56 : vector<256x128xf32>
    %c1_80 = arith.constant 1 : index
    %c0_81 = arith.constant 0 : index
    %c0_82 = arith.constant 0 : index
    %58 = vector.load %arg8[%c1_80, %c0_81, %c0_82] : memref<18x16x128xf32, #tpu.memory_space<vmem>>, vector<16x16x128xf32>
    %59 = vector.shape_cast %58 : vector<16x16x128xf32> to vector<256x128xf32>
    %c5 = arith.constant 5 : index
    %c0_83 = arith.constant 0 : index
    %c0_84 = arith.constant 0 : index
    %60 = vector.load %arg4[%c5, %c0_83, %c0_84] : memref<9x128x128xf32, #tpu.memory_space<vmem>>, vector<1x128x128xf32>
    %61 = vector.shape_cast %60 : vector<1x128x128xf32> to vector<128x128xf32>
    %cst_85 = arith.constant dense<0.000000e+00> : vector<256x128xf32>
    %62 = tpu.matmul %59, %61, %cst_85 {dimension_numbers = #tpu.dot_dimension_numbers<[1], [0], [0], [1], [0, 0, 1, 1], [], []>} : vector<256x128xf32>, vector<128x128xf32>, vector<256x128xf32> -> vector<256x128xf32>
    %63 = arith.addf %57, %62 : vector<256x128xf32>
    %c2_86 = arith.constant 2 : index
    %c0_87 = arith.constant 0 : index
    %c0_88 = arith.constant 0 : index
    %64 = vector.load %arg8[%c2_86, %c0_87, %c0_88] : memref<18x16x128xf32, #tpu.memory_space<vmem>>, vector<16x16x128xf32>
    %65 = vector.shape_cast %64 : vector<16x16x128xf32> to vector<256x128xf32>
    %c8 = arith.constant 8 : index
    %c0_89 = arith.constant 0 : index
    %c0_90 = arith.constant 0 : index
    %66 = vector.load %arg4[%c8, %c0_89, %c0_90] : memref<9x128x128xf32, #tpu.memory_space<vmem>>, vector<1x128x128xf32>
    %67 = vector.shape_cast %66 : vector<1x128x128xf32> to vector<128x128xf32>
    %cst_91 = arith.constant dense<0.000000e+00> : vector<256x128xf32>
    %68 = tpu.matmul %65, %67, %cst_91 {dimension_numbers = #tpu.dot_dimension_numbers<[1], [0], [0], [1], [0, 0, 1, 1], [], []>} : vector<256x128xf32>, vector<128x128xf32>, vector<256x128xf32> -> vector<256x128xf32>
    %69 = arith.addf %63, %68 : vector<256x128xf32>
    %70 = vector.shape_cast %69 : vector<256x128xf32> to vector<16x16x128xf32>
    %c0_92 = arith.constant 0 : index
    %c0_93 = arith.constant 0 : index
    %c0_94 = arith.constant 0 : index
    %c0_95 = arith.constant 0 : index
    %71 = vector.load %arg5[%c0_92, %c0_93, %c0_94, %c0_95] : memref<1x16x16x128xf32, #tpu.memory_space<vmem>>, vector<1x16x16x128xf32>
    %72 = vector.shape_cast %71 : vector<1x16x16x128xf32> to vector<16x16x128xf32>
    %73 = vector.shape_cast %70 : vector<16x16x128xf32> to vector<1x16x16x128xf32>
    tpu.vector_store %arg5[%c0_92, %c0_93, %c0_94, %c0_95], %73 {strides = array<i32>} : memref<1x16x16x128xf32, #tpu.memory_space<vmem>>, vector<1x16x16x128xf32>,
    %cst_96 = arith.constant dense<0.000000e+00> : vector<128xf32>
    %74 = vector.multi_reduction <add>, %69, %cst_96 [0] : vector<256x128xf32> to vector<128xf32>
    %75 = vector.shape_cast %74 : vector<128xf32> to vector<1x128xf32>
    %cst_97 = arith.constant 3.906250e-03 : f32
    %76 = vector.broadcast %cst_97 : f32 to vector<1x128xf32>
    %77 = arith.mulf %75, %76 : vector<1x128xf32>
    %78 = vector.broadcast %77 : vector<1x128xf32> to vector<256x128xf32>
    %79 = arith.subf %69, %78 : vector<256x128xf32>
    %c0_98 = arith.constant 0 : index
    %c0_99 = arith.constant 0 : index
    %c0_100 = arith.constant 0 : index
    %80 = vector.load %arg6[%c0_98, %c0_99, %c0_100] : memref<1x2x128xf32, #tpu.memory_space<vmem>>, vector<1x1x128xf32>
    %81 = vector.shape_cast %80 : vector<1x1x128xf32> to vector<1x128xf32>
    %82 = vector.shape_cast %75 : vector<1x128xf32> to vector<1x1x128xf32>
    tpu.vector_store %arg6[%c0_98, %c0_99, %c0_100], %82 {strides = array<i32>} : memref<1x2x128xf32, #tpu.memory_space<vmem>>, vector<1x1x128xf32>,
    %83 = arith.mulf %79, %79 : vector<256x128xf32>
    %cst_101 = arith.constant dense<0.000000e+00> : vector<128xf32>
    %84 = vector.multi_reduction <add>, %83, %cst_101 [0] : vector<256x128xf32> to vector<128xf32>
    %85 = vector.shape_cast %84 : vector<128xf32> to vector<1x128xf32>
    %c0_102 = arith.constant 0 : index
    %c1_103 = arith.constant 1 : index
    %c0_104 = arith.constant 0 : index
    %86 = vector.load %arg6[%c0_102, %c1_103, %c0_104] : memref<1x2x128xf32, #tpu.memory_space<vmem>>, vector<1x1x128xf32>
    %87 = vector.shape_cast %86 : vector<1x1x128xf32> to vector<1x128xf32>
    %88 = vector.shape_cast %85 : vector<1x128xf32> to vector<1x1x128xf32>
    tpu.vector_store %arg6[%c0_102, %c1_103, %c0_104], %88 {strides = array<i32>} : memref<1x2x128xf32, #tpu.memory_space<vmem>>, vector<1x1x128xf32>,
    return
  }
  func.func @transform_0(%arg0: i32) -> (i32, i32, i32, i32) {
    %c0_i32 = arith.constant 0 : i32
    %c0_i32_0 = arith.constant 0 : i32
    %c0_i32_1 = arith.constant 0 : i32
    %c0_i32_2 = arith.constant 0 : i32
    return %arg0, %c0_i32, %c0_i32_0, %c0_i32_1 : i32, i32, i32, i32
  }
  func.func @transform_1(%arg0: i32) -> (i32, i32) {
    %c0_i32 = arith.constant 0 : i32
    %c0_i32_0 = arith.constant 0 : i32
    %c0_i32_1 = arith.constant 0 : i32
    return %c0_i32, %c0_i32_0 : i32, i32
  }
  func.func @transform_2(%arg0: i32) -> (i32, i32) {
    %c0_i32 = arith.constant 0 : i32
    %c0_i32_0 = arith.constant 0 : i32
    %c0_i32_1 = arith.constant 0 : i32
    return %c0_i32, %c0_i32_0 : i32, i32
  }
  func.func @transform_3(%arg0: i32) -> (i32, i32, i32) {
    %c0_i32 = arith.constant 0 : i32
    %c0_i32_0 = arith.constant 0 : i32
    %c0_i32_1 = arith.constant 0 : i32
    %c0_i32_2 = arith.constant 0 : i32
    return %c0_i32, %c0_i32_0, %c0_i32_1 : i32, i32, i32
  }
  func.func @transform_4(%arg0: i32) -> (i32, i32, i32, i32) {
    %c0_i32 = arith.constant 0 : i32
    %c0_i32_0 = arith.constant 0 : i32
    %c0_i32_1 = arith.constant 0 : i32
    %c0_i32_2 = arith.constant 0 : i32
    return %arg0, %c0_i32, %c0_i32_0, %c0_i32_1 : i32, i32, i32, i32
  }
  func.func @transform_5(%arg0: i32) -> (i32, i32, i32) {
    %c0_i32 = arith.constant 0 : i32
    %c0_i32_0 = arith.constant 0 : i32
    %c0_i32_1 = arith.constant 0 : i32
    return %arg0, %c0_i32, %c0_i32_0 : i32, i32, i32
  }
}

module attributes {stable_mosaic.version = 11 : i64} {
  func.func @_bn_residual_kernel(%arg0: i32, %arg1: memref<1x16x16x128xf32, #tpu.memory_space<vmem>>, %arg2: memref<1x16x16x128xf32, #tpu.memory_space<vmem>>, %arg3: memref<1x128xf32, #tpu.memory_space<vmem>>, %arg4: memref<1x128xf32, #tpu.memory_space<vmem>>, %arg5: memref<1x16x16x128xf32, #tpu.memory_space<vmem>>) attributes {dimension_semantics = [#tpu.dimension_semantics<parallel>], iteration_bounds = array<i64: 2>, scalar_prefetch = 0 : i64, scratch_operands = 0 : i64, tpu.core_type = #tpu.core_type<tc>, window_params = [{transform_indices = @transform_0, window_bounds = array<i64: 1, 16, 16, 128>}, {transform_indices = @transform_1, window_bounds = array<i64: 1, 16, 16, 128>}, {pipeline_mode = #tpu.pipeline_mode<synchronous>, transform_indices = @transform_2, window_bounds = array<i64: 1, 128>}, {pipeline_mode = #tpu.pipeline_mode<synchronous>, transform_indices = @transform_3, window_bounds = array<i64: 1, 128>}, {transform_indices = @transform_4, window_bounds = array<i64: 1, 16, 16, 128>}]} {
    %c0 = arith.constant 0 : index
    %c0_0 = arith.constant 0 : index
    %c0_1 = arith.constant 0 : index
    %c0_2 = arith.constant 0 : index
    %0 = vector.load %arg2[%c0, %c0_0, %c0_1, %c0_2] : memref<1x16x16x128xf32, #tpu.memory_space<vmem>>, vector<1x16x16x128xf32>
    %c0_3 = arith.constant 0 : index
    %c0_4 = arith.constant 0 : index
    %c0_5 = arith.constant 0 : index
    %c0_6 = arith.constant 0 : index
    %1 = vector.load %arg1[%c0_3, %c0_4, %c0_5, %c0_6] : memref<1x16x16x128xf32, #tpu.memory_space<vmem>>, vector<1x16x16x128xf32>
    %c0_7 = arith.constant 0 : index
    %c0_8 = arith.constant 0 : index
    %2 = vector.load %arg3[%c0_7, %c0_8] : memref<1x128xf32, #tpu.memory_space<vmem>>, vector<1x128xf32>
    %3 = vector.shape_cast %2 : vector<1x128xf32> to vector<1x1x1x128xf32>
    %4 = vector.broadcast %3 : vector<1x1x1x128xf32> to vector<1x16x16x128xf32>
    %5 = arith.mulf %1, %4 : vector<1x16x16x128xf32>
    %c0_9 = arith.constant 0 : index
    %c0_10 = arith.constant 0 : index
    %6 = vector.load %arg4[%c0_9, %c0_10] : memref<1x128xf32, #tpu.memory_space<vmem>>, vector<1x128xf32>
    %7 = vector.shape_cast %6 : vector<1x128xf32> to vector<1x1x1x128xf32>
    %8 = vector.broadcast %7 : vector<1x1x1x128xf32> to vector<1x16x16x128xf32>
    %9 = arith.addf %5, %8 : vector<1x16x16x128xf32>
    %10 = arith.addf %0, %9 : vector<1x16x16x128xf32>
    %c0_11 = arith.constant 0 : index
    %c0_12 = arith.constant 0 : index
    %c0_13 = arith.constant 0 : index
    %c0_14 = arith.constant 0 : index
    %11 = vector.load %arg5[%c0_11, %c0_12, %c0_13, %c0_14] : memref<1x16x16x128xf32, #tpu.memory_space<vmem>>, vector<1x16x16x128xf32>
    tpu.vector_store %arg5[%c0_11, %c0_12, %c0_13, %c0_14], %10 {strides = array<i32>} : memref<1x16x16x128xf32, #tpu.memory_space<vmem>>, vector<1x16x16x128xf32>,
    return
  }
  func.func @transform_0(%arg0: i32) -> (i32, i32, i32, i32) {
    %c0_i32 = arith.constant 0 : i32
    %c0_i32_0 = arith.constant 0 : i32
    %c0_i32_1 = arith.constant 0 : i32
    %c0_i32_2 = arith.constant 0 : i32
    return %arg0, %c0_i32, %c0_i32_0, %c0_i32_1 : i32, i32, i32, i32
  }
  func.func @transform_1(%arg0: i32) -> (i32, i32, i32, i32) {
    %c0_i32 = arith.constant 0 : i32
    %c0_i32_0 = arith.constant 0 : i32
    %c0_i32_1 = arith.constant 0 : i32
    %c0_i32_2 = arith.constant 0 : i32
    return %arg0, %c0_i32, %c0_i32_0, %c0_i32_1 : i32, i32, i32, i32
  }
  func.func @transform_2(%arg0: i32) -> (i32, i32) {
    %c0_i32 = arith.constant 0 : i32
    %c0_i32_0 = arith.constant 0 : i32
    %c0_i32_1 = arith.constant 0 : i32
    return %c0_i32, %c0_i32_0 : i32, i32
  }
  func.func @transform_3(%arg0: i32) -> (i32, i32) {
    %c0_i32 = arith.constant 0 : i32
    %c0_i32_0 = arith.constant 0 : i32
    %c0_i32_1 = arith.constant 0 : i32
    return %c0_i32, %c0_i32_0 : i32, i32
  }
  func.func @transform_4(%arg0: i32) -> (i32, i32, i32, i32) {
    %c0_i32 = arith.constant 0 : i32
    %c0_i32_0 = arith.constant 0 : i32
    %c0_i32_1 = arith.constant 0 : i32
    %c0_i32_2 = arith.constant 0 : i32
    return %arg0, %c0_i32, %c0_i32_0, %c0_i32_1 : i32, i32, i32, i32
  }
}

module attributes {stable_mosaic.version = 11 : i64} {
  func.func @_conv_kernel(%arg0: i32, %arg1: memref<1x16x16x128xf32, #tpu.memory_space<vmem>>, %arg2: memref<1x128xf32, #tpu.memory_space<vmem>>, %arg3: memref<1x128xf32, #tpu.memory_space<vmem>>, %arg4: memref<9x128x128xf32, #tpu.memory_space<vmem>>, %arg5: memref<1x16x16x128xf32, #tpu.memory_space<vmem>>, %arg6: memref<1x2x128xf32, #tpu.memory_space<vmem>>, %arg7: memref<18x18x128xf32, #tpu.memory_space<vmem>>, %arg8: memref<18x16x128xf32, #tpu.memory_space<vmem>>) attributes {dimension_semantics = [#tpu.dimension_semantics<parallel>], iteration_bounds = array<i64: 2>, scalar_prefetch = 0 : i64, scratch_operands = 2 : i64, tpu.core_type = #tpu.core_type<tc>, window_params = [{transform_indices = @transform_0, window_bounds = array<i64: 1, 16, 16, 128>}, {pipeline_mode = #tpu.pipeline_mode<synchronous>, transform_indices = @transform_1, window_bounds = array<i64: 1, 128>}, {pipeline_mode = #tpu.pipeline_mode<synchronous>, transform_indices = @transform_2, window_bounds = array<i64: 1, 128>}, {pipeline_mode = #tpu.pipeline_mode<synchronous>, transform_indices = @transform_3, window_bounds = array<i64: 9, 128, 128>}, {transform_indices = @transform_4, window_bounds = array<i64: 1, 16, 16, 128>}, {transform_indices = @transform_5, window_bounds = array<i64: 1, 2, 128>}]} {
    %c0 = arith.constant 0 : index
    %c0_0 = arith.constant 0 : index
    %c0_1 = arith.constant 0 : index
    %c0_2 = arith.constant 0 : index
    %0 = vector.load %arg1[%c0, %c0_0, %c0_1, %c0_2] : memref<1x16x16x128xf32, #tpu.memory_space<vmem>>, vector<1x16x16x128xf32>
    %1 = vector.shape_cast %0 : vector<1x16x16x128xf32> to vector<16x16x128xf32>
    %c0_3 = arith.constant 0 : index
    %c0_4 = arith.constant 0 : index
    %2 = vector.load %arg2[%c0_3, %c0_4] : memref<1x128xf32, #tpu.memory_space<vmem>>, vector<1x128xf32>
    %3 = vector.shape_cast %2 : vector<1x128xf32> to vector<1x1x128xf32>
    %4 = vector.broadcast %3 : vector<1x1x128xf32> to vector<16x16x128xf32>
    %5 = arith.mulf %1, %4 : vector<16x16x128xf32>
    %c0_5 = arith.constant 0 : index
    %c0_6 = arith.constant 0 : index
    %6 = vector.load %arg3[%c0_5, %c0_6] : memref<1x128xf32, #tpu.memory_space<vmem>>, vector<1x128xf32>
    %7 = vector.shape_cast %6 : vector<1x128xf32> to vector<1x1x128xf32>
    %8 = vector.broadcast %7 : vector<1x1x128xf32> to vector<16x16x128xf32>
    %9 = arith.addf %5, %8 : vector<16x16x128xf32>
    %cst = arith.constant 0.000000e+00 : f32
    %10 = vector.broadcast %cst : f32 to vector<16x16x128xf32>
    %11 = arith.maximumf %9, %10 : vector<16x16x128xf32>
    %cst_7 = arith.constant 0.000000e+00 : f32
    %12 = vector.broadcast %cst_7 : f32 to vector<1x18x128xf32>
    %cst_8 = arith.constant 0.000000e+00 : f32
    %13 = vector.broadcast %cst_8 : f32 to vector<18x1x128xf32>
    %c0_9 = arith.constant 0 : index
    %c0_10 = arith.constant 0 : index
    %c0_11 = arith.constant 0 : index
    %14 = vector.load %arg7[%c0_9, %c0_10, %c0_11] : memref<18x18x128xf32, #tpu.memory_space<vmem>>, vector<1x18x128xf32>
    tpu.vector_store %arg7[%c0_9, %c0_10, %c0_11], %12 {strides = array<i32>} : memref<18x18x128xf32, #tpu.memory_space<vmem>>, vector<1x18x128xf32>,
    %c17 = arith.constant 17 : index
    %c0_12 = arith.constant 0 : index
    %c0_13 = arith.constant 0 : index
    %15 = vector.load %arg7[%c17, %c0_12, %c0_13] : memref<18x18x128xf32, #tpu.memory_space<vmem>>, vector<1x18x128xf32>
    tpu.vector_store %arg7[%c17, %c0_12, %c0_13], %12 {strides = array<i32>} : memref<18x18x128xf32, #tpu.memory_space<vmem>>, vector<1x18x128xf32>,
    %c0_14 = arith.constant 0 : index
    %c0_15 = arith.constant 0 : index
    %c0_16 = arith.constant 0 : index
    %16 = vector.load %arg7[%c0_14, %c0_15, %c0_16] : memref<18x18x128xf32, #tpu.memory_space<vmem>>, vector<18x1x128xf32>
    tpu.vector_store %arg7[%c0_14, %c0_15, %c0_16], %13 {strides = array<i32>} : memref<18x18x128xf32, #tpu.memory_space<vmem>>, vector<18x1x128xf32>,
    %c0_17 = arith.constant 0 : index
    %c17_18 = arith.constant 17 : index
    %c0_19 = arith.constant 0 : index
    %17 = vector.load %arg7[%c0_17, %c17_18, %c0_19] : memref<18x18x128xf32, #tpu.memory_space<vmem>>, vector<18x1x128xf32>
    tpu.vector_store %arg7[%c0_17, %c17_18, %c0_19], %13 {strides = array<i32>} : memref<18x18x128xf32, #tpu.memory_space<vmem>>, vector<18x1x128xf32>,
    %c1 = arith.constant 1 : index
    %c1_20 = arith.constant 1 : index
    %c0_21 = arith.constant 0 : index
    %18 = vector.load %arg7[%c1, %c1_20, %c0_21] : memref<18x18x128xf32, #tpu.memory_space<vmem>>, vector<16x16x128xf32>
    tpu.vector_store %arg7[%c1, %c1_20, %c0_21], %11 {strides = array<i32>} : memref<18x18x128xf32, #tpu.memory_space<vmem>>, vector<16x16x128xf32>,
    %cst_22 = arith.constant 0.000000e+00 : f32
    %19 = vector.broadcast %cst_22 : f32 to vector<256x128xf32>
    %c0_23 = arith.constant 0 : index
    %c0_24 = arith.constant 0 : index
    %c0_25 = arith.constant 0 : index
    %20 = vector.load %arg7[%c0_23, %c0_24, %c0_25] : memref<18x18x128xf32, #tpu.memory_space<vmem>>, vector<18x16x128xf32>
    %c0_26 = arith.constant 0 : index
    %c0_27 = arith.constant 0 : index
    %c0_28 = arith.constant 0 : index
    %21 = vector.load %arg8[%c0_26, %c0_27, %c0_28] : memref<18x16x128xf32, #tpu.memory_space<vmem>>, vector<18x16x128xf32>
    tpu.vector_store %arg8[%c0_26, %c0_27, %c0_28], %20 {strides = array<i32>} : memref<18x16x128xf32, #tpu.memory_space<vmem>>, vector<18x16x128xf32>,
    %c0_29 = arith.constant 0 : index
    %c0_30 = arith.constant 0 : index
    %c0_31 = arith.constant 0 : index
    %22 = vector.load %arg8[%c0_29, %c0_30, %c0_31] : memref<18x16x128xf32, #tpu.memory_space<vmem>>, vector<16x16x128xf32>
    %23 = vector.shape_cast %22 : vector<16x16x128xf32> to vector<256x128xf32>
    %c0_32 = arith.constant 0 : index
    %c0_33 = arith.constant 0 : index
    %c0_34 = arith.constant 0 : index
    %24 = vector.load %arg4[%c0_32, %c0_33, %c0_34] : memref<9x128x128xf32, #tpu.memory_space<vmem>>, vector<1x128x128xf32>
    %25 = vector.shape_cast %24 : vector<1x128x128xf32> to vector<128x128xf32>
    %cst_35 = arith.constant dense<0.000000e+00> : vector<256x128xf32>
    %26 = tpu.matmul %23, %25, %cst_35 {dimension_numbers = #tpu.dot_dimension_numbers<[1], [0], [0], [1], [0, 0, 1, 1], [], []>} : vector<256x128xf32>, vector<128x128xf32>, vector<256x128xf32> -> vector<256x128xf32>
    %27 = arith.addf %19, %26 : vector<256x128xf32>
    %c1_36 = arith.constant 1 : index
    %c0_37 = arith.constant 0 : index
    %c0_38 = arith.constant 0 : index
    %28 = vector.load %arg8[%c1_36, %c0_37, %c0_38] : memref<18x16x128xf32, #tpu.memory_space<vmem>>, vector<16x16x128xf32>
    %29 = vector.shape_cast %28 : vector<16x16x128xf32> to vector<256x128xf32>
    %c3 = arith.constant 3 : index
    %c0_39 = arith.constant 0 : index
    %c0_40 = arith.constant 0 : index
    %30 = vector.load %arg4[%c3, %c0_39, %c0_40] : memref<9x128x128xf32, #tpu.memory_space<vmem>>, vector<1x128x128xf32>
    %31 = vector.shape_cast %30 : vector<1x128x128xf32> to vector<128x128xf32>
    %cst_41 = arith.constant dense<0.000000e+00> : vector<256x128xf32>
    %32 = tpu.matmul %29, %31, %cst_41 {dimension_numbers = #tpu.dot_dimension_numbers<[1], [0], [0], [1], [0, 0, 1, 1], [], []>} : vector<256x128xf32>, vector<128x128xf32>, vector<256x128xf32> -> vector<256x128xf32>
    %33 = arith.addf %27, %32 : vector<256x128xf32>
    %c2 = arith.constant 2 : index
    %c0_42 = arith.constant 0 : index
    %c0_43 = arith.constant 0 : index
    %34 = vector.load %arg8[%c2, %c0_42, %c0_43] : memref<18x16x128xf32, #tpu.memory_space<vmem>>, vector<16x16x128xf32>
    %35 = vector.shape_cast %34 : vector<16x16x128xf32> to vector<256x128xf32>
    %c6 = arith.constant 6 : index
    %c0_44 = arith.constant 0 : index
    %c0_45 = arith.constant 0 : index
    %36 = vector.load %arg4[%c6, %c0_44, %c0_45] : memref<9x128x128xf32, #tpu.memory_space<vmem>>, vector<1x128x128xf32>
    %37 = vector.shape_cast %36 : vector<1x128x128xf32> to vector<128x128xf32>
    %cst_46 = arith.constant dense<0.000000e+00> : vector<256x128xf32>
    %38 = tpu.matmul %35, %37, %cst_46 {dimension_numbers = #tpu.dot_dimension_numbers<[1], [0], [0], [1], [0, 0, 1, 1], [], []>} : vector<256x128xf32>, vector<128x128xf32>, vector<256x128xf32> -> vector<256x128xf32>
    %39 = arith.addf %33, %38 : vector<256x128xf32>
    %c0_47 = arith.constant 0 : index
    %c1_48 = arith.constant 1 : index
    %c0_49 = arith.constant 0 : index
    %40 = vector.load %arg7[%c0_47, %c1_48, %c0_49] : memref<18x18x128xf32, #tpu.memory_space<vmem>>, vector<18x16x128xf32>
    %c0_50 = arith.constant 0 : index
    %c0_51 = arith.constant 0 : index
    %c0_52 = arith.constant 0 : index
    %41 = vector.load %arg8[%c0_50, %c0_51, %c0_52] : memref<18x16x128xf32, #tpu.memory_space<vmem>>, vector<18x16x128xf32>
    tpu.vector_store %arg8[%c0_50, %c0_51, %c0_52], %40 {strides = array<i32>} : memref<18x16x128xf32, #tpu.memory_space<vmem>>, vector<18x16x128xf32>,
    %c0_53 = arith.constant 0 : index
    %c0_54 = arith.constant 0 : index
    %c0_55 = arith.constant 0 : index
    %42 = vector.load %arg8[%c0_53, %c0_54, %c0_55] : memref<18x16x128xf32, #tpu.memory_space<vmem>>, vector<16x16x128xf32>
    %43 = vector.shape_cast %42 : vector<16x16x128xf32> to vector<256x128xf32>
    %c1_56 = arith.constant 1 : index
    %c0_57 = arith.constant 0 : index
    %c0_58 = arith.constant 0 : index
    %44 = vector.load %arg4[%c1_56, %c0_57, %c0_58] : memref<9x128x128xf32, #tpu.memory_space<vmem>>, vector<1x128x128xf32>
    %45 = vector.shape_cast %44 : vector<1x128x128xf32> to vector<128x128xf32>
    %cst_59 = arith.constant dense<0.000000e+00> : vector<256x128xf32>
    %46 = tpu.matmul %43, %45, %cst_59 {dimension_numbers = #tpu.dot_dimension_numbers<[1], [0], [0], [1], [0, 0, 1, 1], [], []>} : vector<256x128xf32>, vector<128x128xf32>, vector<256x128xf32> -> vector<256x128xf32>
    %47 = arith.addf %39, %46 : vector<256x128xf32>
    %c1_60 = arith.constant 1 : index
    %c0_61 = arith.constant 0 : index
    %c0_62 = arith.constant 0 : index
    %48 = vector.load %arg8[%c1_60, %c0_61, %c0_62] : memref<18x16x128xf32, #tpu.memory_space<vmem>>, vector<16x16x128xf32>
    %49 = vector.shape_cast %48 : vector<16x16x128xf32> to vector<256x128xf32>
    %c4 = arith.constant 4 : index
    %c0_63 = arith.constant 0 : index
    %c0_64 = arith.constant 0 : index
    %50 = vector.load %arg4[%c4, %c0_63, %c0_64] : memref<9x128x128xf32, #tpu.memory_space<vmem>>, vector<1x128x128xf32>
    %51 = vector.shape_cast %50 : vector<1x128x128xf32> to vector<128x128xf32>
    %cst_65 = arith.constant dense<0.000000e+00> : vector<256x128xf32>
    %52 = tpu.matmul %49, %51, %cst_65 {dimension_numbers = #tpu.dot_dimension_numbers<[1], [0], [0], [1], [0, 0, 1, 1], [], []>} : vector<256x128xf32>, vector<128x128xf32>, vector<256x128xf32> -> vector<256x128xf32>
    %53 = arith.addf %47, %52 : vector<256x128xf32>
    %c2_66 = arith.constant 2 : index
    %c0_67 = arith.constant 0 : index
    %c0_68 = arith.constant 0 : index
    %54 = vector.load %arg8[%c2_66, %c0_67, %c0_68] : memref<18x16x128xf32, #tpu.memory_space<vmem>>, vector<16x16x128xf32>
    %55 = vector.shape_cast %54 : vector<16x16x128xf32> to vector<256x128xf32>
    %c7 = arith.constant 7 : index
    %c0_69 = arith.constant 0 : index
    %c0_70 = arith.constant 0 : index
    %56 = vector.load %arg4[%c7, %c0_69, %c0_70] : memref<9x128x128xf32, #tpu.memory_space<vmem>>, vector<1x128x128xf32>
    %57 = vector.shape_cast %56 : vector<1x128x128xf32> to vector<128x128xf32>
    %cst_71 = arith.constant dense<0.000000e+00> : vector<256x128xf32>
    %58 = tpu.matmul %55, %57, %cst_71 {dimension_numbers = #tpu.dot_dimension_numbers<[1], [0], [0], [1], [0, 0, 1, 1], [], []>} : vector<256x128xf32>, vector<128x128xf32>, vector<256x128xf32> -> vector<256x128xf32>
    %59 = arith.addf %53, %58 : vector<256x128xf32>
    %c0_72 = arith.constant 0 : index
    %c2_73 = arith.constant 2 : index
    %c0_74 = arith.constant 0 : index
    %60 = vector.load %arg7[%c0_72, %c2_73, %c0_74] : memref<18x18x128xf32, #tpu.memory_space<vmem>>, vector<18x16x128xf32>
    %c0_75 = arith.constant 0 : index
    %c0_76 = arith.constant 0 : index
    %c0_77 = arith.constant 0 : index
    %61 = vector.load %arg8[%c0_75, %c0_76, %c0_77] : memref<18x16x128xf32, #tpu.memory_space<vmem>>, vector<18x16x128xf32>
    tpu.vector_store %arg8[%c0_75, %c0_76, %c0_77], %60 {strides = array<i32>} : memref<18x16x128xf32, #tpu.memory_space<vmem>>, vector<18x16x128xf32>,
    %c0_78 = arith.constant 0 : index
    %c0_79 = arith.constant 0 : index
    %c0_80 = arith.constant 0 : index
    %62 = vector.load %arg8[%c0_78, %c0_79, %c0_80] : memref<18x16x128xf32, #tpu.memory_space<vmem>>, vector<16x16x128xf32>
    %63 = vector.shape_cast %62 : vector<16x16x128xf32> to vector<256x128xf32>
    %c2_81 = arith.constant 2 : index
    %c0_82 = arith.constant 0 : index
    %c0_83 = arith.constant 0 : index
    %64 = vector.load %arg4[%c2_81, %c0_82, %c0_83] : memref<9x128x128xf32, #tpu.memory_space<vmem>>, vector<1x128x128xf32>
    %65 = vector.shape_cast %64 : vector<1x128x128xf32> to vector<128x128xf32>
    %cst_84 = arith.constant dense<0.000000e+00> : vector<256x128xf32>
    %66 = tpu.matmul %63, %65, %cst_84 {dimension_numbers = #tpu.dot_dimension_numbers<[1], [0], [0], [1], [0, 0, 1, 1], [], []>} : vector<256x128xf32>, vector<128x128xf32>, vector<256x128xf32> -> vector<256x128xf32>
    %67 = arith.addf %59, %66 : vector<256x128xf32>
    %c1_85 = arith.constant 1 : index
    %c0_86 = arith.constant 0 : index
    %c0_87 = arith.constant 0 : index
    %68 = vector.load %arg8[%c1_85, %c0_86, %c0_87] : memref<18x16x128xf32, #tpu.memory_space<vmem>>, vector<16x16x128xf32>
    %69 = vector.shape_cast %68 : vector<16x16x128xf32> to vector<256x128xf32>
    %c5 = arith.constant 5 : index
    %c0_88 = arith.constant 0 : index
    %c0_89 = arith.constant 0 : index
    %70 = vector.load %arg4[%c5, %c0_88, %c0_89] : memref<9x128x128xf32, #tpu.memory_space<vmem>>, vector<1x128x128xf32>
    %71 = vector.shape_cast %70 : vector<1x128x128xf32> to vector<128x128xf32>
    %cst_90 = arith.constant dense<0.000000e+00> : vector<256x128xf32>
    %72 = tpu.matmul %69, %71, %cst_90 {dimension_numbers = #tpu.dot_dimension_numbers<[1], [0], [0], [1], [0, 0, 1, 1], [], []>} : vector<256x128xf32>, vector<128x128xf32>, vector<256x128xf32> -> vector<256x128xf32>
    %73 = arith.addf %67, %72 : vector<256x128xf32>
    %c2_91 = arith.constant 2 : index
    %c0_92 = arith.constant 0 : index
    %c0_93 = arith.constant 0 : index
    %74 = vector.load %arg8[%c2_91, %c0_92, %c0_93] : memref<18x16x128xf32, #tpu.memory_space<vmem>>, vector<16x16x128xf32>
    %75 = vector.shape_cast %74 : vector<16x16x128xf32> to vector<256x128xf32>
    %c8 = arith.constant 8 : index
    %c0_94 = arith.constant 0 : index
    %c0_95 = arith.constant 0 : index
    %76 = vector.load %arg4[%c8, %c0_94, %c0_95] : memref<9x128x128xf32, #tpu.memory_space<vmem>>, vector<1x128x128xf32>
    %77 = vector.shape_cast %76 : vector<1x128x128xf32> to vector<128x128xf32>
    %cst_96 = arith.constant dense<0.000000e+00> : vector<256x128xf32>
    %78 = tpu.matmul %75, %77, %cst_96 {dimension_numbers = #tpu.dot_dimension_numbers<[1], [0], [0], [1], [0, 0, 1, 1], [], []>} : vector<256x128xf32>, vector<128x128xf32>, vector<256x128xf32> -> vector<256x128xf32>
    %79 = arith.addf %73, %78 : vector<256x128xf32>
    %80 = vector.shape_cast %79 : vector<256x128xf32> to vector<16x16x128xf32>
    %c0_97 = arith.constant 0 : index
    %c0_98 = arith.constant 0 : index
    %c0_99 = arith.constant 0 : index
    %c0_100 = arith.constant 0 : index
    %81 = vector.load %arg5[%c0_97, %c0_98, %c0_99, %c0_100] : memref<1x16x16x128xf32, #tpu.memory_space<vmem>>, vector<1x16x16x128xf32>
    %82 = vector.shape_cast %81 : vector<1x16x16x128xf32> to vector<16x16x128xf32>
    %83 = vector.shape_cast %80 : vector<16x16x128xf32> to vector<1x16x16x128xf32>
    tpu.vector_store %arg5[%c0_97, %c0_98, %c0_99, %c0_100], %83 {strides = array<i32>} : memref<1x16x16x128xf32, #tpu.memory_space<vmem>>, vector<1x16x16x128xf32>,
    %cst_101 = arith.constant dense<0.000000e+00> : vector<128xf32>
    %84 = vector.multi_reduction <add>, %79, %cst_101 [0] : vector<256x128xf32> to vector<128xf32>
    %85 = vector.shape_cast %84 : vector<128xf32> to vector<1x128xf32>
    %cst_102 = arith.constant 3.906250e-03 : f32
    %86 = vector.broadcast %cst_102 : f32 to vector<1x128xf32>
    %87 = arith.mulf %85, %86 : vector<1x128xf32>
    %88 = vector.broadcast %87 : vector<1x128xf32> to vector<256x128xf32>
    %89 = arith.subf %79, %88 : vector<256x128xf32>
    %c0_103 = arith.constant 0 : index
    %c0_104 = arith.constant 0 : index
    %c0_105 = arith.constant 0 : index
    %90 = vector.load %arg6[%c0_103, %c0_104, %c0_105] : memref<1x2x128xf32, #tpu.memory_space<vmem>>, vector<1x1x128xf32>
    %91 = vector.shape_cast %90 : vector<1x1x128xf32> to vector<1x128xf32>
    %92 = vector.shape_cast %85 : vector<1x128xf32> to vector<1x1x128xf32>
    tpu.vector_store %arg6[%c0_103, %c0_104, %c0_105], %92 {strides = array<i32>} : memref<1x2x128xf32, #tpu.memory_space<vmem>>, vector<1x1x128xf32>,
    %93 = arith.mulf %89, %89 : vector<256x128xf32>
    %cst_106 = arith.constant dense<0.000000e+00> : vector<128xf32>
    %94 = vector.multi_reduction <add>, %93, %cst_106 [0] : vector<256x128xf32> to vector<128xf32>
    %95 = vector.shape_cast %94 : vector<128xf32> to vector<1x128xf32>
    %c0_107 = arith.constant 0 : index
    %c1_108 = arith.constant 1 : index
    %c0_109 = arith.constant 0 : index
    %96 = vector.load %arg6[%c0_107, %c1_108, %c0_109] : memref<1x2x128xf32, #tpu.memory_space<vmem>>, vector<1x1x128xf32>
    %97 = vector.shape_cast %96 : vector<1x1x128xf32> to vector<1x128xf32>
    %98 = vector.shape_cast %95 : vector<1x128xf32> to vector<1x1x128xf32>
    tpu.vector_store %arg6[%c0_107, %c1_108, %c0_109], %98 {strides = array<i32>} : memref<1x2x128xf32, #tpu.memory_space<vmem>>, vector<1x1x128xf32>,
    return
  }
  func.func @transform_0(%arg0: i32) -> (i32, i32, i32, i32) {
    %c0_i32 = arith.constant 0 : i32
    %c0_i32_0 = arith.constant 0 : i32
    %c0_i32_1 = arith.constant 0 : i32
    %c0_i32_2 = arith.constant 0 : i32
    return %arg0, %c0_i32, %c0_i32_0, %c0_i32_1 : i32, i32, i32, i32
  }
  func.func @transform_1(%arg0: i32) -> (i32, i32) {
    %c0_i32 = arith.constant 0 : i32
    %c0_i32_0 = arith.constant 0 : i32
    %c0_i32_1 = arith.constant 0 : i32
    return %c0_i32, %c0_i32_0 : i32, i32
  }
  func.func @transform_2(%arg0: i32) -> (i32, i32) {
    %c0_i32 = arith.constant 0 : i32
    %c0_i32_0 = arith.constant 0 : i32
    %c0_i32_1 = arith.constant 0 : i32
    return %c0_i32, %c0_i32_0 : i32, i32
  }
  func.func @transform_3(%arg0: i32) -> (i32, i32, i32) {
    %c0_i32 = arith.constant 0 : i32
    %c0_i32_0 = arith.constant 0 : i32
    %c0_i32_1 = arith.constant 0 : i32
    %c0_i32_2 = arith.constant 0 : i32
    return %c0_i32, %c0_i32_0, %c0_i32_1 : i32, i32, i32
  }
  func.func @transform_4(%arg0: i32) -> (i32, i32, i32, i32) {
    %c0_i32 = arith.constant 0 : i32
    %c0_i32_0 = arith.constant 0 : i32
    %c0_i32_1 = arith.constant 0 : i32
    %c0_i32_2 = arith.constant 0 : i32
    return %arg0, %c0_i32, %c0_i32_0, %c0_i32_1 : i32, i32, i32, i32
  }
  func.func @transform_5(%arg0: i32) -> (i32, i32, i32) {
    %c0_i32 = arith.constant 0 : i32
    %c0_i32_0 = arith.constant 0 : i32
    %c0_i32_1 = arith.constant 0 : i32
    return %arg0, %c0_i32, %c0_i32_0 : i32, i32, i32
  }
}

module attributes {stable_mosaic.version = 11 : i64} {
  func.func @_fused_kernel(%arg0: i32, %arg1: memref<1x16x16x128xf32, #tpu.memory_space<vmem>>, %arg2: memref<1x16x16x128xf32, #tpu.memory_space<vmem>>, %arg3: memref<1x128xf32, #tpu.memory_space<vmem>>, %arg4: memref<1x128xf32, #tpu.memory_space<vmem>>, %arg5: memref<9x128x128xf32, #tpu.memory_space<vmem>>, %arg6: memref<1x16x16x128xf32, #tpu.memory_space<vmem>>, %arg7: memref<1x16x16x128xf32, #tpu.memory_space<vmem>>, %arg8: memref<1x2x128xf32, #tpu.memory_space<vmem>>, %arg9: memref<18x18x128xf32, #tpu.memory_space<vmem>>, %arg10: memref<18x16x128xf32, #tpu.memory_space<vmem>>) attributes {dimension_semantics = [#tpu.dimension_semantics<parallel>], iteration_bounds = array<i64: 2>, scalar_prefetch = 0 : i64, scratch_operands = 2 : i64, tpu.core_type = #tpu.core_type<tc>, window_params = [{transform_indices = @transform_0, window_bounds = array<i64: 1, 16, 16, 128>}, {transform_indices = @transform_1, window_bounds = array<i64: 1, 16, 16, 128>}, {pipeline_mode = #tpu.pipeline_mode<synchronous>, transform_indices = @transform_2, window_bounds = array<i64: 1, 128>}, {pipeline_mode = #tpu.pipeline_mode<synchronous>, transform_indices = @transform_3, window_bounds = array<i64: 1, 128>}, {pipeline_mode = #tpu.pipeline_mode<synchronous>, transform_indices = @transform_4, window_bounds = array<i64: 9, 128, 128>}, {transform_indices = @transform_5, window_bounds = array<i64: 1, 16, 16, 128>}, {transform_indices = @transform_6, window_bounds = array<i64: 1, 16, 16, 128>}, {transform_indices = @transform_7, window_bounds = array<i64: 1, 2, 128>}]} {
    %c0 = arith.constant 0 : index
    %c0_0 = arith.constant 0 : index
    %c0_1 = arith.constant 0 : index
    %c0_2 = arith.constant 0 : index
    %0 = vector.load %arg2[%c0, %c0_0, %c0_1, %c0_2] : memref<1x16x16x128xf32, #tpu.memory_space<vmem>>, vector<1x16x16x128xf32>
    %1 = vector.shape_cast %0 : vector<1x16x16x128xf32> to vector<16x16x128xf32>
    %c0_3 = arith.constant 0 : index
    %c0_4 = arith.constant 0 : index
    %c0_5 = arith.constant 0 : index
    %c0_6 = arith.constant 0 : index
    %2 = vector.load %arg1[%c0_3, %c0_4, %c0_5, %c0_6] : memref<1x16x16x128xf32, #tpu.memory_space<vmem>>, vector<1x16x16x128xf32>
    %3 = vector.shape_cast %2 : vector<1x16x16x128xf32> to vector<16x16x128xf32>
    %c0_7 = arith.constant 0 : index
    %c0_8 = arith.constant 0 : index
    %4 = vector.load %arg3[%c0_7, %c0_8] : memref<1x128xf32, #tpu.memory_space<vmem>>, vector<1x128xf32>
    %5 = vector.shape_cast %4 : vector<1x128xf32> to vector<1x1x128xf32>
    %6 = vector.broadcast %5 : vector<1x1x128xf32> to vector<16x16x128xf32>
    %7 = arith.mulf %3, %6 : vector<16x16x128xf32>
    %c0_9 = arith.constant 0 : index
    %c0_10 = arith.constant 0 : index
    %8 = vector.load %arg4[%c0_9, %c0_10] : memref<1x128xf32, #tpu.memory_space<vmem>>, vector<1x128xf32>
    %9 = vector.shape_cast %8 : vector<1x128xf32> to vector<1x1x128xf32>
    %10 = vector.broadcast %9 : vector<1x1x128xf32> to vector<16x16x128xf32>
    %11 = arith.addf %7, %10 : vector<16x16x128xf32>
    %12 = arith.addf %1, %11 : vector<16x16x128xf32>
    %c0_11 = arith.constant 0 : index
    %c0_12 = arith.constant 0 : index
    %c0_13 = arith.constant 0 : index
    %c0_14 = arith.constant 0 : index
    %13 = vector.load %arg7[%c0_11, %c0_12, %c0_13, %c0_14] : memref<1x16x16x128xf32, #tpu.memory_space<vmem>>, vector<1x16x16x128xf32>
    %14 = vector.shape_cast %13 : vector<1x16x16x128xf32> to vector<16x16x128xf32>
    %15 = vector.shape_cast %12 : vector<16x16x128xf32> to vector<1x16x16x128xf32>
    tpu.vector_store %arg7[%c0_11, %c0_12, %c0_13, %c0_14], %15 {strides = array<i32>} : memref<1x16x16x128xf32, #tpu.memory_space<vmem>>, vector<1x16x16x128xf32>,
    %cst = arith.constant 0.000000e+00 : f32
    %16 = vector.broadcast %cst : f32 to vector<1x18x128xf32>
    %cst_15 = arith.constant 0.000000e+00 : f32
    %17 = vector.broadcast %cst_15 : f32 to vector<18x1x128xf32>
    %c0_16 = arith.constant 0 : index
    %c0_17 = arith.constant 0 : index
    %c0_18 = arith.constant 0 : index
    %18 = vector.load %arg9[%c0_16, %c0_17, %c0_18] : memref<18x18x128xf32, #tpu.memory_space<vmem>>, vector<1x18x128xf32>
    tpu.vector_store %arg9[%c0_16, %c0_17, %c0_18], %16 {strides = array<i32>} : memref<18x18x128xf32, #tpu.memory_space<vmem>>, vector<1x18x128xf32>,
    %c17 = arith.constant 17 : index
    %c0_19 = arith.constant 0 : index
    %c0_20 = arith.constant 0 : index
    %19 = vector.load %arg9[%c17, %c0_19, %c0_20] : memref<18x18x128xf32, #tpu.memory_space<vmem>>, vector<1x18x128xf32>
    tpu.vector_store %arg9[%c17, %c0_19, %c0_20], %16 {strides = array<i32>} : memref<18x18x128xf32, #tpu.memory_space<vmem>>, vector<1x18x128xf32>,
    %c0_21 = arith.constant 0 : index
    %c0_22 = arith.constant 0 : index
    %c0_23 = arith.constant 0 : index
    %20 = vector.load %arg9[%c0_21, %c0_22, %c0_23] : memref<18x18x128xf32, #tpu.memory_space<vmem>>, vector<18x1x128xf32>
    tpu.vector_store %arg9[%c0_21, %c0_22, %c0_23], %17 {strides = array<i32>} : memref<18x18x128xf32, #tpu.memory_space<vmem>>, vector<18x1x128xf32>,
    %c0_24 = arith.constant 0 : index
    %c17_25 = arith.constant 17 : index
    %c0_26 = arith.constant 0 : index
    %21 = vector.load %arg9[%c0_24, %c17_25, %c0_26] : memref<18x18x128xf32, #tpu.memory_space<vmem>>, vector<18x1x128xf32>
    tpu.vector_store %arg9[%c0_24, %c17_25, %c0_26], %17 {strides = array<i32>} : memref<18x18x128xf32, #tpu.memory_space<vmem>>, vector<18x1x128xf32>,
    %c1 = arith.constant 1 : index
    %c1_27 = arith.constant 1 : index
    %c0_28 = arith.constant 0 : index
    %22 = vector.load %arg9[%c1, %c1_27, %c0_28] : memref<18x18x128xf32, #tpu.memory_space<vmem>>, vector<16x16x128xf32>
    tpu.vector_store %arg9[%c1, %c1_27, %c0_28], %12 {strides = array<i32>} : memref<18x18x128xf32, #tpu.memory_space<vmem>>, vector<16x16x128xf32>,
    %cst_29 = arith.constant 0.000000e+00 : f32
    %23 = vector.broadcast %cst_29 : f32 to vector<256x128xf32>
    %c0_30 = arith.constant 0 : index
    %c0_31 = arith.constant 0 : index
    %c0_32 = arith.constant 0 : index
    %24 = vector.load %arg9[%c0_30, %c0_31, %c0_32] : memref<18x18x128xf32, #tpu.memory_space<vmem>>, vector<18x16x128xf32>
    %c0_33 = arith.constant 0 : index
    %c0_34 = arith.constant 0 : index
    %c0_35 = arith.constant 0 : index
    %25 = vector.load %arg10[%c0_33, %c0_34, %c0_35] : memref<18x16x128xf32, #tpu.memory_space<vmem>>, vector<18x16x128xf32>
    tpu.vector_store %arg10[%c0_33, %c0_34, %c0_35], %24 {strides = array<i32>} : memref<18x16x128xf32, #tpu.memory_space<vmem>>, vector<18x16x128xf32>,
    %c0_36 = arith.constant 0 : index
    %c0_37 = arith.constant 0 : index
    %c0_38 = arith.constant 0 : index
    %26 = vector.load %arg10[%c0_36, %c0_37, %c0_38] : memref<18x16x128xf32, #tpu.memory_space<vmem>>, vector<16x16x128xf32>
    %27 = vector.shape_cast %26 : vector<16x16x128xf32> to vector<256x128xf32>
    %c0_39 = arith.constant 0 : index
    %c0_40 = arith.constant 0 : index
    %c0_41 = arith.constant 0 : index
    %28 = vector.load %arg5[%c0_39, %c0_40, %c0_41] : memref<9x128x128xf32, #tpu.memory_space<vmem>>, vector<1x128x128xf32>
    %29 = vector.shape_cast %28 : vector<1x128x128xf32> to vector<128x128xf32>
    %cst_42 = arith.constant dense<0.000000e+00> : vector<256x128xf32>
    %30 = tpu.matmul %27, %29, %cst_42 {dimension_numbers = #tpu.dot_dimension_numbers<[1], [0], [0], [1], [0, 0, 1, 1], [], []>} : vector<256x128xf32>, vector<128x128xf32>, vector<256x128xf32> -> vector<256x128xf32>
    %31 = arith.addf %23, %30 : vector<256x128xf32>
    %c1_43 = arith.constant 1 : index
    %c0_44 = arith.constant 0 : index
    %c0_45 = arith.constant 0 : index
    %32 = vector.load %arg10[%c1_43, %c0_44, %c0_45] : memref<18x16x128xf32, #tpu.memory_space<vmem>>, vector<16x16x128xf32>
    %33 = vector.shape_cast %32 : vector<16x16x128xf32> to vector<256x128xf32>
    %c3 = arith.constant 3 : index
    %c0_46 = arith.constant 0 : index
    %c0_47 = arith.constant 0 : index
    %34 = vector.load %arg5[%c3, %c0_46, %c0_47] : memref<9x128x128xf32, #tpu.memory_space<vmem>>, vector<1x128x128xf32>
    %35 = vector.shape_cast %34 : vector<1x128x128xf32> to vector<128x128xf32>
    %cst_48 = arith.constant dense<0.000000e+00> : vector<256x128xf32>
    %36 = tpu.matmul %33, %35, %cst_48 {dimension_numbers = #tpu.dot_dimension_numbers<[1], [0], [0], [1], [0, 0, 1, 1], [], []>} : vector<256x128xf32>, vector<128x128xf32>, vector<256x128xf32> -> vector<256x128xf32>
    %37 = arith.addf %31, %36 : vector<256x128xf32>
    %c2 = arith.constant 2 : index
    %c0_49 = arith.constant 0 : index
    %c0_50 = arith.constant 0 : index
    %38 = vector.load %arg10[%c2, %c0_49, %c0_50] : memref<18x16x128xf32, #tpu.memory_space<vmem>>, vector<16x16x128xf32>
    %39 = vector.shape_cast %38 : vector<16x16x128xf32> to vector<256x128xf32>
    %c6 = arith.constant 6 : index
    %c0_51 = arith.constant 0 : index
    %c0_52 = arith.constant 0 : index
    %40 = vector.load %arg5[%c6, %c0_51, %c0_52] : memref<9x128x128xf32, #tpu.memory_space<vmem>>, vector<1x128x128xf32>
    %41 = vector.shape_cast %40 : vector<1x128x128xf32> to vector<128x128xf32>
    %cst_53 = arith.constant dense<0.000000e+00> : vector<256x128xf32>
    %42 = tpu.matmul %39, %41, %cst_53 {dimension_numbers = #tpu.dot_dimension_numbers<[1], [0], [0], [1], [0, 0, 1, 1], [], []>} : vector<256x128xf32>, vector<128x128xf32>, vector<256x128xf32> -> vector<256x128xf32>
    %43 = arith.addf %37, %42 : vector<256x128xf32>
    %c0_54 = arith.constant 0 : index
    %c1_55 = arith.constant 1 : index
    %c0_56 = arith.constant 0 : index
    %44 = vector.load %arg9[%c0_54, %c1_55, %c0_56] : memref<18x18x128xf32, #tpu.memory_space<vmem>>, vector<18x16x128xf32>
    %c0_57 = arith.constant 0 : index
    %c0_58 = arith.constant 0 : index
    %c0_59 = arith.constant 0 : index
    %45 = vector.load %arg10[%c0_57, %c0_58, %c0_59] : memref<18x16x128xf32, #tpu.memory_space<vmem>>, vector<18x16x128xf32>
    tpu.vector_store %arg10[%c0_57, %c0_58, %c0_59], %44 {strides = array<i32>} : memref<18x16x128xf32, #tpu.memory_space<vmem>>, vector<18x16x128xf32>,
    %c0_60 = arith.constant 0 : index
    %c0_61 = arith.constant 0 : index
    %c0_62 = arith.constant 0 : index
    %46 = vector.load %arg10[%c0_60, %c0_61, %c0_62] : memref<18x16x128xf32, #tpu.memory_space<vmem>>, vector<16x16x128xf32>
    %47 = vector.shape_cast %46 : vector<16x16x128xf32> to vector<256x128xf32>
    %c1_63 = arith.constant 1 : index
    %c0_64 = arith.constant 0 : index
    %c0_65 = arith.constant 0 : index
    %48 = vector.load %arg5[%c1_63, %c0_64, %c0_65] : memref<9x128x128xf32, #tpu.memory_space<vmem>>, vector<1x128x128xf32>
    %49 = vector.shape_cast %48 : vector<1x128x128xf32> to vector<128x128xf32>
    %cst_66 = arith.constant dense<0.000000e+00> : vector<256x128xf32>
    %50 = tpu.matmul %47, %49, %cst_66 {dimension_numbers = #tpu.dot_dimension_numbers<[1], [0], [0], [1], [0, 0, 1, 1], [], []>} : vector<256x128xf32>, vector<128x128xf32>, vector<256x128xf32> -> vector<256x128xf32>
    %51 = arith.addf %43, %50 : vector<256x128xf32>
    %c1_67 = arith.constant 1 : index
    %c0_68 = arith.constant 0 : index
    %c0_69 = arith.constant 0 : index
    %52 = vector.load %arg10[%c1_67, %c0_68, %c0_69] : memref<18x16x128xf32, #tpu.memory_space<vmem>>, vector<16x16x128xf32>
    %53 = vector.shape_cast %52 : vector<16x16x128xf32> to vector<256x128xf32>
    %c4 = arith.constant 4 : index
    %c0_70 = arith.constant 0 : index
    %c0_71 = arith.constant 0 : index
    %54 = vector.load %arg5[%c4, %c0_70, %c0_71] : memref<9x128x128xf32, #tpu.memory_space<vmem>>, vector<1x128x128xf32>
    %55 = vector.shape_cast %54 : vector<1x128x128xf32> to vector<128x128xf32>
    %cst_72 = arith.constant dense<0.000000e+00> : vector<256x128xf32>
    %56 = tpu.matmul %53, %55, %cst_72 {dimension_numbers = #tpu.dot_dimension_numbers<[1], [0], [0], [1], [0, 0, 1, 1], [], []>} : vector<256x128xf32>, vector<128x128xf32>, vector<256x128xf32> -> vector<256x128xf32>
    %57 = arith.addf %51, %56 : vector<256x128xf32>
    %c2_73 = arith.constant 2 : index
    %c0_74 = arith.constant 0 : index
    %c0_75 = arith.constant 0 : index
    %58 = vector.load %arg10[%c2_73, %c0_74, %c0_75] : memref<18x16x128xf32, #tpu.memory_space<vmem>>, vector<16x16x128xf32>
    %59 = vector.shape_cast %58 : vector<16x16x128xf32> to vector<256x128xf32>
    %c7 = arith.constant 7 : index
    %c0_76 = arith.constant 0 : index
    %c0_77 = arith.constant 0 : index
    %60 = vector.load %arg5[%c7, %c0_76, %c0_77] : memref<9x128x128xf32, #tpu.memory_space<vmem>>, vector<1x128x128xf32>
    %61 = vector.shape_cast %60 : vector<1x128x128xf32> to vector<128x128xf32>
    %cst_78 = arith.constant dense<0.000000e+00> : vector<256x128xf32>
    %62 = tpu.matmul %59, %61, %cst_78 {dimension_numbers = #tpu.dot_dimension_numbers<[1], [0], [0], [1], [0, 0, 1, 1], [], []>} : vector<256x128xf32>, vector<128x128xf32>, vector<256x128xf32> -> vector<256x128xf32>
    %63 = arith.addf %57, %62 : vector<256x128xf32>
    %c0_79 = arith.constant 0 : index
    %c2_80 = arith.constant 2 : index
    %c0_81 = arith.constant 0 : index
    %64 = vector.load %arg9[%c0_79, %c2_80, %c0_81] : memref<18x18x128xf32, #tpu.memory_space<vmem>>, vector<18x16x128xf32>
    %c0_82 = arith.constant 0 : index
    %c0_83 = arith.constant 0 : index
    %c0_84 = arith.constant 0 : index
    %65 = vector.load %arg10[%c0_82, %c0_83, %c0_84] : memref<18x16x128xf32, #tpu.memory_space<vmem>>, vector<18x16x128xf32>
    tpu.vector_store %arg10[%c0_82, %c0_83, %c0_84], %64 {strides = array<i32>} : memref<18x16x128xf32, #tpu.memory_space<vmem>>, vector<18x16x128xf32>,
    %c0_85 = arith.constant 0 : index
    %c0_86 = arith.constant 0 : index
    %c0_87 = arith.constant 0 : index
    %66 = vector.load %arg10[%c0_85, %c0_86, %c0_87] : memref<18x16x128xf32, #tpu.memory_space<vmem>>, vector<16x16x128xf32>
    %67 = vector.shape_cast %66 : vector<16x16x128xf32> to vector<256x128xf32>
    %c2_88 = arith.constant 2 : index
    %c0_89 = arith.constant 0 : index
    %c0_90 = arith.constant 0 : index
    %68 = vector.load %arg5[%c2_88, %c0_89, %c0_90] : memref<9x128x128xf32, #tpu.memory_space<vmem>>, vector<1x128x128xf32>
    %69 = vector.shape_cast %68 : vector<1x128x128xf32> to vector<128x128xf32>
    %cst_91 = arith.constant dense<0.000000e+00> : vector<256x128xf32>
    %70 = tpu.matmul %67, %69, %cst_91 {dimension_numbers = #tpu.dot_dimension_numbers<[1], [0], [0], [1], [0, 0, 1, 1], [], []>} : vector<256x128xf32>, vector<128x128xf32>, vector<256x128xf32> -> vector<256x128xf32>
    %71 = arith.addf %63, %70 : vector<256x128xf32>
    %c1_92 = arith.constant 1 : index
    %c0_93 = arith.constant 0 : index
    %c0_94 = arith.constant 0 : index
    %72 = vector.load %arg10[%c1_92, %c0_93, %c0_94] : memref<18x16x128xf32, #tpu.memory_space<vmem>>, vector<16x16x128xf32>
    %73 = vector.shape_cast %72 : vector<16x16x128xf32> to vector<256x128xf32>
    %c5 = arith.constant 5 : index
    %c0_95 = arith.constant 0 : index
    %c0_96 = arith.constant 0 : index
    %74 = vector.load %arg5[%c5, %c0_95, %c0_96] : memref<9x128x128xf32, #tpu.memory_space<vmem>>, vector<1x128x128xf32>
    %75 = vector.shape_cast %74 : vector<1x128x128xf32> to vector<128x128xf32>
    %cst_97 = arith.constant dense<0.000000e+00> : vector<256x128xf32>
    %76 = tpu.matmul %73, %75, %cst_97 {dimension_numbers = #tpu.dot_dimension_numbers<[1], [0], [0], [1], [0, 0, 1, 1], [], []>} : vector<256x128xf32>, vector<128x128xf32>, vector<256x128xf32> -> vector<256x128xf32>
    %77 = arith.addf %71, %76 : vector<256x128xf32>
    %c2_98 = arith.constant 2 : index
    %c0_99 = arith.constant 0 : index
    %c0_100 = arith.constant 0 : index
    %78 = vector.load %arg10[%c2_98, %c0_99, %c0_100] : memref<18x16x128xf32, #tpu.memory_space<vmem>>, vector<16x16x128xf32>
    %79 = vector.shape_cast %78 : vector<16x16x128xf32> to vector<256x128xf32>
    %c8 = arith.constant 8 : index
    %c0_101 = arith.constant 0 : index
    %c0_102 = arith.constant 0 : index
    %80 = vector.load %arg5[%c8, %c0_101, %c0_102] : memref<9x128x128xf32, #tpu.memory_space<vmem>>, vector<1x128x128xf32>
    %81 = vector.shape_cast %80 : vector<1x128x128xf32> to vector<128x128xf32>
    %cst_103 = arith.constant dense<0.000000e+00> : vector<256x128xf32>
    %82 = tpu.matmul %79, %81, %cst_103 {dimension_numbers = #tpu.dot_dimension_numbers<[1], [0], [0], [1], [0, 0, 1, 1], [], []>} : vector<256x128xf32>, vector<128x128xf32>, vector<256x128xf32> -> vector<256x128xf32>
    %83 = arith.addf %77, %82 : vector<256x128xf32>
    %84 = vector.shape_cast %83 : vector<256x128xf32> to vector<16x16x128xf32>
    %c0_104 = arith.constant 0 : index
    %c0_105 = arith.constant 0 : index
    %c0_106 = arith.constant 0 : index
    %c0_107 = arith.constant 0 : index
    %85 = vector.load %arg6[%c0_104, %c0_105, %c0_106, %c0_107] : memref<1x16x16x128xf32, #tpu.memory_space<vmem>>, vector<1x16x16x128xf32>
    %86 = vector.shape_cast %85 : vector<1x16x16x128xf32> to vector<16x16x128xf32>
    %87 = vector.shape_cast %84 : vector<16x16x128xf32> to vector<1x16x16x128xf32>
    tpu.vector_store %arg6[%c0_104, %c0_105, %c0_106, %c0_107], %87 {strides = array<i32>} : memref<1x16x16x128xf32, #tpu.memory_space<vmem>>, vector<1x16x16x128xf32>,
    %cst_108 = arith.constant dense<0.000000e+00> : vector<128xf32>
    %88 = vector.multi_reduction <add>, %83, %cst_108 [0] : vector<256x128xf32> to vector<128xf32>
    %89 = vector.shape_cast %88 : vector<128xf32> to vector<1x128xf32>
    %cst_109 = arith.constant 3.906250e-03 : f32
    %90 = vector.broadcast %cst_109 : f32 to vector<1x128xf32>
    %91 = arith.mulf %89, %90 : vector<1x128xf32>
    %92 = vector.broadcast %91 : vector<1x128xf32> to vector<256x128xf32>
    %93 = arith.subf %83, %92 : vector<256x128xf32>
    %c0_110 = arith.constant 0 : index
    %c0_111 = arith.constant 0 : index
    %c0_112 = arith.constant 0 : index
    %94 = vector.load %arg8[%c0_110, %c0_111, %c0_112] : memref<1x2x128xf32, #tpu.memory_space<vmem>>, vector<1x1x128xf32>
    %95 = vector.shape_cast %94 : vector<1x1x128xf32> to vector<1x128xf32>
    %96 = vector.shape_cast %89 : vector<1x128xf32> to vector<1x1x128xf32>
    tpu.vector_store %arg8[%c0_110, %c0_111, %c0_112], %96 {strides = array<i32>} : memref<1x2x128xf32, #tpu.memory_space<vmem>>, vector<1x1x128xf32>,
    %97 = arith.mulf %93, %93 : vector<256x128xf32>
    %cst_113 = arith.constant dense<0.000000e+00> : vector<128xf32>
    %98 = vector.multi_reduction <add>, %97, %cst_113 [0] : vector<256x128xf32> to vector<128xf32>
    %99 = vector.shape_cast %98 : vector<128xf32> to vector<1x128xf32>
    %c0_114 = arith.constant 0 : index
    %c1_115 = arith.constant 1 : index
    %c0_116 = arith.constant 0 : index
    %100 = vector.load %arg8[%c0_114, %c1_115, %c0_116] : memref<1x2x128xf32, #tpu.memory_space<vmem>>, vector<1x1x128xf32>
    %101 = vector.shape_cast %100 : vector<1x1x128xf32> to vector<1x128xf32>
    %102 = vector.shape_cast %99 : vector<1x128xf32> to vector<1x1x128xf32>
    tpu.vector_store %arg8[%c0_114, %c1_115, %c0_116], %102 {strides = array<i32>} : memref<1x2x128xf32, #tpu.memory_space<vmem>>, vector<1x1x128xf32>,
    return
  }
  func.func @transform_0(%arg0: i32) -> (i32, i32, i32, i32) {
    %c0_i32 = arith.constant 0 : i32
    %c0_i32_0 = arith.constant 0 : i32
    %c0_i32_1 = arith.constant 0 : i32
    %c0_i32_2 = arith.constant 0 : i32
    return %arg0, %c0_i32, %c0_i32_0, %c0_i32_1 : i32, i32, i32, i32
  }
  func.func @transform_1(%arg0: i32) -> (i32, i32, i32, i32) {
    %c0_i32 = arith.constant 0 : i32
    %c0_i32_0 = arith.constant 0 : i32
    %c0_i32_1 = arith.constant 0 : i32
    %c0_i32_2 = arith.constant 0 : i32
    return %arg0, %c0_i32, %c0_i32_0, %c0_i32_1 : i32, i32, i32, i32
  }
  func.func @transform_2(%arg0: i32) -> (i32, i32) {
    %c0_i32 = arith.constant 0 : i32
    %c0_i32_0 = arith.constant 0 : i32
    %c0_i32_1 = arith.constant 0 : i32
    return %c0_i32, %c0_i32_0 : i32, i32
  }
  func.func @transform_3(%arg0: i32) -> (i32, i32) {
    %c0_i32 = arith.constant 0 : i32
    %c0_i32_0 = arith.constant 0 : i32
    %c0_i32_1 = arith.constant 0 : i32
    return %c0_i32, %c0_i32_0 : i32, i32
  }
  func.func @transform_4(%arg0: i32) -> (i32, i32, i32) {
    %c0_i32 = arith.constant 0 : i32
    %c0_i32_0 = arith.constant 0 : i32
    %c0_i32_1 = arith.constant 0 : i32
    %c0_i32_2 = arith.constant 0 : i32
    return %c0_i32, %c0_i32_0, %c0_i32_1 : i32, i32, i32
  }
  func.func @transform_5(%arg0: i32) -> (i32, i32, i32, i32) {
    %c0_i32 = arith.constant 0 : i32
    %c0_i32_0 = arith.constant 0 : i32
    %c0_i32_1 = arith.constant 0 : i32
    %c0_i32_2 = arith.constant 0 : i32
    return %arg0, %c0_i32, %c0_i32_0, %c0_i32_1 : i32, i32, i32, i32
  }
  func.func @transform_6(%arg0: i32) -> (i32, i32, i32, i32) {
    %c0_i32 = arith.constant 0 : i32
    %c0_i32_0 = arith.constant 0 : i32
    %c0_i32_1 = arith.constant 0 : i32
    %c0_i32_2 = arith.constant 0 : i32
    return %arg0, %c0_i32, %c0_i32_0, %c0_i32_1 : i32, i32, i32, i32
  }
  func.func @transform_7(%arg0: i32) -> (i32, i32, i32) {
    %c0_i32 = arith.constant 0 : i32
    %c0_i32_0 = arith.constant 0 : i32
    %c0_i32_1 = arith.constant 0 : i32
    return %arg0, %c0_i32, %c0_i32_0 : i32, i32, i32
  }
}

</mosaic_0001>

<bundles_post_ra>
// kernel: residual_stack_forward.9
= control target key start
LH: loop header
LB: loop body
LE: loop exit
PB: predicated region body
PF: predicated region fallthrough
CT: control target
= control target key end

     0   :  { %s544_s15 = smov 0   ;;  %s740_s0 = inlined_call_operand.vmem [shape: f32[2,16,16,128], index: 0, kind: input, shape index: {}]   ;;  %s741_s1 = inlined_call_operand.vmem [shape: f32[2,16,16,128], index: 1, kind: input, shape index: {}]   ;;  %s742_s2 = inlined_call_operand.vmem [shape: f32[1,128], index: 2, kind: input, shape index: {}]   ;;  %s743_s3 = inlined_call_operand.vmem [shape: f32[1,128], index: 3, kind: input, shape index: {}]   ;;  %s744_s4 = inlined_call_operand.vmem [shape: f32[2,16,16,128], index: 4, kind: output, shape index: {}]  }
   0x1 LB: > { %s485_s16 = sadd.s32 4294967295, %s517_s15   ;;  %p489_p0 = scmp.ge.s32.totalorder %s517_s15, 1  ;;  %s517_s15 = sphi %s544_s15, %s14_s15  }
   0x2   : > { %p172_p1 = scmp.lt.s32.totalorder %s517_s15, 3 }
   0x4   : > { %p173_p2 = pnand %p489_p0, %p172_p1 }
   0x5   : > { %p203_p3 = scmp.lt.s32.totalorder (!%p173_p2), %s485_s16, 1 }
   0x6   : > { %176 = sbr.rel (%p173_p2) target bundleno = 53 (0x35), region = 36 }
   0xb   : > { %s746_s16 = smov (!%p203_p3, %s485_s16), 1  ;;  %v555_v0 = vld [vmem:[%s742_s2] ss:$0 sm:$0xff] }
   0xc   : > { %s498_s19 = sshll.u32 %s746_s16, 8  ;;  %v570_v1 = vld [vmem:[%s743_s3] ss:$0 sm:$0xff] }
   0xd   : > { %s560_s22 = scalar_lea.vmem %s740_s0, %s498_s19  ;;  %s565_s25 = scalar_lea.vmem %s741_s1, %s498_s19 }
   0xe   : > { %v250_v2 = vld [vmem:[%s560_s22] sm:$0xff]  ;;  %v251_v4 = vld [vmem:[%s560_s22 + $0x8] sm:$0xff]  ;;  %v252_v5 = vld [vmem:[%s560_s22 + $0x10] sm:$0xff]  ;;  %s589_s30 = scalar_lea.vmem %s744_s4, %s498_s19 }
   0xf   : > { %v286_v3 = vmul.f32 %v555_v0, %v250_v2  ;;  %v218_v6 = vld [vmem:[%s565_s25] sm:$0xff]  ;;  %v219_v7 = vld [vmem:[%s565_s25 + $0x8] sm:$0xff]  ;;  %v287_v8 = vmul.f32 %v555_v0, %v251_v4  ;;  %v288_v9 = vmul.f32 %v555_v0, %v252_v5  ;;  %v253_v10 = vld [vmem:[%s560_s22 + $0x18] sm:$0xff] }
  0x10   : > { %v220_v12 = vld [vmem:[%s565_s25 + $0x10] sm:$0xff]  ;;  %v289_v13 = vmul.f32 %v555_v0, %v253_v10  ;;  %v254_v14 = vld [vmem:[%s560_s22 + $0x20] sm:$0xff]  ;;  %v255_v15 = vld [vmem:[%s560_s22 + $0x28] sm:$0xff] }
  0x11   : > { %v322_v11 = vadd.f32 %v570_v1, %v286_v3  ;;  %v323_v16 = vadd.f32 %v570_v1, %v287_v8  ;;  %v324_v17 = vadd.f32 %v570_v1, %v288_v9  ;;  %v221_v18 = vld [vmem:[%s565_s25 + $0x18] sm:$0xff]  ;;  %v222_v19 = vld [vmem:[%s565_s25 + $0x20] sm:$0xff]  ;;  %v290_v20 = vmul.f32 %v555_v0, %v254_v14  ;;  %v256_v22 = vld [vmem:[%s560_s22 + $0x30] sm:$0xff] }
  0x12   : > { %v291_v21 = vmul.f32 %v555_v0, %v255_v15  ;;  %v325_v24 = vadd.f32 %v570_v1, %v289_v13  ;;  %v223_v25 = vld [vmem:[%s565_s25 + $0x28] sm:$0xff]  ;;  %v292_v26 = vmul.f32 %v555_v0, %v256_v22  ;;  %v257_v27 = vld [vmem:[%s560_s22 + $0x38] sm:$0xff]  ;;  %v258_v28 = vld [vmem:[%s560_s22 + $0x40] sm:$0xff] }
  0x13   : > { %v354_v23 = vadd.f32 %v322_v11, %v218_v6  ;;  %v355_v29 = vadd.f32 %v323_v16, %v219_v7  ;;  %v356_v30 = vadd.f32 %v324_v17, %v220_v12  ;;  %v326_v31 = vadd.f32 %v570_v1, %v290_v20  ;;  %v224_v33 = vld [vmem:[%s565_s25 + $0x30] sm:$0xff]  ;;  %v259_v34 = vld [vmem:[%s560_s22 + $0x48] sm:$0xff]  ;;  %v261_v40 = vld [vmem:[%s560_s22 + $0x58] sm:$0xff] }
  0x14   : > { %v327_v32 = vadd.f32 %v570_v1, %v291_v21  ;;  %v357_v35 = vadd.f32 %v325_v24, %v221_v18  ;;  %v328_v36 = vadd.f32 %v570_v1, %v292_v26  ;;  %v293_v37 = vmul.f32 %v555_v0, %v257_v27  ;;  %v260_v39 = vld [vmem:[%s560_s22 + $0x50] sm:$0xff]  ;;  %v225_v43 = vld [vmem:[%s565_s25 + $0x38] sm:$0xff]  ;;  %v226_v44 = vld [vmem:[%s565_s25 + $0x40] sm:$0xff] }
  0x15   : > { %386 = vst [vmem:[%s589_s30] sm:$0xff] %v354_v23  ;;  %v294_v38 = vmul.f32 %v555_v0, %v258_v28  ;;  %v358_v41 = vadd.f32 %v326_v31, %v222_v19  ;;  %v295_v45 = vmul.f32 %v555_v0, %v259_v34  ;;  %v296_v46 = vmul.f32 %v555_v0, %v260_v39  ;;  %v262_v47 = vld [vmem:[%s560_s22 + $0x60] sm:$0xff]  ;;  %v227_v51 = vld [vmem:[%s565_s25 + $0x48] sm:$0xff]  ;;  %v264_v54 = vld [vmem:[%s560_s22 + $0x70] sm:$0xff] }
  0x16   : > { %387 = vst [vmem:[%s589_s30 + $0x8] sm:$0xff] %v355_v29  ;;  %v359_v42 = vadd.f32 %v327_v32, %v223_v25  ;;  %v360_v48 = vadd.f32 %v328_v36, %v224_v33  ;;  %v329_v49 = vadd.f32 %v570_v1, %v293_v37  ;;  %v297_v52 = vmul.f32 %v555_v0, %v261_v40  ;;  %v263_v53 = vld [vmem:[%s560_s22 + $0x68] sm:$0xff]  ;;  %v228_v56 = vld [vmem:[%s565_s25 + $0x50] sm:$0xff]  ;;  %v265_v60 = vld [vmem:[%s560_s22 + $0x78] sm:$0xff] }
  0x17   : > { %388 = vst [vmem:[%s589_s30 + $0x10] sm:$0xff] %v356_v30  ;;  %v330_v50 = vadd.f32 %v570_v1, %v294_v38  ;;  %v331_v55 = vadd.f32 %v570_v1, %v295_v45  ;;  %v332_v57 = vadd.f32 %v570_v1, %v296_v46  ;;  %v298_v58 = vmul.f32 %v555_v0, %v262_v47  ;;  %v229_v63 = vld [vmem:[%s565_s25 + $0x58] sm:$0xff]  ;;  %v266_v4 = vld [vmem:[%s560_s22 + $0x80] sm:$0xff]  ;;  %v267_v5 = vld [vmem:[%s560_s22 + $0x88] sm:$0xff] }
  0x18   : > { %389 = vst [vmem:[%s589_s30 + $0x18] sm:$0xff] %v357_v35  ;;  %v299_v59 = vmul.f32 %v555_v0, %v263_v53  ;;  %v361_v61 = vadd.f32 %v329_v49, %v225_v43  ;;  %v333_v2 = vadd.f32 %v570_v1, %v297_v52  ;;  %v300_v3 = vmul.f32 %v555_v0, %v264_v54  ;;  %v230_v7 = vld [vmem:[%s565_s25 + $0x60] sm:$0xff]  ;;  %v268_v10 = vld [vmem:[%s560_s22 + $0x90] sm:$0xff]  ;;  %v231_v12 = vld [vmem:[%s565_s25 + $0x68] sm:$0xff] }
  0x19   : > { %390 = vst [vmem:[%s589_s30 + $0x20] sm:$0xff] %v358_v41  ;;  %v362_v62 = vadd.f32 %v330_v50, %v226_v44  ;;  %v363_v6 = vadd.f32 %v331_v55, %v227_v51  ;;  %v334_v8 = vadd.f32 %v570_v1, %v298_v58  ;;  %v364_v11 = vadd.f32 %v332_v57, %v228_v56  ;;  %v269_v16 = vld [vmem:[%s560_s22 + $0x98] sm:$0xff]  ;;  %v270_v17 = vld [vmem:[%s560_s22 + $0xa0] sm:$0xff]  ;;  %v232_v19 = vld [vmem:[%s565_s25 + $0x70] sm:$0xff] }
  0x1a   : > { %391 = vst [vmem:[%s589_s30 + $0x28] sm:$0xff] %v359_v42  ;;  %v335_v9 = vadd.f32 %v570_v1, %v299_v59  ;;  %v336_v13 = vadd.f32 %v570_v1, %v300_v3  ;;  %v301_v14 = vmul.f32 %v555_v0, %v265_v60  ;;  %v302_v15 = vmul.f32 %v555_v0, %v266_v4  ;;  %v271_v22 = vld [vmem:[%s560_s22 + $0xa8] sm:$0xff]  ;;  %v233_v24 = vld [vmem:[%s565_s25 + $0x78] sm:$0xff]  ;;  %v272_v28 = vld [vmem:[%s560_s22 + $0xb0] sm:$0xff] }
  0x1b   : > { %392 = vst [vmem:[%s589_s30 + $0x30] sm:$0xff] %v360_v48  ;;  %v365_v18 = vadd.f32 %v333_v2, %v229_v63  ;;  %v303_v20 = vmul.f32 %v555_v0, %v267_v5  ;;  %v304_v21 = vmul.f32 %v555_v0, %v268_v10  ;;  %v366_v23 = vadd.f32 %v334_v8, %v230_v7  ;;  %v234_v30 = vld [vmem:[%s565_s25 + $0x80] sm:$0xff]  ;;  %v273_v34 = vld [vmem:[%s560_s22 + $0xb8] sm:$0xff]  ;;  %v235_v37 = vld [vmem:[%s565_s25 + $0x88] sm:$0xff] }
  0x1c   : > { %393 = vst [vmem:[%s589_s30 + $0x38] sm:$0xff] %v361_v61  ;;  %v337_v25 = vadd.f32 %v570_v1, %v301_v14  ;;  %v338_v26 = vadd.f32 %v570_v1, %v302_v15  ;;  %v305_v27 = vmul.f32 %v555_v0, %v269_v16  ;;  %v367_v29 = vadd.f32 %v335_v9, %v231_v12  ;;  %v274_v35 = vld [vmem:[%s560_s22 + $0xc0] sm:$0xff]  ;;  %v275_v40 = vld [vmem:[%s560_s22 + $0xc8] sm:$0xff]  ;;  %v236_v42 = vld [vmem:[%s565_s25 + $0x90] sm:$0xff] }
  0x1d   : > { %394 = vst [vmem:[%s589_s30 + $0x40] sm:$0xff] %v362_v62  ;;  %v339_v31 = vadd.f32 %v570_v1, %v303_v20  ;;  %v306_v32 = vmul.f32 %v555_v0, %v270_v17  ;;  %v307_v33 = vmul.f32 %v555_v0, %v271_v22  ;;  %v368_v36 = vadd.f32 %v336_v13, %v232_v19  ;;  %v276_v44 = vld [vmem:[%s560_s22 + $0xd0] sm:$0xff]  ;;  %v237_v46 = vld [vmem:[%s565_s25 + $0x98] sm:$0xff]  ;;  %v238_v52 = vld [vmem:[%s565_s25 + $0xa0] sm:$0xff] }
  0x1e   : > { %395 = vst [vmem:[%s589_s30 + $0x48] sm:$0xff] %v363_v6  ;;  %v340_v38 = vadd.f32 %v570_v1, %v304_v21  ;;  %v308_v39 = vmul.f32 %v555_v0, %v272_v28  ;;  %v369_v41 = vadd.f32 %v337_v25, %v233_v24  ;;  %v341_v43 = vadd.f32 %v570_v1, %v305_v27  ;;  %v277_v50 = vld [vmem:[%s560_s22 + $0xd8] sm:$0xff]  ;;  %v278_v55 = vld [vmem:[%s560_s22 + $0xe0] sm:$0xff]  ;;  %v239_v57 = vld [vmem:[%s565_s25 + $0xa8] sm:$0xff] }
  0x1f   : > { %396 = vst [vmem:[%s589_s30 + $0x50] sm:$0xff] %v364_v11  ;;  %v370_v45 = vadd.f32 %v338_v26, %v234_v30  ;;  %v342_v47 = vadd.f32 %v570_v1, %v306_v32  ;;  %v309_v48 = vmul.f32 %v555_v0, %v273_v34  ;;  %v310_v49 = vmul.f32 %v555_v0, %v274_v35  ;;  %v279_v60 = vld [vmem:[%s560_s22 + $0xe8] sm:$0xff]  ;;  %v240_v62 = vld [vmem:[%s565_s25 + $0xb0] sm:$0xff]  ;;  %v241_v5 = vld [vmem:[%s565_s25 + $0xb8] sm:$0xff] }
  0x20   : > { %397 = vst [vmem:[%s589_s30 + $0x58] sm:$0xff] %v365_v18  ;;  %v371_v51 = vadd.f32 %v339_v31, %v235_v37  ;;  %v343_v53 = vadd.f32 %v570_v1, %v307_v33  ;;  %v311_v54 = vmul.f32 %v555_v0, %v275_v40  ;;  %v372_v56 = vadd.f32 %v340_v38, %v236_v42  ;;  %v280_v3 = vld [vmem:[%s560_s22 + $0xf0] sm:$0xff]  ;;  %v281_v8 = vld [vmem:[%s560_s22 + $0xf8] sm:$0xff]  ;;  %v242_v10 = vld [vmem:[%s565_s25 + $0xc0] sm:$0xff] }
  0x21   : > { %398 = vst [vmem:[%s589_s30 + $0x60] sm:$0xff] %v366_v23  ;;  %v344_v58 = vadd.f32 %v570_v1, %v308_v39  ;;  %v312_v59 = vmul.f32 %v555_v0, %v276_v44  ;;  %v373_v61 = vadd.f32 %v341_v43, %v237_v46  ;;  %v345_v63 = vadd.f32 %v570_v1, %v309_v48  ;;  %v243_v14 = vld [vmem:[%s565_s25 + $0xc8] sm:$0xff]  ;;  %v244_v18 = vld [vmem:[%s565_s25 + $0xd0] sm:$0xff]  ;;  %v245_v22 = vld [vmem:[%s565_s25 + $0xd8] sm:$0xff] }
  0x22   : > { %399 = vst [vmem:[%s589_s30 + $0x68] sm:$0xff] %v367_v29  ;;  %v313_v2 = vmul.f32 %v555_v0, %v277_v50  ;;  %v374_v4 = vadd.f32 %v342_v47, %v238_v52  ;;  %v346_v6 = vadd.f32 %v570_v1, %v310_v49  ;;  %v314_v7 = vmul.f32 %v555_v0, %v278_v55  ;;  %v246_v25 = vld [vmem:[%s565_s25 + $0xe0] sm:$0xff]  ;;  %v247_v28 = vld [vmem:[%s565_s25 + $0xe8] sm:$0xff]  ;;  %v248_v30 = vld [vmem:[%s565_s25 + $0xf0] sm:$0xff] }
  0x23   : > { %400 = vst [vmem:[%s589_s30 + $0x70] sm:$0xff] %v368_v36  ;;  %v375_v9 = vadd.f32 %v343_v53, %v239_v57  ;;  %v347_v11 = vadd.f32 %v570_v1, %v311_v54  ;;  %v315_v12 = vmul.f32 %v555_v0, %v279_v60  ;;  %v376_v13 = vadd.f32 %v344_v58, %v240_v62  ;;  %v249_v33 = vld [vmem:[%s565_s25 + $0xf8] sm:$0xff] }
  0x24   : > { %401 = vst [vmem:[%s589_s30 + $0x78] sm:$0xff] %v369_v41  ;;  %v348_v15 = vadd.f32 %v570_v1, %v312_v59  ;;  %v316_v16 = vmul.f32 %v555_v0, %v280_v3  ;;  %v377_v17 = vadd.f32 %v345_v63, %v241_v5  ;;  %v349_v19 = vadd.f32 %v570_v1, %v313_v2 }
  0x25   : > { %402 = vst [vmem:[%s589_s30 + $0x80] sm:$0xff] %v370_v45  ;;  %v317_v20 = vmul.f32 %v555_v0, %v281_v8  ;;  %v378_v21 = vadd.f32 %v346_v6, %v242_v10  ;;  %v350_v23 = vadd.f32 %v570_v1, %v314_v7  ;;  %v379_v24 = vadd.f32 %v347_v11, %v243_v14 }
  0x26   : > { %403 = vst [vmem:[%s589_s30 + $0x88] sm:$0xff] %v371_v51  ;;  %v351_v26 = vadd.f32 %v570_v1, %v315_v12  ;;  %v380_v27 = vadd.f32 %v348_v15, %v244_v18  ;;  %v352_v0 = vadd.f32 %v570_v1, %v316_v16  ;;  %v381_v29 = vadd.f32 %v349_v19, %v245_v22 }
  0x27   : > { %404 = vst [vmem:[%s589_s30 + $0x90] sm:$0xff] %v372_v56  ;;  %v353_v31 = vadd.f32 %v570_v1, %v317_v20  ;;  %v382_v32 = vadd.f32 %v350_v23, %v246_v25 }
  0x28   : > { %405 = vst [vmem:[%s589_s30 + $0x98] sm:$0xff] %v373_v61  ;;  %v383_v34 = vadd.f32 %v351_v26, %v247_v28  ;;  %v384_v35 = vadd.f32 %v352_v0, %v248_v30 }
  0x29   : > { %406 = vst [vmem:[%s589_s30 + $0xa0] sm:$0xff] %v374_v4  ;;  %v385_v36 = vadd.f32 %v353_v31, %v249_v33 }
  0x2a   : > { %407 = vst [vmem:[%s589_s30 + $0xa8] sm:$0xff] %v375_v9 }
  0x2b   : > { %408 = vst [vmem:[%s589_s30 + $0xb0] sm:$0xff] %v376_v13 }
  0x2c   : > { %409 = vst [vmem:[%s589_s30 + $0xb8] sm:$0xff] %v377_v17 }
  0x2d   : > { %410 = vst [vmem:[%s589_s30 + $0xc0] sm:$0xff] %v378_v21 }
  0x2e   : > { %411 = vst [vmem:[%s589_s30 + $0xc8] sm:$0xff] %v379_v24 }
  0x2f   : > { %412 = vst [vmem:[%s589_s30 + $0xd0] sm:$0xff] %v380_v27 }
  0x30   : > { %413 = vst [vmem:[%s589_s30 + $0xd8] sm:$0xff] %v381_v29 }
  0x31   : > { %414 = vst [vmem:[%s589_s30 + $0xe0] sm:$0xff] %v382_v32 }
  0x32   : > { %415 = vst [vmem:[%s589_s30 + $0xe8] sm:$0xff] %v383_v34 }
  0x33   : > { %416 = vst [vmem:[%s589_s30 + $0xf0] sm:$0xff] %v384_v35 }
  0x34   : > { %417 = vst [vmem:[%s589_s30 + $0xf8] sm:$0xff] %v385_v36 }
  0x35 PF: > { %s14_s15 = sadd.s32 1, %s517_s15  }
  0x36   : > { %p11_p4 = scmp.ge.s32.totalorder %s14_s15, 4  }
  0x38   :  { %13 = sbr.rel (!%p11_p4) target bundleno = 1 (0x1), region = 69 }

// kernel: residual_stack_forward.6
= control target key start
LH: loop header
LB: loop body
LE: loop exit
PB: predicated region body
PF: predicated region fallthrough
CT: control target
= control target key end

     0   :  { %s2870_s18 = smov 0   ;;  %s4231_s0 = inlined_call_operand.vmem [shape: f32[2,16,16,128], index: 0, kind: input, shape index: {}]   ;;  %s4232_s1 = inlined_call_operand.vmem [shape: f32[1,128], index: 1, kind: input, shape index: {}]   ;;  %s4233_s2 = inlined_call_operand.vmem [shape: f32[1,128], index: 2, kind: input, shape index: {}]   ;;  %s4234_s3 = inlined_call_operand.vmem [shape: f32[9,128,128], index: 3, kind: input, shape index: {}]   ;;  %s4235_s4 = inlined_call_operand.vmem [shape: f32[2,16,16,128], index: 4, kind: output, shape index: {0}]   ;;  %s4236_s5 = inlined_call_operand.vmem [shape: f32[2,2,128], index: 5, kind: output, shape index: {1}]  }
   0x1 LB: > { %s2606_s19 = sadd.s32 4294967295, %s2837_s18   ;;  %p2610_p0 = scmp.ge.s32.totalorder %s2837_s18, 1  ;;  %s2837_s18 = sphi %s2870_s18, %s16_s18  }
   0x2   : > { %p190_p1 = scmp.lt.s32.totalorder %s2837_s18, 3 }
   0x4   : > { %p191_p2 = pnand %p2610_p0, %p190_p1 }
   0x6   : > { %194 = sbr.rel (%p191_p2) target bundleno = 864 (0x360), region = 36 }
   0xb   : > { %v2631_v0 = vld [vmem:[%s4234_s3 + $0x1f8] sm:$0xff]  ;;  %v2630_v1 = vld [vmem:[%s4234_s3 + $0x1f0] sm:$0xff]  ;;  %p222_p3 = scmp.lt.s32.totalorder %s2606_s19, 1  ;;  %v2839_v2 = vmov 0.0   ;;  %v2629_v3 = vld [vmem:[%s4234_s3 + $0x1e8] sm:$0xff] }
   0xc   : > { %2748 = vmatpush.msra.mxu1 %v2631_v0  ;;  %2749 = vmatpush.msra.mxu2 %v2631_v0  ;;  %384 = vst [vmem:[#allocation2 + $0x78] sm:$0x1] %v2839_v2  ;;  %v2628_v4 = vld [vmem:[%s4234_s3 + $0x1e0] sm:$0xff]  ;;  %v2627_v5 = vld [vmem:[%s4234_s3 + $0x1d8] sm:$0xff]  ;;  %v2626_v10 = vld [vmem:[%s4234_s3 + $0x1d0] sm:$0xff] }
   0xd   : > { %2750 = vmatpush.msra.mxu3 %v2631_v0  ;;  %618 = vmatpush.msra.mxu0 %v2631_v0  ;;  %s4256_s19 = smov (!%p222_p3, %s2606_s19), 1  ;;  %372 = vst [vmem:[#allocation2] sm:$0xff] %v2839_v2  ;;  %v2910_v6 = vld [vmem:[%s4232_s1] ss:$0 sm:$0xff]  ;;  %v2625_v12 = vld [vmem:[%s4234_s3 + $0x1c8] sm:$0xff]  ;;  %v2623_v15 = vld [vmem:[%s4234_s3 + $0x1b8] sm:$0xff] }
   0xe   : > { %2751 = vmatpush.msra.mxu1 %v2630_v1  ;;  %2752 = vmatpush.msra.mxu2 %v2630_v1  ;;  %373 = vst [vmem:[#allocation2 + $0x8] sm:$0xff] %v2839_v2  ;;  %s2746_s28 = sshll.u32 %s4256_s19, 8  ;;  %v2917_v8 = vld [vmem:[%s4233_s2] ss:$0 sm:$0xff]  ;;  %v2622_v16 = vld [vmem:[%s4234_s3 + $0x1b0] sm:$0xff]  ;;  %v2621_v17 = vld [vmem:[%s4234_s3 + $0x1a8] sm:$0xff] }
   0xf   : > { %2753 = vmatpush.msra.mxu3 %v2630_v1  ;;  %619 = vmatpush.msra.mxu0 %v2630_v1  ;;  %374 = vst [vmem:[#allocation2 + $0x10] sm:$0x3] %v2839_v2  ;;  %s2905_s8 = scalar_lea.vmem %s4231_s0, %s2746_s28  ;;  %v2624_v14 = vld [vmem:[%s4234_s3 + $0x1c0] sm:$0xff]  ;;  %v2619_v19 = vld [vmem:[%s4234_s3 + $0x198] sm:$0xff]  ;;  %v2618_v20 = vld [vmem:[%s4234_s3 + $0x190] sm:$0xff]  ;;  %s3955_s13 = scalar_lea.vmem %s4235_s4, %s2746_s28 }
  0x10   : > { %2754 = vmatpush.msra.mxu1 %v2629_v3  ;;  %2755 = vmatpush.msra.mxu2 %v2629_v3  ;;  %376 = vst [vmem:[#allocation2 + $0x198] sm:$0xff] %v2839_v2  ;;  %v244_v7 = vld [vmem:[%s2905_s8 + $0x40] sm:$0xff]  ;;  %v2617_v22 = vld [vmem:[%s4234_s3 + $0x188] sm:$0xff]  ;;  %v2647_v26 = vld [vmem:[%s4234_s3 + $0x378] sm:$0xff]  ;;  %s2615_s28 = sshll.u32 %s4256_s19, 1 }
  0x11   : > { %2756 = vmatpush.msra.mxu3 %v2629_v3  ;;  %620 = vmatpush.msra.mxu0 %v2629_v3  ;;  %377 = vst [vmem:[#allocation2 + $0x1a0] sm:$0xff] %v2839_v2  ;;  %v280_v9 = vmul.f32 %v2910_v6, %v244_v7  ;;  %v2620_v18 = vld [vmem:[%s4234_s3 + $0x1a0] sm:$0xff]  ;;  %v567_v28 = vld [vmem:[%s4234_s3 + $0x78] sm:$0xff]  ;;  %v2646_v30 = vld [vmem:[%s4234_s3 + $0x370] sm:$0xff]  ;;  %s4139_s16 = scalar_lea.vmem %s4236_s5, %s2615_s28 }
  0x12   : > { %2757 = vmatpush.msra.mxu1 %v2628_v4  ;;  %2758 = vmatpush.msra.mxu2 %v2628_v4  ;;  %378 = vst [vmem:[#allocation2 + $0x1a8] sm:$0x3] %v2839_v2  ;;  %v252_v21 = vld [vmem:[%s2905_s8 + $0x80] sm:$0xff]  ;;  %v2663_v29 = vld [vmem:[%s4234_s3 + $0xf8] sm:$0xff]  ;;  %v245_v31 = vld [vmem:[%s2905_s8 + $0x48] sm:$0xff] }
  0x13   : > { %2759 = vmatpush.msra.mxu3 %v2628_v4  ;;  %621 = vmatpush.msra.mxu0 %v2628_v4  ;;  %380 = vst [vmem:[#allocation2 + $0x18] sm:$0x1] %v2839_v2  ;;  %v316_v11 = vadd.f32 %v2917_v8, %v280_v9  ;;  %v2616_v23 = vld [vmem:[%s4234_s3 + $0x180] sm:$0xff]  ;;  %v288_v24 = vmul.f32 %v2910_v6, %v252_v21  ;;  %v253_v33 = vld [vmem:[%s2905_s8 + $0x88] sm:$0xff]  ;;  %v566_v34 = vld [vmem:[%s4234_s3 + $0x70] sm:$0xff] }
  0x14   : > { %2760 = vmatpush.msra.mxu1 %v2627_v5  ;;  %2761 = vmatpush.msra.mxu2 %v2627_v5  ;;  %381 = vst [vmem:[#allocation2 + $0x30] sm:$0x1] %v2839_v2  ;;  %v260_v27 = vld [vmem:[%s2905_s8 + $0xc0] sm:$0xff]  ;;  %v2662_v37 = vld [vmem:[%s4234_s3 + $0xf0] sm:$0xff]  ;;  %v2645_v38 = vld [vmem:[%s4234_s3 + $0x368] sm:$0xff]  ;;  %v281_v40 = vmul.f32 %v2910_v6, %v245_v31  ;;  %v289_v44 = vmul.f32 %v2910_v6, %v253_v33 }
  0x15   : > { %2762 = vmatpush.msra.mxu3 %v2627_v5  ;;  %622 = vmatpush.msra.mxu0 %v2627_v5  ;;  %382 = vst [vmem:[#allocation2 + $0x48] sm:$0x1] %v2839_v2  ;;  %v348_v13 = vmax.f32 %v316_v11, 0.0  ;;  %v324_v32 = vadd.f32 %v2917_v8, %v288_v24  ;;  %v236_v35 = vld [vmem:[%s2905_s8] sm:$0xff]  ;;  %v296_v36 = vmul.f32 %v2910_v6, %v260_v27  ;;  %v261_v39 = vld [vmem:[%s2905_s8 + $0xc8] sm:$0xff]  ;;  %v2679_v41 = vld [vmem:[%s4234_s3 + $0x278] sm:$0xff] }
  0x16   : > { %2763 = vmatpush.msra.mxu1 %v2626_v10  ;;  %2764 = vmatpush.msra.mxu2 %v2626_v10  ;;  %383 = vst [vmem:[#allocation2 + $0x60] sm:$0x1] %v2839_v2  ;;  %v565_v42 = vld [vmem:[%s4234_s3 + $0x68] sm:$0xff]  ;;  %v246_v43 = vld [vmem:[%s2905_s8 + $0x50] sm:$0xff]  ;;  %v272_v45 = vmul.f32 %v2910_v6, %v236_v35  ;;  %v2644_v47 = vld [vmem:[%s4234_s3 + $0x360] sm:$0xff]  ;;  %v297_v54 = vmul.f32 %v2910_v6, %v261_v39 }
  0x17   : > { %2765 = vmatpush.msra.mxu3 %v2626_v10  ;;  %623 = vmatpush.msra.mxu0 %v2626_v10  ;;  %385 = vst [vmem:[#allocation2 + $0x90] sm:$0x1] %v2839_v2  ;;  %v2661_v46 = vld [vmem:[%s4234_s3 + $0xe8] sm:$0xff]  ;;  %v254_v48 = vld [vmem:[%s2905_s8 + $0x90] sm:$0xff]  ;;  %v356_v49 = vmax.f32 %v324_v32, 0.0  ;;  %v564_v51 = vld [vmem:[%s4234_s3 + $0x60] sm:$0xff]  ;;  %v3043_v53 = vadd.f32 %v2917_v8, %v296_v36  ;;  %v317_v58 = vadd.f32 %v2917_v8, %v281_v40 }
  0x18   : > { %2766 = vmatpush.msra.mxu1 %v2625_v12  ;;  %2767 = vmatpush.msra.mxu2 %v2625_v12  ;;  %424 = vst [vmem:[#allocation2 + $0x79] sm:$0xff] %v348_v13  ;;  %v2678_v50 = vld [vmem:[%s4234_s3 + $0x270] sm:$0xff]  ;;  %v237_v52 = vld [vmem:[%s2905_s8 + $0x8] sm:$0xff]  ;;  %v2660_v55 = vld [vmem:[%s4234_s3 + $0xe0] sm:$0xff]  ;;  %v282_v59 = vmul.f32 %v2910_v6, %v246_v43  ;;  %v3064_v62 = vadd.f32 %v2917_v8, %v289_v44 }
  0x19   : > { %2768 = vmatpush.msra.mxu3 %v2625_v12  ;;  %624 = vmatpush.msra.mxu0 %v2625_v12  ;;  %386 = vst [vmem:[#allocation2 + $0xa8] sm:$0x1] %v2839_v2  ;;  %v2643_v56 = vld [vmem:[%s4234_s3 + $0x358] sm:$0xff]  ;;  %v262_v57 = vld [vmem:[%s2905_s8 + $0xd0] sm:$0xff]  ;;  %v2677_v60 = vld [vmem:[%s4234_s3 + $0x268] sm:$0xff]  ;;  %v308_v63 = vadd.f32 %v2917_v8, %v272_v45  ;;  %v290_v0 = vmul.f32 %v2910_v6, %v254_v48  ;;  %v364_v12 = vmax.f32 %v3043_v53, 0.0 }
  0x1a   : > { %2769 = vmatpush.msra.mxu1 %v2624_v14  ;;  %2770 = vmatpush.msra.mxu2 %v2624_v14  ;;  %387 = vst [vmem:[#allocation2 + $0xc0] sm:$0x1] %v2839_v2  ;;  %v563_v61 = vld [vmem:[%s4234_s3 + $0x58] sm:$0xff]  ;;  %v2642_v3 = vld [vmem:[%s4234_s3 + $0x350] sm:$0xff]  ;;  %v273_v5 = vmul.f32 %v2910_v6, %v237_v52  ;;  %v298_v7 = vmul.f32 %v2910_v6, %v262_v57  ;;  %v2676_v9 = vld [vmem:[%s4234_s3 + $0x260] sm:$0xff]  ;;  %v357_v21 = vmax.f32 %v3064_v62, 0.0 }
  0x1b   : > { %2771 = vmatpush.msra.mxu3 %v2624_v14  ;;  %625 = vmatpush.msra.mxu0 %v2624_v14  ;;  %388 = vst [vmem:[#allocation2 + $0xd8] sm:$0x1] %v2839_v2  ;;  %v2659_v1 = vld [vmem:[%s4234_s3 + $0xd8] sm:$0xff]  ;;  %v562_v11 = vld [vmem:[%s4234_s3 + $0x50] sm:$0xff]  ;;  %v3087_v13 = vadd.f32 %v2917_v8, %v297_v54  ;;  %v256_v27 = vld [vmem:[%s2905_s8 + $0xa0] sm:$0xff] }
  0x1c   : > { %2772 = vmatpush.msra.mxu1 %v2623_v15  ;;  %2773 = vmatpush.msra.mxu2 %v2623_v15  ;;  %389 = vst [vmem:[#allocation2 + $0xf0] sm:$0x1] %v2839_v2  ;;  %v247_v4 = vld [vmem:[%s2905_s8 + $0x58] sm:$0xff]  ;;  %v2658_v14 = vld [vmem:[%s4234_s3 + $0xd0] sm:$0xff]  ;;  %v264_v32 = vld [vmem:[%s2905_s8 + $0xe0] sm:$0xff]  ;;  %v292_v48 = vmul.f32 %v2910_v6, %v256_v27 }
  0x1d   : > { %2774 = vmatpush.msra.mxu3 %v2623_v15  ;;  %626 = vmatpush.msra.mxu0 %v2623_v15  ;;  %390 = vst [vmem:[#allocation2 + $0x108] sm:$0x1] %v2839_v2  ;;  %v255_v10 = vld [vmem:[%s2905_s8 + $0x98] sm:$0xff]  ;;  %v2641_v15 = vld [vmem:[%s4234_s3 + $0x348] sm:$0xff]  ;;  %v2674_v43 = vld [vmem:[%s4234_s3 + $0x250] sm:$0xff]  ;;  %v300_v57 = vmul.f32 %v2910_v6, %v264_v32 }
  0x1e   : > { %2775 = vmatpush.msra.mxu1 %v2622_v16  ;;  %2776 = vmatpush.msra.mxu2 %v2622_v16  ;;  %391 = vst [vmem:[#allocation2 + $0x120] sm:$0x1] %v2839_v2  ;;  %v291_v24 = vmul.f32 %v2910_v6, %v255_v10  ;;  %v239_v31 = vld [vmem:[%s2905_s8 + $0x18] sm:$0xff]  ;;  %v249_v33 = vld [vmem:[%s2905_s8 + $0x68] sm:$0xff]  ;;  %v560_v52 = vld [vmem:[%s4234_s3 + $0x40] sm:$0xff] }
  0x1f   : > { %2777 = vmatpush.msra.mxu3 %v2622_v16  ;;  %627 = vmatpush.msra.mxu0 %v2622_v16  ;;  %392 = vst [vmem:[#allocation2 + $0x138] sm:$0x1] %v2839_v2  ;;  %v2978_v25 = vld [vmem:[#allocation2 + $0x78] sm:$0xff]  ;;  %v238_v16 = vld [vmem:[%s2905_s8 + $0x10] sm:$0xff]  ;;  %v2657_v36 = vld [vmem:[%s4234_s3 + $0xc8] sm:$0xff]  ;;  %v275_v54 = vmul.f32 %v2910_v6, %v239_v31 }
  0x20   : > { %2778 = vmatpush.msra.mxu1 %v2621_v17  ;;  %2779 = vmatpush.msra.mxu2 %v2621_v17  ;;  %393 = vst [vmem:[#allocation2 + $0x150] sm:$0x1] %v2839_v2  ;;  %v2639_v53 = vld [vmem:[%s4234_s3 + $0x338] sm:$0xff]  ;;  %v265_v62 = vld [vmem:[%s2905_s8 + $0xe8] sm:$0xff]  ;;  %v258_v10 = vld [vmem:[%s2905_s8 + $0xb0] sm:$0xff] }
  0x21   : > { %2780 = vmatpush.msra.mxu3 %v2621_v17  ;;  %628 = vmatpush.msra.mxu0 %v2621_v17  ;;  %394 = vst [vmem:[#allocation2 + $0x168] sm:$0x1] %v2839_v2  ;;  %v3097_v17 = vmax.f32 %v317_v58, 0.0  ;;  %v285_v58 = vmul.f32 %v2910_v6, %v249_v33  ;;  %v294_v31 = vmul.f32 %v2910_v6, %v258_v10  ;;  %v558_v33 = vld [vmem:[%s4234_s3 + $0x30] sm:$0xff]  ;;  %v2652_v10 = vld [vmem:[%s4234_s3 + $0xa0] sm:$0xff] }
  0x22   : > { %2781 = vmatpush.msra.mxu1 %v2620_v18  ;;  %2782 = vmatpush.msra.mxu2 %v2620_v18  ;;  %395 = vst [vmem:[#allocation2 + $0x180] sm:$0x1] %v2839_v2 }
  0x23   : > { %2783 = vmatpush.msra.mxu3 %v2620_v18  ;;  %398 = vst [vmem:[#allocation2 + $0x29] sm:$0x1] %v2839_v2  ;;  %629 = vmatpush.msra.mxu0 %v2620_v18  ;;  %v318_v18 = vadd.f32 %v2917_v8, %v282_v59  ;;  %v240_v59 = vld [vmem:[%s2905_s8 + $0x20] sm:$0xff] }
  0x24   : > { %2784 = vmatpush.msra.mxu1 %v2619_v19  ;;  %2785 = vmatpush.msra.mxu2 %v2619_v19  ;;  %399 = vst [vmem:[#allocation2 + $0x41] sm:$0x1] %v2839_v2 }
  0x25   : > { %2786 = vmatpush.msra.mxu3 %v2619_v19  ;;  %400 = vst [vmem:[#allocation2 + $0x59] sm:$0x1] %v2839_v2  ;;  %630 = vmatpush.msra.mxu0 %v2619_v19  ;;  %v283_v19 = vmul.f32 %v2910_v6, %v247_v4  ;;  %v3131_v39 = vmax.f32 %v318_v18, 0.0  ;;  %v301_v18 = vmul.f32 %v2910_v6, %v265_v62 }
  0x26   : > { %2787 = vmatpush.msra.mxu1 %v2618_v20  ;;  %2788 = vmatpush.msra.mxu2 %v2618_v20  ;;  %401 = vst [vmem:[#allocation2 + $0x71] sm:$0x1] %v2839_v2 }
  0x27   : > { %2789 = vmatpush.msra.mxu3 %v2618_v20  ;;  %402 = vst [vmem:[#allocation2 + $0x89] sm:$0x1] %v2839_v2  ;;  %631 = vmatpush.msra.mxu0 %v2618_v20  ;;  %v263_v20 = vld [vmem:[%s2905_s8 + $0xd8] sm:$0xff]  ;;  %v319_v40 = vadd.f32 %v2917_v8, %v283_v19 }
  0x28   : > { %2790 = vmatpush.msra.mxu1 %v2617_v22  ;;  %2791 = vmatpush.msra.mxu2 %v2617_v22  ;;  %403 = vst [vmem:[#allocation2 + $0xa1] sm:$0x1] %v2839_v2  ;;  %v299_v35 = vmul.f32 %v2910_v6, %v263_v20 }
  0x29   : > { %2792 = vmatpush.msra.mxu3 %v2617_v22  ;;  %404 = vst [vmem:[#allocation2 + $0xb9] sm:$0x1] %v2839_v2  ;;  %632 = vmatpush.msra.mxu0 %v2617_v22  ;;  %v3104_v22 = vmax.f32 %v308_v63, 0.0 }
  0x2a   : > { %2793 = vmatpush.msra.mxu1 %v2616_v23  ;;  %2794 = vmatpush.msra.mxu2 %v2616_v23  ;;  %405 = vst [vmem:[#allocation2 + $0xd1] sm:$0x1] %v2839_v2 }
  0x2b   : > { %658 = vmatmul.f32.vlgmr.msra.gmra.mxu1 %v2978_v25  ;;  %406 = vst [vmem:[#allocation2 + $0xe9] sm:$0x1] %v2839_v2  ;;  %2795 = vmatpush.msra.mxu3 %v2616_v23 }
  0x2c   : > { %894 = vmatpush.msrb.mxu2 %v2647_v26  ;;  %407 = vst [vmem:[#allocation2 + $0x101] sm:$0x1] %v2839_v2  ;;  %731 = vmatpush.msrb.mxu1 %v567_v28  ;;  %v248_v26 = vld [vmem:[%s2905_s8 + $0x60] sm:$0xff]  ;;  %v309_v28 = vadd.f32 %v2917_v8, %v273_v5  ;;  %v311_v5 = vadd.f32 %v2917_v8, %v275_v54 }
  0x2d   : > { %408 = vst [vmem:[#allocation2 + $0x119] sm:$0x1] %v2839_v2  ;;  %1160 = vmatpush.msrb.mxu3 %v2663_v29  ;;  %633 = vmatpush.msra.mxu0 %v2616_v23  ;;  %v326_v23 = vadd.f32 %v2917_v8, %v290_v0  ;;  %v3113_v29 = vadd.f32 %v2917_v8, %v298_v7 }
  0x2e   : > { %895 = vmatpush.msrb.mxu2 %v2646_v30  ;;  %409 = vst [vmem:[#allocation2 + $0x131] sm:$0x1] %v2839_v2  ;;  %732 = vmatpush.msrb.mxu1 %v566_v34  ;;  %v274_v30 = vmul.f32 %v2910_v6, %v238_v16  ;;  %v365_v34 = vmax.f32 %v3087_v13, 0.0  ;;  %v284_v44 = vmul.f32 %v2910_v6, %v248_v26  ;;  %v3228_v32 = vmax.f32 %v311_v5, 0.0  ;;  %v557_v5 = vld [vmem:[%s4234_s3 + $0x28] sm:$0xff] }
  0x2f   : > { %410 = vst [vmem:[#allocation2 + $0x149] sm:$0x1] %v2839_v2  ;;  %1161 = vmatpush.msrb.mxu3 %v2662_v37  ;;  %1354 = vmatpush.msrb.mxu0 %v2679_v41  ;;  %v2675_v37 = vld [vmem:[%s4234_s3 + $0x258] sm:$0xff]  ;;  %v2640_v41 = vld [vmem:[%s4234_s3 + $0x340] sm:$0xff]  ;;  %v328_v0 = vadd.f32 %v2917_v8, %v292_v48  ;;  %v276_v7 = vmul.f32 %v2910_v6, %v240_v59  ;;  %v2653_v59 = vld [vmem:[%s4234_s3 + $0xa8] sm:$0xff] }
  0x30   : > { %896 = vmatpush.msrb.mxu2 %v2645_v38  ;;  %411 = vst [vmem:[#allocation2 + $0x161] sm:$0x1] %v2839_v2  ;;  %733 = vmatpush.msrb.mxu1 %v565_v42  ;;  %v561_v38 = vld [vmem:[%s4234_s3 + $0x48] sm:$0xff]  ;;  %v2656_v42 = vld [vmem:[%s4234_s3 + $0xc0] sm:$0xff]  ;;  %v336_v13 = vadd.f32 %v2917_v8, %v300_v57  ;;  %v321_v16 = vadd.f32 %v2917_v8, %v285_v58 }
  0x31   : > { %412 = vst [vmem:[#allocation2 + $0x179] sm:$0x1] %v2839_v2  ;;  %1162 = vmatpush.msrb.mxu3 %v2661_v46  ;;  %1355 = vmatpush.msrb.mxu0 %v2678_v50  ;;  %v3146_v46 = vmax.f32 %v326_v23, 0.0  ;;  %v366_v50 = vmax.f32 %v3113_v29, 0.0  ;;  %v2638_v23 = vld [vmem:[%s4234_s3 + $0x330] sm:$0xff]  ;;  %v3215_v27 = vmax.f32 %v328_v0, 0.0 }
  0x32   : > { %897 = vmatpush.msrb.mxu2 %v2644_v47  ;;  %413 = vst [vmem:[#allocation2 + $0x191] sm:$0x1] %v2839_v2  ;;  %734 = vmatpush.msrb.mxu1 %v564_v51  ;;  %v327_v47 = vadd.f32 %v2917_v8, %v291_v24  ;;  %v310_v51 = vadd.f32 %v2917_v8, %v274_v30  ;;  %v2672_v29 = vld [vmem:[%s4234_s3 + $0x240] sm:$0xff] }
  0x33   : > { %432 = vst [vmem:[#allocation2 + $0xd9] sm:$0xff] %v356_v49  ;;  %1163 = vmatpush.msrb.mxu3 %v2660_v55  ;;  %1356 = vmatpush.msrb.mxu0 %v2677_v60  ;;  %v3152_v49 = vmax.f32 %v309_v28, 0.0  ;;  %v257_v55 = vld [vmem:[%s2905_s8 + $0xa8] sm:$0xff]  ;;  %v3169_v60 = vmax.f32 %v319_v40, 0.0  ;;  %v2654_v28 = vld [vmem:[%s4234_s3 + $0xb0] sm:$0xff] }
  0x34   : > { %898 = vmatpush.msrb.mxu2 %v2643_v56  ;;  %379 = vst [vmem:[#allocation2] sm:$0x1] %v2839_v2  ;;  %735 = vmatpush.msrb.mxu1 %v563_v61  ;;  %v335_v56 = vadd.f32 %v2917_v8, %v299_v35  ;;  %v320_v61 = vadd.f32 %v2917_v8, %v284_v44  ;;  %v3174_v63 = vmax.f32 %v327_v47, 0.0  ;;  %v3181_v4 = vmax.f32 %v310_v51, 0.0  ;;  %v241_v40 = vld [vmem:[%s2905_s8 + $0x28] sm:$0xff] }
  0x35   : > { %396 = vst [vmem:[#allocation2 + $0x198] sm:$0x1] %v2839_v2  ;;  %1164 = vmatpush.msrb.mxu3 %v2659_v1  ;;  %1357 = vmatpush.msrb.mxu0 %v2676_v9  ;;  %v293_v1 = vmul.f32 %v2910_v6, %v257_v55  ;;  %v250_v9 = vld [vmem:[%s2905_s8 + $0x70] sm:$0xff]  ;;  %v312_v35 = vadd.f32 %v2917_v8, %v276_v7  ;;  %v251_v55 = vld [vmem:[%s2905_s8 + $0x78] sm:$0xff]  ;;  %v2636_v7 = vld [vmem:[%s4234_s3 + $0x320] sm:$0xff] }
  0x36   : > { %899 = vmatpush.msrb.mxu2 %v2642_v3  ;;  %397 = vst [vmem:[#allocation2 + $0x11] sm:$0x1] %v2839_v2  ;;  %736 = vmatpush.msrb.mxu1 %v562_v11  ;;  %v3203_v20 = vmax.f32 %v320_v61, 0.0  ;;  %v286_v24 = vmul.f32 %v2910_v6, %v250_v9  ;;  %v277_v44 = vmul.f32 %v2910_v6, %v241_v40  ;;  %v2671_v61 = vld [vmem:[%s4234_s3 + $0x238] sm:$0xff] }
  0x37   : > { %414 = vst [vmem:[#allocation2 + $0x1a9] sm:$0x1] %v2839_v2  ;;  %1165 = vmatpush.msrb.mxu3 %v2658_v14  ;;  %1358 = vmatpush.msrb.mxu0 %v2675_v37  ;;  %v2655_v14 = vld [vmem:[%s4234_s3 + $0xb8] sm:$0xff]  ;;  %v329_v30 = vadd.f32 %v2917_v8, %v293_v1  ;;  %v3237_v37 = vmax.f32 %v321_v16, 0.0  ;;  %v330_v51 = vadd.f32 %v2917_v8, %v294_v31  ;;  %v556_v16 = vld [vmem:[%s4234_s3 + $0x20] sm:$0xff] }
  0x38   : > { %900 = vmatpush.msrb.mxu2 %v2641_v15  ;;  %440 = vst [vmem:[#allocation2 + $0x139] sm:$0xff] %v364_v12  ;;  %737 = vmatpush.msrb.mxu1 %v561_v38  ;;  %v367_v12 = vmax.f32 %v335_v56, 0.0  ;;  %v2673_v15 = vld [vmem:[%s4234_s3 + $0x248] sm:$0xff]  ;;  %v337_v38 = vadd.f32 %v2917_v8, %v301_v18  ;;  %v313_v54 = vadd.f32 %v2917_v8, %v277_v44  ;;  %v259_v56 = vld [vmem:[%s2905_s8 + $0xb8] sm:$0xff] }
  0x39   : > { %425 = vst [vmem:[#allocation2 + $0x81] sm:$0xff] %v3097_v17  ;;  %1166 = vmatpush.msrb.mxu3 %v2657_v36  ;;  %1359 = vmatpush.msrb.mxu0 %v2674_v43  ;;  %v368_v36 = vmax.f32 %v336_v13, 0.0  ;;  %v322_v43 = vadd.f32 %v2917_v8, %v286_v24  ;;  %v287_v0 = vmul.f32 %v2910_v6, %v251_v55  ;;  %v3291_v13 = vmax.f32 %v330_v51, 0.0  ;;  %v2635_v18 = vld [vmem:[%s4234_s3 + $0x318] sm:$0xff]  ;;  %v242_v24 = vld [vmem:[%s2905_s8 + $0x30] sm:$0xff]  ;;  %v2669_v44 = vld [vmem:[%s4234_s3 + $0x228] sm:$0xff] }
  0x3a   : > { %v3144_v45 = vld [vmem:[#allocation2 + $0xd8] sm:$0xff]  ;;  %433 = vst [vmem:[#allocation2 + $0xe1] sm:$0xff] %v357_v21  ;;  %901 = vmatpush.msrb.mxu2 %v2640_v41  ;;  %738 = vmatpush.msrb.mxu1 %v560_v52  ;;  %v266_v41 = vld [vmem:[%s2905_s8 + $0xf0] sm:$0xff]  ;;  %v369_v58 = vmax.f32 %v337_v38, 0.0  ;;  %v295_v1 = vmul.f32 %v2910_v6, %v259_v56  ;;  %v278_v31 = vmul.f32 %v2910_v6, %v242_v24  ;;  %v552_v24 = vld [vmem:[%s4234_s3] sm:$0xff] }
  0x3b   : > { %682 = vmatmul.f32.vlgmr.msra.gmra.mxu2 %v3144_v45  ;;  %416 = vst [vmem:[#allocation2 + $0x19] sm:$0xff] %v3104_v22  ;;  %1167 = vmatpush.msrb.mxu3 %v2656_v42  ;;  %v559_v21 = vld [vmem:[%s4234_s3 + $0x38] sm:$0xff]  ;;  %v302_v47 = vmul.f32 %v2910_v6, %v266_v41  ;;  %v3282_v9 = vmax.f32 %v322_v43, 0.0  ;;  %v2634_v51 = vld [vmem:[%s4234_s3 + $0x310] sm:$0xff] }
  0x3c   : > { %441 = vst [vmem:[#allocation2 + $0x141] sm:$0xff] %v365_v34  ;;  %902 = vmatpush.msrb.mxu2 %v2639_v53  ;;  %1360 = vmatpush.msrb.mxu0 %v2673_v15  ;;  %v2637_v34 = vld [vmem:[%s4234_s3 + $0x328] sm:$0xff]  ;;  %v3257_v53 = vmax.f32 %v312_v35, 0.0  ;;  %v331_v15 = vadd.f32 %v2917_v8, %v295_v1  ;;  %v314_v38 = vadd.f32 %v2917_v8, %v278_v31  ;;  %v2651_v43 = vld [vmem:[%s4234_s3 + $0x98] sm:$0xff]  ;;  %v2650_v56 = vld [vmem:[%s4234_s3 + $0x90] sm:$0xff] }
  0x3d   : > { %426 = vst [vmem:[#allocation2 + $0x91] sm:$0xff] %v3131_v39  ;;  %1168 = vmatpush.msrb.mxu3 %v2655_v14  ;;  %739 = vmatpush.msrb.mxu1 %v559_v21  ;;  %v338_v62 = vadd.f32 %v2917_v8, %v302_v47  ;;  %v323_v14 = vadd.f32 %v2917_v8, %v287_v0  ;;  %v3304_v21 = vmax.f32 %v313_v54, 0.0  ;;  %v555_v47 = vld [vmem:[%s4234_s3 + $0x18] sm:$0xff] }
  0x3e   : > { %434 = vst [vmem:[#allocation2 + $0xf1] sm:$0xff] %v3146_v46  ;;  %903 = vmatpush.msrb.mxu2 %v2638_v23  ;;  %1361 = vmatpush.msrb.mxu0 %v2672_v29  ;;  %v3318_v35 = vmax.f32 %v331_v15, 0.0  ;;  %v3344_v54 = vmax.f32 %v314_v38, 0.0  ;;  %v2667_v15 = vld [vmem:[%s4234_s3 + $0x218] sm:$0xff] }
  0x3f   : > { %v3178_v3 = vld [vmem:[#allocation2 + $0x138] sm:$0xff]  ;;  %417 = vst [vmem:[#allocation2 + $0x21] sm:$0xff] %v3152_v49  ;;  %1169 = vmatpush.msrb.mxu3 %v2654_v28  ;;  %740 = vmatpush.msrb.mxu1 %v558_v33  ;;  %v370_v23 = vmax.f32 %v338_v62, 0.0 }
  0x40   : > { %706 = vmatmul.f32.vlgmr.msra.gmra.mxu3 %v3178_v3  ;;  %v3188_v11 = vld [vmem:[#allocation2 + $0x80] sm:$0xff]  ;;  %442 = vst [vmem:[#allocation2 + $0x151] sm:$0xff] %v366_v50  ;;  %v3251_v50 = vmax.f32 %v329_v30, 0.0  ;;  %904 = vmatpush.msrb.mxu2 %v2637_v34  ;;  %v267_v28 = vld [vmem:[%s2905_s8 + $0xf8] sm:$0xff]  ;;  %v3311_v30 = vmax.f32 %v323_v14, 0.0  ;;  %v2649_v14 = vld [vmem:[%s4234_s3 + $0x88] sm:$0xff] }
  0x41   : > { %661 = vmatmul.f32.gmra.mxu1 %v3188_v11  ;;  %v3200_v19 = vld [vmem:[#allocation2 + $0xe0] sm:$0xff]  ;;  %427 = vst [vmem:[#allocation2 + $0x99] sm:$0xff] %v3169_v60  ;;  %1170 = vmatpush.msrb.mxu3 %v2653_v59  ;;  %v303_v33 = vmul.f32 %v2910_v6, %v267_v28  ;;  %v554_v59 = vld [vmem:[%s4234_s3 + $0x10] sm:$0xff]  ;;  %v243_v62 = vld [vmem:[%s2905_s8 + $0x38] sm:$0xff] }
  0x42   : > { %v3212_v26 = vld [vmem:[#allocation2 + $0x18] sm:$0xff]  ;;  %435 = vst [vmem:[#allocation2 + $0xf9] sm:$0xff] %v3174_v63  ;;  %1362 = vmatpush.msrb.mxu0 %v2671_v61  ;;  %741 = vmatpush.msrb.mxu1 %v557_v5  ;;  %v2633_v61 = vld [vmem:[%s4234_s3 + $0x308] sm:$0xff]  ;;  %v279_v1 = vmul.f32 %v2910_v6, %v243_v62 }
  0x43   : > { %685 = vmatmul.f32.gmra.mxu2 %v3200_v19  ;;  %634 = vmatmul.f32.vlgmr.msra.gmra.mxu0 %v3212_v26  ;;  %418 = vst [vmem:[#allocation2 + $0x31] sm:$0xff] %v3181_v4  ;;  %v3242_v42 = vld [vmem:[#allocation2 + $0x140] sm:$0xff]  ;;  %v3325_v40 = vadd.f32 %v2917_v8, %v303_v33  ;;  %v553_v6 = vld [vmem:[%s4234_s3 + $0x8] sm:$0xff]  ;;  %v2711_v28 = vld [vmem:[%s4234_s3 + $0x178] sm:$0xff] }
  0x44   : > { %443 = vst [vmem:[#allocation2 + $0x159] sm:$0xff] %v367_v12  ;;  %v3248_v48 = vld [vmem:[#allocation2 + $0x90] sm:$0xff]  ;;  %905 = vmatpush.msrb.mxu2 %v2636_v7  ;;  %1171 = vmatpush.msrb.mxu3 %v2652_v10  ;;  %v315_v10 = vadd.f32 %v2917_v8, %v279_v1  ;;  %v2632_v8 = vld [vmem:[%s4234_s3 + $0x300] sm:$0xff]  ;;  %v2743_v1 = vld [vmem:[%s4234_s3 + $0x478] sm:$0xff] }
  0x45   : > { %428 = vst [vmem:[#allocation2 + $0xa9] sm:$0xff] %v3203_v20  ;;  %v3254_v52 = vld [vmem:[#allocation2 + $0xf0] sm:$0xff]  ;;  %742 = vmatpush.msrb.mxu1 %v556_v16  ;;  %v4237_v55 = vmax.f32 %v3325_v40, 0.0 }
  0x46   : > { %436 = vst [vmem:[#allocation2 + $0x109] sm:$0xff] %v3215_v27  ;;  %v3263_v57 = vld [vmem:[#allocation2 + $0x20] sm:$0xff]  ;;  %v2670_v12 = vld [vmem:[%s4234_s3 + $0x230] sm:$0xff]  ;;  %906 = vmatpush.msrb.mxu2 %v2635_v18  ;;  %1172 = vmatpush.msrb.mxu3 %v2651_v43  ;;  %v3390_v16 = vmax.f32 %v315_v10, 0.0 }
  0x47   : > { %419 = vst [vmem:[#allocation2 + $0x39] sm:$0xff] %v3228_v32  ;;  %v3308_v29 = vld [vmem:[#allocation2 + $0x150] sm:$0xff]  ;;  %1363 = vmatpush.msrb.mxu0 %v2670_v12  ;;  %743 = vmatpush.msrb.mxu1 %v555_v47  ;;  %v2648_v18 = vld [vmem:[%s4234_s3 + $0x80] sm:$0xff]  ;;  %v2727_v47 = vld [vmem:[%s4234_s3 + $0x2f8] sm:$0xff] }
  0x48   : > { %709 = vmatmul.f32.gmra.mxu3 %v3242_v42  ;;  %444 = vst [vmem:[#allocation2 + $0x169] sm:$0xff] %v368_v36  ;;  %v3315_v34 = vld [vmem:[#allocation2 + $0x98] sm:$0xff]  ;;  %907 = vmatpush.msrb.mxu2 %v2634_v51  ;;  %v2710_v10 = vld [vmem:[%s4234_s3 + $0x170] sm:$0xff] }
  0x49   : > { %664 = vmatmul.f32.gmra.mxu1 %v3248_v48  ;;  %429 = vst [vmem:[#allocation2 + $0xb1] sm:$0xff] %v3237_v37  ;;  %v3320_v36 = vld [vmem:[#allocation2 + $0xf8] sm:$0xff]  ;;  %1364 = vmatpush.msrb.mxu0 %v2669_v44  ;;  %v2665_v44 = vld [vmem:[%s4234_s3 + $0x208] sm:$0xff] }
  0x4a   : > { %437 = vst [vmem:[#allocation2 + $0x111] sm:$0xff] %v3251_v50  ;;  %v3328_v41 = vld [vmem:[#allocation2 + $0x30] sm:$0xff]  ;;  %1173 = vmatpush.msrb.mxu3 %v2650_v56  ;;  %744 = vmatpush.msrb.mxu1 %v554_v59  ;;  %v2695_v51 = vld [vmem:[%s4234_s3 + $0x3f8] sm:$0xff]  ;;  %v2664_v56 = vld [vmem:[%s4234_s3 + $0x200] sm:$0xff] }
  0x4b   : > { %688 = vmatmul.f32.gmra.mxu2 %v3254_v52  ;;  %637 = vmatmul.f32.gmra.mxu0 %v3263_v57  ;;  %420 = vst [vmem:[#allocation2 + $0x49] sm:$0xff] %v3257_v53  ;;  %v3366_v0 = vld [vmem:[#allocation2 + $0x158] sm:$0xff] }
  0x4c   : > { %445 = vst [vmem:[#allocation2 + $0x171] sm:$0xff] %v369_v58  ;;  %v2668_v58 = vld [vmem:[%s4234_s3 + $0x220] sm:$0xff]  ;;  %v3369_v5 = vld [vmem:[#allocation2 + $0xa8] sm:$0xff]  ;;  %908 = vmatpush.msrb.mxu2 %v2633_v61  ;;  %1174 = vmatpush.msrb.mxu3 %v2649_v14 }
  0x4d   : > { %430 = vst [vmem:[#allocation2 + $0xc1] sm:$0xff] %v3282_v9  ;;  %1365 = vmatpush.msrb.mxu0 %v2668_v58  ;;  %v3371_v7 = vld [vmem:[#allocation2 + $0x108] sm:$0xff]  ;;  %745 = vmatpush.msrb.mxu1 %v553_v6 }
  0x4e   : > { %438 = vst [vmem:[#allocation2 + $0x121] sm:$0xff] %v3291_v13  ;;  %v3375_v12 = vld [vmem:[#allocation2 + $0x38] sm:$0xff]  ;;  %909 = vmatpush.msrb.mxu2 %v2632_v8  ;;  %1175 = vmatpush.msrb.mxu3 %v2648_v18  ;;  %v2726_v18 = vld [vmem:[%s4234_s3 + $0x2f0] sm:$0xff] }
  0x4f   : > { %421 = vst [vmem:[#allocation2 + $0x51] sm:$0xff] %v3304_v21  ;;  %1366 = vmatpush.msrb.mxu0 %v2667_v15  ;;  %v3407_v31 = vld [vmem:[#allocation2 + $0x168] sm:$0xff]  ;;  %746 = vmatpush.msrb.mxu1 %v552_v24 }
  0x50   : > { %712 = vmatmul.f32.gmra.mxu3 %v3308_v29  ;;  %446 = vst [vmem:[#allocation2 + $0x181] sm:$0xff] %v370_v23  ;;  %v2666_v23 = vld [vmem:[%s4234_s3 + $0x210] sm:$0xff]  ;;  %1814 = vmatpush.msra.mxu2 %v2711_v28  ;;  %v448_v28 = vld [vmem:[#allocation2] sm:$0xff] }
  0x51   : > { %667 = vmatmul.f32.gmra.mxu1 %v3315_v34  ;;  %431 = vst [vmem:[#allocation2 + $0xc9] sm:$0xff] %v3311_v30  ;;  %1367 = vmatpush.msrb.mxu0 %v2666_v23  ;;  %v3409_v33 = vld [vmem:[#allocation2 + $0xb0] sm:$0xff] }
  0x52   : > { %439 = vst [vmem:[#allocation2 + $0x129] sm:$0xff] %v3318_v35  ;;  %v3411_v38 = vld [vmem:[#allocation2 + $0x110] sm:$0xff]  ;;  %v3413_v43 = vld [vmem:[#allocation2 + $0x48] sm:$0xff]  ;;  %2008 = vmatpush.msra.mxu3 %v2727_v47  ;;  %1548 = vmatpush.msra.mxu1 %v2695_v51 }
  0x53   : > { %691 = vmatmul.f32.gmra.mxu2 %v3320_v36  ;;  %640 = vmatmul.f32.gmra.mxu0 %v3328_v41  ;;  %422 = vst [vmem:[#allocation2 + $0x61] sm:$0xff] %v3344_v54  ;;  %v3431_v58 = vld [vmem:[#allocation2 + $0x170] sm:$0xff]  ;;  %v2709_v51 = vld [vmem:[%s4234_s3 + $0x168] sm:$0xff] }
  0x54   : > { %447 = vst [vmem:[#allocation2 + $0x189] sm:$0xff] %v4237_v55  ;;  %1368 = vmatpush.msrb.mxu0 %v2665_v44  ;;  %v3433_v59 = vld [vmem:[#allocation2 + $0xc0] sm:$0xff]  ;;  %1815 = vmatpush.msra.mxu2 %v2710_v10  ;;  %v2694_v23 = vld [vmem:[%s4234_s3 + $0x3f0] sm:$0xff]  ;;  %v2693_v10 = vld [vmem:[%s4234_s3 + $0x3e8] sm:$0xff] }
  0x55   : > { %423 = vst [vmem:[#allocation2 + $0x69] sm:$0xff] %v3390_v16  ;;  %v3436_v61 = vld [vmem:[#allocation2 + $0x120] sm:$0xff]  ;;  %2009 = vmatpush.msra.mxu3 %v2726_v18  ;;  %1549 = vmatpush.msra.mxu1 %v2694_v23  ;;  %v2742_v47 = vld [vmem:[%s4234_s3 + $0x470] sm:$0xff]  ;;  %v2741_v23 = vld [vmem:[%s4234_s3 + $0x468] sm:$0xff] }
  0x56   : > { %1369 = vmatpush.msrb.mxu0 %v2664_v56  ;;  %v3438_v62 = vld [vmem:[#allocation2 + $0x50] sm:$0xff]  ;;  %1816 = vmatpush.msra.mxu2 %v2709_v51  ;;  %v1039_v56 = vld [vmem:[#allocation2 + $0x1] sm:$0xff] }
  0x57   : > { %v3449_v14 = vld [vmem:[#allocation2 + $0x180] sm:$0xff]  ;;  %1550 = vmatpush.msra.mxu1 %v2693_v10  ;;  %v1040_v18 = vld [vmem:[#allocation2 + $0x9] sm:$0xff] }
  0x58   : > { %715 = vmatmul.f32.gmra.mxu3 %v3366_v0  ;;  %2202 = vmatpush.msra.mxu0 %v2743_v1  ;;  %v3451_v15 = vld [vmem:[#allocation2 + $0xc8] sm:$0xff] }
  0x59   : > { %670 = vmatmul.f32.gmra.mxu1 %v3369_v5  ;;  %v3453_v6 = vld [vmem:[#allocation2 + $0x128] sm:$0xff] }
  0x5a   : > { %v3456_v8 = vld [vmem:[#allocation2 + $0x60] sm:$0xff]  ;;  %2203 = vmatpush.msra.mxu0 %v2742_v47  ;;  %v2725_v1 = vld [vmem:[%s4234_s3 + $0x2e8] sm:$0xff] }
  0x5b   : > { %694 = vmatmul.f32.gmra.mxu2 %v3371_v7  ;;  %643 = vmatmul.f32.gmra.mxu0 %v3375_v12  ;;  %v3467_v24 = vld [vmem:[#allocation2 + $0x188] sm:$0xff] }
  0x5c   : > { %v3470_v44 = vld [vmem:[#allocation2 + $0x68] sm:$0xff]  ;;  %2010 = vmatpush.msra.mxu3 %v2725_v1  ;;  %2204 = vmatpush.msra.mxu0 %v2741_v23 }
  0x5d   : > { %v2689_v1 = vld [vmem:[%s4234_s3 + $0x3c8] sm:$0xff] }
  0x60   : > { %718 = vmatmul.f32.gmra.mxu3 %v3407_v31 }
  0x61   : > { %673 = vmatmul.f32.gmra.mxu1 %v3409_v33 }
  0x63   : > { %697 = vmatmul.f32.gmra.mxu2 %v3411_v38  ;;  %646 = vmatmul.f32.gmra.mxu0 %v3413_v43 }
  0x68   : > { %721 = vmatmul.f32.gmra.mxu3 %v3431_v58 }
  0x69   : > { %676 = vmatmul.f32.gmra.mxu1 %v3433_v59 }
  0x6b   : > { %700 = vmatmul.f32.gmra.mxu2 %v3436_v61  ;;  %649 = vmatmul.f32.gmra.mxu0 %v3438_v62 }
  0x70   : > { %724 = vmatmul.f32.gmra.mxu3 %v3449_v14 }
  0x71   : > { %679 = vmatmul.f32.gmra.mxu1 %v3451_v15 }
  0x73   : > { %703 = vmatmul.f32.gmra.mxu2 %v3453_v6  ;;  %652 = vmatmul.f32.gmra.mxu0 %v3456_v8 }
  0x78   : > { %727 = vmatmul.f32.gmra.mxu3 %v3467_v24 }
  0x79   : > { %747 = vmatmul.f32.vlgmr.msrb.gmra.mxu1 %v448_v28  ;;  %v2724_v28 = vld [vmem:[%s4234_s3 + $0x2e0] sm:$0xff] }
  0x7a   : > { %2011 = vmatpush.msra.mxu3 %v2724_v28 }
  0x7b   : > { %910 = vmatmul.f32.vlgmr.msrb.gmra.mxu2 %v3328_v41  ;;  %655 = vmatmul.f32.gmra.mxu0 %v3470_v44 }
  0x80   : > { %1176 = vmatmul.f32.vlgmr.msrb.gmra.mxu3 %v1039_v56 }
  0x81   : > { %750 = vmatmul.f32.gmra.mxu1 %v2839_v2  ;;  %v2708_v2 = vld [vmem:[%s4234_s3 + $0x160] sm:$0xff] }
  0x82   : > { %1817 = vmatpush.msra.mxu2 %v2708_v2 }
  0x83   : > { %913 = vmatmul.f32.gmra.mxu2 %v3375_v12  ;;  %1370 = vmatmul.f32.vlgmr.msrb.gmra.mxu0 %v3104_v22 }
  0x88   : > { %1179 = vmatmul.f32.gmra.mxu3 %v1040_v18  ;;  %v3577_v18 = vld [vmem:[#allocation2 + $0x79] sm:$0xff] }
  0x89   : > { %753 = vmatmul.f32.gmra.mxu1 %v3212_v26  ;;  %v2692_v26 = vld [vmem:[%s4234_s3 + $0x3e0] sm:$0xff] }
  0x8a   : > { %1551 = vmatpush.msra.mxu1 %v2692_v26  ;;  %v2704_v26 = vld [vmem:[%s4234_s3 + $0x140] sm:$0xff] }
  0x8b   : > { %916 = vmatmul.f32.gmra.mxu2 %v3413_v43  ;;  %1373 = vmatmul.f32.gmra.mxu0 %v3152_v49 }
  0x90   : > { %1182 = vmatmul.f32.gmra.mxu3 %v3104_v22  ;;  %v2740_v22 = vld [vmem:[%s4234_s3 + $0x460] sm:$0xff] }
  0x91   : > { %756 = vmatmul.f32.gmra.mxu1 %v3263_v57  ;;  %2205 = vmatpush.msra.mxu0 %v2740_v22  ;;  %v2707_v57 = vld [vmem:[%s4234_s3 + $0x158] sm:$0xff] }
  0x92   : > { %1818 = vmatpush.msra.mxu2 %v2707_v57 }
  0x93   : > { %919 = vmatmul.f32.gmra.mxu2 %v3438_v62  ;;  %1376 = vmatmul.f32.gmra.mxu0 %v3181_v4 }
  0x98   : > { %1185 = vmatmul.f32.gmra.mxu3 %v3152_v49  ;;  %v2723_v49 = vld [vmem:[%s4234_s3 + $0x2d8] sm:$0xff] }
  0x99   : > { %759 = vmatmul.f32.gmra.mxu1 %v3328_v41  ;;  %v2691_v41 = vld [vmem:[%s4234_s3 + $0x3d8] sm:$0xff]  ;;  %2012 = vmatpush.msra.mxu3 %v2723_v49  ;;  %v2688_v49 = vld [vmem:[%s4234_s3 + $0x3c0] sm:$0xff] }
  0x9a   : > { %1552 = vmatpush.msra.mxu1 %v2691_v41 }
  0x9b   : > { %922 = vmatmul.f32.gmra.mxu2 %v3456_v8  ;;  %1379 = vmatmul.f32.gmra.mxu0 %v3228_v32 }
  0xa0   : > { %1188 = vmatmul.f32.gmra.mxu3 %v3181_v4  ;;  %v2739_v4 = vld [vmem:[%s4234_s3 + $0x458] sm:$0xff] }
  0xa1   : > { %762 = vmatmul.f32.gmra.mxu1 %v3375_v12  ;;  %2206 = vmatpush.msra.mxu0 %v2739_v4  ;;  %v2706_v12 = vld [vmem:[%s4234_s3 + $0x150] sm:$0xff] }
  0xa2   : > { %1819 = vmatpush.msra.mxu2 %v2706_v12 }
  0xa3   : > { %925 = vmatmul.f32.gmra.mxu2 %v3470_v44  ;;  %1382 = vmatmul.f32.gmra.mxu0 %v3257_v53 }
  0xa8   : > { %1191 = vmatmul.f32.gmra.mxu3 %v3228_v32  ;;  %v2722_v32 = vld [vmem:[%s4234_s3 + $0x2d0] sm:$0xff]  ;;  %v3548_v47 = vpop.f32.mrf.mxu1 }
  0xa9   : > { %765 = vmatmul.f32.gmra.mxu1 %v3413_v43  ;;  %v2690_v43 = vld [vmem:[%s4234_s3 + $0x3d0] sm:$0xff]  ;;  %2013 = vmatpush.msra.mxu3 %v2722_v32 }
  0xaa   : > { %1553 = vmatpush.msra.mxu1 %v2690_v43 }
  0xab   : > { %928 = vmatmul.f32.gmra.mxu2 %v2978_v25  ;;  %1385 = vmatmul.f32.gmra.mxu0 %v3304_v21 }
  0xac   : > { %1554 = vmatpush.msra.mxu1 %v2689_v1  ;;  %v2687_v1 = vld [vmem:[%s4234_s3 + $0x3b8] sm:$0xff] }
  0xae   : > { %1555 = vmatpush.msra.mxu1 %v2688_v49 }
  0xb0   : > { %1194 = vmatmul.f32.gmra.mxu3 %v3257_v53  ;;  %v2738_v53 = vld [vmem:[%s4234_s3 + $0x450] sm:$0xff]  ;;  %1556 = vmatpush.msra.mxu1 %v2687_v1 }
  0xb1   : > { %768 = vmatmul.f32.gmra.mxu1 %v3438_v62  ;;  %2207 = vmatpush.msra.mxu0 %v2738_v53  ;;  %v2705_v62 = vld [vmem:[%s4234_s3 + $0x148] sm:$0xff]  ;;  %v2703_v53 = vld [vmem:[%s4234_s3 + $0x138] sm:$0xff]  ;;  %v2686_v1 = vld [vmem:[%s4234_s3 + $0x3b0] sm:$0xff] }
  0xb2   : > { %1820 = vmatpush.msra.mxu2 %v2705_v62  ;;  %1557 = vmatpush.msra.mxu1 %v2686_v1 }
  0xb3   : > { %931 = vmatmul.f32.gmra.mxu2 %v3188_v11  ;;  %1388 = vmatmul.f32.gmra.mxu0 %v3344_v54 }
  0xb4   : > { %1821 = vmatpush.msra.mxu2 %v2704_v26 }
  0xb6   : > { %1822 = vmatpush.msra.mxu2 %v2703_v53 }
  0xb8   : > { %1197 = vmatmul.f32.gmra.mxu3 %v3304_v21 }
  0xb9   : > { %771 = vmatmul.f32.gmra.mxu1 %v3456_v8  ;;  %v2721_v8 = vld [vmem:[%s4234_s3 + $0x2c8] sm:$0xff] }
  0xba   : > { %2014 = vmatpush.msra.mxu3 %v2721_v8 }
  0xbb   : > { %934 = vmatmul.f32.gmra.mxu2 %v3248_v48  ;;  %1391 = vmatmul.f32.gmra.mxu0 %v3390_v16 }
  0xbe   : > { %v3560_v51 = vpop.f32.mrf.mxu2  ;;  %v3562_v56 = vpop.f32.mrf.mxu1 }
  0xc0   : > { %1200 = vmatmul.f32.gmra.mxu3 %v3344_v54  ;;  %v3565_v21 = vpop.f32.mrf.mxu0 }
  0xc1   : > { %774 = vmatmul.f32.gmra.mxu1 %v3470_v44  ;;  %v2737_v44 = vld [vmem:[%s4234_s3 + $0x448] sm:$0xff] }
  0xc2   : > { %2208 = vmatpush.msra.mxu0 %v2737_v44 }
  0xc3   : > { %v3574_v10 = vpop.f32.mrf.mxu3  ;;  %937 = vmatmul.f32.gmra.mxu2 %v3315_v34  ;;  %1394 = vmatmul.f32.gmra.mxu0 %v3577_v18 }
  0xc4   : > { %4238 = vst [vmem:[#allocation4_spill] sm:$0xff] %v3574_v10  ;;  %v3721_v10 = vld [vmem:[#allocation2 + $0xe1] sm:$0xff] }
  0xc6   : > { %v3580_v54 = vpop.f32.mrf.mxu2  ;;  %v3582_v23 = vpop.f32.mrf.mxu1 }
  0xc8   : > { %1203 = vmatmul.f32.gmra.mxu3 %v3390_v16  ;;  %v3585_v2 = vpop.f32.mrf.mxu0 }
  0xc9   : > { %777 = vmatmul.f32.gmra.mxu1 %v2978_v25  ;;  %v2720_v25 = vld [vmem:[%s4234_s3 + $0x2c0] sm:$0xff] }
  0xca   : > { %2015 = vmatpush.msra.mxu3 %v2720_v25 }
  0xcb   : > { %v3591_v28 = vpop.f32.mrf.mxu3  ;;  %940 = vmatmul.f32.gmra.mxu2 %v3369_v5  ;;  %1397 = vmatmul.f32.gmra.mxu0 %v3097_v17 }
  0xcc   : > { %4239 = vst [vmem:[#allocation5_spill] sm:$0xff] %v3591_v28 }
  0xce   : > { %v3598_v16 = vpop.f32.mrf.mxu2  ;;  %v3600_v22 = vpop.f32.mrf.mxu1 }
  0xd0   : > { %1206 = vmatmul.f32.gmra.mxu3 %v3577_v18  ;;  %v3603_v57 = vpop.f32.mrf.mxu0 }
  0xd1   : > { %780 = vmatmul.f32.gmra.mxu1 %v3188_v11  ;;  %v2736_v11 = vld [vmem:[%s4234_s3 + $0x440] sm:$0xff] }
  0xd2   : > { %2209 = vmatpush.msra.mxu0 %v2736_v11 }
  0xd3   : > { %v3612_v41 = vpop.f32.mrf.mxu3  ;;  %943 = vmatmul.f32.gmra.mxu2 %v3409_v33  ;;  %1400 = vmatmul.f32.gmra.mxu0 %v3131_v39 }
  0xd4   : > { %4240 = vst [vmem:[#allocation6_spill] sm:$0xff] %v3612_v41 }
  0xd6   : > { %v3616_v4 = vpop.f32.mrf.mxu2  ;;  %v3618_v12 = vpop.f32.mrf.mxu1 }
  0xd8   : > { %1209 = vmatmul.f32.gmra.mxu3 %v3097_v17  ;;  %v3621_v32 = vpop.f32.mrf.mxu0 }
  0xd9   : > { %783 = vmatmul.f32.gmra.mxu1 %v3248_v48  ;;  %v2719_v48 = vld [vmem:[%s4234_s3 + $0x2b8] sm:$0xff] }
  0xda   : > { %2016 = vmatpush.msra.mxu3 %v2719_v48 }
  0xdb   : > { %v3627_v43 = vpop.f32.mrf.mxu3  ;;  %946 = vmatmul.f32.gmra.mxu2 %v3433_v59  ;;  %1403 = vmatmul.f32.gmra.mxu0 %v3169_v60 }
  0xdc   : > { %4241 = vst [vmem:[#allocation7_spill] sm:$0xff] %v3627_v43 }
  0xde   : > { %v3634_v17 = vpop.f32.mrf.mxu2  ;;  %v3636_v62 = vpop.f32.mrf.mxu1 }
  0xe0   : > { %1212 = vmatmul.f32.gmra.mxu3 %v3131_v39  ;;  %v3639_v8 = vpop.f32.mrf.mxu0 }
  0xe1   : > { %786 = vmatmul.f32.gmra.mxu1 %v3315_v34  ;;  %v2735_v34 = vld [vmem:[%s4234_s3 + $0x438] sm:$0xff] }
  0xe2   : > { %2210 = vmatpush.msra.mxu0 %v2735_v34 }
  0xe3   : > { %v3648_v44 = vpop.f32.mrf.mxu3  ;;  %949 = vmatmul.f32.gmra.mxu2 %v3451_v15  ;;  %1406 = vmatmul.f32.gmra.mxu0 %v3203_v20 }
  0xe4   : > { %4242 = vst [vmem:[#allocation8_spill] sm:$0xff] %v3648_v44 }
  0xe6   : > { %v3652_v39 = vpop.f32.mrf.mxu2  ;;  %v3654_v26 = vpop.f32.mrf.mxu1 }
  0xe8   : > { %1215 = vmatmul.f32.gmra.mxu3 %v3169_v60  ;;  %v3657_v25 = vpop.f32.mrf.mxu0  ;;  %v2702_v60 = vld [vmem:[%s4234_s3 + $0x130] sm:$0xff] }
  0xe9   : > { %789 = vmatmul.f32.gmra.mxu1 %v3369_v5  ;;  %1823 = vmatpush.msra.mxu2 %v2702_v60  ;;  %v2718_v5 = vld [vmem:[%s4234_s3 + $0x2b0] sm:$0xff] }
  0xea   : > { %2017 = vmatpush.msra.mxu3 %v2718_v5 }
  0xeb   : > { %v3663_v49 = vpop.f32.mrf.mxu3  ;;  %952 = vmatmul.f32.gmra.mxu2 %v3144_v45  ;;  %1409 = vmatmul.f32.gmra.mxu0 %v3237_v37 }
  0xec   : > { %4243 = vst [vmem:[#allocation9_spill] sm:$0xff] %v3663_v49  ;;  %v2734_v49 = vld [vmem:[%s4234_s3 + $0x430] sm:$0xff] }
  0xed   : > { %2211 = vmatpush.msra.mxu0 %v2734_v49  ;;  %v3706_v49 = vld [vmem:[#allocation2 + $0xd9] sm:$0xff] }
  0xee   : > { %v3667_v11 = vpop.f32.mrf.mxu2  ;;  %v3669_v53 = vpop.f32.mrf.mxu1 }
  0xf0   : > { %1218 = vmatmul.f32.gmra.mxu3 %v3203_v20  ;;  %v3675_v48 = vpop.f32.mrf.mxu0 }
  0xf1   : > { %792 = vmatmul.f32.gmra.mxu1 %v3409_v33 }
  0xf3   : > { %v3684_v34 = vpop.f32.mrf.mxu3  ;;  %955 = vmatmul.f32.gmra.mxu2 %v3200_v19  ;;  %1412 = vmatmul.f32.gmra.mxu0 %v3282_v9 }
  0xf4   : > { %4244 = vst [vmem:[#allocation10_spill] sm:$0xff] %v3684_v34 }
  0xf6   : > { %v3688_v20 = vpop.f32.mrf.mxu2  ;;  %v748_v60 = vpop.f32.mrf.mxu1 }
  0xf7   : > { %v749_v5 = vadd.f32 %v748_v60, %v3565_v21  ;;  %v2685_v21 = vld [vmem:[%s4234_s3 + $0x3a8] sm:$0xff] }
  0xf8   : > { %1221 = vmatmul.f32.gmra.mxu3 %v3237_v37  ;;  %v3691_v55 = vpop.f32.mrf.mxu0  ;;  %v2701_v37 = vld [vmem:[%s4234_s3 + $0x128] sm:$0xff]  ;;  %1558 = vmatpush.msra.mxu1 %v2685_v21  ;;  %v2700_v21 = vld [vmem:[%s4234_s3 + $0x120] sm:$0xff] }
  0xf9   : > { %795 = vmatmul.f32.gmra.mxu1 %v3433_v59  ;;  %1824 = vmatpush.msra.mxu2 %v2701_v37 }
  0xfb   : > { %v3697_v33 = vpop.f32.mrf.mxu3  ;;  %958 = vmatmul.f32.gmra.mxu2 %v3254_v52  ;;  %1415 = vmatmul.f32.gmra.mxu0 %v3311_v30 }
  0xfc   : > { %4245 = vst [vmem:[#allocation11_spill] sm:$0xff] %v3697_v33  ;;  %v2717_v33 = vld [vmem:[%s4234_s3 + $0x2a8] sm:$0xff]  ;;  %1825 = vmatpush.msra.mxu2 %v2700_v21 }
  0xfd   : > { %2018 = vmatpush.msra.mxu3 %v2717_v33 }
  0xfe   : > { %v911_v1 = vpop.f32.mrf.mxu2  ;;  %v751_v34 = vpop.f32.mrf.mxu1 }
  0xff   : > { %v1007_v44 = vadd.f32 %v911_v1, %v749_v5  ;;  %v752_v5 = vadd.f32 %v751_v34, %v3585_v2 }
 0x100   : > { %1224 = vmatmul.f32.gmra.mxu3 %v3282_v9  ;;  %v1371_v59 = vpop.f32.mrf.mxu0 }
 0x101   : > { %798 = vmatmul.f32.gmra.mxu1 %v3451_v15  ;;  %v2733_v15 = vld [vmem:[%s4234_s3 + $0x428] sm:$0xff] }
 0x102   : > { %2212 = vmatpush.msra.mxu0 %v2733_v15 }
 0x103   : > { %v1177_v60 = vpop.f32.mrf.mxu3  ;;  %961 = vmatmul.f32.gmra.mxu2 %v3320_v36  ;;  %1418 = vmatmul.f32.gmra.mxu0 %v3706_v49 }
 0x104   : > { %v1273_v9 = vadd.f32 %v1177_v60, %v1007_v44 }
 0x106   : > { %v3718_v1 = vadd.f32 %v1371_v59, %v1273_v9  ;;  %v914_v37 = vpop.f32.mrf.mxu2  ;;  %v754_v43 = vpop.f32.mrf.mxu1  ;;  %v2716_v9 = vld [vmem:[%s4234_s3 + $0x2a0] sm:$0xff] }
 0x107   : > { %v1008_v41 = vadd.f32 %v914_v37, %v752_v5  ;;  %v755_v34 = vadd.f32 %v754_v43, %v3603_v57  ;;  %2019 = vmatpush.msra.mxu3 %v2716_v9 }
 0x108   : > { %1227 = vmatmul.f32.gmra.mxu3 %v3311_v30  ;;  %v1374_v28 = vpop.f32.mrf.mxu0 }
 0x109   : > { %801 = vmatmul.f32.gmra.mxu1 %v3144_v45 }
 0x10b   : > { %v1180_v44 = vpop.f32.mrf.mxu3  ;;  %964 = vmatmul.f32.gmra.mxu2 %v3371_v7  ;;  %1421 = vmatmul.f32.gmra.mxu0 %v3721_v10 }
 0x10c   : > { %v1274_v2 = vadd.f32 %v1180_v44, %v1008_v41 }
 0x10e   : > { %v3730_v33 = vadd.f32 %v1374_v28, %v1274_v2  ;;  %v917_v30 = vpop.f32.mrf.mxu2  ;;  %v757_v59 = vpop.f32.mrf.mxu1  ;;  %v2684_v28 = vld [vmem:[%s4234_s3 + $0x3a0] sm:$0xff] }
 0x10f   : > { %v1009_v60 = vadd.f32 %v917_v30, %v755_v34  ;;  %1559 = vmatpush.msra.mxu1 %v2684_v28  ;;  %v758_v43 = vadd.f32 %v757_v59, %v3621_v32  ;;  %v2715_v28 = vld [vmem:[%s4234_s3 + $0x298] sm:$0xff] }
 0x110   : > { %1230 = vmatmul.f32.gmra.mxu3 %v3706_v49  ;;  %v1377_v45 = vpop.f32.mrf.mxu0 }
 0x111   : > { %804 = vmatmul.f32.gmra.mxu1 %v3200_v19  ;;  %v2732_v19 = vld [vmem:[%s4234_s3 + $0x420] sm:$0xff]  ;;  %2020 = vmatpush.msra.mxu3 %v2715_v28 }
 0x112   : > { %2213 = vmatpush.msra.mxu0 %v2732_v19 }
 0x113   : > { %v1183_v57 = vpop.f32.mrf.mxu3  ;;  %967 = vmatmul.f32.gmra.mxu2 %v3411_v38  ;;  %1424 = vmatmul.f32.gmra.mxu0 %v3146_v46 }
 0x114   : > { %v1275_v41 = vadd.f32 %v1183_v57, %v1009_v60 }
 0x116   : > { %v3746_v5 = vadd.f32 %v1377_v45, %v1275_v41  ;;  %v920_v37 = vpop.f32.mrf.mxu2  ;;  %v760_v15 = vpop.f32.mrf.mxu1  ;;  %v2699_v45 = vld [vmem:[%s4234_s3 + $0x118] sm:$0xff] }
 0x117   : > { %v1010_v44 = vadd.f32 %v920_v37, %v758_v43  ;;  %v761_v30 = vadd.f32 %v760_v15, %v3639_v8  ;;  %1826 = vmatpush.msra.mxu2 %v2699_v45  ;;  %v2683_v8 = vld [vmem:[%s4234_s3 + $0x398] sm:$0xff] }
 0x118   : > { %1233 = vmatmul.f32.gmra.mxu3 %v3721_v10  ;;  %v1380_v2 = vpop.f32.mrf.mxu0  ;;  %1560 = vmatpush.msra.mxu1 %v2683_v8 }
 0x119   : > { %807 = vmatmul.f32.gmra.mxu1 %v3254_v52 }
 0x11b   : > { %v1186_v34 = vpop.f32.mrf.mxu3  ;;  %970 = vmatmul.f32.gmra.mxu2 %v3436_v61  ;;  %1427 = vmatmul.f32.gmra.mxu0 %v3174_v63 }
 0x11c   : > { %v1276_v32 = vadd.f32 %v1186_v34, %v1010_v44 }
 0x11e   : > { %v3756_v59 = vadd.f32 %v1380_v2, %v1276_v32  ;;  %v923_v21 = vpop.f32.mrf.mxu2  ;;  %v763_v60 = vpop.f32.mrf.mxu1 }
 0x11f   : > { %v1011_v9 = vadd.f32 %v923_v21, %v761_v30  ;;  %v2698_v21 = vld [vmem:[%s4234_s3 + $0x110] sm:$0xff] }
 0x120   : > { %1236 = vmatmul.f32.gmra.mxu3 %v3146_v46  ;;  %v1383_v52 = vpop.f32.mrf.mxu0  ;;  %v764_v46 = vadd.f32 %v763_v60, %v3657_v25  ;;  %1827 = vmatpush.msra.mxu2 %v2698_v21 }
 0x121   : > { %810 = vmatmul.f32.gmra.mxu1 %v3320_v36  ;;  %v2731_v36 = vld [vmem:[%s4234_s3 + $0x418] sm:$0xff] }
 0x122   : > { %2214 = vmatpush.msra.mxu0 %v2731_v36  ;;  %v3814_v36 = vld [vmem:[#allocation2 + $0x139] sm:$0xff] }
 0x123   : > { %v1189_v57 = vpop.f32.mrf.mxu3  ;;  %973 = vmatmul.f32.gmra.mxu2 %v3453_v6  ;;  %1430 = vmatmul.f32.gmra.mxu0 %v3215_v27 }
 0x124   : > { %v1277_v41 = vadd.f32 %v1189_v57, %v1011_v9 }
 0x126   : > { %v3772_v43 = vadd.f32 %v1383_v52, %v1277_v41  ;;  %v926_v37 = vpop.f32.mrf.mxu2  ;;  %v766_v15 = vpop.f32.mrf.mxu1 }
 0x127   : > { %v1012_v44 = vadd.f32 %v926_v37, %v764_v46  ;;  %v767_v34 = vadd.f32 %v766_v15, %v3675_v48  ;;  %v2682_v48 = vld [vmem:[%s4234_s3 + $0x390] sm:$0xff] }
 0x128   : > { %1239 = vmatmul.f32.gmra.mxu3 %v3174_v63  ;;  %v1386_v2 = vpop.f32.mrf.mxu0  ;;  %1561 = vmatpush.msra.mxu1 %v2682_v48  ;;  %v2808_v48 = vld [vmem:[#allocation2 + $0x138] sm:$0xff] }
 0x129   : > { %813 = vmatmul.f32.gmra.mxu1 %v3371_v7 }
 0x12b   : > { %v1192_v19 = vpop.f32.mrf.mxu3  ;;  %976 = vmatmul.f32.gmra.mxu2 %v3178_v3  ;;  %1433 = vmatmul.f32.gmra.mxu0 %v3251_v50  ;;  %v2714_v3 = vld [vmem:[%s4234_s3 + $0x290] sm:$0xff] }
 0x12c   : > { %v1278_v25 = vadd.f32 %v1192_v19, %v1012_v44  ;;  %2021 = vmatpush.msra.mxu3 %v2714_v3  ;;  %v2697_v44 = vld [vmem:[%s4234_s3 + $0x108] sm:$0xff] }
 0x12d   : > { %1828 = vmatpush.msra.mxu2 %v2697_v44  ;;  %v2713_v19 = vld [vmem:[%s4234_s3 + $0x288] sm:$0xff] }
 0x12e   : > { %v3782_v32 = vadd.f32 %v1386_v2, %v1278_v25  ;;  %v929_v30 = vpop.f32.mrf.mxu2  ;;  %v769_v63 = vpop.f32.mrf.mxu1  ;;  %2022 = vmatpush.msra.mxu3 %v2713_v19  ;;  %v3829_v3 = vld [vmem:[#allocation2 + $0x141] sm:$0xff] }
 0x12f   : > { %v1013_v60 = vadd.f32 %v929_v30, %v767_v34 }
 0x130   : > { %1242 = vmatmul.f32.gmra.mxu3 %v3215_v27  ;;  %v1389_v7 = vpop.f32.mrf.mxu0  ;;  %v770_v27 = vadd.f32 %v769_v63, %v3691_v55 }
 0x131   : > { %816 = vmatmul.f32.gmra.mxu1 %v3411_v38  ;;  %v2730_v38 = vld [vmem:[%s4234_s3 + $0x410] sm:$0xff] }
 0x132   : > { %2215 = vmatpush.msra.mxu0 %v2730_v38  ;;  %v3843_v38 = vld [vmem:[#allocation2 + $0x151] sm:$0xff] }
 0x133   : > { %v1195_v45 = vpop.f32.mrf.mxu3  ;;  %979 = vmatmul.f32.gmra.mxu2 %v3242_v42  ;;  %1436 = vmatmul.f32.gmra.mxu0 %v3291_v13 }
 0x134   : > { %v1279_v9 = vadd.f32 %v1195_v45, %v1013_v60 }
 0x136   : > { %v3798_v52 = vadd.f32 %v1389_v7, %v1279_v9  ;;  %v932_v28 = vpop.f32.mrf.mxu2  ;;  %v772_v8 = vpop.f32.mrf.mxu1 }
 0x137   : > { %v1014_v57 = vadd.f32 %v932_v28, %v770_v27  ;;  %v773_v46 = vadd.f32 %v772_v8, %v3548_v47  ;;  %v2681_v47 = vld [vmem:[%s4234_s3 + $0x388] sm:$0xff]  ;;  %v2696_v8 = vld [vmem:[%s4234_s3 + $0x100] sm:$0xff] }
 0x138   : > { %1245 = vmatmul.f32.gmra.mxu3 %v3251_v50  ;;  %v1392_v41 = vpop.f32.mrf.mxu0  ;;  %1562 = vmatpush.msra.mxu1 %v2681_v47 }
 0x139   : > { %819 = vmatmul.f32.gmra.mxu1 %v3436_v61  ;;  %1829 = vmatpush.msra.mxu2 %v2696_v8 }
 0x13b   : > { %v1198_v42 = vpop.f32.mrf.mxu3  ;;  %982 = vmatmul.f32.gmra.mxu2 %v3308_v29  ;;  %1439 = vmatmul.f32.gmra.mxu0 %v3318_v35 }
 0x13c   : > { %v1280_v55 = vadd.f32 %v1198_v42, %v1014_v57  ;;  %v2712_v42 = vld [vmem:[%s4234_s3 + $0x280] sm:$0xff] }
 0x13d   : > { %2023 = vmatpush.msra.mxu3 %v2712_v42 }
 0x13e   : > { %v3808_v37 = vadd.f32 %v1392_v41, %v1280_v55  ;;  %v935_v15 = vpop.f32.mrf.mxu2  ;;  %v775_v50 = vpop.f32.mrf.mxu1  ;;  %v2809_v55 = vld [vmem:[#allocation2 + $0x140] sm:$0xff] }
 0x13f   : > { %v1015_v61 = vadd.f32 %v935_v15, %v773_v46  ;;  %v776_v34 = vadd.f32 %v775_v50, %v3562_v56 }
 0x140   : > { %1248 = vmatmul.f32.gmra.mxu3 %v3291_v13  ;;  %v1395_v2 = vpop.f32.mrf.mxu0 }
 0x141   : > { %822 = vmatmul.f32.gmra.mxu1 %v3453_v6  ;;  %v2729_v6 = vld [vmem:[%s4234_s3 + $0x408] sm:$0xff] }
 0x142   : > { %2216 = vmatpush.msra.mxu0 %v2729_v6 }
 0x143   : > { %v1201_v25 = vpop.f32.mrf.mxu3  ;;  %985 = vmatmul.f32.gmra.mxu2 %v3366_v0  ;;  %1442 = vmatmul.f32.gmra.mxu0 %v3814_v36 }
 0x144   : > { %v1281_v13 = vadd.f32 %v1201_v25, %v1015_v61  ;;  %v3857_v25 = vld [vmem:[#allocation2 + $0x159] sm:$0xff] }
 0x146   : > { %v3826_v30 = vadd.f32 %v1395_v2, %v1281_v13  ;;  %v938_v63 = vpop.f32.mrf.mxu2  ;;  %v778_v21 = vpop.f32.mrf.mxu1  ;;  %v2728_v13 = vld [vmem:[%s4234_s3 + $0x400] sm:$0xff] }
 0x147   : > { %v1016_v60 = vadd.f32 %v938_v63, %v776_v34  ;;  %v779_v9 = vadd.f32 %v778_v21, %v3582_v23  ;;  %v2680_v23 = vld [vmem:[%s4234_s3 + $0x380] sm:$0xff]  ;;  %2217 = vmatpush.msra.mxu0 %v2728_v13 }
 0x148   : > { %1251 = vmatmul.f32.gmra.mxu3 %v3318_v35  ;;  %v1398_v7 = vpop.f32.mrf.mxu0  ;;  %1563 = vmatpush.msra.mxu1 %v2680_v23 }
 0x149   : > { %825 = vmatmul.f32.gmra.mxu1 %v2808_v48 }
 0x14b   : > { %v1204_v45 = vpop.f32.mrf.mxu3  ;;  %988 = vmatmul.f32.gmra.mxu2 %v3407_v31  ;;  %1445 = vmatmul.f32.gmra.mxu0 %v3829_v3 }
 0x14c   : > { %v1282_v56 = vadd.f32 %v1204_v45, %v1016_v60  ;;  %v3869_v45 = vld [vmem:[#allocation2 + $0x169] sm:$0xff] }
 0x14e   : > { %v3837_v35 = vadd.f32 %v1398_v7, %v1282_v56  ;;  %v941_v27 = vpop.f32.mrf.mxu2  ;;  %v781_v28 = vpop.f32.mrf.mxu1 }
 0x14f   : > { %v1017_v57 = vadd.f32 %v941_v27, %v779_v9  ;;  %v782_v50 = vadd.f32 %v781_v28, %v3600_v22 }
 0x150   : > { %1254 = vmatmul.f32.gmra.mxu3 %v3814_v36  ;;  %v1401_v41 = vpop.f32.mrf.mxu0 }
 0x151   : > { %828 = vmatmul.f32.gmra.mxu1 %v2809_v55 }
 0x153   : > { %v1207_v46 = vpop.f32.mrf.mxu3  ;;  %991 = vmatmul.f32.gmra.mxu2 %v3431_v58  ;;  %1448 = vmatmul.f32.gmra.mxu0 %v3843_v38 }
 0x154   : > { %v1283_v15 = vadd.f32 %v1207_v46, %v1017_v57  ;;  %v482_v57 = vld [vmem:[#allocation2 + $0x198] sm:$0xff] }
 0x156   : > { %v3854_v44 = vadd.f32 %v1401_v41, %v1283_v15  ;;  %v944_v61 = vpop.f32.mrf.mxu2  ;;  %v784_v2 = vpop.f32.mrf.mxu1  ;;  %v3878_v41 = vld [vmem:[#allocation2 + $0x171] sm:$0xff] }
 0x157   : > { %v1018_v19 = vadd.f32 %v944_v61, %v782_v50  ;;  %v785_v63 = vadd.f32 %v784_v2, %v3618_v12  ;;  %v3886_v50 = vld [vmem:[#allocation2 + $0x181] sm:$0xff] }
 0x158   : > { %1257 = vmatmul.f32.gmra.mxu3 %v3829_v3  ;;  %v1404_v47 = vpop.f32.mrf.mxu0  ;;  %v2810_v61 = vld [vmem:[#allocation2 + $0x8] sm:$0xff] }
 0x159   : > { %831 = vmatmul.f32.gmra.mxu1 %v3308_v29 }
 0x15b   : > { %v1210_v34 = vpop.f32.mrf.mxu3  ;;  %994 = vmatmul.f32.gmra.mxu2 %v3449_v14  ;;  %1451 = vmatmul.f32.gmra.mxu0 %v3857_v25 }
 0x15c   : > { %v1284_v22 = vadd.f32 %v1210_v34, %v1018_v19 }
 0x15e   : > { %v3866_v21 = vadd.f32 %v1404_v47, %v1284_v22  ;;  %v947_v60 = vpop.f32.mrf.mxu2  ;;  %v787_v7 = vpop.f32.mrf.mxu1 }
 0x15f   : > { %v1019_v6 = vadd.f32 %v947_v60, %v785_v63  ;;  %v788_v12 = vadd.f32 %v787_v7, %v3636_v62  ;;  %v1693_v63 = vld [vmem:[#allocation2 + $0x2] sm:$0xff]  ;;  %v2811_v60 = vld [vmem:[#allocation2 + $0x31] sm:$0xff]  ;;  %v4246_v7 = vmax.f32 %v3325_v40, 0.0 }
 0x160   : > { %1260 = vmatmul.f32.gmra.mxu3 %v3843_v38  ;;  %v1407_v48 = vpop.f32.mrf.mxu0 }
 0x161   : > { %834 = vmatmul.f32.gmra.mxu1 %v3366_v0 }
 0x163   : > { %v1213_v29 = vpop.f32.mrf.mxu3  ;;  %997 = vmatmul.f32.gmra.mxu2 %v3467_v24  ;;  %1454 = vmatmul.f32.gmra.mxu0 %v3869_v45 }
 0x164   : > { %v1285_v14 = vadd.f32 %v1213_v29, %v1019_v6 }
 0x166   : > { %v3875_v56 = vadd.f32 %v1407_v48, %v1285_v14  ;;  %v950_v9 = vpop.f32.mrf.mxu2  ;;  %v790_v27 = vpop.f32.mrf.mxu1  ;;  %v1695_v48 = vld [vmem:[#allocation2 + $0x1a] sm:$0xff] }
 0x167   : > { %v1020_v28 = vadd.f32 %v950_v9, %v788_v12  ;;  %v791_v62 = vadd.f32 %v790_v27, %v3654_v26 }
 0x168   : > { %1263 = vmatmul.f32.gmra.mxu3 %v3857_v25  ;;  %v1410_v8 = vpop.f32.mrf.mxu0 }
 0x169   : > { %837 = vmatmul.f32.gmra.mxu1 %v3407_v31 }
 0x16b   : > { %v1216_v0 = vpop.f32.mrf.mxu3  ;;  %1000 = vmatmul.f32.gmra.mxu2 %v482_v57  ;;  %1457 = vmatmul.f32.gmra.mxu0 %v3878_v41  ;;  %v2812_v57 = vld [vmem:[#allocation2 + $0x39] sm:$0xff] }
 0x16c   : > { %v1286_v24 = vadd.f32 %v1216_v0, %v1020_v28  ;;  %v1694_v28 = vld [vmem:[#allocation2 + $0xa] sm:$0xff] }
 0x16e   : > { %v3883_v42 = vadd.f32 %v1410_v8, %v1286_v24  ;;  %v953_v23 = vpop.f32.mrf.mxu2  ;;  %v793_v55 = vpop.f32.mrf.mxu1  ;;  %v1697_v8 = vld [vmem:[#allocation2 + $0x32] sm:$0xff]  ;;  %v1696_v24 = vld [vmem:[#allocation2 + $0x22] sm:$0xff] }
 0x16f   : > { %v1021_v46 = vadd.f32 %v953_v23, %v791_v62  ;;  %v794_v26 = vadd.f32 %v793_v55, %v3669_v53 }
 0x170   : > { %1266 = vmatmul.f32.gmra.mxu3 %v3869_v45  ;;  %v1413_v15 = vpop.f32.mrf.mxu0 }
 0x171   : > { %840 = vmatmul.f32.gmra.mxu1 %v3431_v58 }
 0x173   : > { %v1219_v31 = vpop.f32.mrf.mxu3  ;;  %1003 = vmatmul.f32.gmra.mxu2 %v2810_v61  ;;  %1460 = vmatmul.f32.gmra.mxu0 %v3886_v50  ;;  %v2813_v61 = vld [vmem:[#allocation2 + $0x49] sm:$0xff] }
 0x174   : > { %v1287_v2 = vadd.f32 %v1219_v31, %v1021_v46  ;;  %v1698_v31 = vld [vmem:[#allocation2 + $0x3a] sm:$0xff] }
 0x176   : > { %v3891_v19 = vadd.f32 %v1413_v15, %v1287_v2  ;;  %v956_v47 = vpop.f32.mrf.mxu2  ;;  %v796_v13 = vpop.f32.mrf.mxu1 }
 0x177   : > { %v1022_v34 = vadd.f32 %v956_v47, %v794_v26  ;;  %v797_v53 = vadd.f32 %v796_v13, %v3560_v51 }
 0x178   : > { %1269 = vmatmul.f32.gmra.mxu3 %v3878_v41  ;;  %v1416_v22 = vpop.f32.mrf.mxu0 }
 0x179   : > { %1564 = vmatmul.f32.vlgmr.msra.gmra.mxu1 %v2811_v60  ;;  %v1699_v60 = vld [vmem:[#allocation2 + $0x4a] sm:$0xff] }
 0x17b   : > { %v1222_v58 = vpop.f32.mrf.mxu3  ;;  %1830 = vmatmul.f32.vlgmr.msra.gmra.mxu2 %v1693_v63  ;;  %1463 = vmatmul.f32.gmra.mxu0 %v4246_v7 }
 0x17c   : > { %v1288_v6 = vadd.f32 %v1222_v58, %v1022_v34  ;;  %v2814_v58 = vld [vmem:[#allocation2 + $0x51] sm:$0xff] }
 0x17e   : > { %v3897_v29 = vadd.f32 %v1416_v22, %v1288_v6  ;;  %v959_v14 = vpop.f32.mrf.mxu2  ;;  %v799_v12 = vpop.f32.mrf.mxu1 }
 0x17f   : > { %v1023_v9 = vadd.f32 %v959_v14, %v797_v53  ;;  %v800_v62 = vadd.f32 %v799_v12, %v3580_v54 }
 0x180   : > { %2024 = vmatmul.f32.vlgmr.msra.gmra.mxu3 %v1695_v48  ;;  %v1419_v27 = vpop.f32.mrf.mxu0 }
 0x181   : > { %1567 = vmatmul.f32.gmra.mxu1 %v2812_v57 }
 0x183   : > { %v1225_v0 = vpop.f32.mrf.mxu3  ;;  %1833 = vmatmul.f32.gmra.mxu2 %v1694_v28  ;;  %2218 = vmatmul.f32.vlgmr.msra.gmra.mxu0 %v1697_v8  ;;  %v2815_v28 = vld [vmem:[#allocation2 + $0x61] sm:$0xff] }
 0x184   : > { %v1289_v40 = vadd.f32 %v1225_v0, %v1023_v9 }
 0x186   : > { %v3900_v23 = vadd.f32 %v1419_v27, %v1289_v40  ;;  %v962_v51 = vpop.f32.mrf.mxu2  ;;  %v802_v55 = vpop.f32.mrf.mxu1  ;;  %v1700_v27 = vld [vmem:[#allocation2 + $0x52] sm:$0xff] }
 0x187   : > { %v1024_v46 = vadd.f32 %v962_v51, %v800_v62  ;;  %v803_v47 = vadd.f32 %v802_v55, %v3598_v16 }
 0x188   : > { %2027 = vmatmul.f32.gmra.mxu3 %v1696_v24  ;;  %v1422_v15 = vpop.f32.mrf.mxu0 }
 0x189   : > { %1570 = vmatmul.f32.gmra.mxu1 %v2813_v61 }
 0x18b   : > { %v1228_v2 = vpop.f32.mrf.mxu3  ;;  %1836 = vmatmul.f32.gmra.mxu2 %v1695_v48  ;;  %2221 = vmatmul.f32.gmra.mxu0 %v1698_v31 }
 0x18c   : > { %v1290_v26 = vadd.f32 %v1228_v2, %v1024_v46  ;;  %v1701_v46 = vld [vmem:[#allocation2 + $0x62] sm:$0xff] }
 0x18e   : > { %v3903_v13 = vadd.f32 %v1422_v15, %v1290_v26  ;;  %v965_v34 = vpop.f32.mrf.mxu2  ;;  %v805_v54 = vpop.f32.mrf.mxu1  ;;  %v2816_v15 = vld [vmem:[#allocation2 + $0x69] sm:$0xff] }
 0x18f   : > { %v1025_v22 = vadd.f32 %v965_v34, %v803_v47  ;;  %v806_v48 = vadd.f32 %v805_v54, %v3616_v4 }
 0x190   : > { %2030 = vmatmul.f32.gmra.mxu3 %v1697_v8  ;;  %v1425_v63 = vpop.f32.mrf.mxu0 }
 0x191   : > { %1573 = vmatmul.f32.gmra.mxu1 %v2814_v58 }
 0x193   : > { %v1231_v7 = vpop.f32.mrf.mxu3  ;;  %1839 = vmatmul.f32.gmra.mxu2 %v1696_v24  ;;  %2224 = vmatmul.f32.gmra.mxu0 %v1699_v60 }
 0x194   : > { %v1291_v6 = vadd.f32 %v1231_v7, %v1025_v22  ;;  %v1702_v22 = vld [vmem:[#allocation2 + $0x6a] sm:$0xff] }
 0x196   : > { %v3906_v53 = vadd.f32 %v1425_v63, %v1291_v6  ;;  %v968_v14 = vpop.f32.mrf.mxu2  ;;  %v808_v16 = vpop.f32.mrf.mxu1 }
 0x197   : > { %v1026_v12 = vadd.f32 %v968_v14, %v806_v48  ;;  %v809_v40 = vadd.f32 %v808_v16, %v3634_v17  ;;  %v1703_v16 = vld [vmem:[#allocation2 + $0x7a] sm:$0xff] }
 0x198   : > { %2033 = vmatmul.f32.gmra.mxu3 %v1698_v31  ;;  %v1428_v9 = vpop.f32.mrf.mxu0 }
 0x199   : > { %1576 = vmatmul.f32.gmra.mxu1 %v2815_v28 }
 0x19b   : > { %v1234_v57 = vpop.f32.mrf.mxu3  ;;  %1842 = vmatmul.f32.gmra.mxu2 %v1697_v8  ;;  %2227 = vmatmul.f32.gmra.mxu0 %v1700_v27 }
 0x19c   : > { %v1292_v0 = vadd.f32 %v1234_v57, %v1026_v12  ;;  %v2817_v12 = vld [vmem:[#allocation2 + $0x81] sm:$0xff] }
 0x19e   : > { %v3909_v24 = vadd.f32 %v1428_v9, %v1292_v0  ;;  %v971_v62 = vpop.f32.mrf.mxu2  ;;  %v811_v4 = vpop.f32.mrf.mxu1 }
 0x19f   : > { %v1027_v51 = vadd.f32 %v971_v62, %v809_v40  ;;  %v812_v8 = vadd.f32 %v811_v4, %v3652_v39  ;;  %v1704_v62 = vld [vmem:[#allocation2 + $0x82] sm:$0xff]  ;;  %v2818_v4 = vld [vmem:[#allocation2 + $0x91] sm:$0xff] }
 0x1a0   : > { %2036 = vmatmul.f32.gmra.mxu3 %v1699_v60  ;;  %v1431_v55 = vpop.f32.mrf.mxu0 }
 0x1a1   : > { %1579 = vmatmul.f32.gmra.mxu1 %v2816_v15  ;;  %v4247_v15 = vld [vmem:[#allocation4_spill] sm:$0xff] }
 0x1a3   : > { %v1237_v61 = vpop.f32.mrf.mxu3  ;;  %1845 = vmatmul.f32.gmra.mxu2 %v1698_v31  ;;  %2230 = vmatmul.f32.gmra.mxu0 %v1701_v46 }
 0x1a4   : > { %v1293_v2 = vadd.f32 %v1237_v61, %v1027_v51 }
 0x1a6   : > { %v3912_v26 = vadd.f32 %v1431_v55, %v1293_v2  ;;  %v974_v47 = vpop.f32.mrf.mxu2  ;;  %v814_v17 = vpop.f32.mrf.mxu1 }
 0x1a7   : > { %v1028_v34 = vadd.f32 %v974_v47, %v812_v8  ;;  %v815_v31 = vadd.f32 %v814_v17, %v3667_v11  ;;  %v1705_v17 = vld [vmem:[#allocation2 + $0x92] sm:$0xff] }
 0x1a8   : > { %2039 = vmatmul.f32.gmra.mxu3 %v1700_v27  ;;  %v1434_v54 = vpop.f32.mrf.mxu0 }
 0x1a9   : > { %1582 = vmatmul.f32.gmra.mxu1 %v3577_v18 }
 0x1ab   : > { %v1240_v63 = vpop.f32.mrf.mxu3  ;;  %1848 = vmatmul.f32.gmra.mxu2 %v1699_v60  ;;  %2233 = vmatmul.f32.gmra.mxu0 %v1702_v22 }
 0x1ac   : > { %v1294_v58 = vadd.f32 %v1240_v63, %v1028_v34  ;;  %v2819_v34 = vld [vmem:[#allocation2 + $0x99] sm:$0xff] }
 0x1ae   : > { %v3916_v7 = vadd.f32 %v1434_v54, %v1294_v58  ;;  %v977_v6 = vpop.f32.mrf.mxu2  ;;  %v817_v39 = vpop.f32.mrf.mxu1  ;;  %v4248_v58 = vld [vmem:[#allocation5_spill] sm:$0xff] }
 0x1af   : > { %v1029_v48 = vadd.f32 %v977_v6, %v815_v31  ;;  %v818_v60 = vadd.f32 %v817_v39, %v3688_v20 }
 0x1b0   : > { %2042 = vmatmul.f32.gmra.mxu3 %v1701_v46  ;;  %v1437_v14 = vpop.f32.mrf.mxu0 }
 0x1b1   : > { %1585 = vmatmul.f32.gmra.mxu1 %v2817_v12  ;;  %v1706_v12 = vld [vmem:[#allocation2 + $0x9a] sm:$0xff] }
 0x1b3   : > { %v1243_v9 = vpop.f32.mrf.mxu3  ;;  %1851 = vmatmul.f32.gmra.mxu2 %v1700_v27  ;;  %2236 = vmatmul.f32.gmra.mxu0 %v1703_v16 }
 0x1b4   : > { %v1295_v18 = vadd.f32 %v1243_v9, %v1029_v48  ;;  %v2820_v9 = vld [vmem:[#allocation2 + $0xa9] sm:$0xff] }
 0x1b6   : > { %v3919_v28 = vadd.f32 %v1437_v14, %v1295_v18  ;;  %v980_v57 = vpop.f32.mrf.mxu2  ;;  %v820_v11 = vpop.f32.mrf.mxu1 }
 0x1b7   : > { %v1030_v0 = vadd.f32 %v980_v57, %v818_v60  ;;  %v821_v27 = vadd.f32 %v820_v11, %v4247_v15  ;;  %v4249_v57 = vld [vmem:[#allocation6_spill] sm:$0xff]  ;;  %v2821_v15 = vld [vmem:[#allocation2 + $0xb1] sm:$0xff] }
 0x1b8   : > { %2045 = vmatmul.f32.gmra.mxu3 %v1702_v22  ;;  %v1440_v40 = vpop.f32.mrf.mxu0 }
 0x1b9   : > { %1588 = vmatmul.f32.gmra.mxu1 %v2818_v4 }
 0x1bb   : > { %v1246_v51 = vpop.f32.mrf.mxu3  ;;  %1854 = vmatmul.f32.gmra.mxu2 %v1701_v46  ;;  %2239 = vmatmul.f32.gmra.mxu0 %v1704_v62 }
 0x1bc   : > { %v1296_v55 = vadd.f32 %v1246_v51, %v1030_v0 }
 0x1be   : > { %v3922_v61 = vadd.f32 %v1440_v40, %v1296_v55  ;;  %v983_v2 = vpop.f32.mrf.mxu2  ;;  %v823_v20 = vpop.f32.mrf.mxu1  ;;  %v1707_v55 = vld [vmem:[#allocation2 + $0xaa] sm:$0xff] }
 0x1bf   : > { %v1031_v8 = vadd.f32 %v983_v2, %v821_v27  ;;  %v824_v46 = vadd.f32 %v823_v20, %v4248_v58  ;;  %v4250_v20 = vld [vmem:[#allocation7_spill] sm:$0xff]  ;;  %v1708_v58 = vld [vmem:[#allocation2 + $0xb2] sm:$0xff] }
 0x1c0   : > { %2048 = vmatmul.f32.gmra.mxu3 %v1703_v16  ;;  %v1443_v47 = vpop.f32.mrf.mxu0 }
 0x1c1   : > { %1591 = vmatmul.f32.gmra.mxu1 %v2819_v34 }
 0x1c3   : > { %v1249_v54 = vpop.f32.mrf.mxu3  ;;  %1857 = vmatmul.f32.gmra.mxu2 %v1702_v22  ;;  %2242 = vmatmul.f32.gmra.mxu0 %v1705_v17 }
 0x1c4   : > { %v1297_v63 = vadd.f32 %v1249_v54, %v1031_v8 }
 0x1c6   : > { %v3925_v31 = vadd.f32 %v1443_v47, %v1297_v63  ;;  %v986_v6 = vpop.f32.mrf.mxu2  ;;  %v826_v39 = vpop.f32.mrf.mxu1 }
 0x1c7   : > { %v1032_v48 = vadd.f32 %v986_v6, %v824_v46  ;;  %v827_v22 = vadd.f32 %v826_v39, %v4249_v57  ;;  %v2822_v46 = vld [vmem:[#allocation2 + $0xc1] sm:$0xff] }
 0x1c8   : > { %2051 = vmatmul.f32.gmra.mxu3 %v1704_v62  ;;  %v1446_v14 = vpop.f32.mrf.mxu0 }
 0x1c9   : > { %1594 = vmatmul.f32.gmra.mxu1 %v2820_v9 }
 0x1cb   : > { %v1252_v18 = vpop.f32.mrf.mxu3  ;;  %1860 = vmatmul.f32.gmra.mxu2 %v1703_v16  ;;  %2245 = vmatmul.f32.gmra.mxu0 %v1706_v12 }
 0x1cc   : > { %v1298_v60 = vadd.f32 %v1252_v18, %v1032_v48  ;;  %v4251_v48 = vld [vmem:[#allocation8_spill] sm:$0xff] }
 0x1ce   : > { %v3928_v11 = vadd.f32 %v1446_v14, %v1298_v60  ;;  %v989_v0 = vpop.f32.mrf.mxu2  ;;  %v829_v40 = vpop.f32.mrf.mxu1 }
 0x1cf   : > { %v1033_v4 = vadd.f32 %v989_v0, %v827_v22  ;;  %v830_v16 = vadd.f32 %v829_v40, %v4250_v20  ;;  %v1709_v22 = vld [vmem:[#allocation2 + $0xc2] sm:$0xff] }
 0x1d0   : > { %2054 = vmatmul.f32.gmra.mxu3 %v1705_v17  ;;  %v1449_v51 = vpop.f32.mrf.mxu0  ;;  %v2823_v0 = vld [vmem:[#allocation2 + $0xc9] sm:$0xff] }
 0x1d1   : > { %1597 = vmatmul.f32.gmra.mxu1 %v2821_v15 }
 0x1d3   : > { %v1255_v27 = vpop.f32.mrf.mxu3  ;;  %1863 = vmatmul.f32.gmra.mxu2 %v1704_v62  ;;  %2248 = vmatmul.f32.gmra.mxu0 %v1707_v55 }
 0x1d4   : > { %v1299_v2 = vadd.f32 %v1255_v27, %v1033_v4 }
 0x1d6   : > { %v3931_v8 = vadd.f32 %v1449_v51, %v1299_v2  ;;  %v992_v47 = vpop.f32.mrf.mxu2  ;;  %v832_v34 = vpop.f32.mrf.mxu1  ;;  %v4252_v51 = vld [vmem:[#allocation9_spill] sm:$0xff] }
 0x1d7   : > { %v1034_v54 = vadd.f32 %v992_v47, %v830_v16  ;;  %v833_v62 = vadd.f32 %v832_v34, %v4251_v48  ;;  %v1710_v47 = vld [vmem:[#allocation2 + $0xca] sm:$0xff] }
 0x1d8   : > { %2057 = vmatmul.f32.gmra.mxu3 %v1706_v12  ;;  %v1452_v63 = vpop.f32.mrf.mxu0 }
 0x1d9   : > { %1600 = vmatmul.f32.gmra.mxu1 %v2822_v46 }
 0x1db   : > { %v1258_v6 = vpop.f32.mrf.mxu3  ;;  %1866 = vmatmul.f32.gmra.mxu2 %v1705_v17  ;;  %2251 = vmatmul.f32.gmra.mxu0 %v1708_v58 }
 0x1dc   : > { %v1300_v39 = vadd.f32 %v1258_v6, %v1034_v54 }
 0x1de   : > { %v3934_v14 = vadd.f32 %v1452_v63, %v1300_v39  ;;  %v995_v9 = vpop.f32.mrf.mxu2  ;;  %v835_v18 = vpop.f32.mrf.mxu1  ;;  %v4253_v63 = vld [vmem:[#allocation10_spill] sm:$0xff] }
 0x1df   : > { %v1035_v60 = vadd.f32 %v995_v9, %v833_v62  ;;  %v836_v17 = vadd.f32 %v835_v18, %v4252_v51  ;;  %v1711_v9 = vld [vmem:[#allocation2 + $0xda] sm:$0xff] }
 0x1e0   : > { %2060 = vmatmul.f32.gmra.mxu3 %v1707_v55  ;;  %v1455_v57 = vpop.f32.mrf.mxu0 }
 0x1e1   : > { %1603 = vmatmul.f32.gmra.mxu1 %v2823_v0 }
 0x1e3   : > { %v1261_v40 = vpop.f32.mrf.mxu3  ;;  %1869 = vmatmul.f32.gmra.mxu2 %v1706_v12  ;;  %2254 = vmatmul.f32.gmra.mxu0 %v1709_v22 }
 0x1e4   : > { %v1301_v4 = vadd.f32 %v1261_v40, %v1035_v60  ;;  %v4254_v60 = vld [vmem:[#allocation11_spill] sm:$0xff] }
 0x1e6   : > { %v3937_v15 = vadd.f32 %v1455_v57, %v1301_v4  ;;  %v998_v27 = vpop.f32.mrf.mxu2  ;;  %v838_v2 = vpop.f32.mrf.mxu1 }
 0x1e7   : > { %v1036_v20 = vadd.f32 %v998_v27, %v836_v17  ;;  %v839_v12 = vadd.f32 %v838_v2, %v4253_v63  ;;  %v1712_v17 = vld [vmem:[#allocation2 + $0xe2] sm:$0xff]  ;;  %v2824_v27 = vld [vmem:[#allocation2 + $0xf1] sm:$0xff] }
 0x1e8   : > { %2063 = vmatmul.f32.gmra.mxu3 %v1708_v58  ;;  %v1458_v16 = vpop.f32.mrf.mxu0 }
 0x1e9   : > { %1606 = vmatmul.f32.gmra.mxu1 %v3706_v49 }
 0x1eb   : > { %v1264_v34 = vpop.f32.mrf.mxu3  ;;  %1872 = vmatmul.f32.gmra.mxu2 %v1707_v55  ;;  %2257 = vmatmul.f32.gmra.mxu0 %v1710_v47 }
 0x1ec   : > { %v1302_v54 = vadd.f32 %v1264_v34, %v1036_v20 }
 0x1ee   : > { %v3941_v46 = vadd.f32 %v1458_v16, %v1302_v54  ;;  %v1001_v6 = vpop.f32.mrf.mxu2  ;;  %v841_v39 = vpop.f32.mrf.mxu1 }
 0x1ef   : > { %v1037_v48 = vadd.f32 %v1001_v6, %v839_v12  ;;  %v842_v55 = vadd.f32 %v841_v39, %v4254_v60  ;;  %v1713_v12 = vld [vmem:[#allocation2 + $0xf2] sm:$0xff]  ;;  %v1714_v60 = vld [vmem:[#allocation2 + $0xfa] sm:$0xff] }
 0x1f0   : > { %2066 = vmatmul.f32.gmra.mxu3 %v1709_v22  ;;  %v1461_v62 = vpop.f32.mrf.mxu0  ;;  %v2825_v6 = vld [vmem:[#allocation2 + $0xf9] sm:$0xff] }
 0x1f1   : > { %1609 = vmatmul.f32.gmra.mxu1 %v3721_v10 }
 0x1f3   : > { %v1267_v18 = vpop.f32.mrf.mxu3  ;;  %1875 = vmatmul.f32.gmra.mxu2 %v1708_v58  ;;  %2260 = vmatmul.f32.gmra.mxu0 %v1711_v9 }
 0x1f4   : > { %v1303_v49 = vadd.f32 %v1267_v18, %v1037_v48 }
 0x1f6   : > { %v3945_v57 = vadd.f32 %v1461_v62, %v1303_v49  ;;  %v1004_v0 = vpop.f32.mrf.mxu2  ;;  %v1565_v40 = vpop.f32.mrf.mxu1 }
 0x1f7   : > { %v1038_v4 = vadd.f32 %v1004_v0, %v842_v55  ;;  %v1661_v58 = vadd.f32 %v1565_v40, %v3718_v1  ;;  %v2826_v55 = vld [vmem:[#allocation2 + $0x109] sm:$0xff] }
 0x1f8   : > { %2069 = vmatmul.f32.gmra.mxu3 %v1710_v47  ;;  %v1464_v51 = vpop.f32.mrf.mxu0 }
 0x1f9   : > { %1612 = vmatmul.f32.gmra.mxu1 %v2824_v27 }
 0x1fb   : > { %v1270_v2 = vpop.f32.mrf.mxu3  ;;  %1878 = vmatmul.f32.gmra.mxu2 %v1709_v22  ;;  %2263 = vmatmul.f32.gmra.mxu0 %v1712_v17 }
 0x1fc   : > { %v1304_v10 = vadd.f32 %v1270_v2, %v1038_v4 }
 0x1fe   : > { %v3948_v20 = vadd.f32 %v1464_v51, %v1304_v10  ;;  %v1831_v16 = vpop.f32.mrf.mxu2  ;;  %v1568_v34 = vpop.f32.mrf.mxu1 }
 0x1ff   : > { %v1927_v54 = vadd.f32 %v1831_v16, %v1661_v58  ;;  %v1662_v1 = vadd.f32 %v1568_v34, %v3730_v33  ;;  %v1715_v58 = vld [vmem:[#allocation2 + $0x10a] sm:$0xff] }
 0x200   : > { %2072 = vmatmul.f32.gmra.mxu3 %v1711_v9  ;;  %v2219_v63 = vpop.f32.mrf.mxu0  ;;  %v2827_v16 = vld [vmem:[#allocation2 + $0x111] sm:$0xff] }
 0x201   : > { %1615 = vmatmul.f32.gmra.mxu1 %v2825_v6 }
 0x203   : > { %v2025_v39 = vpop.f32.mrf.mxu3  ;;  %1881 = vmatmul.f32.gmra.mxu2 %v1710_v47  ;;  %2266 = vmatmul.f32.gmra.mxu0 %v1713_v12 }
 0x204   : > { %v2121_v48 = vadd.f32 %v2025_v39, %v1927_v54 }
 0x206   : > { %v3958_v22 = vadd.f32 %v2219_v63, %v2121_v48  ;;  %v1834_v62 = vpop.f32.mrf.mxu2  ;;  %v1571_v18 = vpop.f32.mrf.mxu1 }
 0x207   : > { %v1928_v47 = vadd.f32 %v1834_v62, %v1662_v1  ;;  %v1663_v4 = vadd.f32 %v1571_v18, %v3746_v5  ;;  %v1716_v1 = vld [vmem:[#allocation2 + $0x112] sm:$0xff]  ;;  %v2828_v62 = vld [vmem:[#allocation2 + $0x121] sm:$0xff] }
 0x208   : > { %2347 = vst [vmem:[%s3955_s13] sm:$0xff] %v3958_v22  ;;  %2075 = vmatmul.f32.gmra.mxu3 %v1712_v17  ;;  %v2222_v49 = vpop.f32.mrf.mxu0 }
 0x209   : > { %1618 = vmatmul.f32.gmra.mxu1 %v2826_v55 }
 0x20b   : > { %v2028_v0 = vpop.f32.mrf.mxu3  ;;  %1884 = vmatmul.f32.gmra.mxu2 %v1711_v9  ;;  %2269 = vmatmul.f32.gmra.mxu0 %v1714_v60 }
 0x20c   : > { %v2122_v40 = vadd.f32 %v2028_v0, %v1928_v47 }
 0x20e   : > { %v3963_v33 = vadd.f32 %v2222_v49, %v2122_v40  ;;  %v1837_v51 = vpop.f32.mrf.mxu2  ;;  %v1574_v27 = vpop.f32.mrf.mxu1 }
 0x20f   : > { %v1929_v2 = vadd.f32 %v1837_v51, %v1663_v4  ;;  %v1664_v54 = vadd.f32 %v1574_v27, %v3756_v59  ;;  %v1717_v4 = vld [vmem:[#allocation2 + $0x122] sm:$0xff] }
 0x210   : > { %2348 = vst [vmem:[%s3955_s13 + $0x8] sm:$0xff] %v3963_v33  ;;  %2078 = vmatmul.f32.gmra.mxu3 %v1713_v12  ;;  %v2225_v10 = vpop.f32.mrf.mxu0  ;;  %v2829_v51 = vld [vmem:[#allocation2 + $0x129] sm:$0xff] }
 0x211   : > { %1621 = vmatmul.f32.gmra.mxu1 %v2827_v16 }
 0x213   : > { %v2031_v34 = vpop.f32.mrf.mxu3  ;;  %1887 = vmatmul.f32.gmra.mxu2 %v1712_v17  ;;  %2272 = vmatmul.f32.gmra.mxu0 %v1715_v58 }
 0x214   : > { %v2123_v9 = vadd.f32 %v2031_v34, %v1929_v2 }
 0x216   : > { %v3968_v5 = vadd.f32 %v2225_v10, %v2123_v9  ;;  %v1840_v63 = vpop.f32.mrf.mxu2  ;;  %v1577_v6 = vpop.f32.mrf.mxu1 }
 0x217   : > { %v1930_v39 = vadd.f32 %v1840_v63, %v1664_v54  ;;  %v1665_v47 = vadd.f32 %v1577_v6, %v3772_v43  ;;  %v1718_v54 = vld [vmem:[#allocation2 + $0x12a] sm:$0xff] }
 0x218   : > { %2349 = vst [vmem:[%s3955_s13 + $0x10] sm:$0xff] %v3968_v5  ;;  %2081 = vmatmul.f32.gmra.mxu3 %v1714_v60  ;;  %v2228_v48 = vpop.f32.mrf.mxu0 }
 0x219   : > { %1624 = vmatmul.f32.gmra.mxu1 %v2828_v62 }
 0x21b   : > { %v2034_v18 = vpop.f32.mrf.mxu3  ;;  %1890 = vmatmul.f32.gmra.mxu2 %v1713_v12  ;;  %2275 = vmatmul.f32.gmra.mxu0 %v1716_v1 }
 0x21c   : > { %v2124_v17 = vadd.f32 %v2034_v18, %v1930_v39 }
 0x21e   : > { %v3973_v59 = vadd.f32 %v2228_v48, %v2124_v17  ;;  %v1843_v49 = vpop.f32.mrf.mxu2  ;;  %v1580_v55 = vpop.f32.mrf.mxu1  ;;  %v1719_v17 = vld [vmem:[#allocation2 + $0x13a] sm:$0xff] }
 0x21f   : > { %v1931_v0 = vadd.f32 %v1843_v49, %v1665_v47  ;;  %v1666_v2 = vadd.f32 %v1580_v55, %v3782_v32 }
 0x220   : > { %2350 = vst [vmem:[%s3955_s13 + $0x18] sm:$0xff] %v3973_v59  ;;  %2084 = vmatmul.f32.gmra.mxu3 %v1715_v58  ;;  %v2231_v40 = vpop.f32.mrf.mxu0 }
 0x221   : > { %1627 = vmatmul.f32.gmra.mxu1 %v2829_v51  ;;  %v1720_v51 = vld [vmem:[#allocation2 + $0x142] sm:$0xff] }
 0x223   : > { %v2037_v27 = vpop.f32.mrf.mxu3  ;;  %1893 = vmatmul.f32.gmra.mxu2 %v1714_v60  ;;  %2278 = vmatmul.f32.gmra.mxu0 %v1717_v4 }
 0x224   : > { %v2125_v12 = vadd.f32 %v2037_v27, %v1931_v0 }
 0x226   : > { %v3978_v43 = vadd.f32 %v2231_v40, %v2125_v12  ;;  %v1846_v10 = vpop.f32.mrf.mxu2  ;;  %v1583_v16 = vpop.f32.mrf.mxu1 }
 0x227   : > { %v1932_v34 = vadd.f32 %v1846_v10, %v1666_v2  ;;  %v1667_v6 = vadd.f32 %v1583_v16, %v3798_v52 }
 0x228   : > { %2351 = vst [vmem:[%s3955_s13 + $0x20] sm:$0xff] %v3978_v43  ;;  %2087 = vmatmul.f32.gmra.mxu3 %v1716_v1  ;;  %v2234_v9 = vpop.f32.mrf.mxu0 }
 0x229   : > { %1630 = vmatmul.f32.gmra.mxu1 %v3814_v36 }
 0x22b   : > { %v2040_v63 = vpop.f32.mrf.mxu3  ;;  %1896 = vmatmul.f32.gmra.mxu2 %v1715_v58  ;;  %2281 = vmatmul.f32.gmra.mxu0 %v1718_v54 }
 0x22c   : > { %v2126_v60 = vadd.f32 %v2040_v63, %v1932_v34  ;;  %v1721_v34 = vld [vmem:[#allocation2 + $0x152] sm:$0xff] }
 0x22e   : > { %v3984_v32 = vadd.f32 %v2234_v9, %v2126_v60  ;;  %v1849_v39 = vpop.f32.mrf.mxu2  ;;  %v1586_v48 = vpop.f32.mrf.mxu1 }
 0x22f   : > { %v1933_v62 = vadd.f32 %v1849_v39, %v1667_v6  ;;  %v1668_v47 = vadd.f32 %v1586_v48, %v3808_v37  ;;  %v1722_v48 = vld [vmem:[#allocation2 + $0x15a] sm:$0xff] }
 0x230   : > { %2352 = vst [vmem:[%s3955_s13 + $0x28] sm:$0xff] %v3984_v32  ;;  %2090 = vmatmul.f32.gmra.mxu3 %v1717_v4  ;;  %v2237_v18 = vpop.f32.mrf.mxu0 }
 0x231   : > { %1633 = vmatmul.f32.gmra.mxu1 %v3829_v3 }
 0x233   : > { %v2043_v36 = vpop.f32.mrf.mxu3  ;;  %1899 = vmatmul.f32.gmra.mxu2 %v1716_v1  ;;  %2284 = vmatmul.f32.gmra.mxu0 %v1719_v17 }
 0x234   : > { %v2127_v58 = vadd.f32 %v2043_v36, %v1933_v62 }
 0x236   : > { %v3990_v52 = vadd.f32 %v2237_v18, %v2127_v58  ;;  %v1852_v49 = vpop.f32.mrf.mxu2  ;;  %v1589_v55 = vpop.f32.mrf.mxu1 }
 0x237   : > { %v1934_v0 = vadd.f32 %v1852_v49, %v1668_v47  ;;  %v1669_v27 = vadd.f32 %v1589_v55, %v3826_v30  ;;  %v1723_v49 = vld [vmem:[#allocation2 + $0x16a] sm:$0xff] }
 0x238   : > { %2353 = vst [vmem:[%s3955_s13 + $0x30] sm:$0xff] %v3990_v52  ;;  %2093 = vmatmul.f32.gmra.mxu3 %v1718_v54  ;;  %v2240_v40 = vpop.f32.mrf.mxu0 }
 0x239   : > { %1636 = vmatmul.f32.gmra.mxu1 %v3843_v38 }
 0x23b   : > { %v2046_v3 = vpop.f32.mrf.mxu3  ;;  %1902 = vmatmul.f32.gmra.mxu2 %v1717_v4  ;;  %2287 = vmatmul.f32.gmra.mxu0 %v1720_v51 }
 0x23c   : > { %v2128_v1 = vadd.f32 %v2046_v3, %v1934_v0 }
 0x23e   : > { %v3996_v37 = vadd.f32 %v2240_v40, %v2128_v1  ;;  %v1855_v12 = vpop.f32.mrf.mxu2  ;;  %v1592_v2 = vpop.f32.mrf.mxu1 }
 0x23f   : > { %v1935_v10 = vadd.f32 %v1855_v12, %v1669_v27  ;;  %v1670_v9 = vadd.f32 %v1592_v2, %v3837_v35  ;;  %v1724_v27 = vld [vmem:[#allocation2 + $0x172] sm:$0xff] }
 0x240   : > { %2354 = vst [vmem:[%s3955_s13 + $0x38] sm:$0xff] %v3996_v37  ;;  %2096 = vmatmul.f32.gmra.mxu3 %v1719_v17  ;;  %v2243_v16 = vpop.f32.mrf.mxu0 }
 0x241   : > { %1639 = vmatmul.f32.gmra.mxu1 %v3857_v25 }
 0x243   : > { %v2049_v38 = vpop.f32.mrf.mxu3  ;;  %1905 = vmatmul.f32.gmra.mxu2 %v1718_v54  ;;  %2290 = vmatmul.f32.gmra.mxu0 %v1721_v34 }
 0x244   : > { %v2129_v4 = vadd.f32 %v2049_v38, %v1935_v10 }
 0x246   : > { %v4002_v30 = vadd.f32 %v2243_v16, %v2129_v4  ;;  %v1858_v63 = vpop.f32.mrf.mxu2  ;;  %v1595_v60 = vpop.f32.mrf.mxu1  ;;  %v1725_v4 = vld [vmem:[#allocation2 + $0x182] sm:$0xff] }
 0x247   : > { %v1936_v6 = vadd.f32 %v1858_v63, %v1670_v9  ;;  %v1671_v62 = vadd.f32 %v1595_v60, %v3854_v44  ;;  %v2830_v9 = vld [vmem:[#allocation2 + $0x189] sm:$0xff] }
 0x248   : > { %2355 = vst [vmem:[%s3955_s13 + $0x40] sm:$0xff] %v4002_v30  ;;  %2099 = vmatmul.f32.gmra.mxu3 %v1720_v51  ;;  %v2246_v39 = vpop.f32.mrf.mxu0 }
 0x249   : > { %1642 = vmatmul.f32.gmra.mxu1 %v3869_v45 }
 0x24b   : > { %v2052_v25 = vpop.f32.mrf.mxu3  ;;  %1908 = vmatmul.f32.gmra.mxu2 %v1719_v17  ;;  %2293 = vmatmul.f32.gmra.mxu0 %v1722_v48 }
 0x24c   : > { %v2130_v54 = vadd.f32 %v2052_v25, %v1936_v6 }
 0x24e   : > { %v4008_v35 = vadd.f32 %v2246_v39, %v2130_v54  ;;  %v1861_v18 = vpop.f32.mrf.mxu2  ;;  %v1598_v36 = vpop.f32.mrf.mxu1  ;;  %v1073_v39 = vld [vmem:[#allocation2 + $0x199] sm:$0xff] }
 0x24f   : > { %v1937_v58 = vadd.f32 %v1861_v18, %v1671_v62  ;;  %v1672_v55 = vadd.f32 %v1598_v36, %v3866_v21  ;;  %v1726_v62 = vld [vmem:[#allocation2 + $0x18a] sm:$0xff] }
 0x250   : > { %2356 = vst [vmem:[%s3955_s13 + $0x48] sm:$0xff] %v4008_v35  ;;  %2102 = vmatmul.f32.gmra.mxu3 %v1721_v34  ;;  %v2249_v47 = vpop.f32.mrf.mxu0 }
 0x251   : > { %1645 = vmatmul.f32.gmra.mxu1 %v3878_v41 }
 0x253   : > { %v2055_v45 = vpop.f32.mrf.mxu3  ;;  %1911 = vmatmul.f32.gmra.mxu2 %v1720_v51  ;;  %2296 = vmatmul.f32.gmra.mxu0 %v1723_v49 }
 0x254   : > { %v2131_v17 = vadd.f32 %v2055_v45, %v1937_v58  ;;  %v1074_v45 = vld [vmem:[#allocation2 + $0x1a1] sm:$0xff] }
 0x256   : > { %v4014_v44 = vadd.f32 %v2249_v47, %v2131_v17  ;;  %v1864_v0 = vpop.f32.mrf.mxu2  ;;  %v1601_v40 = vpop.f32.mrf.mxu1 }
 0x257   : > { %v1938_v3 = vadd.f32 %v1864_v0, %v1672_v55  ;;  %v1673_v12 = vadd.f32 %v1601_v40, %v3875_v56  ;;  %v1727_v0 = vld [vmem:[#allocation2 + $0x19a] sm:$0xff] }
 0x258   : > { %2357 = vst [vmem:[%s3955_s13 + $0x50] sm:$0xff] %v4014_v44  ;;  %2105 = vmatmul.f32.gmra.mxu3 %v1722_v48  ;;  %v2252_v1 = vpop.f32.mrf.mxu0 }
 0x259   : > { %1648 = vmatmul.f32.gmra.mxu1 %v3886_v50 }
 0x25b   : > { %v2058_v41 = vpop.f32.mrf.mxu3  ;;  %1914 = vmatmul.f32.gmra.mxu2 %v1721_v34  ;;  %2299 = vmatmul.f32.gmra.mxu0 %v1724_v27 }
 0x25c   : > { %v2132_v51 = vadd.f32 %v2058_v41, %v1938_v3 }
 0x25e   : > { %v4020_v21 = vadd.f32 %v2252_v1, %v2132_v51  ;;  %v1867_v2 = vpop.f32.mrf.mxu2  ;;  %v1604_v10 = vpop.f32.mrf.mxu1 }
 0x25f   : > { %v1939_v16 = vadd.f32 %v1867_v2, %v1673_v12  ;;  %v1674_v63 = vadd.f32 %v1604_v10, %v3883_v42  ;;  %v1728_v2 = vld [vmem:[#allocation2 + $0x1a2] sm:$0xff] }
 0x260   : > { %2358 = vst [vmem:[%s3955_s13 + $0x58] sm:$0xff] %v4020_v21  ;;  %2108 = vmatmul.f32.gmra.mxu3 %v1723_v49  ;;  %v2255_v38 = vpop.f32.mrf.mxu0 }
 0x261   : > { %1651 = vmatmul.f32.gmra.mxu1 %v2830_v9 }
 0x263   : > { %v2061_v50 = vpop.f32.mrf.mxu3  ;;  %1917 = vmatmul.f32.gmra.mxu2 %v1722_v48  ;;  %2302 = vmatmul.f32.gmra.mxu0 %v1725_v4 }
 0x264   : > { %v2133_v34 = vadd.f32 %v2061_v50, %v1939_v16 }
 0x266   : > { %v4025_v56 = vadd.f32 %v2255_v38, %v2133_v34  ;;  %v1870_v60 = vpop.f32.mrf.mxu2  ;;  %v1607_v6 = vpop.f32.mrf.mxu1 }
 0x267   : > { %v1940_v25 = vadd.f32 %v1870_v60, %v1674_v63  ;;  %v1675_v36 = vadd.f32 %v1607_v6, %v3891_v19 }
 0x268   : > { %2359 = vst [vmem:[%s3955_s13 + $0x60] sm:$0xff] %v4025_v56  ;;  %2111 = vmatmul.f32.gmra.mxu3 %v1724_v27  ;;  %v2258_v54 = vpop.f32.mrf.mxu0 }
 0x269   : > { %1654 = vmatmul.f32.gmra.mxu1 %v1073_v39 }
 0x26b   : > { %v2064_v18 = vpop.f32.mrf.mxu3  ;;  %1920 = vmatmul.f32.gmra.mxu2 %v1723_v49  ;;  %2305 = vmatmul.f32.gmra.mxu0 %v1726_v62 }
 0x26c   : > { %v2134_v48 = vadd.f32 %v2064_v18, %v1940_v25 }
 0x26e   : > { %v4030_v42 = vadd.f32 %v2258_v54, %v2134_v48  ;;  %v1873_v58 = vpop.f32.mrf.mxu2  ;;  %v1610_v47 = vpop.f32.mrf.mxu1 }
 0x26f   : > { %v1941_v17 = vadd.f32 %v1873_v58, %v1675_v36  ;;  %v1676_v3 = vadd.f32 %v1610_v47, %v3897_v29 }
 0x270   : > { %2360 = vst [vmem:[%s3955_s13 + $0x68] sm:$0xff] %v4030_v42  ;;  %2114 = vmatmul.f32.gmra.mxu3 %v1725_v4  ;;  %v2261_v55 = vpop.f32.mrf.mxu0 }
 0x271   : > { %1657 = vmatmul.f32.gmra.mxu1 %v1074_v45 }
 0x273   : > { %v2067_v40 = vpop.f32.mrf.mxu3  ;;  %1923 = vmatmul.f32.gmra.mxu2 %v1724_v27  ;;  %2308 = vmatmul.f32.gmra.mxu0 %v1727_v0 }
 0x274   : > { %v2135_v49 = vadd.f32 %v2067_v40, %v1941_v17 }
 0x276   : > { %v4035_v19 = vadd.f32 %v2261_v55, %v2135_v49  ;;  %v1876_v1 = vpop.f32.mrf.mxu2  ;;  %v1613_v41 = vpop.f32.mrf.mxu1 }
 0x277   : > { %v1942_v51 = vadd.f32 %v1876_v1, %v1676_v3  ;;  %v1677_v27 = vadd.f32 %v1613_v41, %v3900_v23 }
 0x278   : > { %2361 = vst [vmem:[%s3955_s13 + $0x70] sm:$0xff] %v4035_v19  ;;  %2117 = vmatmul.f32.gmra.mxu3 %v1726_v62  ;;  %v2264_v12 = vpop.f32.mrf.mxu0 }
 0x27b   : > { %v2070_v10 = vpop.f32.mrf.mxu3  ;;  %2311 = vmatmul.f32.gmra.mxu0 %v1728_v2 }
 0x27c   : > { %v2136_v16 = vadd.f32 %v2070_v10, %v1942_v51 }
 0x27e   : > { %v4040_v38 = vadd.f32 %v2264_v12, %v2136_v16  ;;  %v1879_v29 = vpop.f32.mrf.mxu2  ;;  %v1616_v4 = vpop.f32.mrf.mxu1 }
 0x27f   : > { %v1943_v9 = vadd.f32 %v1879_v29, %v1677_v27  ;;  %v1678_v60 = vadd.f32 %v1616_v4, %v3903_v13 }
 0x280   : > { %2362 = vst [vmem:[%s3955_s13 + $0x78] sm:$0xff] %v4040_v38  ;;  %v2267_v50 = vpop.f32.mrf.mxu0 }
 0x283   : > { %v2073_v34 = vpop.f32.mrf.mxu3 }
 0x284   : > { %v2137_v63 = vadd.f32 %v2073_v34, %v1943_v9 }
 0x286   : > { %v4045_v6 = vadd.f32 %v2267_v50, %v2137_v63  ;;  %v1882_v39 = vpop.f32.mrf.mxu2  ;;  %v1619_v25 = vpop.f32.mrf.mxu1 }
 0x287   : > { %v1944_v23 = vadd.f32 %v1882_v39, %v1678_v60  ;;  %v1679_v48 = vadd.f32 %v1619_v25, %v3906_v53  ;;  %v2379_v25 = vadd.f32 %v3963_v33, %v3958_v22 }
 0x288   : > { %2363 = vst [vmem:[%s3955_s13 + $0x80] sm:$0xff] %v4045_v6  ;;  %v2270_v54 = vpop.f32.mrf.mxu0 }
 0x28b   : > { %v2076_v62 = vpop.f32.mrf.mxu3 }
 0x28c   : > { %v2138_v18 = vadd.f32 %v2076_v62, %v1944_v23 }
 0x28e   : > { %v4050_v36 = vadd.f32 %v2270_v54, %v2138_v18  ;;  %v1885_v58 = vpop.f32.mrf.mxu2  ;;  %v1622_v47 = vpop.f32.mrf.mxu1  ;;  %v2380_v54 = vadd.f32 %v2379_v25, %v3968_v5 }
 0x28f   : > { %v1945_v13 = vadd.f32 %v1885_v58, %v1679_v48  ;;  %v1680_v0 = vadd.f32 %v1622_v47, %v3909_v24 }
 0x290   : > { %2364 = vst [vmem:[%s3955_s13 + $0x88] sm:$0xff] %v4050_v36  ;;  %v2273_v45 = vpop.f32.mrf.mxu0  ;;  %v2381_v58 = vadd.f32 %v2380_v54, %v3973_v59 }
 0x293   : > { %v2079_v17 = vpop.f32.mrf.mxu3 }
 0x294   : > { %v2139_v55 = vadd.f32 %v2079_v17, %v1945_v13 }
 0x296   : > { %v4055_v40 = vadd.f32 %v2273_v45, %v2139_v55  ;;  %v1888_v49 = vpop.f32.mrf.mxu2  ;;  %v1625_v3 = vpop.f32.mrf.mxu1  ;;  %v2382_v45 = vadd.f32 %v2381_v58, %v3978_v43 }
 0x297   : > { %v1946_v53 = vadd.f32 %v1888_v49, %v1680_v0  ;;  %v1681_v12 = vadd.f32 %v1625_v3, %v3912_v26 }
 0x298   : > { %2365 = vst [vmem:[%s3955_s13 + $0x90] sm:$0xff] %v4055_v40  ;;  %v2276_v1 = vpop.f32.mrf.mxu0  ;;  %v2383_v55 = vadd.f32 %v2382_v45, %v3984_v32 }
 0x29a   : > { %v2384_v49 = vadd.f32 %v2383_v55, %v3990_v52 }
 0x29b   : > { %v2082_v41 = vpop.f32.mrf.mxu3 }
 0x29c   : > { %v2140_v51 = vadd.f32 %v2082_v41, %v1946_v53  ;;  %v2385_v41 = vadd.f32 %v2384_v49, %v3996_v37 }
 0x29e   : > { %v4060_v2 = vadd.f32 %v2276_v1, %v2140_v51  ;;  %v1891_v10 = vpop.f32.mrf.mxu2  ;;  %v1628_v16 = vpop.f32.mrf.mxu1 }
 0x29f   : > { %v1947_v24 = vadd.f32 %v1891_v10, %v1681_v12  ;;  %v1682_v9 = vadd.f32 %v1628_v16, %v3916_v7  ;;  %v2386_v10 = vadd.f32 %v2385_v41, %v4002_v30 }
 0x2a0   : > { %2366 = vst [vmem:[%s3955_s13 + $0x98] sm:$0xff] %v4060_v2  ;;  %v2279_v27 = vpop.f32.mrf.mxu0 }
 0x2a3   : > { %v2085_v29 = vpop.f32.mrf.mxu3 }
 0x2a4   : > { %v2141_v4 = vadd.f32 %v2085_v29, %v1947_v24  ;;  %v2387_v24 = vadd.f32 %v2386_v10, %v4008_v35 }
 0x2a6   : > { %v4065_v50 = vadd.f32 %v2279_v27, %v2141_v4  ;;  %v1894_v34 = vpop.f32.mrf.mxu2  ;;  %v1631_v63 = vpop.f32.mrf.mxu1  ;;  %v2388_v29 = vadd.f32 %v2387_v24, %v4014_v44 }
 0x2a7   : > { %v1948_v26 = vadd.f32 %v1894_v34, %v1682_v9  ;;  %v1683_v62 = vadd.f32 %v1631_v63, %v3919_v28 }
 0x2a8   : > { %2367 = vst [vmem:[%s3955_s13 + $0xa0] sm:$0xff] %v4065_v50  ;;  %v2282_v60 = vpop.f32.mrf.mxu0  ;;  %v2389_v63 = vadd.f32 %v2388_v29, %v4020_v21 }
 0x2ab   : > { %v2088_v39 = vpop.f32.mrf.mxu3 }
 0x2ac   : > { %v2142_v23 = vadd.f32 %v2088_v39, %v1948_v26  ;;  %v2390_v39 = vadd.f32 %v2389_v63, %v4025_v56 }
 0x2ae   : > { %v4073_v18 = vadd.f32 %v2282_v60, %v2142_v23  ;;  %v1897_v7 = vpop.f32.mrf.mxu2  ;;  %v1634_v48 = vpop.f32.mrf.mxu1  ;;  %v2391_v23 = vadd.f32 %v2390_v39, %v4030_v42 }
 0x2af   : > { %v1949_v47 = vadd.f32 %v1897_v7, %v1683_v62  ;;  %v1684_v28 = vadd.f32 %v1634_v48, %v3922_v61 }
 0x2b0   : > { %2368 = vst [vmem:[%s3955_s13 + $0xa8] sm:$0xff] %v4073_v18  ;;  %v2285_v13 = vpop.f32.mrf.mxu0  ;;  %v2392_v62 = vadd.f32 %v2391_v23, %v4035_v19 }
 0x2b3   : > { %v2091_v17 = vpop.f32.mrf.mxu3 }
 0x2b4   : > { %v2143_v0 = vadd.f32 %v2091_v17, %v1949_v47  ;;  %v2393_v47 = vadd.f32 %v2392_v62, %v4040_v38 }
 0x2b6   : > { %v4082_v3 = vadd.f32 %v2285_v13, %v2143_v0  ;;  %v1900_v53 = vpop.f32.mrf.mxu2  ;;  %v1637_v1 = vpop.f32.mrf.mxu1  ;;  %v2394_v17 = vadd.f32 %v2393_v47, %v4045_v6 }
 0x2b7   : > { %v1950_v51 = vadd.f32 %v1900_v53, %v1684_v28  ;;  %v1685_v61 = vadd.f32 %v1637_v1, %v3925_v31 }
 0x2b8   : > { %2369 = vst [vmem:[%s3955_s13 + $0xb0] sm:$0xff] %v4082_v3  ;;  %v2288_v12 = vpop.f32.mrf.mxu0  ;;  %v2395_v0 = vadd.f32 %v2394_v17, %v4050_v36 }
 0x2ba   : > { %v2396_v28 = vadd.f32 %v2395_v0, %v4055_v40 }
 0x2bb   : > { %v2094_v16 = vpop.f32.mrf.mxu3 }
 0x2bc   : > { %v2144_v27 = vadd.f32 %v2094_v16, %v1950_v51  ;;  %v2397_v51 = vadd.f32 %v2396_v28, %v4060_v2 }
 0x2be   : > { %v4091_v4 = vadd.f32 %v2288_v12, %v2144_v27  ;;  %v1903_v9 = vpop.f32.mrf.mxu2  ;;  %v1640_v34 = vpop.f32.mrf.mxu1  ;;  %v2398_v16 = vadd.f32 %v2397_v51, %v4065_v50 }
 0x2bf   : > { %v1951_v26 = vadd.f32 %v1903_v9, %v1685_v61  ;;  %v1686_v31 = vadd.f32 %v1640_v34, %v3928_v11 }
 0x2c0   : > { %2370 = vst [vmem:[%s3955_s13 + $0xb8] sm:$0xff] %v4091_v4  ;;  %v2291_v60 = vpop.f32.mrf.mxu0  ;;  %v2399_v27 = vadd.f32 %v2398_v16, %v4073_v18 }
 0x2c2   : > { %v2400_v61 = vadd.f32 %v2399_v27, %v4082_v3 }
 0x2c3   : > { %v2097_v25 = vpop.f32.mrf.mxu3 }
 0x2c4   : > { %v2145_v54 = vadd.f32 %v2097_v25, %v1951_v26  ;;  %v2401_v26 = vadd.f32 %v2400_v61, %v4091_v4 }
 0x2c6   : > { %v4100_v7 = vadd.f32 %v2291_v60, %v2145_v54  ;;  %v1906_v48 = vpop.f32.mrf.mxu2  ;;  %v1643_v58 = vpop.f32.mrf.mxu1 }
 0x2c7   : > { %v1952_v13 = vadd.f32 %v1906_v48, %v1686_v31  ;;  %v1687_v11 = vadd.f32 %v1643_v58, %v3931_v8 }
 0x2c8   : > { %2371 = vst [vmem:[%s3955_s13 + $0xc0] sm:$0xff] %v4100_v7  ;;  %v2294_v45 = vpop.f32.mrf.mxu0  ;;  %v2402_v25 = vadd.f32 %v2401_v26, %v4100_v7 }
 0x2cb   : > { %v2100_v55 = vpop.f32.mrf.mxu3 }
 0x2cc   : > { %v2146_v49 = vadd.f32 %v2100_v55, %v1952_v13 }
 0x2ce   : > { %v4109_v53 = vadd.f32 %v2294_v45, %v2146_v49  ;;  %v1909_v1 = vpop.f32.mrf.mxu2  ;;  %v1646_v41 = vpop.f32.mrf.mxu1 }
 0x2cf   : > { %v1953_v12 = vadd.f32 %v1909_v1, %v1687_v11  ;;  %v1688_v8 = vadd.f32 %v1646_v41, %v3934_v14 }
 0x2d0   : > { %2372 = vst [vmem:[%s3955_s13 + $0xc8] sm:$0xff] %v4109_v53  ;;  %v2297_v10 = vpop.f32.mrf.mxu0  ;;  %v2403_v54 = vadd.f32 %v2402_v25, %v4109_v53 }
 0x2d3   : > { %v2103_v24 = vpop.f32.mrf.mxu3 }
 0x2d4   : > { %v2147_v29 = vadd.f32 %v2103_v24, %v1953_v12 }
 0x2d6   : > { %v4118_v9 = vadd.f32 %v2297_v10, %v2147_v29  ;;  %v1912_v34 = vpop.f32.mrf.mxu2  ;;  %v1649_v63 = vpop.f32.mrf.mxu1 }
 0x2d7   : > { %v1954_v60 = vadd.f32 %v1912_v34, %v1688_v8  ;;  %v1689_v31 = vadd.f32 %v1649_v63, %v3937_v15 }
 0x2d8   : > { %2373 = vst [vmem:[%s3955_s13 + $0xd0] sm:$0xff] %v4118_v9  ;;  %v2300_v39 = vpop.f32.mrf.mxu0  ;;  %v2404_v14 = vadd.f32 %v2403_v54, %v4118_v9 }
 0x2db   : > { %v2106_v23 = vpop.f32.mrf.mxu3 }
 0x2dc   : > { %v2148_v62 = vadd.f32 %v2106_v23, %v1954_v60 }
 0x2de   : > { %v2342_v48 = vadd.f32 %v2300_v39, %v2148_v62  ;;  %v1915_v58 = vpop.f32.mrf.mxu2  ;;  %v1652_v47 = vpop.f32.mrf.mxu1 }
 0x2df   : > { %v1955_v45 = vadd.f32 %v1915_v58, %v1689_v31  ;;  %v1690_v49 = vadd.f32 %v1652_v47, %v3941_v46 }
 0x2e0   : > { %2374 = vst [vmem:[%s3955_s13 + $0xd8] sm:$0xff] %v2342_v48  ;;  %v2405_v13 = vadd.f32 %v2404_v14, %v2342_v48  ;;  %v2303_v17 = vpop.f32.mrf.mxu0 }
 0x2e3   : > { %v2109_v55 = vpop.f32.mrf.mxu3 }
 0x2e4   : > { %v2149_v0 = vadd.f32 %v2109_v55, %v1955_v45 }
 0x2e6   : > { %v2343_v28 = vadd.f32 %v2303_v17, %v2149_v0  ;;  %v1918_v11 = vpop.f32.mrf.mxu2  ;;  %v1655_v12 = vpop.f32.mrf.mxu1 }
 0x2e7   : > { %v1956_v41 = vadd.f32 %v1918_v11, %v1690_v49  ;;  %v1691_v16 = vadd.f32 %v1655_v12, %v3945_v57 }
 0x2e8   : > { %2375 = vst [vmem:[%s3955_s13 + $0xe0] sm:$0xff] %v2343_v28  ;;  %v2406_v1 = vadd.f32 %v2405_v13, %v2343_v28  ;;  %v2306_v51 = vpop.f32.mrf.mxu0 }
 0x2eb   : > { %v2112_v15 = vpop.f32.mrf.mxu3 }
 0x2ec   : > { %v2150_v10 = vadd.f32 %v2112_v15, %v1956_v41 }
 0x2ee   : > { %v2344_v24 = vadd.f32 %v2306_v51, %v2150_v10  ;;  %v1921_v27 = vpop.f32.mrf.mxu2  ;;  %v1658_v46 = vpop.f32.mrf.mxu1 }
 0x2ef   : > { %v1957_v61 = vadd.f32 %v1921_v27, %v1691_v16  ;;  %v1692_v26 = vadd.f32 %v1658_v46, %v3948_v20 }
 0x2f0   : > { %2376 = vst [vmem:[%s3955_s13 + $0xe8] sm:$0xff] %v2344_v24  ;;  %v2407_v29 = vadd.f32 %v2406_v1, %v2344_v24  ;;  %v2309_v8 = vpop.f32.mrf.mxu0 }
 0x2f3   : > { %v2115_v34 = vpop.f32.mrf.mxu3 }
 0x2f4   : > { %v2151_v63 = vadd.f32 %v2115_v34, %v1957_v61 }
 0x2f6   : > { %v2345_v60 = vadd.f32 %v2309_v8, %v2151_v63  ;;  %v1924_v39 = vpop.f32.mrf.mxu2 }
 0x2f7   : > { %v1958_v23 = vadd.f32 %v1924_v39, %v1692_v26 }
 0x2f8   : > { %2377 = vst [vmem:[%s3955_s13 + $0xf0] sm:$0xff] %v2345_v60  ;;  %v2408_v25 = vadd.f32 %v2407_v29, %v2345_v60  ;;  %v2312_v57 = vpop.f32.mrf.mxu0 }
 0x2fb   : > { %v2118_v54 = vpop.f32.mrf.mxu3 }
 0x2fc   : > { %v2152_v62 = vadd.f32 %v2118_v54, %v1958_v23 }
 0x2fe   : > { %v2346_v14 = vadd.f32 %v2312_v57, %v2152_v62 }
 0x300   : > { %2378 = vst [vmem:[%s3955_s13 + $0xf8] sm:$0xff] %v2346_v14  ;;  %v2409_v31 = vadd.f32 %v2408_v25, %v2346_v14 }
 0x302   : > { %v2410_v58 = vrot.slane %v2409_v31, 4 }
 0x304   : > { %v2411_v47 = vadd.f32 %v2410_v58, %v2409_v31 }
 0x306   : > { %v2412_v13 = vrot.slane %v2411_v47, 2 }
 0x308   : > { %v2413_v45 = vadd.f32 %v2412_v13, %v2411_v47 }
 0x30a   : > { %v2414_v17 = vrot.slane %v2413_v45, 1 }
 0x30c   : > { %v2415_v20 = vadd.f32 %v2414_v17, %v2413_v45 }
 0x30e   : > { %2449 = vst [vmem:[%s4139_s16] sm:$0x1] %v2415_v20  ;;  %v4142_v55 = vmul.f32 0.00390625, %v2415_v20 }
 0x310   : > { %v4146_v0 = vsub.f32 %v4118_v9, %v4142_v55  ;;  %v4149_v49 = vsub.f32 %v2342_v48, %v4142_v55  ;;  %v4152_v11 = vsub.f32 %v2343_v28, %v4142_v55  ;;  %v4155_v1 = vsub.f32 %v2344_v24, %v4142_v55 }
 0x311   : > { %v4158_v41 = vsub.f32 %v2345_v60, %v4142_v55  ;;  %v4161_v51 = vsub.f32 %v2346_v14, %v4142_v55  ;;  %v2417_v12 = vsub.f32 %v3958_v22, %v4142_v55  ;;  %v2418_v9 = vsub.f32 %v3963_v33, %v4142_v55 }
 0x312   : > { %v2419_v48 = vsub.f32 %v3968_v5, %v4142_v55  ;;  %v2420_v10 = vsub.f32 %v3973_v59, %v4142_v55  ;;  %v2421_v16 = vsub.f32 %v3978_v43, %v4142_v55  ;;  %v2422_v29 = vsub.f32 %v3984_v32, %v4142_v55 }
 0x313   : > { %v2450_v28 = vmul.f32 %v2417_v12, %v2417_v12  ;;  %v2451_v15 = vmul.f32 %v2418_v9, %v2418_v9  ;;  %v2423_v33 = vsub.f32 %v3990_v52, %v4142_v55  ;;  %v2424_v46 = vsub.f32 %v3996_v37, %v4142_v55 }
 0x314   : > { %v2452_v24 = vmul.f32 %v2419_v48, %v2419_v48  ;;  %v2453_v22 = vmul.f32 %v2420_v10, %v2420_v10  ;;  %v2454_v8 = vmul.f32 %v2421_v16, %v2421_v16  ;;  %v2455_v34 = vmul.f32 %v2422_v29, %v2422_v29 }
 0x315   : > { %v2482_v27 = vadd.f32 %v2451_v15, %v2450_v28  ;;  %v2425_v43 = vsub.f32 %v4002_v30, %v4142_v55  ;;  %v2456_v63 = vmul.f32 %v2423_v33, %v2423_v33  ;;  %v2426_v32 = vsub.f32 %v4008_v35, %v4142_v55 }
 0x316   : > { %v2457_v60 = vmul.f32 %v2424_v46, %v2424_v46  ;;  %v2427_v52 = vsub.f32 %v4014_v44, %v4142_v55  ;;  %v2428_v37 = vsub.f32 %v4020_v21, %v4142_v55  ;;  %v2429_v30 = vsub.f32 %v4025_v56, %v4142_v55 }
 0x317   : > { %v2483_v61 = vadd.f32 %v2482_v27, %v2452_v24  ;;  %v2458_v25 = vmul.f32 %v2425_v43, %v2425_v43  ;;  %v2459_v54 = vmul.f32 %v2426_v32, %v2426_v32  ;;  %v2430_v35 = vsub.f32 %v4030_v42, %v4142_v55 }
 0x318   : > { %v2460_v62 = vmul.f32 %v2427_v52, %v2427_v52  ;;  %v2461_v31 = vmul.f32 %v2428_v37, %v2428_v37  ;;  %v2431_v44 = vsub.f32 %v4035_v19, %v4142_v55  ;;  %v2462_v47 = vmul.f32 %v2429_v30, %v2429_v30 }
 0x319   : > { %v2484_v5 = vadd.f32 %v2483_v61, %v2453_v22  ;;  %v2432_v21 = vsub.f32 %v4040_v38, %v4142_v55  ;;  %v2463_v45 = vmul.f32 %v2430_v35, %v2430_v35  ;;  %v2433_v56 = vsub.f32 %v4045_v6, %v4142_v55 }
 0x31a   : > { %v2464_v20 = vmul.f32 %v2431_v44, %v2431_v44  ;;  %v2434_v42 = vsub.f32 %v4050_v36, %v4142_v55  ;;  %v2435_v19 = vsub.f32 %v4055_v40, %v4142_v55  ;;  %v2436_v38 = vsub.f32 %v4060_v2, %v4142_v55 }
 0x31b   : > { %v2485_v59 = vadd.f32 %v2484_v5, %v2454_v8  ;;  %v2465_v9 = vmul.f32 %v2432_v21, %v2432_v21  ;;  %v2466_v28 = vmul.f32 %v2433_v56, %v2433_v56  ;;  %v2437_v6 = vsub.f32 %v4065_v50, %v4142_v55 }
 0x31c   : > { %v2467_v10 = vmul.f32 %v2434_v42, %v2434_v42  ;;  %v2468_v24 = vmul.f32 %v2435_v19, %v2435_v19  ;;  %v2438_v36 = vsub.f32 %v4073_v18, %v4142_v55  ;;  %v2469_v29 = vmul.f32 %v2436_v38, %v2436_v38 }
 0x31d   : > { %v2486_v26 = vadd.f32 %v2485_v59, %v2455_v34  ;;  %v2439_v40 = vsub.f32 %v4082_v3, %v4142_v55  ;;  %v2470_v61 = vmul.f32 %v2437_v6, %v2437_v6  ;;  %v2440_v2 = vsub.f32 %v4091_v4, %v4142_v55 }
 0x31e   : > { %v2471_v8 = vmul.f32 %v2438_v36, %v2438_v36  ;;  %v2441_v50 = vsub.f32 %v4100_v7, %v4142_v55  ;;  %v2442_v18 = vsub.f32 %v4109_v53, %v4142_v55  ;;  %v2478_v7 = vmul.f32 %v4152_v11, %v4152_v11 }
 0x31f   : > { %v2487_v39 = vadd.f32 %v2486_v26, %v2456_v63  ;;  %v2472_v46 = vmul.f32 %v2439_v40, %v2439_v40  ;;  %v2473_v59 = vmul.f32 %v2440_v2, %v2440_v2  ;;  %v2479_v53 = vmul.f32 %v4155_v1, %v4155_v1 }
 0x320   : > { %v2474_v63 = vmul.f32 %v2441_v50, %v2441_v50  ;;  %v2475_v3 = vmul.f32 %v2442_v18, %v2442_v18 }
 0x321   : > { %v2488_v23 = vadd.f32 %v2487_v39, %v2457_v60  ;;  %v2476_v60 = vmul.f32 %v4146_v0, %v4146_v0  ;;  %v2477_v39 = vmul.f32 %v4149_v49, %v4149_v49  ;;  %v2481_v0 = vmul.f32 %v4161_v51, %v4161_v51 }
 0x323   : > { %v2489_v57 = vadd.f32 %v2488_v23, %v2458_v25  ;;  %v2480_v23 = vmul.f32 %v4158_v41, %v4158_v41 }
 0x325   : > { %v2490_v14 = vadd.f32 %v2489_v57, %v2459_v54 }
 0x327   : > { %v2491_v58 = vadd.f32 %v2490_v14, %v2460_v62 }
 0x329   : > { %v2492_v13 = vadd.f32 %v2491_v58, %v2461_v31 }
 0x32b   : > { %v2493_v17 = vadd.f32 %v2492_v13, %v2462_v47 }
 0x32d   : > { %v2494_v12 = vadd.f32 %v2493_v17, %v2463_v45 }
 0x32f   : > { %v2495_v48 = vadd.f32 %v2494_v12, %v2464_v20 }
 0x331   : > { %v2496_v15 = vadd.f32 %v2495_v48, %v2465_v9 }
 0x333   : > { %v2497_v16 = vadd.f32 %v2496_v15, %v2466_v28 }
 0x335   : > { %v2498_v27 = vadd.f32 %v2497_v16, %v2467_v10 }
 0x337   : > { %v2499_v22 = vadd.f32 %v2498_v27, %v2468_v24 }
 0x339   : > { %v2500_v33 = vadd.f32 %v2499_v22, %v2469_v29 }
 0x33b   : > { %v2501_v5 = vadd.f32 %v2500_v33, %v2470_v61 }
 0x33d   : > { %v2502_v34 = vadd.f32 %v2501_v5, %v2471_v8 }
 0x33f   : > { %v2503_v43 = vadd.f32 %v2502_v34, %v2472_v46 }
 0x341   : > { %v2504_v26 = vadd.f32 %v2503_v43, %v2473_v59 }
 0x343   : > { %v2505_v32 = vadd.f32 %v2504_v26, %v2474_v63 }
 0x345   : > { %v2506_v4 = vadd.f32 %v2505_v32, %v2475_v3 }
 0x347   : > { %v2507_v52 = vadd.f32 %v2506_v4, %v2476_v60 }
 0x349   : > { %v2508_v25 = vadd.f32 %v2507_v52, %v2477_v39 }
 0x34b   : > { %v2509_v55 = vadd.f32 %v2508_v25, %v2478_v7 }
 0x34d   : > { %v2510_v37 = vadd.f32 %v2509_v55, %v2479_v53 }
 0x34f   : > { %v2511_v54 = vadd.f32 %v2510_v37, %v2480_v23 }
 0x351   : > { %v2512_v57 = vadd.f32 %v2511_v54, %v2481_v0 }
 0x353   : > { %v2513_v49 = vrot.slane %v2512_v57, 4 }
 0x355   : > { %v2514_v30 = vadd.f32 %v2513_v49, %v2512_v57 }
 0x357   : > { %v2515_v62 = vrot.slane %v2514_v30, 2 }
 0x359   : > { %v2516_v14 = vadd.f32 %v2515_v62, %v2514_v30 }
 0x35b   : > { %v2517_v35 = vrot.slane %v2516_v14, 1 }
 0x35d   : > { %v2518_v11 = vadd.f32 %v2517_v35, %v2516_v14 }
 0x35f   : > { %2519 = vst [vmem:[%s4139_s16 + $0x1] sm:$0x1] %v2518_v11 }
 0x360 PF: > { %s16_s18 = sadd.s32 1, %s2837_s18  }
 0x361   : > { %p13_p4 = scmp.ge.s32.totalorder %s16_s18, 4  }
 0x363   :  { %15 = sbr.rel (!%p13_p4) target bundleno = 1 (0x1), region = 90 }

// kernel: residual_stack_forward.5
= control target key start
LH: loop header
LB: loop body
LE: loop exit
PB: predicated region body
PF: predicated region fallthrough
CT: control target
= control target key end

     0   :  { %s2765_s18 = smov 0   ;;  %s4039_s0 = inlined_call_operand.vmem [shape: f32[2,16,16,128], index: 0, kind: input, shape index: {}]   ;;  %s4040_s1 = inlined_call_operand.vmem [shape: f32[1,128], index: 1, kind: input, shape index: {}]   ;;  %s4041_s2 = inlined_call_operand.vmem [shape: f32[1,128], index: 2, kind: input, shape index: {}]   ;;  %s4042_s3 = inlined_call_operand.vmem [shape: f32[9,128,128], index: 3, kind: input, shape index: {}]   ;;  %s4043_s4 = inlined_call_operand.vmem [shape: f32[2,16,16,128], index: 4, kind: output, shape index: {0}]   ;;  %s4044_s5 = inlined_call_operand.vmem [shape: f32[2,2,128], index: 5, kind: output, shape index: {1}]  }
   0x1 LB: > { %s2502_s1 = sadd.s32 4294967295, %s2732_s18   ;;  %p2506_p0 = scmp.ge.s32.totalorder %s2732_s18, 1  ;;  %s2732_s18 = sphi %s2765_s18, %s16_s18  }
   0x2   : > { %p190_p1 = scmp.lt.s32.totalorder %s2732_s18, 3 }
   0x4   : > { %p191_p2 = pnand %p2506_p0, %p190_p1 }
   0x6   : > { %194 = sbr.rel (%p191_p2) target bundleno = 864 (0x360), region = 36 }
   0xb   : > { %v2527_v0 = vld [vmem:[%s4042_s3 + $0x1f8] sm:$0xff]  ;;  %v2526_v1 = vld [vmem:[%s4042_s3 + $0x1f0] sm:$0xff]  ;;  %p222_p3 = scmp.lt.s32.totalorder %s2502_s1, 1  ;;  %v2734_v2 = vmov 0.0   ;;  %v2525_v3 = vld [vmem:[%s4042_s3 + $0x1e8] sm:$0xff] }
   0xc   : > { %2644 = vmatpush.msra.mxu1 %v2527_v0  ;;  %2645 = vmatpush.msra.mxu2 %v2527_v0  ;;  %280 = vst [vmem:[#allocation2 + $0x78] sm:$0x1] %v2734_v2  ;;  %v2524_v4 = vld [vmem:[%s4042_s3 + $0x1e0] sm:$0xff]  ;;  %v2523_v5 = vld [vmem:[%s4042_s3 + $0x1d8] sm:$0xff]  ;;  %v2522_v7 = vld [vmem:[%s4042_s3 + $0x1d0] sm:$0xff] }
   0xd   : > { %2646 = vmatpush.msra.mxu3 %v2527_v0  ;;  %514 = vmatpush.msra.mxu0 %v2527_v0  ;;  %s4062_s1 = smov (!%p222_p3, %s2502_s1), 1  ;;  %268 = vst [vmem:[#allocation2] sm:$0xff] %v2734_v2  ;;  %v2521_v8 = vld [vmem:[%s4042_s3 + $0x1c8] sm:$0xff]  ;;  %v2520_v9 = vld [vmem:[%s4042_s3 + $0x1c0] sm:$0xff]  ;;  %v2519_v10 = vld [vmem:[%s4042_s3 + $0x1b8] sm:$0xff] }
   0xe   : > { %2647 = vmatpush.msra.mxu1 %v2526_v1  ;;  %2648 = vmatpush.msra.mxu2 %v2526_v1  ;;  %269 = vst [vmem:[#allocation2 + $0x8] sm:$0xff] %v2734_v2  ;;  %s2642_s26 = sshll.u32 %s4062_s1, 8  ;;  %v2518_v11 = vld [vmem:[%s4042_s3 + $0x1b0] sm:$0xff]  ;;  %v2517_v12 = vld [vmem:[%s4042_s3 + $0x1a8] sm:$0xff]  ;;  %v2516_v13 = vld [vmem:[%s4042_s3 + $0x1a0] sm:$0xff] }
   0xf   : > { %2649 = vmatpush.msra.mxu3 %v2526_v1  ;;  %515 = vmatpush.msra.mxu0 %v2526_v1  ;;  %270 = vst [vmem:[#allocation2 + $0x10] sm:$0x3] %v2734_v2  ;;  %s2797_s29 = scalar_lea.vmem %s4039_s0, %s2642_s26  ;;  %v2515_v14 = vld [vmem:[%s4042_s3 + $0x198] sm:$0xff]  ;;  %v2514_v15 = vld [vmem:[%s4042_s3 + $0x190] sm:$0xff]  ;;  %v2513_v16 = vld [vmem:[%s4042_s3 + $0x188] sm:$0xff]  ;;  %s3764_s30 = scalar_lea.vmem %s4043_s4, %s2642_s26 }
  0x10   : > { %2650 = vmatpush.msra.mxu1 %v2525_v3  ;;  %2651 = vmatpush.msra.mxu2 %v2525_v3  ;;  %272 = vst [vmem:[#allocation2 + $0x198] sm:$0xff] %v2734_v2  ;;  %v2804_v6 = vld [vmem:[%s2797_s29 + $0x40] sm:$0xff]  ;;  %v2543_v19 = vld [vmem:[%s4042_s3 + $0x378] sm:$0xff]  ;;  %v2542_v22 = vld [vmem:[%s4042_s3 + $0x370] sm:$0xff]  ;;  %s2511_s26 = sshll.u32 %s4062_s1, 1 }
  0x11   : > { %2652 = vmatpush.msra.mxu3 %v2525_v3  ;;  %516 = vmatpush.msra.mxu0 %v2525_v3  ;;  %273 = vst [vmem:[#allocation2 + $0x1a0] sm:$0xff] %v2734_v2  ;;  %v2512_v17 = vld [vmem:[%s4042_s3 + $0x180] sm:$0xff]  ;;  %v463_v20 = vld [vmem:[%s4042_s3 + $0x78] sm:$0xff]  ;;  %v462_v23 = vld [vmem:[%s4042_s3 + $0x70] sm:$0xff]  ;;  %s3947_s7 = scalar_lea.vmem %s4044_s5, %s2511_s26 }
  0x12   : > { %2653 = vmatpush.msra.mxu1 %v2524_v4  ;;  %2654 = vmatpush.msra.mxu2 %v2524_v4  ;;  %320 = vst [vmem:[#allocation2 + $0x79] sm:$0xff] %v2804_v6  ;;  %v2559_v21 = vld [vmem:[%s4042_s3 + $0xf8] sm:$0xff]  ;;  %v2558_v24 = vld [vmem:[%s4042_s3 + $0xf0] sm:$0xff]  ;;  %v2541_v25 = vld [vmem:[%s4042_s3 + $0x368] sm:$0xff] }
  0x13   : > { %2655 = vmatpush.msra.mxu3 %v2524_v4  ;;  %517 = vmatpush.msra.mxu0 %v2524_v4  ;;  %274 = vst [vmem:[#allocation2 + $0x1a8] sm:$0x3] %v2734_v2  ;;  %v2575_v26 = vld [vmem:[%s4042_s3 + $0x278] sm:$0xff]  ;;  %v461_v27 = vld [vmem:[%s4042_s3 + $0x68] sm:$0xff]  ;;  %v2540_v29 = vld [vmem:[%s4042_s3 + $0x360] sm:$0xff] }
  0x14   : > { %2656 = vmatpush.msra.mxu1 %v2523_v5  ;;  %2657 = vmatpush.msra.mxu2 %v2523_v5  ;;  %276 = vst [vmem:[#allocation2 + $0x18] sm:$0x1] %v2734_v2  ;;  %v2557_v28 = vld [vmem:[%s4042_s3 + $0xe8] sm:$0xff]  ;;  %v2574_v30 = vld [vmem:[%s4042_s3 + $0x270] sm:$0xff]  ;;  %v460_v31 = vld [vmem:[%s4042_s3 + $0x60] sm:$0xff] }
  0x15   : > { %2658 = vmatpush.msra.mxu3 %v2523_v5  ;;  %518 = vmatpush.msra.mxu0 %v2523_v5  ;;  %277 = vst [vmem:[#allocation2 + $0x30] sm:$0x1] %v2734_v2  ;;  %v2914_v32 = vld [vmem:[%s2797_s29 + $0x80] sm:$0xff]  ;;  %v2539_v34 = vld [vmem:[%s4042_s3 + $0x358] sm:$0xff]  ;;  %v2573_v35 = vld [vmem:[%s4042_s3 + $0x268] sm:$0xff] }
  0x16   : > { %2659 = vmatpush.msra.mxu1 %v2522_v7  ;;  %2660 = vmatpush.msra.mxu2 %v2522_v7  ;;  %278 = vst [vmem:[#allocation2 + $0x48] sm:$0x1] %v2734_v2  ;;  %v2556_v33 = vld [vmem:[%s4042_s3 + $0xe0] sm:$0xff]  ;;  %v459_v36 = vld [vmem:[%s4042_s3 + $0x58] sm:$0xff]  ;;  %v2538_v38 = vld [vmem:[%s4042_s3 + $0x350] sm:$0xff] }
  0x17   : > { %2661 = vmatpush.msra.mxu3 %v2522_v7  ;;  %519 = vmatpush.msra.mxu0 %v2522_v7  ;;  %279 = vst [vmem:[#allocation2 + $0x60] sm:$0x1] %v2734_v2  ;;  %v2555_v37 = vld [vmem:[%s4042_s3 + $0xd8] sm:$0xff]  ;;  %v2572_v39 = vld [vmem:[%s4042_s3 + $0x260] sm:$0xff]  ;;  %v458_v40 = vld [vmem:[%s4042_s3 + $0x50] sm:$0xff] }
  0x18   : > { %2662 = vmatpush.msra.mxu1 %v2521_v8  ;;  %2663 = vmatpush.msra.mxu2 %v2521_v8  ;;  %281 = vst [vmem:[#allocation2 + $0x90] sm:$0x1] %v2734_v2  ;;  %v2554_v41 = vld [vmem:[%s4042_s3 + $0xd0] sm:$0xff]  ;;  %v2537_v42 = vld [vmem:[%s4042_s3 + $0x348] sm:$0xff]  ;;  %v260_v43 = vld [vmem:[%s2797_s29 + $0xc0] sm:$0xff] }
  0x19   : > { %2664 = vmatpush.msra.mxu3 %v2521_v8  ;;  %520 = vmatpush.msra.mxu0 %v2521_v8  ;;  %282 = vst [vmem:[#allocation2 + $0xa8] sm:$0x1] %v2734_v2  ;;  %v2862_v18 = vld [vmem:[#allocation2 + $0x78] sm:$0xff]  ;;  %v2954_v44 = vld [vmem:[%s2797_s29 + $0x48] sm:$0xff]  ;;  %v2961_v46 = vld [vmem:[%s2797_s29] sm:$0xff] }
  0x1a   : > { %2665 = vmatpush.msra.mxu1 %v2520_v9  ;;  %2666 = vmatpush.msra.mxu2 %v2520_v9  ;;  %283 = vst [vmem:[#allocation2 + $0xc0] sm:$0x1] %v2734_v2  ;;  %v2958_v45 = vld [vmem:[%s2797_s29 + $0x88] sm:$0xff]  ;;  %v2571_v49 = vld [vmem:[%s4042_s3 + $0x258] sm:$0xff]  ;;  %v2536_v51 = vld [vmem:[%s4042_s3 + $0x340] sm:$0xff] }
  0x1b   : > { %2667 = vmatpush.msra.mxu3 %v2520_v9  ;;  %521 = vmatpush.msra.mxu0 %v2520_v9  ;;  %284 = vst [vmem:[#allocation2 + $0xd8] sm:$0x1] %v2734_v2  ;;  %v261_v47 = vld [vmem:[%s2797_s29 + $0xc8] sm:$0xff]  ;;  %v2552_v52 = vld [vmem:[%s4042_s3 + $0xc0] sm:$0xff]  ;;  %v2570_v53 = vld [vmem:[%s4042_s3 + $0x250] sm:$0xff] }
  0x1c   : > { %2668 = vmatpush.msra.mxu1 %v2519_v10  ;;  %2669 = vmatpush.msra.mxu2 %v2519_v10  ;;  %285 = vst [vmem:[#allocation2 + $0xf0] sm:$0x1] %v2734_v2  ;;  %v2553_v48 = vld [vmem:[%s4042_s3 + $0xc8] sm:$0xff]  ;;  %v2987_v55 = vld [vmem:[%s2797_s29 + $0x50] sm:$0xff]  ;;  %v456_v57 = vld [vmem:[%s4042_s3 + $0x40] sm:$0xff] }
  0x1d   : > { %2670 = vmatpush.msra.mxu3 %v2519_v10  ;;  %522 = vmatpush.msra.mxu0 %v2519_v10  ;;  %286 = vst [vmem:[#allocation2 + $0x108] sm:$0x1] %v2734_v2  ;;  %v457_v50 = vld [vmem:[%s4042_s3 + $0x48] sm:$0xff]  ;;  %v2992_v56 = vld [vmem:[%s2797_s29 + $0x90] sm:$0xff]  ;;  %v2535_v58 = vld [vmem:[%s4042_s3 + $0x338] sm:$0xff] }
  0x1e   : > { %2671 = vmatpush.msra.mxu1 %v2518_v11  ;;  %2672 = vmatpush.msra.mxu2 %v2518_v11  ;;  %287 = vst [vmem:[#allocation2 + $0x120] sm:$0x1] %v2734_v2  ;;  %v3001_v59 = vld [vmem:[%s2797_s29 + $0x8] sm:$0xff]  ;;  %v262_v60 = vld [vmem:[%s2797_s29 + $0xd0] sm:$0xff]  ;;  %v3007_v61 = vld [vmem:[%s2797_s29 + $0x58] sm:$0xff] }
  0x1f   : > { %2673 = vmatpush.msra.mxu3 %v2518_v11  ;;  %523 = vmatpush.msra.mxu0 %v2518_v11  ;;  %288 = vst [vmem:[#allocation2 + $0x138] sm:$0x1] %v2734_v2  ;;  %v3010_v62 = vld [vmem:[%s2797_s29 + $0x98] sm:$0xff]  ;;  %v3016_v0 = vld [vmem:[%s2797_s29 + $0x10] sm:$0xff]  ;;  %v3023_v4 = vld [vmem:[%s2797_s29 + $0x60] sm:$0xff] }
  0x20   : > { %2674 = vmatpush.msra.mxu1 %v2517_v12  ;;  %2675 = vmatpush.msra.mxu2 %v2517_v12  ;;  %289 = vst [vmem:[#allocation2 + $0x150] sm:$0x1] %v2734_v2  ;;  %v263_v1 = vld [vmem:[%s2797_s29 + $0xd8] sm:$0xff]  ;;  %v2569_v7 = vld [vmem:[%s4042_s3 + $0x248] sm:$0xff]  ;;  %v2534_v10 = vld [vmem:[%s4042_s3 + $0x330] sm:$0xff] }
  0x21   : > { %2676 = vmatpush.msra.mxu3 %v2517_v12  ;;  %524 = vmatpush.msra.mxu0 %v2517_v12  ;;  %290 = vst [vmem:[#allocation2 + $0x168] sm:$0x1] %v2734_v2  ;;  %v2551_v5 = vld [vmem:[%s4042_s3 + $0xb8] sm:$0xff]  ;;  %v2550_v12 = vld [vmem:[%s4042_s3 + $0xb0] sm:$0xff] }
  0x22   : > { %2677 = vmatpush.msra.mxu1 %v2516_v13  ;;  %2678 = vmatpush.msra.mxu2 %v2516_v13  ;;  %291 = vst [vmem:[#allocation2 + $0x180] sm:$0x1] %v2734_v2  ;;  %v455_v9 = vld [vmem:[%s4042_s3 + $0x38] sm:$0xff] }
  0x23   : > { %2679 = vmatpush.msra.mxu3 %v2516_v13  ;;  %294 = vst [vmem:[#allocation2 + $0x29] sm:$0x1] %v2734_v2  ;;  %525 = vmatpush.msra.mxu0 %v2516_v13  ;;  %v2568_v13 = vld [vmem:[%s4042_s3 + $0x240] sm:$0xff] }
  0x24   : > { %2680 = vmatpush.msra.mxu1 %v2515_v14  ;;  %2681 = vmatpush.msra.mxu2 %v2515_v14  ;;  %295 = vst [vmem:[#allocation2 + $0x41] sm:$0x1] %v2734_v2 }
  0x25   : > { %2682 = vmatpush.msra.mxu3 %v2515_v14  ;;  %296 = vst [vmem:[#allocation2 + $0x59] sm:$0x1] %v2734_v2  ;;  %526 = vmatpush.msra.mxu0 %v2515_v14  ;;  %v3054_v14 = vld [vmem:[%s2797_s29 + $0xa0] sm:$0xff] }
  0x26   : > { %2683 = vmatpush.msra.mxu1 %v2514_v15  ;;  %2684 = vmatpush.msra.mxu2 %v2514_v15  ;;  %297 = vst [vmem:[#allocation2 + $0x71] sm:$0x1] %v2734_v2 }
  0x27   : > { %2685 = vmatpush.msra.mxu3 %v2514_v15  ;;  %298 = vst [vmem:[#allocation2 + $0x89] sm:$0x1] %v2734_v2  ;;  %527 = vmatpush.msra.mxu0 %v2514_v15  ;;  %v454_v15 = vld [vmem:[%s4042_s3 + $0x30] sm:$0xff] }
  0x28   : > { %2686 = vmatpush.msra.mxu1 %v2513_v16  ;;  %2687 = vmatpush.msra.mxu2 %v2513_v16  ;;  %299 = vst [vmem:[#allocation2 + $0xa1] sm:$0x1] %v2734_v2 }
  0x29   : > { %2688 = vmatpush.msra.mxu3 %v2513_v16  ;;  %300 = vst [vmem:[#allocation2 + $0xb9] sm:$0x1] %v2734_v2  ;;  %528 = vmatpush.msra.mxu0 %v2513_v16  ;;  %v2533_v16 = vld [vmem:[%s4042_s3 + $0x328] sm:$0xff] }
  0x2a   : > { %2689 = vmatpush.msra.mxu1 %v2512_v17  ;;  %2690 = vmatpush.msra.mxu2 %v2512_v17  ;;  %301 = vst [vmem:[#allocation2 + $0xd1] sm:$0x1] %v2734_v2 }
  0x2b   : > { %554 = vmatmul.f32.vlgmr.msra.gmra.mxu1 %v2862_v18  ;;  %302 = vst [vmem:[#allocation2 + $0xe9] sm:$0x1] %v2734_v2  ;;  %2691 = vmatpush.msra.mxu3 %v2512_v17 }
  0x2c   : > { %790 = vmatpush.msrb.mxu2 %v2543_v19  ;;  %303 = vst [vmem:[#allocation2 + $0x101] sm:$0x1] %v2734_v2  ;;  %627 = vmatpush.msrb.mxu1 %v463_v20  ;;  %v264_v20 = vld [vmem:[%s2797_s29 + $0xe0] sm:$0xff] }
  0x2d   : > { %304 = vst [vmem:[#allocation2 + $0x119] sm:$0x1] %v2734_v2  ;;  %1056 = vmatpush.msrb.mxu3 %v2559_v21  ;;  %529 = vmatpush.msra.mxu0 %v2512_v17  ;;  %v3063_v17 = vld [vmem:[%s2797_s29 + $0x18] sm:$0xff] }
  0x2e   : > { %791 = vmatpush.msrb.mxu2 %v2542_v22  ;;  %305 = vst [vmem:[#allocation2 + $0x131] sm:$0x1] %v2734_v2  ;;  %628 = vmatpush.msrb.mxu1 %v462_v23  ;;  %v3073_v22 = vld [vmem:[%s2797_s29 + $0x68] sm:$0xff] }
  0x2f   : > { %306 = vst [vmem:[#allocation2 + $0x149] sm:$0x1] %v2734_v2  ;;  %1057 = vmatpush.msrb.mxu3 %v2558_v24  ;;  %1250 = vmatpush.msrb.mxu0 %v2575_v26  ;;  %v3079_v24 = vld [vmem:[%s2797_s29 + $0xa8] sm:$0xff] }
  0x30   : > { %792 = vmatpush.msrb.mxu2 %v2541_v25  ;;  %307 = vst [vmem:[#allocation2 + $0x161] sm:$0x1] %v2734_v2  ;;  %629 = vmatpush.msrb.mxu1 %v461_v27  ;;  %v3082_v25 = vld [vmem:[%s2797_s29 + $0x20] sm:$0xff]  ;;  %v2549_v27 = vld [vmem:[%s4042_s3 + $0xa8] sm:$0xff] }
  0x31   : > { %308 = vst [vmem:[#allocation2 + $0x179] sm:$0x1] %v2734_v2  ;;  %1058 = vmatpush.msrb.mxu3 %v2557_v28  ;;  %1251 = vmatpush.msrb.mxu0 %v2574_v30  ;;  %v2567_v28 = vld [vmem:[%s4042_s3 + $0x238] sm:$0xff]  ;;  %v453_v30 = vld [vmem:[%s4042_s3 + $0x28] sm:$0xff] }
  0x32   : > { %793 = vmatpush.msrb.mxu2 %v2540_v29  ;;  %309 = vst [vmem:[#allocation2 + $0x191] sm:$0x1] %v2734_v2  ;;  %630 = vmatpush.msrb.mxu1 %v460_v31  ;;  %v265_v29 = vld [vmem:[%s2797_s29 + $0xe8] sm:$0xff]  ;;  %v2532_v31 = vld [vmem:[%s4042_s3 + $0x320] sm:$0xff] }
  0x33   : > { %328 = vst [vmem:[#allocation2 + $0xd9] sm:$0xff] %v2914_v32  ;;  %1059 = vmatpush.msrb.mxu3 %v2556_v33  ;;  %1252 = vmatpush.msrb.mxu0 %v2573_v35  ;;  %v2548_v33 = vld [vmem:[%s4042_s3 + $0xa0] sm:$0xff]  ;;  %v3110_v35 = vld [vmem:[%s2797_s29 + $0x70] sm:$0xff] }
  0x34   : > { %794 = vmatpush.msrb.mxu2 %v2539_v34  ;;  %275 = vst [vmem:[#allocation2] sm:$0x1] %v2734_v2  ;;  %631 = vmatpush.msrb.mxu1 %v459_v36  ;;  %v2566_v34 = vld [vmem:[%s4042_s3 + $0x230] sm:$0xff] }
  0x35   : > { %292 = vst [vmem:[#allocation2 + $0x198] sm:$0x1] %v2734_v2  ;;  %1060 = vmatpush.msrb.mxu3 %v2555_v37  ;;  %1253 = vmatpush.msrb.mxu0 %v2572_v39  ;;  %v3116_v36 = vld [vmem:[%s2797_s29 + $0xb0] sm:$0xff]  ;;  %v452_v37 = vld [vmem:[%s4042_s3 + $0x20] sm:$0xff]  ;;  %v3125_v39 = vld [vmem:[%s2797_s29 + $0x28] sm:$0xff] }
  0x36   : > { %795 = vmatpush.msrb.mxu2 %v2538_v38  ;;  %293 = vst [vmem:[#allocation2 + $0x11] sm:$0x1] %v2734_v2  ;;  %632 = vmatpush.msrb.mxu1 %v458_v40  ;;  %v2531_v38 = vld [vmem:[%s4042_s3 + $0x318] sm:$0xff] }
  0x37   : > { %310 = vst [vmem:[#allocation2 + $0x1a9] sm:$0x1] %v2734_v2  ;;  %1061 = vmatpush.msrb.mxu3 %v2554_v41  ;;  %1254 = vmatpush.msrb.mxu0 %v2571_v49  ;;  %v3131_v41 = vld [vmem:[%s2797_s29 + $0xf0] sm:$0xff]  ;;  %v3145_v49 = vld [vmem:[%s2797_s29 + $0xb8] sm:$0xff] }
  0x38   : > { %796 = vmatpush.msrb.mxu2 %v2537_v42  ;;  %336 = vst [vmem:[#allocation2 + $0x139] sm:$0xff] %v260_v43  ;;  %633 = vmatpush.msrb.mxu1 %v457_v50  ;;  %v3137_v43 = vld [vmem:[%s2797_s29 + $0x78] sm:$0xff] }
  0x39   : > { %321 = vst [vmem:[#allocation2 + $0x81] sm:$0xff] %v2954_v44  ;;  %1062 = vmatpush.msrb.mxu3 %v2553_v48  ;;  %1255 = vmatpush.msrb.mxu0 %v2570_v53  ;;  %v2547_v50 = vld [vmem:[%s4042_s3 + $0x98] sm:$0xff] }
  0x3a   : > { %v2983_v54 = vld [vmem:[#allocation2 + $0xd8] sm:$0xff]  ;;  %329 = vst [vmem:[#allocation2 + $0xe1] sm:$0xff] %v2958_v45  ;;  %797 = vmatpush.msrb.mxu2 %v2536_v51  ;;  %634 = vmatpush.msrb.mxu1 %v456_v57  ;;  %v2565_v51 = vld [vmem:[%s4042_s3 + $0x228] sm:$0xff]  ;;  %v2530_v57 = vld [vmem:[%s4042_s3 + $0x310] sm:$0xff] }
  0x3b   : > { %578 = vmatmul.f32.vlgmr.msra.gmra.mxu2 %v2983_v54  ;;  %312 = vst [vmem:[#allocation2 + $0x19] sm:$0xff] %v2961_v46  ;;  %1063 = vmatpush.msrb.mxu3 %v2552_v52  ;;  %v3156_v52 = vld [vmem:[%s2797_s29 + $0x30] sm:$0xff]  ;;  %v451_v53 = vld [vmem:[%s4042_s3 + $0x18] sm:$0xff] }
  0x3c   : > { %337 = vst [vmem:[#allocation2 + $0x141] sm:$0xff] %v261_v47  ;;  %798 = vmatpush.msrb.mxu2 %v2535_v58  ;;  %1256 = vmatpush.msrb.mxu0 %v2569_v7  ;;  %v3167_v58 = vld [vmem:[%s2797_s29 + $0xf8] sm:$0xff]  ;;  %v2529_v7 = vld [vmem:[%s4042_s3 + $0x308] sm:$0xff] }
  0x3d   : > { %322 = vst [vmem:[#allocation2 + $0x91] sm:$0xff] %v2987_v55  ;;  %1064 = vmatpush.msrb.mxu3 %v2551_v5  ;;  %635 = vmatpush.msrb.mxu1 %v455_v9  ;;  %v450_v5 = vld [vmem:[%s4042_s3 + $0x10] sm:$0xff] }
  0x3e   : > { %330 = vst [vmem:[#allocation2 + $0xf1] sm:$0xff] %v2992_v56  ;;  %799 = vmatpush.msrb.mxu2 %v2534_v10  ;;  %1257 = vmatpush.msrb.mxu0 %v2568_v13  ;;  %v3193_v13 = vld [vmem:[%s2797_s29 + $0x38] sm:$0xff] }
  0x3f   : > { %v3012_v63 = vld [vmem:[#allocation2 + $0x138] sm:$0xff]  ;;  %313 = vst [vmem:[#allocation2 + $0x21] sm:$0xff] %v3001_v59  ;;  %1065 = vmatpush.msrb.mxu3 %v2550_v12  ;;  %636 = vmatpush.msrb.mxu1 %v454_v15 }
  0x40   : > { %602 = vmatmul.f32.vlgmr.msra.gmra.mxu3 %v3012_v63  ;;  %v3020_v3 = vld [vmem:[#allocation2 + $0x80] sm:$0xff]  ;;  %338 = vst [vmem:[#allocation2 + $0x151] sm:$0xff] %v262_v60  ;;  %800 = vmatpush.msrb.mxu2 %v2533_v16  ;;  %v2546_v60 = vld [vmem:[%s4042_s3 + $0x90] sm:$0xff]  ;;  %v2545_v16 = vld [vmem:[%s4042_s3 + $0x88] sm:$0xff] }
  0x41   : > { %557 = vmatmul.f32.gmra.mxu1 %v3020_v3  ;;  %v3032_v8 = vld [vmem:[#allocation2 + $0xe0] sm:$0xff]  ;;  %323 = vst [vmem:[#allocation2 + $0x99] sm:$0xff] %v3007_v61  ;;  %1066 = vmatpush.msrb.mxu3 %v2549_v27  ;;  %v449_v27 = vld [vmem:[%s4042_s3 + $0x8] sm:$0xff] }
  0x42   : > { %v3041_v11 = vld [vmem:[#allocation2 + $0x18] sm:$0xff]  ;;  %331 = vst [vmem:[#allocation2 + $0xf9] sm:$0xff] %v3010_v62  ;;  %1258 = vmatpush.msrb.mxu0 %v2567_v28  ;;  %637 = vmatpush.msrb.mxu1 %v453_v30  ;;  %v2528_v28 = vld [vmem:[%s4042_s3 + $0x300] sm:$0xff]  ;;  %v2562_v30 = vld [vmem:[%s4042_s3 + $0x210] sm:$0xff] }
  0x43   : > { %581 = vmatmul.f32.gmra.mxu2 %v3032_v8  ;;  %530 = vmatmul.f32.vlgmr.msra.gmra.mxu0 %v3041_v11  ;;  %314 = vst [vmem:[#allocation2 + $0x31] sm:$0xff] %v3016_v0  ;;  %v3065_v19 = vld [vmem:[#allocation2 + $0x140] sm:$0xff] }
  0x44   : > { %339 = vst [vmem:[#allocation2 + $0x159] sm:$0xff] %v263_v1  ;;  %v3069_v21 = vld [vmem:[#allocation2 + $0x90] sm:$0xff]  ;;  %801 = vmatpush.msrb.mxu2 %v2532_v31  ;;  %1067 = vmatpush.msrb.mxu3 %v2548_v33  ;;  %v2564_v1 = vld [vmem:[%s4042_s3 + $0x220] sm:$0xff]  ;;  %v2607_v33 = vld [vmem:[%s4042_s3 + $0x178] sm:$0xff] }
  0x45   : > { %324 = vst [vmem:[#allocation2 + $0xa9] sm:$0xff] %v3023_v4  ;;  %v3075_v23 = vld [vmem:[#allocation2 + $0xf0] sm:$0xff]  ;;  %1259 = vmatpush.msrb.mxu0 %v2566_v34  ;;  %638 = vmatpush.msrb.mxu1 %v452_v37  ;;  %v448_v31 = vld [vmem:[%s4042_s3] sm:$0xff] }
  0x46   : > { %332 = vst [vmem:[#allocation2 + $0x109] sm:$0xff] %v3054_v14  ;;  %v3085_v26 = vld [vmem:[#allocation2 + $0x20] sm:$0xff]  ;;  %802 = vmatpush.msrb.mxu2 %v2531_v38  ;;  %1068 = vmatpush.msrb.mxu3 %v2547_v50 }
  0x47   : > { %315 = vst [vmem:[#allocation2 + $0x39] sm:$0xff] %v3063_v17  ;;  %v3127_v40 = vld [vmem:[#allocation2 + $0x150] sm:$0xff]  ;;  %1260 = vmatpush.msrb.mxu0 %v2565_v51  ;;  %639 = vmatpush.msrb.mxu1 %v451_v53  ;;  %v2561_v51 = vld [vmem:[%s4042_s3 + $0x208] sm:$0xff]  ;;  %v2623_v53 = vld [vmem:[%s4042_s3 + $0x2f8] sm:$0xff] }
  0x48   : > { %605 = vmatmul.f32.gmra.mxu3 %v3065_v19  ;;  %340 = vst [vmem:[#allocation2 + $0x169] sm:$0xff] %v264_v20  ;;  %v3133_v42 = vld [vmem:[#allocation2 + $0x98] sm:$0xff]  ;;  %803 = vmatpush.msrb.mxu2 %v2530_v57 }
  0x49   : > { %560 = vmatmul.f32.gmra.mxu1 %v3069_v21  ;;  %325 = vst [vmem:[#allocation2 + $0xb1] sm:$0xff] %v3073_v22  ;;  %v3139_v47 = vld [vmem:[#allocation2 + $0xf8] sm:$0xff]  ;;  %1069 = vmatpush.msrb.mxu3 %v2546_v60  ;;  %v2560_v60 = vld [vmem:[%s4042_s3 + $0x200] sm:$0xff] }
  0x4a   : > { %333 = vst [vmem:[#allocation2 + $0x111] sm:$0xff] %v3079_v24  ;;  %v3141_v48 = vld [vmem:[#allocation2 + $0x30] sm:$0xff]  ;;  %1261 = vmatpush.msrb.mxu0 %v2564_v1  ;;  %640 = vmatpush.msrb.mxu1 %v450_v5  ;;  %v2563_v20 = vld [vmem:[%s4042_s3 + $0x218] sm:$0xff] }
  0x4b   : > { %584 = vmatmul.f32.gmra.mxu2 %v3075_v23  ;;  %533 = vmatmul.f32.gmra.mxu0 %v3085_v26  ;;  %316 = vst [vmem:[#allocation2 + $0x49] sm:$0xff] %v3082_v25  ;;  %v3186_v9 = vld [vmem:[#allocation2 + $0x158] sm:$0xff] }
  0x4c   : > { %341 = vst [vmem:[#allocation2 + $0x171] sm:$0xff] %v265_v29  ;;  %v3188_v10 = vld [vmem:[#allocation2 + $0xa8] sm:$0xff]  ;;  %804 = vmatpush.msrb.mxu2 %v2529_v7  ;;  %1070 = vmatpush.msrb.mxu3 %v2545_v16  ;;  %v2544_v29 = vld [vmem:[%s4042_s3 + $0x80] sm:$0xff]  ;;  %v2591_v57 = vld [vmem:[%s4042_s3 + $0x3f8] sm:$0xff] }
  0x4d   : > { %326 = vst [vmem:[#allocation2 + $0xc1] sm:$0xff] %v3110_v35  ;;  %v3190_v12 = vld [vmem:[#allocation2 + $0x108] sm:$0xff]  ;;  %1262 = vmatpush.msrb.mxu0 %v2563_v20  ;;  %641 = vmatpush.msrb.mxu1 %v449_v27  ;;  %v2639_v20 = vld [vmem:[%s4042_s3 + $0x478] sm:$0xff]  ;;  %v2606_v27 = vld [vmem:[%s4042_s3 + $0x170] sm:$0xff] }
  0x4e   : > { %334 = vst [vmem:[#allocation2 + $0x121] sm:$0xff] %v3116_v36  ;;  %v3196_v15 = vld [vmem:[#allocation2 + $0x38] sm:$0xff]  ;;  %805 = vmatpush.msrb.mxu2 %v2528_v28  ;;  %1071 = vmatpush.msrb.mxu3 %v2544_v29 }
  0x4f   : > { %317 = vst [vmem:[#allocation2 + $0x51] sm:$0xff] %v3125_v39  ;;  %v3226_v34 = vld [vmem:[#allocation2 + $0x168] sm:$0xff]  ;;  %1263 = vmatpush.msrb.mxu0 %v2562_v30  ;;  %642 = vmatpush.msrb.mxu1 %v448_v31 }
  0x50   : > { %608 = vmatmul.f32.gmra.mxu3 %v3127_v40  ;;  %342 = vst [vmem:[#allocation2 + $0x181] sm:$0xff] %v3131_v41  ;;  %v3228_v37 = vld [vmem:[#allocation2 + $0xb0] sm:$0xff]  ;;  %1710 = vmatpush.msra.mxu2 %v2607_v33 }
  0x51   : > { %563 = vmatmul.f32.gmra.mxu1 %v3133_v42  ;;  %327 = vst [vmem:[#allocation2 + $0xc9] sm:$0xff] %v3137_v43  ;;  %v3230_v38 = vld [vmem:[#allocation2 + $0x110] sm:$0xff]  ;;  %1264 = vmatpush.msrb.mxu0 %v2561_v51 }
  0x52   : > { %335 = vst [vmem:[#allocation2 + $0x129] sm:$0xff] %v3145_v49  ;;  %v3232_v50 = vld [vmem:[#allocation2 + $0x48] sm:$0xff]  ;;  %1904 = vmatpush.msra.mxu3 %v2623_v53  ;;  %1444 = vmatpush.msra.mxu1 %v2591_v57  ;;  %v2622_v33 = vld [vmem:[%s4042_s3 + $0x2f0] sm:$0xff]  ;;  %v344_v57 = vld [vmem:[#allocation2] sm:$0xff] }
  0x53   : > { %587 = vmatmul.f32.gmra.mxu2 %v3139_v47  ;;  %536 = vmatmul.f32.gmra.mxu0 %v3141_v48  ;;  %318 = vst [vmem:[#allocation2 + $0x61] sm:$0xff] %v3156_v52  ;;  %v3250_v1 = vld [vmem:[#allocation2 + $0x170] sm:$0xff] }
  0x54   : > { %343 = vst [vmem:[#allocation2 + $0x189] sm:$0xff] %v3167_v58  ;;  %1265 = vmatpush.msrb.mxu0 %v2560_v60  ;;  %v3252_v5 = vld [vmem:[#allocation2 + $0xc0] sm:$0xff]  ;;  %1711 = vmatpush.msra.mxu2 %v2606_v27  ;;  %v2590_v51 = vld [vmem:[%s4042_s3 + $0x3f0] sm:$0xff]  ;;  %v2605_v27 = vld [vmem:[%s4042_s3 + $0x168] sm:$0xff] }
  0x55   : > { %319 = vst [vmem:[#allocation2 + $0x69] sm:$0xff] %v3193_v13  ;;  %v3255_v7 = vld [vmem:[#allocation2 + $0x120] sm:$0xff]  ;;  %1905 = vmatpush.msra.mxu3 %v2622_v33  ;;  %1445 = vmatpush.msra.mxu1 %v2590_v51  ;;  %v2621_v51 = vld [vmem:[%s4042_s3 + $0x2e8] sm:$0xff] }
  0x56   : > { %v3257_v16 = vld [vmem:[#allocation2 + $0x50] sm:$0xff]  ;;  %2098 = vmatpush.msra.mxu0 %v2639_v20  ;;  %1712 = vmatpush.msra.mxu2 %v2605_v27  ;;  %v935_v33 = vld [vmem:[#allocation2 + $0x1] sm:$0xff] }
  0x57   : > { %v3268_v28 = vld [vmem:[#allocation2 + $0x180] sm:$0xff]  ;;  %v2638_v20 = vld [vmem:[%s4042_s3 + $0x470] sm:$0xff]  ;;  %1906 = vmatpush.msra.mxu3 %v2621_v51  ;;  %v2637_v27 = vld [vmem:[%s4042_s3 + $0x468] sm:$0xff] }
  0x58   : > { %611 = vmatmul.f32.gmra.mxu3 %v3186_v9  ;;  %v3270_v29 = vld [vmem:[#allocation2 + $0xc8] sm:$0xff]  ;;  %2099 = vmatpush.msra.mxu0 %v2638_v20 }
  0x59   : > { %566 = vmatmul.f32.gmra.mxu1 %v3188_v10  ;;  %v3272_v30 = vld [vmem:[#allocation2 + $0x128] sm:$0xff] }
  0x5a   : > { %v3275_v31 = vld [vmem:[#allocation2 + $0x60] sm:$0xff]  ;;  %v936_v20 = vld [vmem:[#allocation2 + $0x9] sm:$0xff]  ;;  %2100 = vmatpush.msra.mxu0 %v2637_v27 }
  0x5b   : > { %590 = vmatmul.f32.gmra.mxu2 %v3190_v12  ;;  %539 = vmatmul.f32.gmra.mxu0 %v3196_v15  ;;  %v3286_v53 = vld [vmem:[#allocation2 + $0x188] sm:$0xff] }
  0x5c   : > { %v3289_v60 = vld [vmem:[#allocation2 + $0x68] sm:$0xff] }
  0x5d   : > { %v2585_v27 = vld [vmem:[%s4042_s3 + $0x3c8] sm:$0xff] }
  0x60   : > { %614 = vmatmul.f32.gmra.mxu3 %v3226_v34 }
  0x61   : > { %569 = vmatmul.f32.gmra.mxu1 %v3228_v37 }
  0x63   : > { %593 = vmatmul.f32.gmra.mxu2 %v3230_v38  ;;  %542 = vmatmul.f32.gmra.mxu0 %v3232_v50 }
  0x68   : > { %617 = vmatmul.f32.gmra.mxu3 %v3250_v1 }
  0x69   : > { %572 = vmatmul.f32.gmra.mxu1 %v3252_v5 }
  0x6b   : > { %596 = vmatmul.f32.gmra.mxu2 %v3255_v7  ;;  %545 = vmatmul.f32.gmra.mxu0 %v3257_v16 }
  0x70   : > { %620 = vmatmul.f32.gmra.mxu3 %v3268_v28 }
  0x71   : > { %575 = vmatmul.f32.gmra.mxu1 %v3270_v29 }
  0x73   : > { %599 = vmatmul.f32.gmra.mxu2 %v3272_v30  ;;  %548 = vmatmul.f32.gmra.mxu0 %v3275_v31 }
  0x78   : > { %623 = vmatmul.f32.gmra.mxu3 %v3286_v53 }
  0x79   : > { %643 = vmatmul.f32.vlgmr.msrb.gmra.mxu1 %v344_v57  ;;  %v2589_v57 = vld [vmem:[%s4042_s3 + $0x3e8] sm:$0xff] }
  0x7a   : > { %1446 = vmatpush.msra.mxu1 %v2589_v57 }
  0x7b   : > { %806 = vmatmul.f32.vlgmr.msrb.gmra.mxu2 %v3141_v48  ;;  %551 = vmatmul.f32.gmra.mxu0 %v3289_v60 }
  0x80   : > { %1072 = vmatmul.f32.vlgmr.msrb.gmra.mxu3 %v935_v33  ;;  %v2620_v33 = vld [vmem:[%s4042_s3 + $0x2e0] sm:$0xff] }
  0x81   : > { %646 = vmatmul.f32.gmra.mxu1 %v2734_v2  ;;  %v2604_v2 = vld [vmem:[%s4042_s3 + $0x160] sm:$0xff]  ;;  %1907 = vmatpush.msra.mxu3 %v2620_v33 }
  0x82   : > { %1713 = vmatpush.msra.mxu2 %v2604_v2 }
  0x83   : > { %809 = vmatmul.f32.gmra.mxu2 %v3196_v15  ;;  %1266 = vmatmul.f32.vlgmr.msrb.gmra.mxu0 %v2961_v46 }
  0x88   : > { %1075 = vmatmul.f32.gmra.mxu3 %v936_v20 }
  0x89   : > { %649 = vmatmul.f32.gmra.mxu1 %v3041_v11  ;;  %v2588_v11 = vld [vmem:[%s4042_s3 + $0x3e0] sm:$0xff] }
  0x8a   : > { %1447 = vmatpush.msra.mxu1 %v2588_v11 }
  0x8b   : > { %812 = vmatmul.f32.gmra.mxu2 %v3232_v50  ;;  %1269 = vmatmul.f32.gmra.mxu0 %v3001_v59 }
  0x90   : > { %1078 = vmatmul.f32.gmra.mxu3 %v2961_v46  ;;  %v2636_v46 = vld [vmem:[%s4042_s3 + $0x460] sm:$0xff] }
  0x91   : > { %652 = vmatmul.f32.gmra.mxu1 %v3085_v26  ;;  %2101 = vmatpush.msra.mxu0 %v2636_v46  ;;  %v2603_v26 = vld [vmem:[%s4042_s3 + $0x158] sm:$0xff] }
  0x92   : > { %1714 = vmatpush.msra.mxu2 %v2603_v26  ;;  %v2600_v26 = vld [vmem:[%s4042_s3 + $0x140] sm:$0xff] }
  0x93   : > { %815 = vmatmul.f32.gmra.mxu2 %v3257_v16  ;;  %1272 = vmatmul.f32.gmra.mxu0 %v3016_v0 }
  0x98   : > { %1081 = vmatmul.f32.gmra.mxu3 %v3001_v59  ;;  %v2619_v59 = vld [vmem:[%s4042_s3 + $0x2d8] sm:$0xff] }
  0x99   : > { %655 = vmatmul.f32.gmra.mxu1 %v3141_v48  ;;  %v2587_v48 = vld [vmem:[%s4042_s3 + $0x3d8] sm:$0xff]  ;;  %1908 = vmatpush.msra.mxu3 %v2619_v59 }
  0x9a   : > { %1448 = vmatpush.msra.mxu1 %v2587_v48 }
  0x9b   : > { %818 = vmatmul.f32.gmra.mxu2 %v3275_v31  ;;  %1275 = vmatmul.f32.gmra.mxu0 %v3063_v17 }
  0xa0   : > { %1084 = vmatmul.f32.gmra.mxu3 %v3016_v0  ;;  %v2635_v0 = vld [vmem:[%s4042_s3 + $0x458] sm:$0xff] }
  0xa1   : > { %658 = vmatmul.f32.gmra.mxu1 %v3196_v15  ;;  %2102 = vmatpush.msra.mxu0 %v2635_v0  ;;  %v2602_v15 = vld [vmem:[%s4042_s3 + $0x150] sm:$0xff]  ;;  %v2584_v0 = vld [vmem:[%s4042_s3 + $0x3c0] sm:$0xff] }
  0xa2   : > { %1715 = vmatpush.msra.mxu2 %v2602_v15 }
  0xa3   : > { %821 = vmatmul.f32.gmra.mxu2 %v3289_v60  ;;  %1278 = vmatmul.f32.gmra.mxu0 %v3082_v25 }
  0xa8   : > { %1087 = vmatmul.f32.gmra.mxu3 %v3063_v17  ;;  %v2618_v17 = vld [vmem:[%s4042_s3 + $0x2d0] sm:$0xff]  ;;  %v3367_v51 = vpop.f32.mrf.mxu1 }
  0xa9   : > { %661 = vmatmul.f32.gmra.mxu1 %v3232_v50  ;;  %v2586_v50 = vld [vmem:[%s4042_s3 + $0x3d0] sm:$0xff]  ;;  %1909 = vmatpush.msra.mxu3 %v2618_v17 }
  0xaa   : > { %1449 = vmatpush.msra.mxu1 %v2586_v50 }
  0xab   : > { %824 = vmatmul.f32.gmra.mxu2 %v2862_v18  ;;  %1281 = vmatmul.f32.gmra.mxu0 %v3125_v39 }
  0xac   : > { %1450 = vmatpush.msra.mxu1 %v2585_v27 }
  0xae   : > { %1451 = vmatpush.msra.mxu1 %v2584_v0 }
  0xb0   : > { %1090 = vmatmul.f32.gmra.mxu3 %v3082_v25  ;;  %v2634_v25 = vld [vmem:[%s4042_s3 + $0x450] sm:$0xff] }
  0xb1   : > { %664 = vmatmul.f32.gmra.mxu1 %v3257_v16  ;;  %2103 = vmatpush.msra.mxu0 %v2634_v25  ;;  %v2601_v16 = vld [vmem:[%s4042_s3 + $0x148] sm:$0xff] }
  0xb2   : > { %1716 = vmatpush.msra.mxu2 %v2601_v16  ;;  %v2599_v16 = vld [vmem:[%s4042_s3 + $0x138] sm:$0xff] }
  0xb3   : > { %827 = vmatmul.f32.gmra.mxu2 %v3020_v3  ;;  %1284 = vmatmul.f32.gmra.mxu0 %v3156_v52 }
  0xb4   : > { %1717 = vmatpush.msra.mxu2 %v2600_v26 }
  0xb6   : > { %1718 = vmatpush.msra.mxu2 %v2599_v16 }
  0xb8   : > { %1093 = vmatmul.f32.gmra.mxu3 %v3125_v39 }
  0xb9   : > { %667 = vmatmul.f32.gmra.mxu1 %v3275_v31  ;;  %v2617_v31 = vld [vmem:[%s4042_s3 + $0x2c8] sm:$0xff] }
  0xba   : > { %1910 = vmatpush.msra.mxu3 %v2617_v31 }
  0xbb   : > { %830 = vmatmul.f32.gmra.mxu2 %v3069_v21  ;;  %1287 = vmatmul.f32.gmra.mxu0 %v3193_v13 }
  0xbe   : > { %v3379_v57 = vpop.f32.mrf.mxu2  ;;  %v3381_v20 = vpop.f32.mrf.mxu1 }
  0xc0   : > { %1096 = vmatmul.f32.gmra.mxu3 %v3156_v52  ;;  %v3384_v39 = vpop.f32.mrf.mxu0 }
  0xc1   : > { %670 = vmatmul.f32.gmra.mxu1 %v3289_v60  ;;  %v2633_v60 = vld [vmem:[%s4042_s3 + $0x448] sm:$0xff] }
  0xc2   : > { %2104 = vmatpush.msra.mxu0 %v2633_v60  ;;  %v2583_v60 = vld [vmem:[%s4042_s3 + $0x3b8] sm:$0xff] }
  0xc3   : > { %v3393_v2 = vpop.f32.mrf.mxu3  ;;  %833 = vmatmul.f32.gmra.mxu2 %v3133_v42  ;;  %1290 = vmatmul.f32.gmra.mxu0 %v2804_v6 }
  0xc4   : > { %4045 = vst [vmem:[#allocation4_spill] sm:$0xff] %v3393_v2  ;;  %1452 = vmatpush.msra.mxu1 %v2583_v60 }
  0xc6   : > { %v3397_v52 = vpop.f32.mrf.mxu2  ;;  %v3399_v33 = vpop.f32.mrf.mxu1 }
  0xc8   : > { %1099 = vmatmul.f32.gmra.mxu3 %v3193_v13  ;;  %v3402_v11 = vpop.f32.mrf.mxu0 }
  0xc9   : > { %673 = vmatmul.f32.gmra.mxu1 %v2862_v18  ;;  %v2616_v18 = vld [vmem:[%s4042_s3 + $0x2c0] sm:$0xff] }
  0xca   : > { %1911 = vmatpush.msra.mxu3 %v2616_v18 }
  0xcb   : > { %v3408_v46 = vpop.f32.mrf.mxu3  ;;  %836 = vmatmul.f32.gmra.mxu2 %v3188_v10  ;;  %1293 = vmatmul.f32.gmra.mxu0 %v2954_v44 }
  0xcc   : > { %4046 = vst [vmem:[#allocation5_spill] sm:$0xff] %v3408_v46 }
  0xce   : > { %v3415_v13 = vpop.f32.mrf.mxu2  ;;  %v3417_v59 = vpop.f32.mrf.mxu1 }
  0xd0   : > { %1102 = vmatmul.f32.gmra.mxu3 %v2804_v6  ;;  %v3420_v48 = vpop.f32.mrf.mxu0 }
  0xd1   : > { %676 = vmatmul.f32.gmra.mxu1 %v3020_v3  ;;  %v2632_v3 = vld [vmem:[%s4042_s3 + $0x440] sm:$0xff] }
  0xd2   : > { %2105 = vmatpush.msra.mxu0 %v2632_v3 }
  0xd3   : > { %v3429_v15 = vpop.f32.mrf.mxu3  ;;  %839 = vmatmul.f32.gmra.mxu2 %v3228_v37  ;;  %1296 = vmatmul.f32.gmra.mxu0 %v2987_v55 }
  0xd4   : > { %4047 = vst [vmem:[#allocation6_spill] sm:$0xff] %v3429_v15 }
  0xd6   : > { %v3433_v6 = vpop.f32.mrf.mxu2  ;;  %v3435_v17 = vpop.f32.mrf.mxu1 }
  0xd8   : > { %1105 = vmatmul.f32.gmra.mxu3 %v2954_v44  ;;  %v3438_v50 = vpop.f32.mrf.mxu0 }
  0xd9   : > { %679 = vmatmul.f32.gmra.mxu1 %v3069_v21  ;;  %v2615_v21 = vld [vmem:[%s4042_s3 + $0x2b8] sm:$0xff] }
  0xda   : > { %1912 = vmatpush.msra.mxu3 %v2615_v21 }
  0xdb   : > { %v3444_v25 = vpop.f32.mrf.mxu3  ;;  %842 = vmatmul.f32.gmra.mxu2 %v3252_v5  ;;  %1299 = vmatmul.f32.gmra.mxu0 %v3007_v61 }
  0xdc   : > { %4048 = vst [vmem:[#allocation7_spill] sm:$0xff] %v3444_v25  ;;  %v2630_v25 = vld [vmem:[%s4042_s3 + $0x430] sm:$0xff] }
  0xde   : > { %v3451_v44 = vpop.f32.mrf.mxu2  ;;  %v3453_v31 = vpop.f32.mrf.mxu1 }
  0xe0   : > { %1108 = vmatmul.f32.gmra.mxu3 %v2987_v55  ;;  %v3456_v27 = vpop.f32.mrf.mxu0 }
  0xe1   : > { %682 = vmatmul.f32.gmra.mxu1 %v3133_v42  ;;  %v2631_v42 = vld [vmem:[%s4042_s3 + $0x438] sm:$0xff] }
  0xe2   : > { %2106 = vmatpush.msra.mxu0 %v2631_v42  ;;  %v2582_v42 = vld [vmem:[%s4042_s3 + $0x3b0] sm:$0xff] }
  0xe3   : > { %v3465_v26 = vpop.f32.mrf.mxu3  ;;  %845 = vmatmul.f32.gmra.mxu2 %v3270_v29  ;;  %1302 = vmatmul.f32.gmra.mxu0 %v3023_v4 }
  0xe4   : > { %4049 = vst [vmem:[#allocation8_spill] sm:$0xff] %v3465_v26  ;;  %1453 = vmatpush.msra.mxu1 %v2582_v42  ;;  %2107 = vmatpush.msra.mxu0 %v2630_v25  ;;  %v2613_v25 = vld [vmem:[%s4042_s3 + $0x2a8] sm:$0xff] }
  0xe6   : > { %v3469_v55 = vpop.f32.mrf.mxu2  ;;  %v3471_v18 = vpop.f32.mrf.mxu1 }
  0xe8   : > { %1111 = vmatmul.f32.gmra.mxu3 %v3007_v61  ;;  %v3474_v0 = vpop.f32.mrf.mxu0  ;;  %v2598_v61 = vld [vmem:[%s4042_s3 + $0x130] sm:$0xff] }
  0xe9   : > { %685 = vmatmul.f32.gmra.mxu1 %v3188_v10  ;;  %1719 = vmatpush.msra.mxu2 %v2598_v61  ;;  %v2614_v10 = vld [vmem:[%s4042_s3 + $0x2b0] sm:$0xff] }
  0xea   : > { %1913 = vmatpush.msra.mxu3 %v2614_v10 }
  0xeb   : > { %v3480_v3 = vpop.f32.mrf.mxu3  ;;  %848 = vmatmul.f32.gmra.mxu2 %v2983_v54  ;;  %1305 = vmatmul.f32.gmra.mxu0 %v3073_v22 }
  0xec   : > { %4050 = vst [vmem:[#allocation9_spill] sm:$0xff] %v3480_v3  ;;  %1914 = vmatpush.msra.mxu3 %v2613_v25  ;;  %v2596_v25 = vld [vmem:[%s4042_s3 + $0x120] sm:$0xff] }
  0xee   : > { %v3484_v16 = vpop.f32.mrf.mxu2  ;;  %v3486_v21 = vpop.f32.mrf.mxu1 }
  0xf0   : > { %1114 = vmatmul.f32.gmra.mxu3 %v3023_v4  ;;  %v3492_v60 = vpop.f32.mrf.mxu0 }
  0xf1   : > { %688 = vmatmul.f32.gmra.mxu1 %v3228_v37 }
  0xf3   : > { %v3501_v3 = vpop.f32.mrf.mxu3  ;;  %851 = vmatmul.f32.gmra.mxu2 %v3032_v8  ;;  %1308 = vmatmul.f32.gmra.mxu0 %v3110_v35 }
  0xf4   : > { %4051 = vst [vmem:[#allocation10_spill] sm:$0xff] %v3501_v3 }
  0xf6   : > { %v3505_v4 = vpop.f32.mrf.mxu2  ;;  %v644_v61 = vpop.f32.mrf.mxu1 }
  0xf7   : > { %v645_v10 = vadd.f32 %v644_v61, %v3384_v39 }
  0xf8   : > { %1117 = vmatmul.f32.gmra.mxu3 %v3073_v22  ;;  %v3508_v26 = vpop.f32.mrf.mxu0  ;;  %v2597_v22 = vld [vmem:[%s4042_s3 + $0x128] sm:$0xff] }
  0xf9   : > { %691 = vmatmul.f32.gmra.mxu1 %v3252_v5  ;;  %1720 = vmatpush.msra.mxu2 %v2597_v22 }
  0xfb   : > { %v3514_v37 = vpop.f32.mrf.mxu3  ;;  %854 = vmatmul.f32.gmra.mxu2 %v3075_v23  ;;  %1311 = vmatmul.f32.gmra.mxu0 %v3137_v43 }
  0xfc   : > { %4052 = vst [vmem:[#allocation11_spill] sm:$0xff] %v3514_v37  ;;  %v2581_v37 = vld [vmem:[%s4042_s3 + $0x3a8] sm:$0xff]  ;;  %1721 = vmatpush.msra.mxu2 %v2596_v25  ;;  %v2595_v25 = vld [vmem:[%s4042_s3 + $0x118] sm:$0xff] }
  0xfd   : > { %1454 = vmatpush.msra.mxu1 %v2581_v37 }
  0xfe   : > { %v807_v42 = vpop.f32.mrf.mxu2  ;;  %v647_v3 = vpop.f32.mrf.mxu1  ;;  %1722 = vmatpush.msra.mxu2 %v2595_v25 }
  0xff   : > { %v903_v15 = vadd.f32 %v807_v42, %v645_v10 }
 0x100   : > { %1120 = vmatmul.f32.gmra.mxu3 %v3110_v35  ;;  %v1267_v5 = vpop.f32.mrf.mxu0  ;;  %v648_v35 = vadd.f32 %v647_v3, %v3402_v11 }
 0x101   : > { %694 = vmatmul.f32.gmra.mxu1 %v3270_v29  ;;  %v2629_v29 = vld [vmem:[%s4042_s3 + $0x428] sm:$0xff] }
 0x102   : > { %2108 = vmatpush.msra.mxu0 %v2629_v29 }
 0x103   : > { %v1073_v39 = vpop.f32.mrf.mxu3  ;;  %857 = vmatmul.f32.gmra.mxu2 %v3139_v47  ;;  %1314 = vmatmul.f32.gmra.mxu0 %v2914_v32 }
 0x104   : > { %v1169_v61 = vadd.f32 %v1073_v39, %v903_v15 }
 0x106   : > { %v3533_v10 = vadd.f32 %v1267_v5, %v1169_v61  ;;  %v810_v42 = vpop.f32.mrf.mxu2  ;;  %v650_v22 = vpop.f32.mrf.mxu1  ;;  %v2612_v61 = vld [vmem:[%s4042_s3 + $0x2a0] sm:$0xff] }
 0x107   : > { %v904_v46 = vadd.f32 %v810_v42, %v648_v35  ;;  %v651_v15 = vadd.f32 %v650_v22, %v3420_v48  ;;  %1915 = vmatpush.msra.mxu3 %v2612_v61 }
 0x108   : > { %1123 = vmatmul.f32.gmra.mxu3 %v3137_v43  ;;  %v1270_v2 = vpop.f32.mrf.mxu0 }
 0x109   : > { %697 = vmatmul.f32.gmra.mxu1 %v2983_v54 }
 0x10b   : > { %v1076_v37 = vpop.f32.mrf.mxu3  ;;  %860 = vmatmul.f32.gmra.mxu2 %v3190_v12  ;;  %1317 = vmatmul.f32.gmra.mxu0 %v2958_v45 }
 0x10c   : > { %v1170_v11 = vadd.f32 %v1076_v37, %v904_v46 }
 0x10e   : > { %v3543_v3 = vadd.f32 %v1270_v2, %v1170_v11  ;;  %v813_v5 = vpop.f32.mrf.mxu2  ;;  %v653_v43 = vpop.f32.mrf.mxu1  ;;  %v2580_v2 = vld [vmem:[%s4042_s3 + $0x3a0] sm:$0xff] }
 0x10f   : > { %v905_v39 = vadd.f32 %v813_v5, %v651_v15  ;;  %1455 = vmatpush.msra.mxu1 %v2580_v2 }
 0x110   : > { %1126 = vmatmul.f32.gmra.mxu3 %v2914_v32  ;;  %v1273_v54 = vpop.f32.mrf.mxu0  ;;  %v654_v32 = vadd.f32 %v653_v43, %v3438_v50 }
 0x111   : > { %700 = vmatmul.f32.gmra.mxu1 %v3032_v8  ;;  %v2628_v8 = vld [vmem:[%s4042_s3 + $0x420] sm:$0xff] }
 0x112   : > { %2109 = vmatpush.msra.mxu0 %v2628_v8 }
 0x113   : > { %v1079_v46 = vpop.f32.mrf.mxu3  ;;  %863 = vmatmul.f32.gmra.mxu2 %v3230_v38  ;;  %1320 = vmatmul.f32.gmra.mxu0 %v2992_v56 }
 0x114   : > { %v1171_v48 = vadd.f32 %v1079_v46, %v905_v39 }
 0x116   : > { %v3559_v35 = vadd.f32 %v1273_v54, %v1171_v48  ;;  %v816_v42 = vpop.f32.mrf.mxu2  ;;  %v656_v22 = vpop.f32.mrf.mxu1  ;;  %v2611_v54 = vld [vmem:[%s4042_s3 + $0x298] sm:$0xff] }
 0x117   : > { %v906_v29 = vadd.f32 %v816_v42, %v654_v32  ;;  %v657_v15 = vadd.f32 %v656_v22, %v3456_v27  ;;  %v2579_v27 = vld [vmem:[%s4042_s3 + $0x398] sm:$0xff]  ;;  %1916 = vmatpush.msra.mxu3 %v2611_v54 }
 0x118   : > { %1129 = vmatmul.f32.gmra.mxu3 %v2958_v45  ;;  %v1276_v37 = vpop.f32.mrf.mxu0  ;;  %1456 = vmatpush.msra.mxu1 %v2579_v27 }
 0x119   : > { %703 = vmatmul.f32.gmra.mxu1 %v3075_v23 }
 0x11b   : > { %v1082_v11 = vpop.f32.mrf.mxu3  ;;  %866 = vmatmul.f32.gmra.mxu2 %v3255_v7  ;;  %1323 = vmatmul.f32.gmra.mxu0 %v3010_v62 }
 0x11c   : > { %v1172_v50 = vadd.f32 %v1082_v11, %v906_v29 }
 0x11e   : > { %v3569_v5 = vadd.f32 %v1276_v37, %v1172_v50  ;;  %v819_v43 = vpop.f32.mrf.mxu2  ;;  %v659_v45 = vpop.f32.mrf.mxu1  ;;  %v2594_v50 = vld [vmem:[%s4042_s3 + $0x110] sm:$0xff] }
 0x11f   : > { %v907_v39 = vadd.f32 %v819_v43, %v657_v15  ;;  %1723 = vmatpush.msra.mxu2 %v2594_v50  ;;  %v2610_v43 = vld [vmem:[%s4042_s3 + $0x290] sm:$0xff] }
 0x120   : > { %1132 = vmatmul.f32.gmra.mxu3 %v2992_v56  ;;  %v1279_v23 = vpop.f32.mrf.mxu0  ;;  %v660_v56 = vadd.f32 %v659_v45, %v3474_v0 }
 0x121   : > { %706 = vmatmul.f32.gmra.mxu1 %v3139_v47  ;;  %v2627_v47 = vld [vmem:[%s4042_s3 + $0x418] sm:$0xff]  ;;  %1917 = vmatpush.msra.mxu3 %v2610_v43  ;;  %v3642_v43 = vld [vmem:[#allocation2 + $0x141] sm:$0xff] }
 0x122   : > { %2110 = vmatpush.msra.mxu0 %v2627_v47  ;;  %v3627_v47 = vld [vmem:[#allocation2 + $0x139] sm:$0xff] }
 0x123   : > { %v1085_v61 = vpop.f32.mrf.mxu3  ;;  %869 = vmatmul.f32.gmra.mxu2 %v3272_v30  ;;  %1326 = vmatmul.f32.gmra.mxu0 %v3054_v14 }
 0x124   : > { %v1173_v2 = vadd.f32 %v1085_v61, %v907_v39 }
 0x126   : > { %v3585_v46 = vadd.f32 %v1279_v23, %v1173_v2  ;;  %v822_v48 = vpop.f32.mrf.mxu2  ;;  %v662_v32 = vpop.f32.mrf.mxu1 }
 0x127   : > { %v908_v42 = vadd.f32 %v822_v48, %v660_v56  ;;  %v663_v37 = vadd.f32 %v662_v32, %v3492_v60  ;;  %v2578_v60 = vld [vmem:[%s4042_s3 + $0x390] sm:$0xff] }
 0x128   : > { %1135 = vmatmul.f32.gmra.mxu3 %v3010_v62  ;;  %v1282_v22 = vpop.f32.mrf.mxu0  ;;  %1457 = vmatpush.msra.mxu1 %v2578_v60 }
 0x129   : > { %709 = vmatmul.f32.gmra.mxu1 %v3190_v12 }
 0x12b   : > { %v1088_v29 = vpop.f32.mrf.mxu3  ;;  %872 = vmatmul.f32.gmra.mxu2 %v3012_v63  ;;  %1329 = vmatmul.f32.gmra.mxu0 %v3079_v24 }
 0x12c   : > { %v1174_v0 = vadd.f32 %v1088_v29, %v908_v42  ;;  %v2593_v42 = vld [vmem:[%s4042_s3 + $0x108] sm:$0xff] }
 0x12d   : > { %1724 = vmatpush.msra.mxu2 %v2593_v42  ;;  %v2609_v29 = vld [vmem:[%s4042_s3 + $0x288] sm:$0xff] }
 0x12e   : > { %v3595_v8 = vadd.f32 %v1282_v22, %v1174_v0  ;;  %v825_v11 = vpop.f32.mrf.mxu2  ;;  %v665_v62 = vpop.f32.mrf.mxu1  ;;  %1918 = vmatpush.msra.mxu3 %v2609_v29 }
 0x12f   : > { %v909_v15 = vadd.f32 %v825_v11, %v663_v37 }
 0x130   : > { %1138 = vmatmul.f32.gmra.mxu3 %v3054_v14  ;;  %v1285_v12 = vpop.f32.mrf.mxu0  ;;  %v666_v14 = vadd.f32 %v665_v62, %v3508_v26 }
 0x131   : > { %712 = vmatmul.f32.gmra.mxu1 %v3230_v38  ;;  %v2626_v38 = vld [vmem:[%s4042_s3 + $0x410] sm:$0xff] }
 0x132   : > { %2111 = vmatpush.msra.mxu0 %v2626_v38 }
 0x133   : > { %v1091_v45 = vpop.f32.mrf.mxu3  ;;  %875 = vmatmul.f32.gmra.mxu2 %v3065_v19  ;;  %1332 = vmatmul.f32.gmra.mxu0 %v3116_v36 }
 0x134   : > { %v1175_v25 = vadd.f32 %v1091_v45, %v909_v15 }
 0x136   : > { %v3611_v39 = vadd.f32 %v1285_v12, %v1175_v25  ;;  %v828_v23 = vpop.f32.mrf.mxu2  ;;  %v668_v54 = vpop.f32.mrf.mxu1 }
 0x137   : > { %v910_v27 = vadd.f32 %v828_v23, %v666_v14  ;;  %v669_v56 = vadd.f32 %v668_v54, %v3367_v51  ;;  %v2577_v51 = vld [vmem:[%s4042_s3 + $0x388] sm:$0xff]  ;;  %v2592_v23 = vld [vmem:[%s4042_s3 + $0x100] sm:$0xff] }
 0x138   : > { %1141 = vmatmul.f32.gmra.mxu3 %v3079_v24  ;;  %v1288_v61 = vpop.f32.mrf.mxu0  ;;  %1458 = vmatpush.msra.mxu1 %v2577_v51 }
 0x139   : > { %715 = vmatmul.f32.gmra.mxu1 %v3255_v7  ;;  %1725 = vmatpush.msra.mxu2 %v2592_v23 }
 0x13b   : > { %v1094_v2 = vpop.f32.mrf.mxu3  ;;  %878 = vmatmul.f32.gmra.mxu2 %v3127_v40  ;;  %1335 = vmatmul.f32.gmra.mxu0 %v3145_v49 }
 0x13c   : > { %v1176_v26 = vadd.f32 %v1094_v2, %v910_v27  ;;  %v3657_v27 = vld [vmem:[#allocation2 + $0x151] sm:$0xff] }
 0x13e   : > { %v3621_v48 = vadd.f32 %v1288_v61, %v1176_v26  ;;  %v831_v32 = vpop.f32.mrf.mxu2  ;;  %v671_v24 = vpop.f32.mrf.mxu1  ;;  %v2608_v61 = vld [vmem:[%s4042_s3 + $0x280] sm:$0xff] }
 0x13f   : > { %v911_v7 = vadd.f32 %v831_v32, %v669_v56  ;;  %v672_v37 = vadd.f32 %v671_v24, %v3381_v20  ;;  %1919 = vmatpush.msra.mxu3 %v2608_v61 }
 0x140   : > { %1144 = vmatmul.f32.gmra.mxu3 %v3116_v36  ;;  %v1291_v22 = vpop.f32.mrf.mxu0 }
 0x141   : > { %718 = vmatmul.f32.gmra.mxu1 %v3272_v30  ;;  %v2625_v30 = vld [vmem:[%s4042_s3 + $0x408] sm:$0xff] }
 0x142   : > { %2112 = vmatpush.msra.mxu0 %v2625_v30 }
 0x143   : > { %v1097_v0 = vpop.f32.mrf.mxu3  ;;  %881 = vmatmul.f32.gmra.mxu2 %v3186_v9  ;;  %1338 = vmatmul.f32.gmra.mxu0 %v3627_v47 }
 0x144   : > { %v1177_v36 = vadd.f32 %v1097_v0, %v911_v7 }
 0x146   : > { %v3639_v11 = vadd.f32 %v1291_v22, %v1177_v36  ;;  %v834_v62 = vpop.f32.mrf.mxu2  ;;  %v674_v50 = vpop.f32.mrf.mxu1  ;;  %v3672_v22 = vld [vmem:[#allocation2 + $0x159] sm:$0xff] }
 0x147   : > { %v912_v15 = vadd.f32 %v834_v62, %v672_v37  ;;  %v675_v45 = vadd.f32 %v674_v50, %v3399_v33  ;;  %v2576_v33 = vld [vmem:[%s4042_s3 + $0x380] sm:$0xff] }
 0x148   : > { %1147 = vmatmul.f32.gmra.mxu3 %v3145_v49  ;;  %v1294_v12 = vpop.f32.mrf.mxu0  ;;  %1459 = vmatpush.msra.mxu1 %v2576_v33 }
 0x149   : > { %721 = vmatmul.f32.gmra.mxu1 %v3012_v63 }
 0x14b   : > { %v1100_v60 = vpop.f32.mrf.mxu3  ;;  %884 = vmatmul.f32.gmra.mxu2 %v3226_v34  ;;  %1341 = vmatmul.f32.gmra.mxu0 %v3642_v43 }
 0x14c   : > { %v1178_v20 = vadd.f32 %v1100_v60, %v912_v15  ;;  %v3684_v15 = vld [vmem:[#allocation2 + $0x169] sm:$0xff] }
 0x14e   : > { %v3651_v49 = vadd.f32 %v1294_v12, %v1178_v20  ;;  %v837_v25 = vpop.f32.mrf.mxu2  ;;  %v677_v14 = vpop.f32.mrf.mxu1 }
 0x14f   : > { %v913_v63 = vadd.f32 %v837_v25, %v675_v45  ;;  %v678_v26 = vadd.f32 %v677_v14, %v3417_v59  ;;  %v378_v25 = vld [vmem:[#allocation2 + $0x198] sm:$0xff] }
 0x150   : > { %1150 = vmatmul.f32.gmra.mxu3 %v3627_v47  ;;  %v1297_v54 = vpop.f32.mrf.mxu0  ;;  %v3693_v14 = vld [vmem:[#allocation2 + $0x171] sm:$0xff] }
 0x151   : > { %724 = vmatmul.f32.gmra.mxu1 %v3065_v19  ;;  %v2624_v19 = vld [vmem:[%s4042_s3 + $0x400] sm:$0xff] }
 0x152   : > { %2113 = vmatpush.msra.mxu0 %v2624_v19  ;;  %v1589_v19 = vld [vmem:[#allocation2 + $0x2] sm:$0xff] }
 0x153   : > { %v1103_v38 = vpop.f32.mrf.mxu3  ;;  %887 = vmatmul.f32.gmra.mxu2 %v3250_v1  ;;  %1344 = vmatmul.f32.gmra.mxu0 %v3657_v27 }
 0x154   : > { %v1179_v2 = vadd.f32 %v1103_v38, %v913_v63 }
 0x156   : > { %v3669_v56 = vadd.f32 %v1297_v54, %v1179_v2  ;;  %v840_v32 = vpop.f32.mrf.mxu2  ;;  %v680_v24 = vpop.f32.mrf.mxu1  ;;  %v2701_v2 = vld [vmem:[#allocation2 + $0x8] sm:$0xff] }
 0x157   : > { %v914_v42 = vadd.f32 %v840_v32, %v678_v26  ;;  %v681_v51 = vadd.f32 %v680_v24, %v3435_v17 }
 0x158   : > { %1153 = vmatmul.f32.gmra.mxu3 %v3642_v43  ;;  %v1300_v7 = vpop.f32.mrf.mxu0 }
 0x159   : > { %727 = vmatmul.f32.gmra.mxu1 %v3127_v40 }
 0x15b   : > { %v1106_v29 = vpop.f32.mrf.mxu3  ;;  %890 = vmatmul.f32.gmra.mxu2 %v3268_v28  ;;  %1347 = vmatmul.f32.gmra.mxu0 %v3672_v22 }
 0x15c   : > { %v1180_v59 = vadd.f32 %v1106_v29, %v914_v42  ;;  %v2702_v29 = vld [vmem:[#allocation2 + $0x31] sm:$0xff] }
 0x15e   : > { %v3681_v0 = vadd.f32 %v1300_v7, %v1180_v59  ;;  %v843_v36 = vpop.f32.mrf.mxu2  ;;  %v683_v37 = vpop.f32.mrf.mxu1 }
 0x15f   : > { %v915_v62 = vadd.f32 %v843_v36, %v681_v51  ;;  %v684_v17 = vadd.f32 %v683_v37, %v3453_v31 }
 0x160   : > { %1156 = vmatmul.f32.gmra.mxu3 %v3657_v27  ;;  %v1303_v50 = vpop.f32.mrf.mxu0 }
 0x161   : > { %730 = vmatmul.f32.gmra.mxu1 %v3186_v9 }
 0x163   : > { %v1109_v40 = vpop.f32.mrf.mxu3  ;;  %893 = vmatmul.f32.gmra.mxu2 %v3286_v53  ;;  %1350 = vmatmul.f32.gmra.mxu0 %v3684_v15 }
 0x164   : > { %v1181_v28 = vadd.f32 %v1109_v40, %v915_v62  ;;  %v1590_v40 = vld [vmem:[#allocation2 + $0xa] sm:$0xff] }
 0x166   : > { %v3690_v12 = vadd.f32 %v1303_v50, %v1181_v28  ;;  %v846_v30 = vpop.f32.mrf.mxu2  ;;  %v686_v60 = vpop.f32.mrf.mxu1  ;;  %v1593_v28 = vld [vmem:[#allocation2 + $0x32] sm:$0xff] }
 0x167   : > { %v916_v20 = vadd.f32 %v846_v30, %v684_v17  ;;  %v687_v31 = vadd.f32 %v686_v60, %v3471_v18  ;;  %v2703_v17 = vld [vmem:[#allocation2 + $0x39] sm:$0xff] }
 0x168   : > { %1159 = vmatmul.f32.gmra.mxu3 %v3672_v22  ;;  %v1306_v45 = vpop.f32.mrf.mxu0 }
 0x169   : > { %733 = vmatmul.f32.gmra.mxu1 %v3226_v34 }
 0x16b   : > { %v1112_v9 = vpop.f32.mrf.mxu3  ;;  %896 = vmatmul.f32.gmra.mxu2 %v378_v25  ;;  %1353 = vmatmul.f32.gmra.mxu0 %v3693_v14 }
 0x16c   : > { %v1182_v53 = vadd.f32 %v1112_v9, %v916_v20 }
 0x16e   : > { %v3698_v23 = vadd.f32 %v1306_v45, %v1182_v53  ;;  %v849_v63 = vpop.f32.mrf.mxu2  ;;  %v689_v54 = vpop.f32.mrf.mxu1 }
 0x16f   : > { %v917_v61 = vadd.f32 %v849_v63, %v687_v31  ;;  %v690_v26 = vadd.f32 %v689_v54, %v3486_v21  ;;  %v1594_v31 = vld [vmem:[#allocation2 + $0x3a] sm:$0xff]  ;;  %v2704_v63 = vld [vmem:[#allocation2 + $0x49] sm:$0xff] }
 0x170   : > { %1162 = vmatmul.f32.gmra.mxu3 %v3684_v15  ;;  %v1309_v33 = vpop.f32.mrf.mxu0 }
 0x171   : > { %736 = vmatmul.f32.gmra.mxu1 %v3250_v1 }
 0x173   : > { %v1115_v38 = vpop.f32.mrf.mxu3  ;;  %899 = vmatmul.f32.gmra.mxu2 %v2701_v2  ;;  %1356 = vmatmul.f32.gmra.mxu0 %v3131_v41  ;;  %v1591_v41 = vld [vmem:[#allocation2 + $0x1a] sm:$0xff] }
 0x174   : > { %v1183_v34 = vadd.f32 %v1115_v38, %v917_v61 }
 0x176   : > { %v3704_v32 = vadd.f32 %v1309_v33, %v1183_v34  ;;  %v852_v18 = vpop.f32.mrf.mxu2  ;;  %v692_v24 = vpop.f32.mrf.mxu1 }
 0x177   : > { %v918_v42 = vadd.f32 %v852_v18, %v690_v26  ;;  %v693_v51 = vadd.f32 %v692_v24, %v3379_v57  ;;  %v1595_v18 = vld [vmem:[#allocation2 + $0x4a] sm:$0xff] }
 0x178   : > { %1165 = vmatmul.f32.gmra.mxu3 %v3693_v14  ;;  %v1312_v7 = vpop.f32.mrf.mxu0  ;;  %v2705_v24 = vld [vmem:[#allocation2 + $0x51] sm:$0xff] }
 0x179   : > { %1460 = vmatmul.f32.vlgmr.msra.gmra.mxu1 %v2702_v29 }
 0x17b   : > { %v1118_v1 = vpop.f32.mrf.mxu3  ;;  %1726 = vmatmul.f32.vlgmr.msra.gmra.mxu2 %v1589_v19  ;;  %1359 = vmatmul.f32.gmra.mxu0 %v3167_v58  ;;  %v1592_v58 = vld [vmem:[#allocation2 + $0x22] sm:$0xff] }
 0x17c   : > { %v1184_v59 = vadd.f32 %v1118_v1, %v918_v42 }
 0x17e   : > { %v3709_v21 = vadd.f32 %v1312_v7, %v1184_v59  ;;  %v855_v36 = vpop.f32.mrf.mxu2  ;;  %v695_v37 = vpop.f32.mrf.mxu1 }
 0x17f   : > { %v919_v62 = vadd.f32 %v855_v36, %v693_v51  ;;  %v696_v20 = vadd.f32 %v695_v37, %v3397_v52  ;;  %v1596_v51 = vld [vmem:[#allocation2 + $0x52] sm:$0xff]  ;;  %v2706_v36 = vld [vmem:[#allocation2 + $0x61] sm:$0xff] }
 0x180   : > { %1920 = vmatmul.f32.vlgmr.msra.gmra.mxu3 %v1591_v41  ;;  %v1315_v50 = vpop.f32.mrf.mxu0 }
 0x181   : > { %1463 = vmatmul.f32.gmra.mxu1 %v2703_v17 }
 0x183   : > { %v1121_v30 = vpop.f32.mrf.mxu3  ;;  %1729 = vmatmul.f32.gmra.mxu2 %v1590_v40  ;;  %2114 = vmatmul.f32.vlgmr.msra.gmra.mxu0 %v1593_v28 }
 0x184   : > { %v1185_v60 = vadd.f32 %v1121_v30, %v919_v62 }
 0x186   : > { %v3712_v45 = vadd.f32 %v1315_v50, %v1185_v60  ;;  %v858_v57 = vpop.f32.mrf.mxu2  ;;  %v698_v25 = vpop.f32.mrf.mxu1 }
 0x187   : > { %v920_v9 = vadd.f32 %v858_v57, %v696_v20  ;;  %v699_v33 = vadd.f32 %v698_v25, %v3415_v13  ;;  %v2707_v20 = vld [vmem:[#allocation2 + $0x69] sm:$0xff] }
 0x188   : > { %1923 = vmatmul.f32.gmra.mxu3 %v1592_v58  ;;  %v1318_v53 = vpop.f32.mrf.mxu0 }
 0x189   : > { %1466 = vmatmul.f32.gmra.mxu1 %v2704_v63 }
 0x18b   : > { %v1124_v54 = vpop.f32.mrf.mxu3  ;;  %1732 = vmatmul.f32.gmra.mxu2 %v1591_v41  ;;  %2117 = vmatmul.f32.gmra.mxu0 %v1594_v31 }
 0x18c   : > { %v1186_v61 = vadd.f32 %v1124_v54, %v920_v9 }
 0x18e   : > { %v3715_v38 = vadd.f32 %v1318_v53, %v1186_v61  ;;  %v861_v2 = vpop.f32.mrf.mxu2  ;;  %v701_v52 = vpop.f32.mrf.mxu1  ;;  %v1598_v61 = vld [vmem:[#allocation2 + $0x6a] sm:$0xff] }
 0x18f   : > { %v921_v34 = vadd.f32 %v861_v2, %v699_v33  ;;  %v702_v19 = vadd.f32 %v701_v52, %v3433_v6  ;;  %v2708_v33 = vld [vmem:[#allocation2 + $0x79] sm:$0xff] }
 0x190   : > { %1926 = vmatmul.f32.gmra.mxu3 %v1593_v28  ;;  %v1321_v26 = vpop.f32.mrf.mxu0 }
 0x191   : > { %1469 = vmatmul.f32.gmra.mxu1 %v2705_v24 }
 0x193   : > { %v1127_v42 = vpop.f32.mrf.mxu3  ;;  %1735 = vmatmul.f32.gmra.mxu2 %v1592_v58  ;;  %2120 = vmatmul.f32.gmra.mxu0 %v1595_v18  ;;  %v1597_v58 = vld [vmem:[#allocation2 + $0x62] sm:$0xff] }
 0x194   : > { %v1187_v7 = vadd.f32 %v1127_v42, %v921_v34 }
 0x196   : > { %v3718_v29 = vadd.f32 %v1321_v26, %v1187_v7  ;;  %v864_v1 = vpop.f32.mrf.mxu2  ;;  %v704_v13 = vpop.f32.mrf.mxu1  ;;  %v1599_v7 = vld [vmem:[#allocation2 + $0x7a] sm:$0xff] }
 0x197   : > { %v922_v59 = vadd.f32 %v864_v1, %v702_v19  ;;  %v705_v50 = vadd.f32 %v704_v13, %v3451_v44  ;;  %v2709_v19 = vld [vmem:[#allocation2 + $0x81] sm:$0xff] }
 0x198   : > { %1929 = vmatmul.f32.gmra.mxu3 %v1594_v31  ;;  %v1324_v41 = vpop.f32.mrf.mxu0 }
 0x199   : > { %1472 = vmatmul.f32.gmra.mxu1 %v2706_v36 }
 0x19b   : > { %v1130_v37 = vpop.f32.mrf.mxu3  ;;  %1738 = vmatmul.f32.gmra.mxu2 %v1593_v28  ;;  %2123 = vmatmul.f32.gmra.mxu0 %v1596_v51 }
 0x19c   : > { %v1188_v62 = vadd.f32 %v1130_v37, %v922_v59 }
 0x19e   : > { %v3721_v40 = vadd.f32 %v1324_v41, %v1188_v62  ;;  %v867_v17 = vpop.f32.mrf.mxu2  ;;  %v707_v6 = vpop.f32.mrf.mxu1  ;;  %v1600_v62 = vld [vmem:[#allocation2 + $0x82] sm:$0xff] }
 0x19f   : > { %v923_v30 = vadd.f32 %v867_v17, %v705_v50  ;;  %v708_v28 = vadd.f32 %v707_v6, %v3469_v55  ;;  %v2710_v50 = vld [vmem:[#allocation2 + $0x91] sm:$0xff] }
 0x1a0   : > { %1932 = vmatmul.f32.gmra.mxu3 %v1595_v18  ;;  %v1327_v60 = vpop.f32.mrf.mxu0 }
 0x1a1   : > { %1475 = vmatmul.f32.gmra.mxu1 %v2707_v20 }
 0x1a3   : > { %v1133_v57 = vpop.f32.mrf.mxu3  ;;  %1741 = vmatmul.f32.gmra.mxu2 %v1594_v31  ;;  %2126 = vmatmul.f32.gmra.mxu0 %v1597_v58 }
 0x1a4   : > { %v1189_v25 = vadd.f32 %v1133_v57, %v923_v30  ;;  %v4053_v30 = vld [vmem:[#allocation4_spill] sm:$0xff] }
 0x1a6   : > { %v3724_v9 = vadd.f32 %v1327_v60, %v1189_v25  ;;  %v870_v53 = vpop.f32.mrf.mxu2  ;;  %v710_v44 = vpop.f32.mrf.mxu1 }
 0x1a7   : > { %v924_v63 = vadd.f32 %v870_v53, %v708_v28  ;;  %v711_v31 = vadd.f32 %v710_v44, %v3484_v16  ;;  %v1601_v28 = vld [vmem:[#allocation2 + $0x92] sm:$0xff] }
 0x1a8   : > { %1935 = vmatmul.f32.gmra.mxu3 %v1596_v51  ;;  %v1330_v54 = vpop.f32.mrf.mxu0  ;;  %v2711_v53 = vld [vmem:[#allocation2 + $0x99] sm:$0xff] }
 0x1a9   : > { %1478 = vmatmul.f32.gmra.mxu1 %v2708_v33 }
 0x1ab   : > { %v1136_v2 = vpop.f32.mrf.mxu3  ;;  %1744 = vmatmul.f32.gmra.mxu2 %v1595_v18  ;;  %2129 = vmatmul.f32.gmra.mxu0 %v1598_v61 }
 0x1ac   : > { %v1190_v52 = vadd.f32 %v1136_v2, %v924_v63 }
 0x1ae   : > { %v3727_v34 = vadd.f32 %v1330_v54, %v1190_v52  ;;  %v873_v26 = vpop.f32.mrf.mxu2  ;;  %v713_v55 = vpop.f32.mrf.mxu1  ;;  %v4054_v54 = vld [vmem:[#allocation5_spill] sm:$0xff] }
 0x1af   : > { %v925_v24 = vadd.f32 %v873_v26, %v711_v31  ;;  %v714_v18 = vadd.f32 %v713_v55, %v3505_v4  ;;  %v1602_v55 = vld [vmem:[#allocation2 + $0x9a] sm:$0xff] }
 0x1b0   : > { %1938 = vmatmul.f32.gmra.mxu3 %v1597_v58  ;;  %v1333_v42 = vpop.f32.mrf.mxu0 }
 0x1b1   : > { %1481 = vmatmul.f32.gmra.mxu1 %v2709_v19 }
 0x1b3   : > { %v1139_v1 = vpop.f32.mrf.mxu3  ;;  %1747 = vmatmul.f32.gmra.mxu2 %v1596_v51  ;;  %2132 = vmatmul.f32.gmra.mxu0 %v1599_v7 }
 0x1b4   : > { %v1191_v13 = vadd.f32 %v1139_v1, %v925_v24  ;;  %v2712_v24 = vld [vmem:[#allocation2 + $0xa9] sm:$0xff]  ;;  %v4055_v1 = vld [vmem:[#allocation6_spill] sm:$0xff] }
 0x1b6   : > { %v3730_v59 = vadd.f32 %v1333_v42, %v1191_v13  ;;  %v876_v41 = vpop.f32.mrf.mxu2  ;;  %v716_v16 = vpop.f32.mrf.mxu1 }
 0x1b7   : > { %v926_v36 = vadd.f32 %v876_v41, %v714_v18  ;;  %v717_v51 = vadd.f32 %v716_v16, %v4053_v30  ;;  %v4056_v30 = vld [vmem:[#allocation7_spill] sm:$0xff] }
 0x1b8   : > { %1941 = vmatmul.f32.gmra.mxu3 %v1598_v61  ;;  %v1336_v37 = vpop.f32.mrf.mxu0 }
 0x1b9   : > { %1484 = vmatmul.f32.gmra.mxu1 %v2710_v50  ;;  %v2713_v50 = vld [vmem:[#allocation2 + $0xb1] sm:$0xff] }
 0x1bb   : > { %v1142_v17 = vpop.f32.mrf.mxu3  ;;  %1750 = vmatmul.f32.gmra.mxu2 %v1597_v58  ;;  %2135 = vmatmul.f32.gmra.mxu0 %v1600_v62 }
 0x1bc   : > { %v1192_v6 = vadd.f32 %v1142_v17, %v926_v36 }
 0x1be   : > { %v3733_v60 = vadd.f32 %v1336_v37, %v1192_v6  ;;  %v879_v20 = vpop.f32.mrf.mxu2  ;;  %v719_v4 = vpop.f32.mrf.mxu1  ;;  %v1603_v37 = vld [vmem:[#allocation2 + $0xaa] sm:$0xff] }
 0x1bf   : > { %v927_v57 = vadd.f32 %v879_v20, %v717_v51  ;;  %v720_v58 = vadd.f32 %v719_v4, %v4054_v54 }
 0x1c0   : > { %1944 = vmatmul.f32.gmra.mxu3 %v1599_v7  ;;  %v1339_v25 = vpop.f32.mrf.mxu0 }
 0x1c1   : > { %1487 = vmatmul.f32.gmra.mxu1 %v2711_v53  ;;  %v1604_v53 = vld [vmem:[#allocation2 + $0xb2] sm:$0xff] }
 0x1c3   : > { %v1145_v44 = vpop.f32.mrf.mxu3  ;;  %1753 = vmatmul.f32.gmra.mxu2 %v1598_v61  ;;  %2138 = vmatmul.f32.gmra.mxu0 %v1601_v28 }
 0x1c4   : > { %v1193_v63 = vadd.f32 %v1145_v44, %v927_v57  ;;  %v2714_v44 = vld [vmem:[#allocation2 + $0xc1] sm:$0xff] }
 0x1c6   : > { %v3736_v33 = vadd.f32 %v1339_v25, %v1193_v63  ;;  %v882_v2 = vpop.f32.mrf.mxu2  ;;  %v722_v52 = vpop.f32.mrf.mxu1 }
 0x1c7   : > { %v928_v31 = vadd.f32 %v882_v2, %v720_v58  ;;  %v723_v61 = vadd.f32 %v722_v52, %v4055_v1  ;;  %v4057_v58 = vld [vmem:[#allocation8_spill] sm:$0xff] }
 0x1c8   : > { %1947 = vmatmul.f32.gmra.mxu3 %v1600_v62  ;;  %v1342_v26 = vpop.f32.mrf.mxu0 }
 0x1c9   : > { %1490 = vmatmul.f32.gmra.mxu1 %v2712_v24 }
 0x1cb   : > { %v1148_v42 = vpop.f32.mrf.mxu3  ;;  %1756 = vmatmul.f32.gmra.mxu2 %v1599_v7  ;;  %2141 = vmatmul.f32.gmra.mxu0 %v1602_v55 }
 0x1cc   : > { %v1194_v19 = vadd.f32 %v1148_v42, %v928_v31  ;;  %v1605_v42 = vld [vmem:[#allocation2 + $0xc2] sm:$0xff] }
 0x1ce   : > { %v3739_v13 = vadd.f32 %v1342_v26, %v1194_v19  ;;  %v885_v18 = vpop.f32.mrf.mxu2  ;;  %v725_v41 = vpop.f32.mrf.mxu1  ;;  %v2715_v19 = vld [vmem:[#allocation2 + $0xc9] sm:$0xff] }
 0x1cf   : > { %v929_v16 = vadd.f32 %v885_v18, %v723_v61  ;;  %v726_v7 = vadd.f32 %v725_v41, %v4056_v30  ;;  %v4058_v18 = vld [vmem:[#allocation9_spill] sm:$0xff] }
 0x1d0   : > { %1950 = vmatmul.f32.gmra.mxu3 %v1601_v28  ;;  %v1345_v36 = vpop.f32.mrf.mxu0  ;;  %v2716_v30 = vld [vmem:[#allocation2 + $0xd9] sm:$0xff] }
 0x1d1   : > { %1493 = vmatmul.f32.gmra.mxu1 %v2713_v50 }
 0x1d3   : > { %v1151_v17 = vpop.f32.mrf.mxu3  ;;  %1759 = vmatmul.f32.gmra.mxu2 %v1600_v62  ;;  %2144 = vmatmul.f32.gmra.mxu0 %v1603_v37 }
 0x1d4   : > { %v1195_v6 = vadd.f32 %v1151_v17, %v929_v16 }
 0x1d6   : > { %v3742_v51 = vadd.f32 %v1345_v36, %v1195_v6  ;;  %v888_v20 = vpop.f32.mrf.mxu2  ;;  %v728_v4 = vpop.f32.mrf.mxu1  ;;  %v1606_v6 = vld [vmem:[#allocation2 + $0xca] sm:$0xff] }
 0x1d7   : > { %v930_v57 = vadd.f32 %v888_v20, %v726_v7  ;;  %v729_v62 = vadd.f32 %v728_v4, %v4057_v58  ;;  %v4059_v4 = vld [vmem:[#allocation10_spill] sm:$0xff] }
 0x1d8   : > { %1953 = vmatmul.f32.gmra.mxu3 %v1602_v55  ;;  %v1348_v25 = vpop.f32.mrf.mxu0  ;;  %v1607_v58 = vld [vmem:[#allocation2 + $0xda] sm:$0xff] }
 0x1d9   : > { %1496 = vmatmul.f32.gmra.mxu1 %v2714_v44 }
 0x1db   : > { %v1154_v63 = vpop.f32.mrf.mxu3  ;;  %1762 = vmatmul.f32.gmra.mxu2 %v1601_v28  ;;  %2147 = vmatmul.f32.gmra.mxu0 %v1604_v53 }
 0x1dc   : > { %v1196_v54 = vadd.f32 %v1154_v63, %v930_v57 }
 0x1de   : > { %v3745_v2 = vadd.f32 %v1348_v25, %v1196_v54  ;;  %v891_v52 = vpop.f32.mrf.mxu2  ;;  %v731_v31 = vpop.f32.mrf.mxu1 }
 0x1df   : > { %v931_v26 = vadd.f32 %v891_v52, %v729_v62  ;;  %v732_v28 = vadd.f32 %v731_v31, %v4058_v18  ;;  %v2717_v62 = vld [vmem:[#allocation2 + $0xe1] sm:$0xff] }
 0x1e0   : > { %1956 = vmatmul.f32.gmra.mxu3 %v1603_v37  ;;  %v1351_v24 = vpop.f32.mrf.mxu0 }
 0x1e1   : > { %1499 = vmatmul.f32.gmra.mxu1 %v2715_v19 }
 0x1e3   : > { %v1157_v1 = vpop.f32.mrf.mxu3  ;;  %1765 = vmatmul.f32.gmra.mxu2 %v1602_v55  ;;  %2150 = vmatmul.f32.gmra.mxu0 %v1605_v42 }
 0x1e4   : > { %v1197_v61 = vadd.f32 %v1157_v1, %v931_v26  ;;  %v4060_v26 = vld [vmem:[#allocation11_spill] sm:$0xff] }
 0x1e6   : > { %v3748_v41 = vadd.f32 %v1351_v24, %v1197_v61  ;;  %v894_v16 = vpop.f32.mrf.mxu2  ;;  %v734_v36 = vpop.f32.mrf.mxu1 }
 0x1e7   : > { %v932_v50 = vadd.f32 %v894_v16, %v732_v28  ;;  %v735_v55 = vadd.f32 %v734_v36, %v4059_v4  ;;  %v1608_v28 = vld [vmem:[#allocation2 + $0xe2] sm:$0xff]  ;;  %v2718_v16 = vld [vmem:[#allocation2 + $0xf1] sm:$0xff] }
 0x1e8   : > { %1959 = vmatmul.f32.gmra.mxu3 %v1604_v53  ;;  %v1354_v17 = vpop.f32.mrf.mxu0 }
 0x1e9   : > { %1502 = vmatmul.f32.gmra.mxu1 %v2716_v30 }
 0x1eb   : > { %v1160_v7 = vpop.f32.mrf.mxu3  ;;  %1768 = vmatmul.f32.gmra.mxu2 %v1603_v37  ;;  %2153 = vmatmul.f32.gmra.mxu0 %v1606_v6 }
 0x1ec   : > { %v1198_v20 = vadd.f32 %v1160_v7, %v932_v50 }
 0x1ee   : > { %v3751_v57 = vadd.f32 %v1354_v17, %v1198_v20  ;;  %v897_v25 = vpop.f32.mrf.mxu2  ;;  %v737_v44 = vpop.f32.mrf.mxu1 }
 0x1ef   : > { %v933_v63 = vadd.f32 %v897_v25, %v735_v55  ;;  %v738_v37 = vadd.f32 %v737_v44, %v4060_v26  ;;  %v1609_v55 = vld [vmem:[#allocation2 + $0xf2] sm:$0xff]  ;;  %v2720_v26 = vld [vmem:[#allocation2 + $0x109] sm:$0xff] }
 0x1f0   : > { %1962 = vmatmul.f32.gmra.mxu3 %v1605_v42  ;;  %v1357_v54 = vpop.f32.mrf.mxu0  ;;  %v2719_v25 = vld [vmem:[#allocation2 + $0xf9] sm:$0xff] }
 0x1f1   : > { %1505 = vmatmul.f32.gmra.mxu1 %v2717_v62 }
 0x1f3   : > { %v1163_v52 = vpop.f32.mrf.mxu3  ;;  %1771 = vmatmul.f32.gmra.mxu2 %v1604_v53  ;;  %2156 = vmatmul.f32.gmra.mxu0 %v1607_v58 }
 0x1f4   : > { %v1199_v31 = vadd.f32 %v1163_v52, %v933_v63 }
 0x1f6   : > { %v3754_v24 = vadd.f32 %v1357_v54, %v1199_v31  ;;  %v900_v19 = vpop.f32.mrf.mxu2  ;;  %v1461_v1 = vpop.f32.mrf.mxu1  ;;  %v1610_v31 = vld [vmem:[#allocation2 + $0xfa] sm:$0xff] }
 0x1f7   : > { %v934_v61 = vadd.f32 %v900_v19, %v738_v37  ;;  %v1557_v53 = vadd.f32 %v1461_v1, %v3533_v10 }
 0x1f8   : > { %1965 = vmatmul.f32.gmra.mxu3 %v1606_v6  ;;  %v1360_v18 = vpop.f32.mrf.mxu0 }
 0x1f9   : > { %1508 = vmatmul.f32.gmra.mxu1 %v2718_v16 }
 0x1fb   : > { %v1166_v36 = vpop.f32.mrf.mxu3  ;;  %1774 = vmatmul.f32.gmra.mxu2 %v1605_v42  ;;  %2159 = vmatmul.f32.gmra.mxu0 %v1608_v28 }
 0x1fc   : > { %v1200_v50 = vadd.f32 %v1166_v36, %v934_v61 }
 0x1fe   : > { %v3757_v17 = vadd.f32 %v1360_v18, %v1200_v50  ;;  %v1727_v30 = vpop.f32.mrf.mxu2  ;;  %v1464_v7 = vpop.f32.mrf.mxu1  ;;  %v1611_v50 = vld [vmem:[#allocation2 + $0x10a] sm:$0xff] }
 0x1ff   : > { %v1823_v20 = vadd.f32 %v1727_v30, %v1557_v53  ;;  %v1558_v10 = vadd.f32 %v1464_v7, %v3543_v3  ;;  %v2721_v53 = vld [vmem:[#allocation2 + $0x111] sm:$0xff] }
 0x200   : > { %1968 = vmatmul.f32.gmra.mxu3 %v1607_v58  ;;  %v2115_v4 = vpop.f32.mrf.mxu0 }
 0x201   : > { %1511 = vmatmul.f32.gmra.mxu1 %v2719_v25 }
 0x203   : > { %v1921_v44 = vpop.f32.mrf.mxu3  ;;  %1777 = vmatmul.f32.gmra.mxu2 %v1606_v6  ;;  %2162 = vmatmul.f32.gmra.mxu0 %v1609_v55 }
 0x204   : > { %v2017_v63 = vadd.f32 %v1921_v44, %v1823_v20 }
 0x206   : > { %v3767_v42 = vadd.f32 %v2115_v4, %v2017_v63  ;;  %v1730_v54 = vpop.f32.mrf.mxu2  ;;  %v1467_v62 = vpop.f32.mrf.mxu1  ;;  %v1612_v63 = vld [vmem:[#allocation2 + $0x112] sm:$0xff] }
 0x207   : > { %v1824_v6 = vadd.f32 %v1730_v54, %v1558_v10  ;;  %v1559_v1 = vadd.f32 %v1467_v62, %v3559_v35  ;;  %v2722_v10 = vld [vmem:[#allocation2 + $0x121] sm:$0xff] }
 0x208   : > { %2243 = vst [vmem:[%s3764_s30] sm:$0xff] %v3767_v42  ;;  %1971 = vmatmul.f32.gmra.mxu3 %v1608_v28  ;;  %v2118_v52 = vpop.f32.mrf.mxu0 }
 0x209   : > { %1514 = vmatmul.f32.gmra.mxu1 %v2720_v26 }
 0x20b   : > { %v1924_v37 = vpop.f32.mrf.mxu3  ;;  %1780 = vmatmul.f32.gmra.mxu2 %v1607_v58  ;;  %2165 = vmatmul.f32.gmra.mxu0 %v1610_v31 }
 0x20c   : > { %v2018_v19 = vadd.f32 %v1924_v37, %v1824_v6 }
 0x20e   : > { %v3772_v3 = vadd.f32 %v2118_v52, %v2018_v19  ;;  %v1733_v61 = vpop.f32.mrf.mxu2  ;;  %v1470_v18 = vpop.f32.mrf.mxu1  ;;  %v1613_v19 = vld [vmem:[#allocation2 + $0x122] sm:$0xff] }
 0x20f   : > { %v1825_v16 = vadd.f32 %v1733_v61, %v1559_v1  ;;  %v1560_v7 = vadd.f32 %v1470_v18, %v3569_v5  ;;  %v2723_v1 = vld [vmem:[#allocation2 + $0x129] sm:$0xff] }
 0x210   : > { %2244 = vst [vmem:[%s3764_s30 + $0x8] sm:$0xff] %v3772_v3  ;;  %1974 = vmatmul.f32.gmra.mxu3 %v1609_v55  ;;  %v2121_v36 = vpop.f32.mrf.mxu0 }
 0x211   : > { %1517 = vmatmul.f32.gmra.mxu1 %v2721_v53 }
 0x213   : > { %v1927_v30 = vpop.f32.mrf.mxu3  ;;  %1783 = vmatmul.f32.gmra.mxu2 %v1608_v28  ;;  %2168 = vmatmul.f32.gmra.mxu0 %v1611_v50 }
 0x214   : > { %v2019_v58 = vadd.f32 %v1927_v30, %v1825_v16 }
 0x216   : > { %v3777_v35 = vadd.f32 %v2121_v36, %v2019_v58  ;;  %v1736_v20 = vpop.f32.mrf.mxu2  ;;  %v1473_v4 = vpop.f32.mrf.mxu1  ;;  %v1614_v58 = vld [vmem:[#allocation2 + $0x12a] sm:$0xff] }
 0x217   : > { %v1826_v25 = vadd.f32 %v1736_v20, %v1560_v7  ;;  %v1561_v62 = vadd.f32 %v1473_v4, %v3585_v46 }
 0x218   : > { %2245 = vst [vmem:[%s3764_s30 + $0x10] sm:$0xff] %v3777_v35  ;;  %1977 = vmatmul.f32.gmra.mxu3 %v1610_v31  ;;  %v2124_v44 = vpop.f32.mrf.mxu0 }
 0x219   : > { %1520 = vmatmul.f32.gmra.mxu1 %v2722_v10 }
 0x21b   : > { %v1930_v54 = vpop.f32.mrf.mxu3  ;;  %1786 = vmatmul.f32.gmra.mxu2 %v1609_v55  ;;  %2171 = vmatmul.f32.gmra.mxu0 %v1612_v63 }
 0x21c   : > { %v2020_v28 = vadd.f32 %v1930_v54, %v1826_v25  ;;  %v1615_v54 = vld [vmem:[#allocation2 + $0x13a] sm:$0xff] }
 0x21e   : > { %v3782_v5 = vadd.f32 %v2124_v44, %v2020_v28  ;;  %v1739_v6 = vpop.f32.mrf.mxu2  ;;  %v1476_v52 = vpop.f32.mrf.mxu1 }
 0x21f   : > { %v1827_v26 = vadd.f32 %v1739_v6, %v1561_v62  ;;  %v1562_v18 = vadd.f32 %v1476_v52, %v3595_v8 }
 0x220   : > { %2246 = vst [vmem:[%s3764_s30 + $0x18] sm:$0xff] %v3782_v5  ;;  %1980 = vmatmul.f32.gmra.mxu3 %v1611_v50  ;;  %v2127_v37 = vpop.f32.mrf.mxu0 }
 0x221   : > { %1523 = vmatmul.f32.gmra.mxu1 %v2723_v1 }
 0x223   : > { %v1933_v61 = vpop.f32.mrf.mxu3  ;;  %1789 = vmatmul.f32.gmra.mxu2 %v1610_v31  ;;  %2174 = vmatmul.f32.gmra.mxu0 %v1613_v19 }
 0x224   : > { %v2021_v55 = vadd.f32 %v1933_v61, %v1827_v26 }
 0x226   : > { %v3787_v46 = vadd.f32 %v2127_v37, %v2021_v55  ;;  %v1742_v16 = vpop.f32.mrf.mxu2  ;;  %v1479_v36 = vpop.f32.mrf.mxu1  ;;  %v1616_v37 = vld [vmem:[#allocation2 + $0x142] sm:$0xff] }
 0x227   : > { %v1828_v53 = vadd.f32 %v1742_v16, %v1562_v18  ;;  %v1563_v20 = vadd.f32 %v1479_v36, %v3611_v39  ;;  %v1617_v36 = vld [vmem:[#allocation2 + $0x152] sm:$0xff] }
 0x228   : > { %2247 = vst [vmem:[%s3764_s30 + $0x20] sm:$0xff] %v3787_v46  ;;  %1983 = vmatmul.f32.gmra.mxu3 %v1612_v63  ;;  %v2130_v30 = vpop.f32.mrf.mxu0 }
 0x229   : > { %1526 = vmatmul.f32.gmra.mxu1 %v3627_v47 }
 0x22b   : > { %v1936_v7 = vpop.f32.mrf.mxu3  ;;  %1792 = vmatmul.f32.gmra.mxu2 %v1611_v50  ;;  %2177 = vmatmul.f32.gmra.mxu0 %v1614_v58 }
 0x22c   : > { %v2022_v31 = vadd.f32 %v1936_v7, %v1828_v53 }
 0x22e   : > { %v3793_v8 = vadd.f32 %v2130_v30, %v2022_v31  ;;  %v1745_v4 = vpop.f32.mrf.mxu2  ;;  %v1482_v25 = vpop.f32.mrf.mxu1 }
 0x22f   : > { %v1829_v44 = vadd.f32 %v1745_v4, %v1563_v20  ;;  %v1564_v28 = vadd.f32 %v1482_v25, %v3621_v48  ;;  %v1618_v4 = vld [vmem:[#allocation2 + $0x15a] sm:$0xff] }
 0x230   : > { %2248 = vst [vmem:[%s3764_s30 + $0x28] sm:$0xff] %v3793_v8  ;;  %1986 = vmatmul.f32.gmra.mxu3 %v1613_v19  ;;  %v2133_v10 = vpop.f32.mrf.mxu0 }
 0x231   : > { %1529 = vmatmul.f32.gmra.mxu1 %v3642_v43 }
 0x233   : > { %v1939_v47 = vpop.f32.mrf.mxu3  ;;  %1795 = vmatmul.f32.gmra.mxu2 %v1612_v63  ;;  %2180 = vmatmul.f32.gmra.mxu0 %v1615_v54 }
 0x234   : > { %v2023_v50 = vadd.f32 %v1939_v47, %v1829_v44 }
 0x236   : > { %v3799_v39 = vadd.f32 %v2133_v10, %v2023_v50  ;;  %v1748_v62 = vpop.f32.mrf.mxu2  ;;  %v1485_v6 = vpop.f32.mrf.mxu1 }
 0x237   : > { %v1830_v52 = vadd.f32 %v1748_v62, %v1564_v28  ;;  %v1565_v1 = vadd.f32 %v1485_v6, %v3639_v11  ;;  %v1619_v28 = vld [vmem:[#allocation2 + $0x16a] sm:$0xff] }
 0x238   : > { %2249 = vst [vmem:[%s3764_s30 + $0x30] sm:$0xff] %v3799_v39  ;;  %1989 = vmatmul.f32.gmra.mxu3 %v1614_v58  ;;  %v2136_v26 = vpop.f32.mrf.mxu0 }
 0x239   : > { %1532 = vmatmul.f32.gmra.mxu1 %v3657_v27 }
 0x23b   : > { %v1942_v43 = vpop.f32.mrf.mxu3  ;;  %1798 = vmatmul.f32.gmra.mxu2 %v1613_v19  ;;  %2183 = vmatmul.f32.gmra.mxu0 %v1616_v37 }
 0x23c   : > { %v2024_v63 = vadd.f32 %v1942_v43, %v1830_v52 }
 0x23e   : > { %v3805_v48 = vadd.f32 %v2136_v26, %v2024_v63  ;;  %v1751_v61 = vpop.f32.mrf.mxu2  ;;  %v1488_v55 = vpop.f32.mrf.mxu1  ;;  %v1620_v63 = vld [vmem:[#allocation2 + $0x172] sm:$0xff] }
 0x23f   : > { %v1831_v18 = vadd.f32 %v1751_v61, %v1565_v1  ;;  %v1566_v53 = vadd.f32 %v1488_v55, %v3651_v49  ;;  %v2724_v1 = vld [vmem:[#allocation2 + $0x181] sm:$0xff] }
 0x240   : > { %2250 = vst [vmem:[%s3764_s30 + $0x38] sm:$0xff] %v3805_v48  ;;  %1992 = vmatmul.f32.gmra.mxu3 %v1615_v54  ;;  %v2139_v16 = vpop.f32.mrf.mxu0 }
 0x241   : > { %1535 = vmatmul.f32.gmra.mxu1 %v3672_v22 }
 0x243   : > { %v1945_v27 = vpop.f32.mrf.mxu3  ;;  %1801 = vmatmul.f32.gmra.mxu2 %v1614_v58  ;;  %2186 = vmatmul.f32.gmra.mxu0 %v1617_v36 }
 0x244   : > { %v2025_v19 = vadd.f32 %v1945_v27, %v1831_v18 }
 0x246   : > { %v3811_v11 = vadd.f32 %v2139_v16, %v2025_v19  ;;  %v1754_v30 = vpop.f32.mrf.mxu2  ;;  %v1491_v7 = vpop.f32.mrf.mxu1  ;;  %v1621_v19 = vld [vmem:[#allocation2 + $0x182] sm:$0xff] }
 0x247   : > { %v1832_v31 = vadd.f32 %v1754_v30, %v1566_v53  ;;  %v1567_v25 = vadd.f32 %v1491_v7, %v3669_v56  ;;  %v2725_v53 = vld [vmem:[#allocation2 + $0x189] sm:$0xff] }
 0x248   : > { %2251 = vst [vmem:[%s3764_s30 + $0x40] sm:$0xff] %v3811_v11  ;;  %1995 = vmatmul.f32.gmra.mxu3 %v1616_v37  ;;  %v2142_v20 = vpop.f32.mrf.mxu0 }
 0x249   : > { %1538 = vmatmul.f32.gmra.mxu1 %v3684_v15 }
 0x24b   : > { %v1948_v22 = vpop.f32.mrf.mxu3  ;;  %1804 = vmatmul.f32.gmra.mxu2 %v1615_v54  ;;  %2189 = vmatmul.f32.gmra.mxu0 %v1618_v4 }
 0x24c   : > { %v2026_v58 = vadd.f32 %v1948_v22, %v1832_v31  ;;  %v969_v22 = vld [vmem:[#allocation2 + $0x199] sm:$0xff] }
 0x24e   : > { %v3817_v49 = vadd.f32 %v2142_v20, %v2026_v58  ;;  %v1757_v44 = vpop.f32.mrf.mxu2  ;;  %v1494_v10 = vpop.f32.mrf.mxu1 }
 0x24f   : > { %v1833_v47 = vadd.f32 %v1757_v44, %v1567_v25  ;;  %v1568_v62 = vadd.f32 %v1494_v10, %v3681_v0  ;;  %v1622_v44 = vld [vmem:[#allocation2 + $0x18a] sm:$0xff] }
 0x250   : > { %2252 = vst [vmem:[%s3764_s30 + $0x48] sm:$0xff] %v3817_v49  ;;  %1998 = vmatmul.f32.gmra.mxu3 %v1617_v36  ;;  %v2145_v50 = vpop.f32.mrf.mxu0 }
 0x251   : > { %1541 = vmatmul.f32.gmra.mxu1 %v3693_v14 }
 0x253   : > { %v1951_v15 = vpop.f32.mrf.mxu3  ;;  %1807 = vmatmul.f32.gmra.mxu2 %v1616_v37  ;;  %2192 = vmatmul.f32.gmra.mxu0 %v1619_v28 }
 0x254   : > { %v2027_v54 = vadd.f32 %v1951_v15, %v1833_v47 }
 0x256   : > { %v3823_v56 = vadd.f32 %v2145_v50, %v2027_v54  ;;  %v1760_v6 = vpop.f32.mrf.mxu2  ;;  %v1497_v52 = vpop.f32.mrf.mxu1  ;;  %v970_v54 = vld [vmem:[#allocation2 + $0x1a1] sm:$0xff] }
 0x257   : > { %v1834_v26 = vadd.f32 %v1760_v6, %v1568_v62  ;;  %v1569_v61 = vadd.f32 %v1497_v52, %v3690_v12  ;;  %v1623_v52 = vld [vmem:[#allocation2 + $0x19a] sm:$0xff] }
 0x258   : > { %2253 = vst [vmem:[%s3764_s30 + $0x50] sm:$0xff] %v3823_v56  ;;  %2001 = vmatmul.f32.gmra.mxu3 %v1618_v4  ;;  %v2148_v43 = vpop.f32.mrf.mxu0 }
 0x259   : > { %1544 = vmatmul.f32.gmra.mxu1 %v2724_v1 }
 0x25b   : > { %v1954_v14 = vpop.f32.mrf.mxu3  ;;  %1810 = vmatmul.f32.gmra.mxu2 %v1617_v36  ;;  %2195 = vmatmul.f32.gmra.mxu0 %v1620_v63 }
 0x25c   : > { %v2028_v37 = vadd.f32 %v1954_v14, %v1834_v26 }
 0x25e   : > { %v3828_v0 = vadd.f32 %v2148_v43, %v2028_v37  ;;  %v1763_v55 = vpop.f32.mrf.mxu2  ;;  %v1500_v18 = vpop.f32.mrf.mxu1 }
 0x25f   : > { %v1835_v16 = vadd.f32 %v1763_v55, %v1569_v61  ;;  %v1570_v7 = vadd.f32 %v1500_v18, %v3698_v23  ;;  %v1624_v55 = vld [vmem:[#allocation2 + $0x1a2] sm:$0xff] }
 0x260   : > { %2254 = vst [vmem:[%s3764_s30 + $0x58] sm:$0xff] %v3828_v0  ;;  %2004 = vmatmul.f32.gmra.mxu3 %v1619_v28  ;;  %v2151_v27 = vpop.f32.mrf.mxu0 }
 0x261   : > { %1547 = vmatmul.f32.gmra.mxu1 %v2725_v53 }
 0x263   : > { %v1957_v30 = vpop.f32.mrf.mxu3  ;;  %1813 = vmatmul.f32.gmra.mxu2 %v1618_v4  ;;  %2198 = vmatmul.f32.gmra.mxu0 %v1621_v19 }
 0x264   : > { %v2029_v36 = vadd.f32 %v1957_v30, %v1835_v16 }
 0x266   : > { %v3833_v12 = vadd.f32 %v2151_v27, %v2029_v36  ;;  %v1766_v31 = vpop.f32.mrf.mxu2  ;;  %v1503_v20 = vpop.f32.mrf.mxu1 }
 0x267   : > { %v1836_v58 = vadd.f32 %v1766_v31, %v1570_v7  ;;  %v1571_v47 = vadd.f32 %v1503_v20, %v3704_v32 }
 0x268   : > { %2255 = vst [vmem:[%s3764_s30 + $0x60] sm:$0xff] %v3833_v12  ;;  %2007 = vmatmul.f32.gmra.mxu3 %v1620_v63  ;;  %v2154_v25 = vpop.f32.mrf.mxu0 }
 0x269   : > { %1550 = vmatmul.f32.gmra.mxu1 %v969_v22 }
 0x26b   : > { %v1960_v10 = vpop.f32.mrf.mxu3  ;;  %1816 = vmatmul.f32.gmra.mxu2 %v1619_v28  ;;  %2201 = vmatmul.f32.gmra.mxu0 %v1622_v44 }
 0x26c   : > { %v2030_v4 = vadd.f32 %v1960_v10, %v1836_v58 }
 0x26e   : > { %v3838_v23 = vadd.f32 %v2154_v25, %v2030_v4  ;;  %v1769_v50 = vpop.f32.mrf.mxu2  ;;  %v1506_v15 = vpop.f32.mrf.mxu1 }
 0x26f   : > { %v1837_v62 = vadd.f32 %v1769_v50, %v1571_v47  ;;  %v1572_v43 = vadd.f32 %v1506_v15, %v3709_v21 }
 0x270   : > { %2256 = vst [vmem:[%s3764_s30 + $0x68] sm:$0xff] %v3838_v23  ;;  %2010 = vmatmul.f32.gmra.mxu3 %v1621_v19  ;;  %v2157_v6 = vpop.f32.mrf.mxu0 }
 0x271   : > { %1553 = vmatmul.f32.gmra.mxu1 %v970_v54 }
 0x273   : > { %v1963_v26 = vpop.f32.mrf.mxu3  ;;  %1819 = vmatmul.f32.gmra.mxu2 %v1620_v63  ;;  %2204 = vmatmul.f32.gmra.mxu0 %v1623_v52 }
 0x274   : > { %v2031_v28 = vadd.f32 %v1963_v26, %v1837_v62 }
 0x276   : > { %v3843_v32 = vadd.f32 %v2157_v6, %v2031_v28  ;;  %v1772_v1 = vpop.f32.mrf.mxu2  ;;  %v1509_v14 = vpop.f32.mrf.mxu1 }
 0x277   : > { %v1838_v37 = vadd.f32 %v1772_v1, %v1572_v43  ;;  %v1573_v63 = vadd.f32 %v1509_v14, %v3712_v45 }
 0x278   : > { %2257 = vst [vmem:[%s3764_s30 + $0x70] sm:$0xff] %v3843_v32  ;;  %2013 = vmatmul.f32.gmra.mxu3 %v1622_v44  ;;  %v2160_v61 = vpop.f32.mrf.mxu0 }
 0x27b   : > { %v1966_v18 = vpop.f32.mrf.mxu3  ;;  %2207 = vmatmul.f32.gmra.mxu0 %v1624_v55 }
 0x27c   : > { %v2032_v16 = vadd.f32 %v1966_v18, %v1838_v37 }
 0x27e   : > { %v3848_v27 = vadd.f32 %v2160_v61, %v2032_v16  ;;  %v1775_v21 = vpop.f32.mrf.mxu2  ;;  %v1512_v19 = vpop.f32.mrf.mxu1 }
 0x27f   : > { %v1839_v53 = vadd.f32 %v1775_v21, %v1573_v63  ;;  %v1574_v31 = vadd.f32 %v1512_v19, %v3715_v38 }
 0x280   : > { %2258 = vst [vmem:[%s3764_s30 + $0x78] sm:$0xff] %v3848_v27  ;;  %v2163_v30 = vpop.f32.mrf.mxu0 }
 0x283   : > { %v1969_v36 = vpop.f32.mrf.mxu3 }
 0x284   : > { %v2033_v7 = vadd.f32 %v1969_v36, %v1839_v53 }
 0x286   : > { %v3853_v20 = vadd.f32 %v2163_v30, %v2033_v7  ;;  %v1778_v22 = vpop.f32.mrf.mxu2  ;;  %v1515_v58 = vpop.f32.mrf.mxu1 }
 0x287   : > { %v1840_v45 = vadd.f32 %v1778_v22, %v1574_v31  ;;  %v1575_v4 = vadd.f32 %v1515_v58, %v3718_v29  ;;  %v2275_v58 = vadd.f32 %v3772_v3, %v3767_v42 }
 0x288   : > { %2259 = vst [vmem:[%s3764_s30 + $0x80] sm:$0xff] %v3853_v20  ;;  %v2166_v25 = vpop.f32.mrf.mxu0 }
 0x28b   : > { %v1972_v44 = vpop.f32.mrf.mxu3 }
 0x28c   : > { %v2034_v10 = vadd.f32 %v1972_v44, %v1840_v45 }
 0x28e   : > { %v3858_v47 = vadd.f32 %v2166_v25, %v2034_v10  ;;  %v1781_v50 = vpop.f32.mrf.mxu2  ;;  %v1518_v15 = vpop.f32.mrf.mxu1  ;;  %v2276_v25 = vadd.f32 %v2275_v58, %v3777_v35 }
 0x28f   : > { %v1841_v38 = vadd.f32 %v1781_v50, %v1575_v4  ;;  %v1576_v52 = vadd.f32 %v1518_v15, %v3721_v40 }
 0x290   : > { %2260 = vst [vmem:[%s3764_s30 + $0x88] sm:$0xff] %v3858_v47  ;;  %v2169_v54 = vpop.f32.mrf.mxu0  ;;  %v2277_v50 = vadd.f32 %v2276_v25, %v3782_v5 }
 0x293   : > { %v1975_v62 = vpop.f32.mrf.mxu3 }
 0x294   : > { %v2035_v6 = vadd.f32 %v1975_v62, %v1841_v38 }
 0x296   : > { %v3863_v26 = vadd.f32 %v2169_v54, %v2035_v6  ;;  %v1784_v28 = vpop.f32.mrf.mxu2  ;;  %v1521_v43 = vpop.f32.mrf.mxu1  ;;  %v2278_v54 = vadd.f32 %v2277_v50, %v3787_v46 }
 0x297   : > { %v1842_v29 = vadd.f32 %v1784_v28, %v1576_v52  ;;  %v1577_v61 = vadd.f32 %v1521_v43, %v3724_v9 }
 0x298   : > { %2261 = vst [vmem:[%s3764_s30 + $0x90] sm:$0xff] %v3863_v26  ;;  %v2172_v1 = vpop.f32.mrf.mxu0  ;;  %v2279_v6 = vadd.f32 %v2278_v54, %v3793_v8 }
 0x29a   : > { %v2280_v28 = vadd.f32 %v2279_v6, %v3799_v39 }
 0x29b   : > { %v1978_v14 = vpop.f32.mrf.mxu3 }
 0x29c   : > { %v2036_v37 = vadd.f32 %v1978_v14, %v1842_v29  ;;  %v2281_v14 = vadd.f32 %v2280_v28, %v3805_v48 }
 0x29e   : > { %v3868_v55 = vadd.f32 %v2172_v1, %v2036_v37  ;;  %v1787_v18 = vpop.f32.mrf.mxu2  ;;  %v1524_v16 = vpop.f32.mrf.mxu1 }
 0x29f   : > { %v1843_v40 = vadd.f32 %v1787_v18, %v1577_v61  ;;  %v1578_v53 = vadd.f32 %v1524_v16, %v3727_v34  ;;  %v2282_v18 = vadd.f32 %v2281_v14, %v3811_v11 }
 0x2a0   : > { %2262 = vst [vmem:[%s3764_s30 + $0x98] sm:$0xff] %v3868_v55  ;;  %v2175_v63 = vpop.f32.mrf.mxu0 }
 0x2a3   : > { %v1981_v21 = vpop.f32.mrf.mxu3 }
 0x2a4   : > { %v2037_v19 = vadd.f32 %v1981_v21, %v1843_v40  ;;  %v2283_v40 = vadd.f32 %v2282_v18, %v3817_v49 }
 0x2a6   : > { %v3873_v30 = vadd.f32 %v2175_v63, %v2037_v19  ;;  %v1790_v36 = vpop.f32.mrf.mxu2  ;;  %v1527_v7 = vpop.f32.mrf.mxu1  ;;  %v2284_v21 = vadd.f32 %v2283_v40, %v3823_v56 }
 0x2a7   : > { %v1844_v9 = vadd.f32 %v1790_v36, %v1578_v53  ;;  %v1579_v44 = vadd.f32 %v1527_v7, %v3730_v59 }
 0x2a8   : > { %2263 = vst [vmem:[%s3764_s30 + $0xa0] sm:$0xff] %v3873_v30  ;;  %v2178_v31 = vpop.f32.mrf.mxu0  ;;  %v2285_v7 = vadd.f32 %v2284_v21, %v3828_v0 }
 0x2ab   : > { %v1984_v22 = vpop.f32.mrf.mxu3 }
 0x2ac   : > { %v2038_v45 = vadd.f32 %v1984_v22, %v1844_v9  ;;  %v2286_v22 = vadd.f32 %v2285_v7, %v3833_v12 }
 0x2ae   : > { %v3881_v10 = vadd.f32 %v2178_v31, %v2038_v45  ;;  %v1793_v34 = vpop.f32.mrf.mxu2  ;;  %v1530_v4 = vpop.f32.mrf.mxu1  ;;  %v2287_v45 = vadd.f32 %v2286_v22, %v3838_v23 }
 0x2af   : > { %v1845_v15 = vadd.f32 %v1793_v34, %v1579_v44  ;;  %v1580_v59 = vadd.f32 %v1530_v4, %v3733_v60 }
 0x2b0   : > { %2264 = vst [vmem:[%s3764_s30 + $0xa8] sm:$0xff] %v3881_v10  ;;  %v2181_v38 = vpop.f32.mrf.mxu0  ;;  %v2288_v44 = vadd.f32 %v2287_v45, %v3843_v32 }
 0x2b3   : > { %v1987_v62 = vpop.f32.mrf.mxu3 }
 0x2b4   : > { %v2039_v52 = vadd.f32 %v1987_v62, %v1845_v15  ;;  %v2289_v15 = vadd.f32 %v2288_v44, %v3848_v27 }
 0x2b6   : > { %v3890_v43 = vadd.f32 %v2181_v38, %v2039_v52  ;;  %v1796_v29 = vpop.f32.mrf.mxu2  ;;  %v1533_v1 = vpop.f32.mrf.mxu1  ;;  %v2290_v62 = vadd.f32 %v2289_v15, %v3853_v20 }
 0x2b7   : > { %v1846_v37 = vadd.f32 %v1796_v29, %v1580_v59  ;;  %v1581_v60 = vadd.f32 %v1533_v1, %v3736_v33 }
 0x2b8   : > { %2265 = vst [vmem:[%s3764_s30 + $0xb0] sm:$0xff] %v3890_v43  ;;  %v2184_v61 = vpop.f32.mrf.mxu0  ;;  %v2291_v52 = vadd.f32 %v2290_v62, %v3858_v47 }
 0x2ba   : > { %v2292_v59 = vadd.f32 %v2291_v52, %v3863_v26 }
 0x2bb   : > { %v1990_v16 = vpop.f32.mrf.mxu3 }
 0x2bc   : > { %v2040_v63 = vadd.f32 %v1990_v16, %v1846_v37  ;;  %v2293_v37 = vadd.f32 %v2292_v59, %v3868_v55 }
 0x2be   : > { %v3899_v19 = vadd.f32 %v2184_v61, %v2040_v63  ;;  %v1799_v53 = vpop.f32.mrf.mxu2  ;;  %v1536_v36 = vpop.f32.mrf.mxu1  ;;  %v2294_v16 = vadd.f32 %v2293_v37, %v3873_v30 }
 0x2bf   : > { %v1847_v9 = vadd.f32 %v1799_v53, %v1581_v60  ;;  %v1582_v33 = vadd.f32 %v1536_v36, %v3739_v13 }
 0x2c0   : > { %2266 = vst [vmem:[%s3764_s30 + $0xb8] sm:$0xff] %v3899_v19  ;;  %v2187_v31 = vpop.f32.mrf.mxu0  ;;  %v2295_v63 = vadd.f32 %v2294_v16, %v3881_v10 }
 0x2c2   : > { %v2296_v60 = vadd.f32 %v2295_v63, %v3890_v43 }
 0x2c3   : > { %v1993_v58 = vpop.f32.mrf.mxu3 }
 0x2c4   : > { %v2041_v25 = vadd.f32 %v1993_v58, %v1847_v9  ;;  %v2297_v9 = vadd.f32 %v2296_v60, %v3899_v19 }
 0x2c6   : > { %v3908_v34 = vadd.f32 %v2187_v31, %v2041_v25  ;;  %v1802_v4 = vpop.f32.mrf.mxu2  ;;  %v1539_v50 = vpop.f32.mrf.mxu1 }
 0x2c7   : > { %v1848_v38 = vadd.f32 %v1802_v4, %v1582_v33  ;;  %v1583_v13 = vadd.f32 %v1539_v50, %v3742_v51 }
 0x2c8   : > { %2267 = vst [vmem:[%s3764_s30 + $0xc0] sm:$0xff] %v3908_v34  ;;  %v2190_v54 = vpop.f32.mrf.mxu0  ;;  %v2298_v58 = vadd.f32 %v2297_v9, %v3908_v34 }
 0x2cb   : > { %v1996_v6 = vpop.f32.mrf.mxu3 }
 0x2cc   : > { %v2042_v28 = vadd.f32 %v1996_v6, %v1848_v38 }
 0x2ce   : > { %v3917_v29 = vadd.f32 %v2190_v54, %v2042_v28  ;;  %v1805_v1 = vpop.f32.mrf.mxu2  ;;  %v1542_v14 = vpop.f32.mrf.mxu1 }
 0x2cf   : > { %v1849_v61 = vadd.f32 %v1805_v1, %v1583_v13  ;;  %v1584_v51 = vadd.f32 %v1542_v14, %v3745_v2 }
 0x2d0   : > { %2268 = vst [vmem:[%s3764_s30 + $0xc8] sm:$0xff] %v3917_v29  ;;  %v2193_v18 = vpop.f32.mrf.mxu0  ;;  %v2299_v25 = vadd.f32 %v2298_v58, %v3917_v29 }
 0x2d3   : > { %v1999_v40 = vpop.f32.mrf.mxu3 }
 0x2d4   : > { %v2043_v21 = vadd.f32 %v1999_v40, %v1849_v61 }
 0x2d6   : > { %v3926_v53 = vadd.f32 %v2193_v18, %v2043_v21  ;;  %v1808_v36 = vpop.f32.mrf.mxu2  ;;  %v1545_v7 = vpop.f32.mrf.mxu1 }
 0x2d7   : > { %v1850_v31 = vadd.f32 %v1808_v36, %v1584_v51  ;;  %v1585_v33 = vadd.f32 %v1545_v7, %v3748_v41 }
 0x2d8   : > { %2269 = vst [vmem:[%s3764_s30 + $0xd0] sm:$0xff] %v3926_v53  ;;  %v2196_v22 = vpop.f32.mrf.mxu0  ;;  %v2300_v2 = vadd.f32 %v2299_v25, %v3926_v53 }
 0x2db   : > { %v2002_v45 = vpop.f32.mrf.mxu3 }
 0x2dc   : > { %v2044_v44 = vadd.f32 %v2002_v45, %v1850_v31 }
 0x2de   : > { %v2238_v4 = vadd.f32 %v2196_v22, %v2044_v44  ;;  %v1811_v50 = vpop.f32.mrf.mxu2  ;;  %v1548_v15 = vpop.f32.mrf.mxu1 }
 0x2df   : > { %v1851_v54 = vadd.f32 %v1811_v50, %v1585_v33  ;;  %v1586_v28 = vadd.f32 %v1548_v15, %v3751_v57 }
 0x2e0   : > { %2270 = vst [vmem:[%s3764_s30 + $0xd8] sm:$0xff] %v2238_v4  ;;  %v2301_v38 = vadd.f32 %v2300_v2, %v2238_v4  ;;  %v2199_v62 = vpop.f32.mrf.mxu0 }
 0x2e3   : > { %v2005_v6 = vpop.f32.mrf.mxu3 }
 0x2e4   : > { %v2045_v52 = vadd.f32 %v2005_v6, %v1851_v54 }
 0x2e6   : > { %v2239_v59 = vadd.f32 %v2199_v62, %v2045_v52  ;;  %v1814_v13 = vpop.f32.mrf.mxu2  ;;  %v1551_v61 = vpop.f32.mrf.mxu1 }
 0x2e7   : > { %v1852_v14 = vadd.f32 %v1814_v13, %v1586_v28  ;;  %v1587_v16 = vadd.f32 %v1551_v61, %v3754_v24 }
 0x2e8   : > { %2271 = vst [vmem:[%s3764_s30 + $0xe0] sm:$0xff] %v2239_v59  ;;  %v2302_v1 = vadd.f32 %v2301_v38, %v2239_v59  ;;  %v2202_v37 = vpop.f32.mrf.mxu0 }
 0x2eb   : > { %v2008_v41 = vpop.f32.mrf.mxu3 }
 0x2ec   : > { %v2046_v18 = vadd.f32 %v2008_v41, %v1852_v14 }
 0x2ee   : > { %v2240_v40 = vadd.f32 %v2202_v37, %v2046_v18  ;;  %v1817_v63 = vpop.f32.mrf.mxu2  ;;  %v1554_v57 = vpop.f32.mrf.mxu1 }
 0x2ef   : > { %v1853_v60 = vadd.f32 %v1817_v63, %v1587_v16  ;;  %v1588_v9 = vadd.f32 %v1554_v57, %v3757_v17 }
 0x2f0   : > { %2272 = vst [vmem:[%s3764_s30 + $0xe8] sm:$0xff] %v2240_v40  ;;  %v2303_v21 = vadd.f32 %v2302_v1, %v2240_v40  ;;  %v2205_v51 = vpop.f32.mrf.mxu0 }
 0x2f3   : > { %v2011_v36 = vpop.f32.mrf.mxu3 }
 0x2f4   : > { %v2047_v7 = vadd.f32 %v2011_v36, %v1853_v60 }
 0x2f6   : > { %v2241_v31 = vadd.f32 %v2205_v51, %v2047_v7  ;;  %v1820_v22 = vpop.f32.mrf.mxu2 }
 0x2f7   : > { %v1854_v45 = vadd.f32 %v1820_v22, %v1588_v9 }
 0x2f8   : > { %2273 = vst [vmem:[%s3764_s30 + $0xf0] sm:$0xff] %v2241_v31  ;;  %v2304_v58 = vadd.f32 %v2303_v21, %v2241_v31  ;;  %v2208_v24 = vpop.f32.mrf.mxu0 }
 0x2fb   : > { %v2014_v25 = vpop.f32.mrf.mxu3 }
 0x2fc   : > { %v2048_v44 = vadd.f32 %v2014_v25, %v1854_v45 }
 0x2fe   : > { %v2242_v2 = vadd.f32 %v2208_v24, %v2048_v44 }
 0x300   : > { %2274 = vst [vmem:[%s3764_s30 + $0xf8] sm:$0xff] %v2242_v2  ;;  %v2305_v33 = vadd.f32 %v2304_v58, %v2242_v2 }
 0x302   : > { %v2306_v50 = vrot.slane %v2305_v33, 4 }
 0x304   : > { %v2307_v15 = vadd.f32 %v2306_v50, %v2305_v33 }
 0x306   : > { %v2308_v38 = vrot.slane %v2307_v15, 2 }
 0x308   : > { %v2309_v54 = vadd.f32 %v2308_v38, %v2307_v15 }
 0x30a   : > { %v2310_v62 = vrot.slane %v2309_v54, 1 }
 0x30c   : > { %v2311_v17 = vadd.f32 %v2310_v62, %v2309_v54 }
 0x30e   : > { %2345 = vst [vmem:[%s3947_s7] sm:$0x1] %v2311_v17  ;;  %v3950_v6 = vmul.f32 0.00390625, %v2311_v17 }
 0x310   : > { %v3954_v52 = vsub.f32 %v3926_v53, %v3950_v6  ;;  %v3957_v28 = vsub.f32 %v2238_v4, %v3950_v6  ;;  %v3960_v13 = vsub.f32 %v2239_v59, %v3950_v6  ;;  %v3963_v1 = vsub.f32 %v2240_v40, %v3950_v6 }
 0x311   : > { %v3966_v14 = vsub.f32 %v2241_v31, %v3950_v6  ;;  %v3969_v37 = vsub.f32 %v2242_v2, %v3950_v6  ;;  %v2313_v61 = vsub.f32 %v3767_v42, %v3950_v6  ;;  %v2314_v53 = vsub.f32 %v3772_v3, %v3950_v6 }
 0x312   : > { %v2315_v4 = vsub.f32 %v3777_v35, %v3950_v6  ;;  %v2316_v18 = vsub.f32 %v3782_v5, %v3950_v6  ;;  %v2317_v16 = vsub.f32 %v3787_v46, %v3950_v6  ;;  %v2318_v21 = vsub.f32 %v3793_v8, %v3950_v6 }
 0x313   : > { %v2346_v59 = vmul.f32 %v2313_v61, %v2313_v61  ;;  %v2347_v41 = vmul.f32 %v2314_v53, %v2314_v53  ;;  %v2319_v3 = vsub.f32 %v3799_v39, %v3950_v6  ;;  %v2320_v57 = vsub.f32 %v3805_v48, %v3950_v6 }
 0x314   : > { %v2348_v40 = vmul.f32 %v2315_v4, %v2315_v4  ;;  %v2349_v42 = vmul.f32 %v2316_v18, %v2316_v18  ;;  %v2350_v51 = vmul.f32 %v2317_v16, %v2317_v16  ;;  %v2351_v36 = vmul.f32 %v2318_v21, %v2318_v21 }
 0x315   : > { %v2378_v63 = vadd.f32 %v2347_v41, %v2346_v59  ;;  %v2321_v46 = vsub.f32 %v3811_v11, %v3950_v6  ;;  %v2352_v7 = vmul.f32 %v2319_v3, %v2319_v3  ;;  %v2322_v8 = vsub.f32 %v3817_v49, %v3950_v6 }
 0x316   : > { %v2353_v31 = vmul.f32 %v2320_v57, %v2320_v57  ;;  %v2323_v39 = vsub.f32 %v3823_v56, %v3950_v6  ;;  %v2324_v48 = vsub.f32 %v3828_v0, %v3950_v6  ;;  %v2325_v11 = vsub.f32 %v3833_v12, %v3950_v6 }
 0x317   : > { %v2379_v60 = vadd.f32 %v2378_v63, %v2348_v40  ;;  %v2354_v58 = vmul.f32 %v2321_v46, %v2321_v46  ;;  %v2355_v25 = vmul.f32 %v2322_v8, %v2322_v8  ;;  %v2326_v49 = vsub.f32 %v3838_v23, %v3950_v6 }
 0x318   : > { %v2356_v44 = vmul.f32 %v2323_v39, %v2323_v39  ;;  %v2357_v33 = vmul.f32 %v2324_v48, %v2324_v48  ;;  %v2327_v56 = vsub.f32 %v3843_v32, %v3950_v6  ;;  %v2358_v15 = vmul.f32 %v2325_v11, %v2325_v11 }
 0x319   : > { %v2380_v35 = vadd.f32 %v2379_v60, %v2349_v42  ;;  %v2328_v0 = vsub.f32 %v3848_v27, %v3950_v6  ;;  %v2359_v54 = vmul.f32 %v2326_v49, %v2326_v49  ;;  %v2329_v12 = vsub.f32 %v3853_v20, %v3950_v6 }
 0x31a   : > { %v2360_v17 = vmul.f32 %v2327_v56, %v2327_v56  ;;  %v2330_v23 = vsub.f32 %v3858_v47, %v3950_v6  ;;  %v2331_v32 = vsub.f32 %v3863_v26, %v3950_v6  ;;  %v2332_v27 = vsub.f32 %v3868_v55, %v3950_v6 }
 0x31b   : > { %v2381_v5 = vadd.f32 %v2380_v35, %v2350_v51  ;;  %v2361_v53 = vmul.f32 %v2328_v0, %v2328_v0  ;;  %v2362_v59 = vmul.f32 %v2329_v12, %v2329_v12  ;;  %v2333_v20 = vsub.f32 %v3873_v30, %v3950_v6 }
 0x31c   : > { %v2363_v18 = vmul.f32 %v2330_v23, %v2330_v23  ;;  %v2364_v40 = vmul.f32 %v2331_v32, %v2331_v32  ;;  %v2334_v47 = vsub.f32 %v3881_v10, %v3950_v6  ;;  %v2365_v21 = vmul.f32 %v2332_v27, %v2332_v27 }
 0x31d   : > { %v2382_v9 = vadd.f32 %v2381_v5, %v2351_v36  ;;  %v2335_v26 = vsub.f32 %v3890_v43, %v3950_v6  ;;  %v2366_v60 = vmul.f32 %v2333_v20, %v2333_v20  ;;  %v2336_v55 = vsub.f32 %v3899_v19, %v3950_v6 }
 0x31e   : > { %v2367_v51 = vmul.f32 %v2334_v47, %v2334_v47  ;;  %v2337_v30 = vsub.f32 %v3908_v34, %v3950_v6  ;;  %v2338_v10 = vsub.f32 %v3917_v29, %v3950_v6  ;;  %v2374_v34 = vmul.f32 %v3960_v13, %v3960_v13 }
 0x31f   : > { %v2383_v22 = vadd.f32 %v2382_v9, %v2352_v7  ;;  %v2368_v57 = vmul.f32 %v2335_v26, %v2335_v26  ;;  %v2369_v5 = vmul.f32 %v2336_v55, %v2336_v55  ;;  %v2375_v29 = vmul.f32 %v3963_v1, %v3963_v1 }
 0x320   : > { %v2370_v7 = vmul.f32 %v2337_v30, %v2337_v30  ;;  %v2371_v43 = vmul.f32 %v2338_v10, %v2338_v10 }
 0x321   : > { %v2384_v45 = vadd.f32 %v2383_v22, %v2353_v31  ;;  %v2372_v31 = vmul.f32 %v3954_v52, %v3954_v52  ;;  %v2373_v22 = vmul.f32 %v3957_v28, %v3957_v28  ;;  %v2377_v52 = vmul.f32 %v3969_v37, %v3969_v37 }
 0x323   : > { %v2385_v24 = vadd.f32 %v2384_v45, %v2354_v58  ;;  %v2376_v45 = vmul.f32 %v3966_v14, %v3966_v14 }
 0x325   : > { %v2386_v2 = vadd.f32 %v2385_v24, %v2355_v25 }
 0x327   : > { %v2387_v50 = vadd.f32 %v2386_v2, %v2356_v44 }
 0x329   : > { %v2388_v38 = vadd.f32 %v2387_v50, %v2357_v33 }
 0x32b   : > { %v2389_v62 = vadd.f32 %v2388_v38, %v2358_v15 }
 0x32d   : > { %v2390_v61 = vadd.f32 %v2389_v62, %v2359_v54 }
 0x32f   : > { %v2391_v4 = vadd.f32 %v2390_v61, %v2360_v17 }
 0x331   : > { %v2392_v41 = vadd.f32 %v2391_v4, %v2361_v53 }
 0x333   : > { %v2393_v16 = vadd.f32 %v2392_v41, %v2362_v59 }
 0x335   : > { %v2394_v63 = vadd.f32 %v2393_v16, %v2363_v18 }
 0x337   : > { %v2395_v42 = vadd.f32 %v2394_v63, %v2364_v40 }
 0x339   : > { %v2396_v3 = vadd.f32 %v2395_v42, %v2365_v21 }
 0x33b   : > { %v2397_v35 = vadd.f32 %v2396_v3, %v2366_v60 }
 0x33d   : > { %v2398_v36 = vadd.f32 %v2397_v35, %v2367_v51 }
 0x33f   : > { %v2399_v46 = vadd.f32 %v2398_v36, %v2368_v57 }
 0x341   : > { %v2400_v9 = vadd.f32 %v2399_v46, %v2369_v5 }
 0x343   : > { %v2401_v8 = vadd.f32 %v2400_v9, %v2370_v7 }
 0x345   : > { %v2402_v19 = vadd.f32 %v2401_v8, %v2371_v43 }
 0x347   : > { %v2403_v39 = vadd.f32 %v2402_v19, %v2372_v31 }
 0x349   : > { %v2404_v58 = vadd.f32 %v2403_v39, %v2373_v22 }
 0x34b   : > { %v2405_v6 = vadd.f32 %v2404_v58, %v2374_v34 }
 0x34d   : > { %v2406_v48 = vadd.f32 %v2405_v6, %v2375_v29 }
 0x34f   : > { %v2407_v25 = vadd.f32 %v2406_v48, %v2376_v45 }
 0x351   : > { %v2408_v24 = vadd.f32 %v2407_v25, %v2377_v52 }
 0x353   : > { %v2409_v28 = vrot.slane %v2408_v24, 4 }
 0x355   : > { %v2410_v11 = vadd.f32 %v2409_v28, %v2408_v24 }
 0x357   : > { %v2411_v44 = vrot.slane %v2410_v11, 2 }
 0x359   : > { %v2412_v2 = vadd.f32 %v2411_v44, %v2410_v11 }
 0x35b   : > { %v2413_v49 = vrot.slane %v2412_v2, 1 }
 0x35d   : > { %v2414_v13 = vadd.f32 %v2413_v49, %v2412_v2 }
 0x35f   : > { %2415 = vst [vmem:[%s3947_s7 + $0x1] sm:$0x1] %v2414_v13 }
 0x360 PF: > { %s16_s18 = sadd.s32 1, %s2732_s18  }
 0x361   : > { %p13_p4 = scmp.ge.s32.totalorder %s16_s18, 4  }
 0x363   :  { %15 = sbr.rel (!%p13_p4) target bundleno = 1 (0x1), region = 90 }

// kernel: residual_stack_forward.7
= control target key start
LH: loop header
LB: loop body
LE: loop exit
PB: predicated region body
PF: predicated region fallthrough
CT: control target
= control target key end

     0   :  { %s3080_s24 = smov 0   ;;  %s4531_s0 = inlined_call_operand.vmem [shape: f32[2,16,16,128], index: 0, kind: input, shape index: {}]   ;;  %s4532_s1 = inlined_call_operand.vmem [shape: f32[2,16,16,128], index: 1, kind: input, shape index: {}]   ;;  %s4533_s2 = inlined_call_operand.vmem [shape: f32[1,128], index: 2, kind: input, shape index: {}]   ;;  %s4534_s3 = inlined_call_operand.vmem [shape: f32[1,128], index: 3, kind: input, shape index: {}]   ;;  %s4535_s4 = inlined_call_operand.vmem [shape: f32[9,128,128], index: 4, kind: input, shape index: {}]   ;;  %s4536_s5 = inlined_call_operand.vmem [shape: f32[2,16,16,128], index: 5, kind: output, shape index: {0}]   ;;  %s4537_s6 = inlined_call_operand.vmem [shape: f32[2,16,16,128], index: 6, kind: output, shape index: {1}]   ;;  %s4538_s7 = inlined_call_operand.vmem [shape: f32[2,2,128], index: 7, kind: output, shape index: {2}]  }
   0x1 LB: > { %s2801_s25 = sadd.s32 4294967295, %s3037_s24   ;;  %p2805_p0 = scmp.ge.s32.totalorder %s3037_s24, 1  ;;  %s3037_s24 = sphi %s3080_s24, %s18_s24  }
   0x2   : > { %p252_p1 = scmp.lt.s32.totalorder %s3037_s24, 3 }
   0x4   : > { %p253_p2 = pnand %p2805_p0, %p252_p1 }
   0x6   : > { %256 = sbr.rel (%p253_p2) target bundleno = 867 (0x363), region = 40 }
   0xb   : > { %v2830_v0 = vld [vmem:[%s4535_s4 + $0x1f8] sm:$0xff]  ;;  %v2829_v1 = vld [vmem:[%s4535_s4 + $0x1f0] sm:$0xff]  ;;  %p298_p3 = scmp.lt.s32.totalorder %s2801_s25, 1  ;;  %v3039_v2 = vmov 0.0   ;;  %v2828_v3 = vld [vmem:[%s4535_s4 + $0x1e8] sm:$0xff] }
   0xc   : > { %2949 = vmatpush.msra.mxu1 %v2830_v0  ;;  %2950 = vmatpush.msra.mxu2 %v2830_v0  ;;  %534 = vst [vmem:[#allocation2 + $0x78] sm:$0x1] %v3039_v2  ;;  %v2827_v4 = vld [vmem:[%s4535_s4 + $0x1e0] sm:$0xff]  ;;  %v2826_v6 = vld [vmem:[%s4535_s4 + $0x1d8] sm:$0xff]  ;;  %v2825_v10 = vld [vmem:[%s4535_s4 + $0x1d0] sm:$0xff] }
   0xd   : > { %2951 = vmatpush.msra.mxu3 %v2830_v0  ;;  %768 = vmatpush.msra.mxu0 %v2830_v0  ;;  %s4548_s25 = smov (!%p298_p3, %s2801_s25), 1  ;;  %522 = vst [vmem:[#allocation2] sm:$0xff] %v3039_v2  ;;  %v3124_v5 = vld [vmem:[%s4533_s2] ss:$0 sm:$0xff]  ;;  %v2824_v13 = vld [vmem:[%s4535_s4 + $0x1c8] sm:$0xff]  ;;  %v2822_v16 = vld [vmem:[%s4535_s4 + $0x1b8] sm:$0xff] }
   0xe   : > { %2952 = vmatpush.msra.mxu1 %v2829_v1  ;;  %2953 = vmatpush.msra.mxu2 %v2829_v1  ;;  %523 = vst [vmem:[#allocation2 + $0x8] sm:$0xff] %v3039_v2  ;;  %s3106_s11 = sshll.u32 %s4548_s25, 8  ;;  %v3136_v9 = vld [vmem:[%s4534_s3] ss:$0 sm:$0xff]  ;;  %v2821_v17 = vld [vmem:[%s4535_s4 + $0x1b0] sm:$0xff]  ;;  %v2820_v18 = vld [vmem:[%s4535_s4 + $0x1a8] sm:$0xff] }
   0xf   : > { %2954 = vmatpush.msra.mxu3 %v2829_v1  ;;  %769 = vmatpush.msra.mxu0 %v2829_v1  ;;  %524 = vst [vmem:[#allocation2 + $0x10] sm:$0x3] %v3039_v2  ;;  %s3113_s14 = scalar_lea.vmem %s4531_s0, %s3106_s11  ;;  %s3119_s17 = scalar_lea.vmem %s4532_s1, %s3106_s11  ;;  %v2823_v15 = vld [vmem:[%s4535_s4 + $0x1c0] sm:$0xff]  ;;  %v2818_v20 = vld [vmem:[%s4535_s4 + $0x198] sm:$0xff]  ;;  %v2817_v21 = vld [vmem:[%s4535_s4 + $0x190] sm:$0xff] }
  0x10   : > { %2955 = vmatpush.msra.mxu1 %v2828_v3  ;;  %2956 = vmatpush.msra.mxu2 %v2828_v3  ;;  %526 = vst [vmem:[#allocation2 + $0x198] sm:$0xff] %v3039_v2  ;;  %v362_v7 = vld [vmem:[%s3113_s14 + $0x40] sm:$0xff]  ;;  %s3153_s9 = scalar_lea.vmem %s4537_s6, %s3106_s11  ;;  %v2816_v22 = vld [vmem:[%s4535_s4 + $0x188] sm:$0xff]  ;;  %v2846_v26 = vld [vmem:[%s4535_s4 + $0x378] sm:$0xff]  ;;  %s4250_s20 = scalar_lea.vmem %s4536_s5, %s3106_s11 }
  0x11   : > { %2957 = vmatpush.msra.mxu3 %v2828_v3  ;;  %770 = vmatpush.msra.mxu0 %v2828_v3  ;;  %527 = vst [vmem:[#allocation2 + $0x1a0] sm:$0xff] %v3039_v2  ;;  %v398_v8 = vmul.f32 %v3124_v5, %v362_v7  ;;  %v330_v11 = vld [vmem:[%s3119_s17 + $0x40] sm:$0xff]  ;;  %v717_v28 = vld [vmem:[%s4535_s4 + $0x78] sm:$0xff]  ;;  %v2845_v30 = vld [vmem:[%s4535_s4 + $0x370] sm:$0xff]  ;;  %s2814_s11 = sshll.u32 %s4548_s25, 1 }
  0x12   : > { %2958 = vmatpush.msra.mxu1 %v2827_v4  ;;  %2959 = vmatpush.msra.mxu2 %v2827_v4  ;;  %528 = vst [vmem:[#allocation2 + $0x1a8] sm:$0x3] %v3039_v2  ;;  %v2819_v19 = vld [vmem:[%s4535_s4 + $0x1a0] sm:$0xff]  ;;  %v2862_v29 = vld [vmem:[%s4535_s4 + $0xf8] sm:$0xff]  ;;  %v716_v31 = vld [vmem:[%s4535_s4 + $0x70] sm:$0xff]  ;;  %s4439_s22 = scalar_lea.vmem %s4538_s7, %s2814_s11 }
  0x13   : > { %2960 = vmatpush.msra.mxu3 %v2827_v4  ;;  %771 = vmatpush.msra.mxu0 %v2827_v4  ;;  %530 = vst [vmem:[#allocation2 + $0x18] sm:$0x1] %v3039_v2  ;;  %v434_v12 = vadd.f32 %v3136_v9, %v398_v8  ;;  %v370_v23 = vld [vmem:[%s3113_s14 + $0x80] sm:$0xff]  ;;  %v2861_v33 = vld [vmem:[%s4535_s4 + $0xf0] sm:$0xff]  ;;  %v2844_v34 = vld [vmem:[%s4535_s4 + $0x368] sm:$0xff] }
  0x14   : > { %2961 = vmatpush.msra.mxu1 %v2826_v6  ;;  %2962 = vmatpush.msra.mxu2 %v2826_v6  ;;  %531 = vst [vmem:[#allocation2 + $0x30] sm:$0x1] %v3039_v2  ;;  %v2815_v24 = vld [vmem:[%s4535_s4 + $0x180] sm:$0xff]  ;;  %v406_v27 = vmul.f32 %v3124_v5, %v370_v23  ;;  %v2878_v37 = vld [vmem:[%s4535_s4 + $0x278] sm:$0xff]  ;;  %v715_v38 = vld [vmem:[%s4535_s4 + $0x68] sm:$0xff] }
  0x15   : > { %2963 = vmatpush.msra.mxu3 %v2826_v6  ;;  %772 = vmatpush.msra.mxu0 %v2826_v6  ;;  %532 = vst [vmem:[#allocation2 + $0x48] sm:$0x1] %v3039_v2  ;;  %v466_v14 = vadd.f32 %v434_v12, %v330_v11  ;;  %v378_v32 = vld [vmem:[%s3113_s14 + $0xc0] sm:$0xff]  ;;  %v363_v39 = vld [vmem:[%s3113_s14 + $0x48] sm:$0xff]  ;;  %v2877_v43 = vld [vmem:[%s4535_s4 + $0x270] sm:$0xff] }
  0x16   : > { %2964 = vmatpush.msra.mxu1 %v2825_v10  ;;  %2965 = vmatpush.msra.mxu2 %v2825_v10  ;;  %533 = vst [vmem:[#allocation2 + $0x60] sm:$0x1] %v3039_v2  ;;  %v338_v35 = vld [vmem:[%s3119_s17 + $0x80] sm:$0xff]  ;;  %v442_v36 = vadd.f32 %v3136_v9, %v406_v27  ;;  %v2860_v40 = vld [vmem:[%s4535_s4 + $0xe8] sm:$0xff]  ;;  %v414_v42 = vmul.f32 %v3124_v5, %v378_v32  ;;  %v2842_v47 = vld [vmem:[%s4535_s4 + $0x358] sm:$0xff] }
  0x17   : > { %2966 = vmatpush.msra.mxu3 %v2825_v10  ;;  %773 = vmatpush.msra.mxu0 %v2825_v10  ;;  %535 = vst [vmem:[#allocation2 + $0x90] sm:$0x1] %v3039_v2  ;;  %v2843_v41 = vld [vmem:[%s4535_s4 + $0x360] sm:$0xff]  ;;  %v371_v45 = vld [vmem:[%s3113_s14 + $0x88] sm:$0xff]  ;;  %v399_v49 = vmul.f32 %v3124_v5, %v363_v39  ;;  %v2858_v55 = vld [vmem:[%s4535_s4 + $0xd8] sm:$0xff] }
  0x18   : > { %2967 = vmatpush.msra.mxu1 %v2824_v13  ;;  %2968 = vmatpush.msra.mxu2 %v2824_v13  ;;  %498 = vst [vmem:[%s3153_s9 + $0x40] sm:$0xff] %v466_v14  ;;  %v714_v44 = vld [vmem:[%s4535_s4 + $0x60] sm:$0xff]  ;;  %v474_v48 = vadd.f32 %v442_v36, %v338_v35  ;;  %v379_v52 = vld [vmem:[%s3113_s14 + $0xc8] sm:$0xff]  ;;  %v450_v53 = vadd.f32 %v3136_v9, %v414_v42  ;;  %v713_v57 = vld [vmem:[%s4535_s4 + $0x58] sm:$0xff] }
  0x19   : > { %2969 = vmatpush.msra.mxu3 %v2824_v13  ;;  %774 = vmatpush.msra.mxu0 %v2824_v13  ;;  %574 = vst [vmem:[#allocation2 + $0x79] sm:$0xff] %v466_v14  ;;  %v2859_v46 = vld [vmem:[%s4535_s4 + $0xe0] sm:$0xff]  ;;  %v407_v54 = vmul.f32 %v3124_v5, %v371_v45  ;;  %v2876_v56 = vld [vmem:[%s4535_s4 + $0x268] sm:$0xff]  ;;  %v2841_v58 = vld [vmem:[%s4535_s4 + $0x350] sm:$0xff]  ;;  %v435_v61 = vadd.f32 %v3136_v9, %v399_v49 }
  0x1a   : > { %2970 = vmatpush.msra.mxu1 %v2823_v15  ;;  %2971 = vmatpush.msra.mxu2 %v2823_v15  ;;  %536 = vst [vmem:[#allocation2 + $0xa8] sm:$0x1] %v3039_v2  ;;  %v346_v50 = vld [vmem:[%s3119_s17 + $0xc0] sm:$0xff]  ;;  %v2857_v59 = vld [vmem:[%s4535_s4 + $0xd0] sm:$0xff]  ;;  %v331_v63 = vld [vmem:[%s3119_s17 + $0x48] sm:$0xff]  ;;  %v415_v4 = vmul.f32 %v3124_v5, %v379_v52 }
  0x1b   : > { %2972 = vmatpush.msra.mxu3 %v2823_v15  ;;  %775 = vmatpush.msra.mxu0 %v2823_v15  ;;  %537 = vst [vmem:[#allocation2 + $0xc0] sm:$0x1] %v3039_v2  ;;  %v354_v51 = vld [vmem:[%s3113_s14] sm:$0xff]  ;;  %v364_v0 = vld [vmem:[%s3113_s14 + $0x50] sm:$0xff]  ;;  %v482_v1 = vadd.f32 %v450_v53, %v346_v50  ;;  %v443_v3 = vadd.f32 %v3136_v9, %v407_v54  ;;  %v2840_v7 = vld [vmem:[%s4535_s4 + $0x348] sm:$0xff] }
  0x1c   : > { %2973 = vmatpush.msra.mxu1 %v2822_v16  ;;  %2974 = vmatpush.msra.mxu2 %v2822_v16  ;;  %538 = vst [vmem:[#allocation2 + $0xd8] sm:$0x1] %v3039_v2  ;;  %v2875_v60 = vld [vmem:[%s4535_s4 + $0x260] sm:$0xff]  ;;  %v390_v62 = vmul.f32 %v3124_v5, %v354_v51  ;;  %v712_v6 = vld [vmem:[%s4535_s4 + $0x50] sm:$0xff]  ;;  %v339_v8 = vld [vmem:[%s3119_s17 + $0x88] sm:$0xff]  ;;  %v3311_v11 = vadd.f32 %v435_v61, %v331_v63 }
  0x1d   : > { %2975 = vmatpush.msra.mxu3 %v2822_v16  ;;  %776 = vmatpush.msra.mxu0 %v2822_v16  ;;  %539 = vst [vmem:[#allocation2 + $0xf0] sm:$0x1] %v3039_v2  ;;  %v372_v10 = vld [vmem:[%s3113_s14 + $0x90] sm:$0xff]  ;;  %v322_v12 = vld [vmem:[%s3119_s17] sm:$0xff]  ;;  %v400_v14 = vmul.f32 %v3124_v5, %v364_v0  ;;  %v347_v15 = vld [vmem:[%s3119_s17 + $0xc8] sm:$0xff] }
  0x1e   : > { %2976 = vmatpush.msra.mxu1 %v2821_v17  ;;  %2977 = vmatpush.msra.mxu2 %v2821_v17  ;;  %540 = vst [vmem:[#allocation2 + $0x108] sm:$0x1] %v3039_v2  ;;  %v426_v13 = vadd.f32 %v3136_v9, %v390_v62  ;;  %v355_v16 = vld [vmem:[%s3113_s14 + $0x8] sm:$0xff]  ;;  %v365_v32 = vld [vmem:[%s3113_s14 + $0x58] sm:$0xff]  ;;  %v710_v36 = vld [vmem:[%s4535_s4 + $0x40] sm:$0xff] }
  0x1f   : > { %2978 = vmatpush.msra.mxu3 %v2821_v17  ;;  %777 = vmatpush.msra.mxu0 %v2821_v17  ;;  %541 = vst [vmem:[#allocation2 + $0x120] sm:$0x1] %v3039_v2  ;;  %v380_v17 = vld [vmem:[%s3113_s14 + $0xd0] sm:$0xff]  ;;  %v373_v39 = vld [vmem:[%s3113_s14 + $0x98] sm:$0xff]  ;;  %v2872_v52 = vld [vmem:[%s4535_s4 + $0x248] sm:$0xff] }
  0x20   : > { %2979 = vmatpush.msra.mxu1 %v2820_v18  ;;  %2980 = vmatpush.msra.mxu2 %v2820_v18  ;;  %542 = vst [vmem:[#allocation2 + $0x138] sm:$0x1] %v3039_v2  ;;  %v3201_v25 = vld [vmem:[#allocation2 + $0x78] sm:$0xff]  ;;  %v3343_v27 = vadd.f32 %v426_v13, %v322_v12  ;;  %v416_v35 = vmul.f32 %v3124_v5, %v380_v17  ;;  %v348_v45 = vld [vmem:[%s3119_s17 + $0xd0] sm:$0xff]  ;;  %v366_v63 = vld [vmem:[%s3113_s14 + $0x60] sm:$0xff] }
  0x21   : > { %2981 = vmatpush.msra.mxu3 %v2820_v18  ;;  %778 = vmatpush.msra.mxu0 %v2820_v18  ;;  %543 = vst [vmem:[#allocation2 + $0x150] sm:$0x1] %v3039_v2  ;;  %v475_v18 = vadd.f32 %v443_v3, %v339_v8  ;;  %v409_v50 = vmul.f32 %v3124_v5, %v373_v39  ;;  %v2854_v51 = vld [vmem:[%s4535_s4 + $0xb8] sm:$0xff]  ;;  %v324_v13 = vld [vmem:[%s3119_s17 + $0x10] sm:$0xff] }
  0x22   : > { %2982 = vmatpush.msra.mxu1 %v2819_v19  ;;  %2983 = vmatpush.msra.mxu2 %v2819_v19  ;;  %544 = vst [vmem:[#allocation2 + $0x168] sm:$0x1] %v3039_v2  ;;  %v452_v49 = vadd.f32 %v3136_v9, %v416_v35  ;;  %v709_v53 = vld [vmem:[%s4535_s4 + $0x38] sm:$0xff] }
  0x23   : > { %2984 = vmatpush.msra.mxu3 %v2819_v19  ;;  %545 = vst [vmem:[#allocation2 + $0x180] sm:$0x1] %v3039_v2  ;;  %779 = vmatpush.msra.mxu0 %v2819_v19  ;;  %v451_v19 = vadd.f32 %v3136_v9, %v415_v4  ;;  %v333_v62 = vld [vmem:[%s3119_s17 + $0x58] sm:$0xff]  ;;  %v708_v4 = vld [vmem:[%s4535_s4 + $0x30] sm:$0xff] }
  0x24   : > { %2985 = vmatpush.msra.mxu1 %v2818_v20  ;;  %2986 = vmatpush.msra.mxu2 %v2818_v20  ;;  %548 = vst [vmem:[#allocation2 + $0x29] sm:$0x1] %v3039_v2  ;;  %v484_v0 = vadd.f32 %v452_v49, %v348_v45  ;;  %v341_v8 = vld [vmem:[%s3119_s17 + $0x98] sm:$0xff]  ;;  %v342_v45 = vld [vmem:[%s3119_s17 + $0xa0] sm:$0xff] }
  0x25   : > { %2987 = vmatpush.msra.mxu3 %v2818_v20  ;;  %549 = vst [vmem:[#allocation2 + $0x41] sm:$0x1] %v3039_v2  ;;  %780 = vmatpush.msra.mxu0 %v2818_v20  ;;  %v408_v20 = vmul.f32 %v3124_v5, %v372_v10  ;;  %v374_v10 = vld [vmem:[%s3113_s14 + $0xa0] sm:$0xff]  ;;  %v349_v17 = vld [vmem:[%s3119_s17 + $0xd8] sm:$0xff] }
  0x26   : > { %2988 = vmatpush.msra.mxu1 %v2817_v21  ;;  %2989 = vmatpush.msra.mxu2 %v2817_v21  ;;  %550 = vst [vmem:[#allocation2 + $0x59] sm:$0x1] %v3039_v2 }
  0x27   : > { %2990 = vmatpush.msra.mxu3 %v2817_v21  ;;  %551 = vst [vmem:[#allocation2 + $0x71] sm:$0x1] %v3039_v2  ;;  %781 = vmatpush.msra.mxu0 %v2817_v21  ;;  %v2874_v21 = vld [vmem:[%s4535_s4 + $0x258] sm:$0xff] }
  0x28   : > { %2991 = vmatpush.msra.mxu1 %v2816_v22  ;;  %2992 = vmatpush.msra.mxu2 %v2816_v22  ;;  %552 = vst [vmem:[#allocation2 + $0x89] sm:$0x1] %v3039_v2 }
  0x29   : > { %2993 = vmatpush.msra.mxu3 %v2816_v22  ;;  %553 = vst [vmem:[#allocation2 + $0xa1] sm:$0x1] %v3039_v2  ;;  %782 = vmatpush.msra.mxu0 %v2816_v22  ;;  %v711_v22 = vld [vmem:[%s4535_s4 + $0x48] sm:$0xff] }
  0x2a   : > { %2994 = vmatpush.msra.mxu1 %v2815_v24  ;;  %2995 = vmatpush.msra.mxu2 %v2815_v24  ;;  %554 = vst [vmem:[#allocation2 + $0xb9] sm:$0x1] %v3039_v2 }
  0x2b   : > { %808 = vmatmul.f32.vlgmr.msra.gmra.mxu1 %v3201_v25  ;;  %555 = vst [vmem:[#allocation2 + $0xd1] sm:$0x1] %v3039_v2  ;;  %2996 = vmatpush.msra.mxu3 %v2815_v24 }
  0x2c   : > { %1044 = vmatpush.msrb.mxu2 %v2846_v26  ;;  %556 = vst [vmem:[#allocation2 + $0xe9] sm:$0x1] %v3039_v2  ;;  %881 = vmatpush.msrb.mxu1 %v717_v28  ;;  %v2855_v26 = vld [vmem:[%s4535_s4 + $0xc0] sm:$0xff]  ;;  %v436_v28 = vadd.f32 %v3136_v9, %v400_v14 }
  0x2d   : > { %557 = vst [vmem:[#allocation2 + $0x101] sm:$0x1] %v3039_v2  ;;  %1310 = vmatpush.msrb.mxu3 %v2862_v29  ;;  %783 = vmatpush.msra.mxu0 %v2815_v24  ;;  %v2839_v24 = vld [vmem:[%s4535_s4 + $0x340] sm:$0xff]  ;;  %v391_v29 = vmul.f32 %v3124_v5, %v355_v16 }
  0x2e   : > { %1045 = vmatpush.msrb.mxu2 %v2845_v30  ;;  %558 = vst [vmem:[#allocation2 + $0x119] sm:$0x1] %v3039_v2  ;;  %882 = vmatpush.msrb.mxu1 %v716_v31  ;;  %v2873_v30 = vld [vmem:[%s4535_s4 + $0x250] sm:$0xff] }
  0x2f   : > { %559 = vst [vmem:[#allocation2 + $0x131] sm:$0x1] %v3039_v2  ;;  %1311 = vmatpush.msrb.mxu3 %v2861_v33  ;;  %1504 = vmatpush.msrb.mxu0 %v2878_v37  ;;  %v332_v31 = vld [vmem:[%s3119_s17 + $0x50] sm:$0xff]  ;;  %v483_v33 = vadd.f32 %v451_v19, %v347_v15  ;;  %v2838_v37 = vld [vmem:[%s4535_s4 + $0x338] sm:$0xff]  ;;  %v427_v42 = vadd.f32 %v3136_v9, %v391_v29  ;;  %v382_v19 = vld [vmem:[%s3113_s14 + $0xe0] sm:$0xff] }
  0x30   : > { %1046 = vmatpush.msrb.mxu2 %v2844_v34  ;;  %560 = vst [vmem:[#allocation2 + $0x149] sm:$0x1] %v3039_v2  ;;  %883 = vmatpush.msrb.mxu1 %v715_v38  ;;  %v444_v34 = vadd.f32 %v3136_v9, %v408_v20  ;;  %v340_v38 = vld [vmem:[%s3119_s17 + $0x90] sm:$0xff]  ;;  %v402_v15 = vmul.f32 %v3124_v5, %v366_v63  ;;  %v2835_v29 = vld [vmem:[%s4535_s4 + $0x320] sm:$0xff]  ;;  %v705_v63 = vld [vmem:[%s4535_s4 + $0x18] sm:$0xff] }
  0x31   : > { %561 = vst [vmem:[#allocation2 + $0x161] sm:$0x1] %v3039_v2  ;;  %1312 = vmatpush.msrb.mxu3 %v2860_v40  ;;  %1505 = vmatpush.msrb.mxu0 %v2877_v43  ;;  %v3366_v40 = vadd.f32 %v436_v28, %v332_v31  ;;  %v401_v43 = vmul.f32 %v3124_v5, %v365_v32 }
  0x32   : > { %1047 = vmatpush.msrb.mxu2 %v2843_v41  ;;  %562 = vst [vmem:[#allocation2 + $0x179] sm:$0x1] %v3039_v2  ;;  %884 = vmatpush.msrb.mxu1 %v714_v44  ;;  %v323_v41 = vld [vmem:[%s3119_s17 + $0x8] sm:$0xff]  ;;  %v438_v32 = vadd.f32 %v3136_v9, %v402_v15  ;;  %v368_v15 = vld [vmem:[%s3113_s14 + $0x70] sm:$0xff] }
  0x33   : > { %563 = vst [vmem:[#allocation2 + $0x191] sm:$0x1] %v3039_v2  ;;  %1313 = vmatpush.msrb.mxu3 %v2859_v46  ;;  %1506 = vmatpush.msrb.mxu0 %v2876_v56  ;;  %v356_v46 = vld [vmem:[%s3113_s14 + $0x10] sm:$0xff] }
  0x34   : > { %1048 = vmatpush.msrb.mxu2 %v2842_v47  ;;  %506 = vst [vmem:[%s3153_s9 + $0x80] sm:$0xff] %v474_v48  ;;  %885 = vmatpush.msrb.mxu1 %v713_v57  ;;  %v381_v47 = vld [vmem:[%s3113_s14 + $0xd8] sm:$0xff]  ;;  %v2853_v56 = vld [vmem:[%s4535_s4 + $0xb0] sm:$0xff]  ;;  %v3398_v57 = vadd.f32 %v427_v42, %v323_v41  ;;  %v418_v41 = vmul.f32 %v3124_v5, %v382_v19  ;;  %v706_v42 = vld [vmem:[%s4535_s4 + $0x20] sm:$0xff] }
  0x35   : > { %582 = vst [vmem:[#allocation2 + $0xd9] sm:$0xff] %v474_v48  ;;  %1314 = vmatpush.msrb.mxu3 %v2858_v55  ;;  %1507 = vmatpush.msrb.mxu0 %v2875_v60  ;;  %v476_v48 = vadd.f32 %v444_v34, %v340_v38  ;;  %v2837_v55 = vld [vmem:[%s4535_s4 + $0x330] sm:$0xff]  ;;  %v2871_v60 = vld [vmem:[%s4535_s4 + $0x240] sm:$0xff]  ;;  %v417_v3 = vmul.f32 %v3124_v5, %v381_v47 }
  0x36   : > { %1049 = vmatpush.msrb.mxu2 %v2841_v58  ;;  %529 = vst [vmem:[#allocation2] sm:$0x1] %v3039_v2  ;;  %886 = vmatpush.msrb.mxu1 %v712_v6  ;;  %v437_v58 = vadd.f32 %v3136_v9, %v401_v43  ;;  %v2836_v6 = vld [vmem:[%s4535_s4 + $0x328] sm:$0xff]  ;;  %v2869_v34 = vld [vmem:[%s4535_s4 + $0x230] sm:$0xff]  ;;  %v2834_v43 = vld [vmem:[%s4535_s4 + $0x318] sm:$0xff] }
  0x37   : > { %546 = vst [vmem:[#allocation2 + $0x198] sm:$0x1] %v3039_v2  ;;  %1315 = vmatpush.msrb.mxu3 %v2857_v59  ;;  %1508 = vmatpush.msrb.mxu0 %v2874_v21  ;;  %v392_v59 = vmul.f32 %v3124_v5, %v356_v46  ;;  %v410_v21 = vmul.f32 %v3124_v5, %v374_v10  ;;  %v375_v46 = vld [vmem:[%s3113_s14 + $0xa8] sm:$0xff]  ;;  %v2867_v10 = vld [vmem:[%s4535_s4 + $0x220] sm:$0xff]  ;;  %v704_v19 = vld [vmem:[%s4535_s4 + $0x10] sm:$0xff] }
  0x38   : > { %547 = vst [vmem:[#allocation2 + $0x11] sm:$0x1] %v3039_v2  ;;  %1050 = vmatpush.msrb.mxu2 %v2840_v7  ;;  %887 = vmatpush.msrb.mxu1 %v711_v22  ;;  %v3427_v12 = vadd.f32 %v437_v58, %v333_v62  ;;  %v2852_v22 = vld [vmem:[%s4535_s4 + $0xa8] sm:$0xff]  ;;  %v454_v58 = vadd.f32 %v3136_v9, %v418_v41 }
  0x39   : > { %564 = vst [vmem:[#allocation2 + $0x1a9] sm:$0x1] %v3039_v2  ;;  %v2856_v2 = vld [vmem:[%s4535_s4 + $0xc8] sm:$0xff]  ;;  %1509 = vmatpush.msrb.mxu0 %v2873_v30  ;;  %v428_v14 = vadd.f32 %v3136_v9, %v392_v59  ;;  %v2851_v30 = vld [vmem:[%s4535_s4 + $0xa0] sm:$0xff]  ;;  %v446_v39 = vadd.f32 %v3136_v9, %v410_v21  ;;  %v411_v59 = vmul.f32 %v3124_v5, %v375_v46 }
  0x3a   : > { %514 = vst [vmem:[%s3153_s9 + $0xc0] sm:$0xff] %v482_v1  ;;  %1316 = vmatpush.msrb.mxu3 %v2856_v2  ;;  %1051 = vmatpush.msrb.mxu2 %v2839_v24  ;;  %v453_v2 = vadd.f32 %v3136_v9, %v417_v3  ;;  %v2870_v24 = vld [vmem:[%s4535_s4 + $0x238] sm:$0xff]  ;;  %v2868_v62 = vld [vmem:[%s4535_s4 + $0x228] sm:$0xff]  ;;  %v2849_v3 = vld [vmem:[%s4535_s4 + $0x90] sm:$0xff] }
  0x3b   : > { %590 = vst [vmem:[#allocation2 + $0x139] sm:$0xff] %v482_v1  ;;  %888 = vmatpush.msrb.mxu1 %v710_v36  ;;  %1510 = vmatpush.msrb.mxu0 %v2872_v52  ;;  %v445_v1 = vadd.f32 %v3136_v9, %v409_v50  ;;  %v3459_v31 = vadd.f32 %v428_v14, %v324_v13  ;;  %v334_v36 = vld [vmem:[%s3119_s17 + $0x60] sm:$0xff]  ;;  %v335_v14 = vld [vmem:[%s3119_s17 + $0x68] sm:$0xff] }
  0x3c   : > { %v3331_v23 = vld [vmem:[#allocation2 + $0xd8] sm:$0xff]  ;;  %499 = vst [vmem:[%s3153_s9 + $0x48] sm:$0xff] %v3311_v11  ;;  %1317 = vmatpush.msrb.mxu3 %v2855_v26  ;;  %1052 = vmatpush.msrb.mxu2 %v2838_v37  ;;  %v707_v26 = vld [vmem:[%s4535_s4 + $0x28] sm:$0xff]  ;;  %v485_v38 = vadd.f32 %v453_v2, %v349_v17  ;;  %v3488_v47 = vadd.f32 %v438_v32, %v334_v36  ;;  %v350_v52 = vld [vmem:[%s3119_s17 + $0xe0] sm:$0xff] }
  0x3d   : > { %832 = vmatmul.f32.vlgmr.msra.gmra.mxu2 %v3331_v23  ;;  %575 = vst [vmem:[#allocation2 + $0x81] sm:$0xff] %v3311_v11  ;;  %889 = vmatpush.msrb.mxu1 %v709_v53  ;;  %v477_v20 = vadd.f32 %v445_v1, %v341_v8  ;;  %v367_v37 = vld [vmem:[%s3113_s14 + $0x68] sm:$0xff]  ;;  %v358_v53 = vld [vmem:[%s3113_s14 + $0x20] sm:$0xff]  ;;  %v2833_v1 = vld [vmem:[%s4535_s4 + $0x310] sm:$0xff]  ;;  %v447_v17 = vadd.f32 %v3136_v9, %v411_v59 }
  0x3e   : > { %507 = vst [vmem:[%s3153_s9 + $0x88] sm:$0xff] %v475_v18  ;;  %1318 = vmatpush.msrb.mxu3 %v2854_v51  ;;  %1053 = vmatpush.msrb.mxu2 %v2837_v55  ;;  %v403_v50 = vmul.f32 %v3124_v5, %v367_v37  ;;  %v383_v55 = vld [vmem:[%s3113_s14 + $0xe8] sm:$0xff]  ;;  %v394_v8 = vmul.f32 %v3124_v5, %v358_v53  ;;  %v384_v36 = vld [vmem:[%s3113_s14 + $0xf0] sm:$0xff]  ;;  %v2831_v46 = vld [vmem:[%s4535_s4 + $0x300] sm:$0xff] }
  0x3f   : > { %583 = vst [vmem:[#allocation2 + $0xe1] sm:$0xff] %v475_v18  ;;  %1511 = vmatpush.msrb.mxu0 %v2871_v60  ;;  %890 = vmatpush.msrb.mxu1 %v708_v4  ;;  %v357_v18 = vld [vmem:[%s3113_s14 + $0x18] sm:$0xff]  ;;  %v343_v21 = vld [vmem:[%s3119_s17 + $0xa8] sm:$0xff]  ;;  %v2865_v53 = vld [vmem:[%s4535_s4 + $0x210] sm:$0xff] }
  0x40   : > { %490 = vst [vmem:[%s3153_s9] sm:$0xff] %v3343_v27  ;;  %1319 = vmatpush.msrb.mxu3 %v2853_v56  ;;  %1054 = vmatpush.msrb.mxu2 %v2836_v6  ;;  %v3500_v56 = vadd.f32 %v446_v39, %v342_v45  ;;  %v2850_v60 = vld [vmem:[%s4535_s4 + $0x98] sm:$0xff]  ;;  %v439_v6 = vadd.f32 %v3136_v9, %v403_v50  ;;  %v2848_v41 = vld [vmem:[%s4535_s4 + $0x88] sm:$0xff]  ;;  %v336_v59 = vld [vmem:[%s3119_s17 + $0x70] sm:$0xff] }
  0x41   : > { %566 = vst [vmem:[#allocation2 + $0x19] sm:$0xff] %v3343_v27  ;;  %1512 = vmatpush.msrb.mxu0 %v2870_v24  ;;  %891 = vmatpush.msrb.mxu1 %v707_v26  ;;  %v326_v26 = vld [vmem:[%s3119_s17 + $0x20] sm:$0xff]  ;;  %v3568_v37 = vadd.f32 %v447_v17, %v343_v21 }
  0x42   : > { %v624_v44 = vld [vmem:[#allocation2 + $0x138] sm:$0xff]  ;;  %515 = vst [vmem:[%s3153_s9 + $0xc8] sm:$0xff] %v483_v33  ;;  %1320 = vmatpush.msrb.mxu3 %v2852_v22  ;;  %1055 = vmatpush.msrb.mxu2 %v2835_v29  ;;  %v376_v22 = vld [vmem:[%s3113_s14 + $0xb0] sm:$0xff]  ;;  %v3556_v24 = vadd.f32 %v439_v6, %v335_v14  ;;  %v430_v29 = vadd.f32 %v3136_v9, %v394_v8 }
  0x43   : > { %856 = vmatmul.f32.vlgmr.msra.gmra.mxu3 %v624_v44  ;;  %591 = vst [vmem:[#allocation2 + $0x141] sm:$0xff] %v483_v33  ;;  %v393_v33 = vmul.f32 %v3124_v5, %v357_v18  ;;  %1513 = vmatpush.msrb.mxu0 %v2869_v34  ;;  %v419_v18 = vmul.f32 %v3124_v5, %v383_v55  ;;  %v359_v34 = vld [vmem:[%s3113_s14 + $0x28] sm:$0xff]  ;;  %v702_v55 = vld [vmem:[%s4535_s4] sm:$0xff]  ;;  %v344_v8 = vld [vmem:[%s3119_s17 + $0xb0] sm:$0xff] }
  0x44   : > { %v3386_v54 = vld [vmem:[#allocation2 + $0x80] sm:$0xff]  ;;  %500 = vst [vmem:[%s3153_s9 + $0x50] sm:$0xff] %v3366_v40  ;;  %1321 = vmatpush.msrb.mxu3 %v2851_v30  ;;  %892 = vmatpush.msrb.mxu1 %v706_v42  ;;  %v404_v30 = vmul.f32 %v3124_v5, %v368_v15  ;;  %v412_v39 = vmul.f32 %v3124_v5, %v376_v22  ;;  %v2866_v42 = vld [vmem:[%s4535_s4 + $0x218] sm:$0xff]  ;;  %v327_v15 = vld [vmem:[%s3119_s17 + $0x28] sm:$0xff] }
  0x45   : > { %811 = vmatmul.f32.gmra.mxu1 %v3386_v54  ;;  %576 = vst [vmem:[#allocation2 + $0x91] sm:$0xff] %v3366_v40  ;;  %1056 = vmatpush.msrb.mxu2 %v2834_v43  ;;  %v429_v49 = vadd.f32 %v3136_v9, %v393_v33  ;;  %v351_v33 = vld [vmem:[%s3119_s17 + $0xe8] sm:$0xff] }
  0x46   : > { %v3405_v61 = vld [vmem:[#allocation2 + $0xe0] sm:$0xff]  ;;  %508 = vst [vmem:[%s3153_s9 + $0x90] sm:$0xff] %v476_v48  ;;  %1322 = vmatpush.msrb.mxu3 %v2850_v60  ;;  %1514 = vmatpush.msrb.mxu0 %v2868_v62  ;;  %v703_v43 = vld [vmem:[%s4535_s4 + $0x8] sm:$0xff]  ;;  %v440_v50 = vadd.f32 %v3136_v9, %v404_v30  ;;  %v369_v60 = vld [vmem:[%s3113_s14 + $0x78] sm:$0xff] }
  0x47   : > { %835 = vmatmul.f32.gmra.mxu2 %v3405_v61  ;;  %584 = vst [vmem:[#allocation2 + $0xf1] sm:$0xff] %v476_v48  ;;  %v325_v48 = vld [vmem:[%s3119_s17 + $0x18] sm:$0xff]  ;;  %893 = vmatpush.msrb.mxu1 %v705_v63  ;;  %v448_v63 = vadd.f32 %v3136_v9, %v412_v39  ;;  %v405_v17 = vmul.f32 %v3124_v5, %v369_v60 }
  0x48   : > { %v3419_v7 = vld [vmem:[#allocation2 + $0x18] sm:$0xff]  ;;  %491 = vst [vmem:[%s3153_s9 + $0x8] sm:$0xff] %v3398_v57  ;;  %v3525_v4 = vadd.f32 %v429_v49, %v325_v48  ;;  %1057 = vmatpush.msrb.mxu2 %v2833_v1  ;;  %1323 = vmatpush.msrb.mxu3 %v2849_v3  ;;  %v2847_v48 = vld [vmem:[%s4535_s4 + $0x80] sm:$0xff]  ;;  %v3593_v49 = vadd.f32 %v430_v29, %v326_v26  ;;  %v2864_v29 = vld [vmem:[%s4535_s4 + $0x208] sm:$0xff] }
  0x49   : > { %784 = vmatmul.f32.vlgmr.msra.gmra.mxu0 %v3419_v7  ;;  %567 = vst [vmem:[#allocation2 + $0x21] sm:$0xff] %v3398_v57  ;;  %894 = vmatpush.msrb.mxu1 %v704_v19  ;;  %v420_v1 = vmul.f32 %v3124_v5, %v384_v36  ;;  %v2910_v3 = vld [vmem:[%s4535_s4 + $0x178] sm:$0xff]  ;;  %v3624_v14 = vadd.f32 %v440_v50, %v336_v59  ;;  %v352_v19 = vld [vmem:[%s3119_s17 + $0xf0] sm:$0xff] }
  0x4a   : > { %v625_v16 = vld [vmem:[#allocation2 + $0x140] sm:$0xff]  ;;  %516 = vst [vmem:[%s3153_s9 + $0xd0] sm:$0xff] %v484_v0  ;;  %1515 = vmatpush.msrb.mxu0 %v2867_v10  ;;  %1324 = vmatpush.msrb.mxu3 %v2848_v41  ;;  %v377_v10 = vld [vmem:[%s3113_s14 + $0xb8] sm:$0xff]  ;;  %v3635_v21 = vadd.f32 %v448_v63, %v344_v8  ;;  %v441_v41 = vadd.f32 %v3136_v9, %v405_v17 }
  0x4b   : > { %859 = vmatmul.f32.gmra.mxu3 %v625_v16  ;;  %592 = vst [vmem:[#allocation2 + $0x151] sm:$0xff] %v484_v0  ;;  %v486_v16 = vadd.f32 %v454_v58, %v350_v52  ;;  %v395_v52 = vmul.f32 %v3124_v5, %v359_v34  ;;  %895 = vmatpush.msrb.mxu1 %v703_v43  ;;  %v2926_v30 = vld [vmem:[%s4535_s4 + $0x2f8] sm:$0xff] }
  0x4c   : > { %v3447_v28 = vld [vmem:[#allocation2 + $0x90] sm:$0xff]  ;;  %501 = vst [vmem:[%s3153_s9 + $0x58] sm:$0xff] %v3427_v12  ;;  %1516 = vmatpush.msrb.mxu0 %v2866_v42  ;;  %1325 = vmatpush.msrb.mxu3 %v2847_v48  ;;  %v456_v22 = vadd.f32 %v3136_v9, %v420_v1  ;;  %v413_v26 = vmul.f32 %v3124_v5, %v377_v10  ;;  %v385_v36 = vld [vmem:[%s3113_s14 + $0xf8] sm:$0xff] }
  0x4d   : > { %814 = vmatmul.f32.gmra.mxu1 %v3447_v28  ;;  %577 = vst [vmem:[#allocation2 + $0x99] sm:$0xff] %v3427_v12  ;;  %v361_v48 = vld [vmem:[%s3113_s14 + $0x38] sm:$0xff] }
  0x4e   : > { %v3466_v35 = vld [vmem:[#allocation2 + $0xf0] sm:$0xff]  ;;  %509 = vst [vmem:[%s3153_s9 + $0x98] sm:$0xff] %v477_v20  ;;  %1517 = vmatpush.msrb.mxu0 %v2865_v53  ;;  %896 = vmatpush.msrb.mxu1 %v702_v55  ;;  %v488_v50 = vadd.f32 %v456_v22, %v352_v19  ;;  %v421_v53 = vmul.f32 %v3124_v5, %v385_v36  ;;  %v345_v59 = vld [vmem:[%s3119_s17 + $0xb8] sm:$0xff] }
  0x4f   : > { %838 = vmatmul.f32.gmra.mxu2 %v3466_v35  ;;  %585 = vst [vmem:[#allocation2 + $0xf9] sm:$0xff] %v477_v20  ;;  %v2832_v20 = vld [vmem:[%s4535_s4 + $0x308] sm:$0xff]  ;;  %2158 = vmatpush.msra.mxu3 %v2926_v30  ;;  %v397_v63 = vmul.f32 %v3124_v5, %v361_v48  ;;  %v329_v22 = vld [vmem:[%s3119_s17 + $0x38] sm:$0xff]  ;;  %v2925_v36 = vld [vmem:[%s4535_s4 + $0x2f0] sm:$0xff] }
  0x50   : > { %v3480_v44 = vld [vmem:[#allocation2 + $0x20] sm:$0xff]  ;;  %492 = vst [vmem:[%s3153_s9 + $0x10] sm:$0xff] %v3459_v31  ;;  %1058 = vmatpush.msrb.mxu2 %v2832_v20  ;;  %v360_v20 = vld [vmem:[%s3113_s14 + $0x30] sm:$0xff]  ;;  %1518 = vmatpush.msrb.mxu0 %v2864_v29  ;;  %v457_v10 = vadd.f32 %v3136_v9, %v421_v53 }
  0x51   : > { %787 = vmatmul.f32.gmra.mxu0 %v3480_v44  ;;  %568 = vst [vmem:[#allocation2 + $0x31] sm:$0xff] %v3459_v31  ;;  %v396_v42 = vmul.f32 %v3124_v5, %v360_v20  ;;  %v353_v5 = vld [vmem:[%s3119_s17 + $0xf8] sm:$0xff]  ;;  %v433_v19 = vadd.f32 %v3136_v9, %v397_v63  ;;  %v2909_v29 = vld [vmem:[%s4535_s4 + $0x170] sm:$0xff]  ;;  %2159 = vmatpush.msra.mxu3 %v2925_v36  ;;  %v2924_v63 = vld [vmem:[%s4535_s4 + $0x2e8] sm:$0xff] }
  0x52   : > { %v3493_v51 = vld [vmem:[#allocation2 + $0x150] sm:$0xff]  ;;  %517 = vst [vmem:[%s3153_s9 + $0xd8] sm:$0xff] %v485_v38  ;;  %1059 = vmatpush.msrb.mxu2 %v2831_v46  ;;  %v337_v46 = vld [vmem:[%s3119_s17 + $0x78] sm:$0xff] }
  0x53   : > { %862 = vmatmul.f32.gmra.mxu3 %v3493_v51  ;;  %593 = vst [vmem:[#allocation2 + $0x159] sm:$0xff] %v485_v38  ;;  %v455_v38 = vadd.f32 %v3136_v9, %v419_v18  ;;  %v3679_v60 = vadd.f32 %v441_v41, %v337_v46 }
  0x54   : > { %v3513_v0 = vld [vmem:[#allocation2 + $0x98] sm:$0xff]  ;;  %502 = vst [vmem:[%s3153_s9 + $0x60] sm:$0xff] %v3488_v47  ;;  %1964 = vmatpush.msra.mxu2 %v2910_v3  ;;  %v328_v3 = vld [vmem:[%s3119_s17 + $0x30] sm:$0xff]  ;;  %2160 = vmatpush.msra.mxu3 %v2924_v63 }
  0x55   : > { %817 = vmatmul.f32.gmra.mxu1 %v3513_v0  ;;  %578 = vst [vmem:[#allocation2 + $0xa9] sm:$0xff] %v3488_v47  ;;  %v487_v62 = vadd.f32 %v455_v38, %v351_v33  ;;  %v2894_v33 = vld [vmem:[%s4535_s4 + $0x3f8] sm:$0xff]  ;;  %v2863_v38 = vld [vmem:[%s4535_s4 + $0x200] sm:$0xff] }
  0x56   : > { %v3532_v13 = vld [vmem:[#allocation2 + $0xf8] sm:$0xff]  ;;  %510 = vst [vmem:[%s3153_s9 + $0xa0] sm:$0xff] %v3500_v56  ;;  %1698 = vmatpush.msra.mxu1 %v2894_v33  ;;  %1519 = vmatpush.msrb.mxu0 %v2863_v38  ;;  %v2893_v38 = vld [vmem:[%s4535_s4 + $0x3f0] sm:$0xff] }
  0x57   : > { %841 = vmatmul.f32.gmra.mxu2 %v3532_v13  ;;  %586 = vst [vmem:[#allocation2 + $0x109] sm:$0xff] %v3500_v56  ;;  %v3009_v63 = vld [vmem:[#allocation2 + $0x78] sm:$0xff] }
  0x58   : > { %v3548_v2 = vld [vmem:[#allocation2 + $0x30] sm:$0xff]  ;;  %493 = vst [vmem:[%s3153_s9 + $0x18] sm:$0xff] %v3525_v4  ;;  %1965 = vmatpush.msra.mxu2 %v2909_v29  ;;  %1699 = vmatpush.msra.mxu1 %v2893_v38  ;;  %v2891_v29 = vld [vmem:[%s4535_s4 + $0x3e0] sm:$0xff]  ;;  %v2888_v38 = vld [vmem:[%s4535_s4 + $0x3c8] sm:$0xff] }
  0x59   : > { %790 = vmatmul.f32.gmra.mxu0 %v3548_v2  ;;  %569 = vst [vmem:[#allocation2 + $0x39] sm:$0xff] %v3525_v4 }
  0x5a   : > { %v3561_v32 = vld [vmem:[#allocation2 + $0x158] sm:$0xff]  ;;  %518 = vst [vmem:[%s3153_s9 + $0xe0] sm:$0xff] %v486_v16 }
  0x5b   : > { %865 = vmatmul.f32.gmra.mxu3 %v3561_v32  ;;  %594 = vst [vmem:[#allocation2 + $0x169] sm:$0xff] %v486_v16  ;;  %v431_v16 = vadd.f32 %v3136_v9, %v395_v52  ;;  %v449_v52 = vadd.f32 %v3136_v9, %v413_v26  ;;  %v3711_v26 = vadd.f32 %v457_v10, %v353_v5  ;;  %v3767_v10 = vld [vmem:[#allocation2 + $0x8] sm:$0xff] }
  0x5c   : > { %v3581_v45 = vld [vmem:[#allocation2 + $0xa8] sm:$0xff]  ;;  %503 = vst [vmem:[%s3153_s9 + $0x68] sm:$0xff] %v3556_v24 }
  0x5d   : > { %820 = vmatmul.f32.gmra.mxu1 %v3581_v45  ;;  %579 = vst [vmem:[#allocation2 + $0xb1] sm:$0xff] %v3556_v24  ;;  %v3658_v39 = vadd.f32 %v431_v16, %v327_v15  ;;  %v3688_v8 = vadd.f32 %v449_v52, %v345_v59  ;;  %v2942_v15 = vld [vmem:[%s4535_s4 + $0x478] sm:$0xff]  ;;  %v2941_v52 = vld [vmem:[%s4535_s4 + $0x470] sm:$0xff]  ;;  %v2908_v59 = vld [vmem:[%s4535_s4 + $0x168] sm:$0xff] }
  0x5e   : > { %v3603_v58 = vld [vmem:[#allocation2 + $0x108] sm:$0xff]  ;;  %511 = vst [vmem:[%s3153_s9 + $0xa8] sm:$0xff] %v3568_v37  ;;  %2352 = vmatpush.msra.mxu0 %v2942_v15  ;;  %1966 = vmatpush.msra.mxu2 %v2908_v59 }
  0x5f   : > { %844 = vmatmul.f32.gmra.mxu2 %v3603_v58  ;;  %587 = vst [vmem:[#allocation2 + $0x111] sm:$0xff] %v3568_v37  ;;  %v1190_v15 = vld [vmem:[#allocation2 + $0x9] sm:$0xff] }
  0x60   : > { %v3616_v6 = vld [vmem:[#allocation2 + $0x38] sm:$0xff]  ;;  %494 = vst [vmem:[%s3153_s9 + $0x20] sm:$0xff] %v3593_v49  ;;  %2353 = vmatpush.msra.mxu0 %v2941_v52  ;;  %v2940_v5 = vld [vmem:[%s4535_s4 + $0x468] sm:$0xff] }
  0x61   : > { %793 = vmatmul.f32.gmra.mxu0 %v3616_v6  ;;  %570 = vst [vmem:[#allocation2 + $0x49] sm:$0xff] %v3593_v49  ;;  %v3859_v52 = vld [vmem:[#allocation2 + $0x79] sm:$0xff] }
  0x62   : > { %v3629_v18 = vld [vmem:[#allocation2 + $0x168] sm:$0xff]  ;;  %519 = vst [vmem:[%s3153_s9 + $0xe8] sm:$0xff] %v487_v62  ;;  %2354 = vmatpush.msra.mxu0 %v2940_v5  ;;  %v2903_v5 = vld [vmem:[%s4535_s4 + $0x140] sm:$0xff] }
  0x63   : > { %868 = vmatmul.f32.gmra.mxu3 %v3629_v18  ;;  %595 = vst [vmem:[#allocation2 + $0x171] sm:$0xff] %v487_v62  ;;  %v432_v62 = vadd.f32 %v3136_v9, %v396_v42  ;;  %v3722_v9 = vadd.f32 %v433_v19, %v329_v22  ;;  %v2907_v19 = vld [vmem:[%s4535_s4 + $0x160] sm:$0xff] }
  0x64   : > { %v3648_v34 = vld [vmem:[#allocation2 + $0xb0] sm:$0xff]  ;;  %504 = vst [vmem:[%s3153_s9 + $0x70] sm:$0xff] %v3624_v14  ;;  %1967 = vmatpush.msra.mxu2 %v2907_v19  ;;  %v2923_v22 = vld [vmem:[%s4535_s4 + $0x2e0] sm:$0xff] }
  0x65   : > { %823 = vmatmul.f32.gmra.mxu1 %v3648_v34  ;;  %580 = vst [vmem:[#allocation2 + $0xc1] sm:$0xff] %v3624_v14  ;;  %v3701_v17 = vadd.f32 %v432_v62, %v328_v3  ;;  %v1189_v62 = vld [vmem:[#allocation2 + $0x1] sm:$0xff]  ;;  %2161 = vmatpush.msra.mxu3 %v2923_v22 }
  0x66   : > { %v3662_v43 = vld [vmem:[#allocation2 + $0x110] sm:$0xff]  ;;  %512 = vst [vmem:[%s3153_s9 + $0xb0] sm:$0xff] %v3635_v21  ;;  %v2892_v3 = vld [vmem:[%s4535_s4 + $0x3e8] sm:$0xff] }
  0x67   : > { %847 = vmatmul.f32.gmra.mxu2 %v3662_v43  ;;  %588 = vst [vmem:[#allocation2 + $0x121] sm:$0xff] %v3635_v21  ;;  %1700 = vmatpush.msra.mxu1 %v2892_v3 }
  0x68   : > { %v3672_v55 = vld [vmem:[#allocation2 + $0x48] sm:$0xff]  ;;  %495 = vst [vmem:[%s3153_s9 + $0x28] sm:$0xff] %v3658_v39 }
  0x69   : > { %796 = vmatmul.f32.gmra.mxu0 %v3672_v55  ;;  %571 = vst [vmem:[#allocation2 + $0x51] sm:$0xff] %v3658_v39  ;;  %1701 = vmatpush.msra.mxu1 %v2891_v29  ;;  %v2919_v29 = vld [vmem:[%s4535_s4 + $0x2c0] sm:$0xff] }
  0x6a   : > { %v3683_v1 = vld [vmem:[#allocation2 + $0x170] sm:$0xff]  ;;  %520 = vst [vmem:[%s3153_s9 + $0xf0] sm:$0xff] %v488_v50 }
  0x6b   : > { %871 = vmatmul.f32.gmra.mxu3 %v3683_v1  ;;  %596 = vst [vmem:[#allocation2 + $0x181] sm:$0xff] %v488_v50  ;;  %v598_v50 = vld [vmem:[#allocation2] sm:$0xff] }
  0x6c   : > { %v3694_v16 = vld [vmem:[#allocation2 + $0xc0] sm:$0xff]  ;;  %505 = vst [vmem:[%s3153_s9 + $0x78] sm:$0xff] %v3679_v60 }
  0x6d   : > { %826 = vmatmul.f32.gmra.mxu1 %v3694_v16  ;;  %581 = vst [vmem:[#allocation2 + $0xc9] sm:$0xff] %v3679_v60 }
  0x6e   : > { %v3704_v20 = vld [vmem:[#allocation2 + $0x120] sm:$0xff]  ;;  %513 = vst [vmem:[%s3153_s9 + $0xb8] sm:$0xff] %v3688_v8 }
  0x6f   : > { %850 = vmatmul.f32.gmra.mxu2 %v3704_v20  ;;  %589 = vst [vmem:[#allocation2 + $0x129] sm:$0xff] %v3688_v8 }
  0x70   : > { %v3716_v30 = vld [vmem:[#allocation2 + $0x50] sm:$0xff]  ;;  %496 = vst [vmem:[%s3153_s9 + $0x30] sm:$0xff] %v3701_v17 }
  0x71   : > { %799 = vmatmul.f32.gmra.mxu0 %v3716_v30  ;;  %572 = vst [vmem:[#allocation2 + $0x61] sm:$0xff] %v3701_v17 }
  0x72   : > { %v3724_v33 = vld [vmem:[#allocation2 + $0x180] sm:$0xff]  ;;  %521 = vst [vmem:[%s3153_s9 + $0xf8] sm:$0xff] %v3711_v26 }
  0x73   : > { %874 = vmatmul.f32.gmra.mxu3 %v3724_v33  ;;  %597 = vst [vmem:[#allocation2 + $0x189] sm:$0xff] %v3711_v26 }
  0x74   : > { %v3736_v41 = vld [vmem:[#allocation2 + $0xc8] sm:$0xff]  ;;  %497 = vst [vmem:[%s3153_s9 + $0x38] sm:$0xff] %v3722_v9 }
  0x75   : > { %829 = vmatmul.f32.gmra.mxu1 %v3736_v41  ;;  %573 = vst [vmem:[#allocation2 + $0x69] sm:$0xff] %v3722_v9 }
  0x76   : > { %v3742_v42 = vld [vmem:[#allocation2 + $0x128] sm:$0xff] }
  0x77   : > { %853 = vmatmul.f32.gmra.mxu2 %v3742_v42 }
  0x78   : > { %v3745_v46 = vld [vmem:[#allocation2 + $0x60] sm:$0xff] }
  0x79   : > { %802 = vmatmul.f32.gmra.mxu0 %v3745_v46 }
  0x7a   : > { %v3748_v48 = vld [vmem:[#allocation2 + $0x188] sm:$0xff] }
  0x7b   : > { %877 = vmatmul.f32.gmra.mxu3 %v3748_v48 }
  0x7c   : > { %v3754_v53 = vld [vmem:[#allocation2 + $0x68] sm:$0xff] }
  0x7d   : > { %897 = vmatmul.f32.vlgmr.msrb.gmra.mxu1 %v598_v50 }
  0x7f   : > { %1060 = vmatmul.f32.vlgmr.msrb.gmra.mxu2 %v3548_v2 }
  0x81   : > { %805 = vmatmul.f32.gmra.mxu0 %v3754_v53 }
  0x83   : > { %1326 = vmatmul.f32.vlgmr.msrb.gmra.mxu3 %v1189_v62 }
  0x85   : > { %900 = vmatmul.f32.gmra.mxu1 %v3767_v10 }
  0x87   : > { %1063 = vmatmul.f32.gmra.mxu2 %v3616_v6 }
  0x89   : > { %1520 = vmatmul.f32.vlgmr.msrb.gmra.mxu0 %v3343_v27 }
  0x8b   : > { %1329 = vmatmul.f32.gmra.mxu3 %v1190_v15 }
  0x8d   : > { %903 = vmatmul.f32.gmra.mxu1 %v3419_v7  ;;  %v2906_v7 = vld [vmem:[%s4535_s4 + $0x158] sm:$0xff] }
  0x8e   : > { %1968 = vmatpush.msra.mxu2 %v2906_v7 }
  0x8f   : > { %1066 = vmatmul.f32.gmra.mxu2 %v3672_v55 }
  0x91   : > { %1523 = vmatmul.f32.gmra.mxu0 %v3398_v57 }
  0x93   : > { %1332 = vmatmul.f32.gmra.mxu3 %v3343_v27  ;;  %v2939_v27 = vld [vmem:[%s4535_s4 + $0x460] sm:$0xff] }
  0x94   : > { %2355 = vmatpush.msra.mxu0 %v2939_v27  ;;  %v2887_v27 = vld [vmem:[%s4535_s4 + $0x3c0] sm:$0xff] }
  0x95   : > { %906 = vmatmul.f32.gmra.mxu1 %v3480_v44  ;;  %v2890_v44 = vld [vmem:[%s4535_s4 + $0x3d8] sm:$0xff] }
  0x96   : > { %1702 = vmatpush.msra.mxu1 %v2890_v44 }
  0x97   : > { %1069 = vmatmul.f32.gmra.mxu2 %v3716_v30 }
  0x99   : > { %1526 = vmatmul.f32.gmra.mxu0 %v3459_v31 }
  0x9b   : > { %1335 = vmatmul.f32.gmra.mxu3 %v3398_v57  ;;  %v2922_v57 = vld [vmem:[%s4535_s4 + $0x2d8] sm:$0xff] }
  0x9c   : > { %2162 = vmatpush.msra.mxu3 %v2922_v57 }
  0x9d   : > { %909 = vmatmul.f32.gmra.mxu1 %v3548_v2  ;;  %v2905_v2 = vld [vmem:[%s4535_s4 + $0x150] sm:$0xff] }
  0x9e   : > { %1969 = vmatpush.msra.mxu2 %v2905_v2  ;;  %v2935_v2 = vld [vmem:[%s4535_s4 + $0x440] sm:$0xff] }
  0x9f   : > { %1072 = vmatmul.f32.gmra.mxu2 %v3745_v46 }
  0xa1   : > { %1529 = vmatmul.f32.gmra.mxu0 %v3525_v4 }
  0xa3   : > { %1338 = vmatmul.f32.gmra.mxu3 %v3459_v31  ;;  %v2938_v31 = vld [vmem:[%s4535_s4 + $0x458] sm:$0xff] }
  0xa4   : > { %2356 = vmatpush.msra.mxu0 %v2938_v31 }
  0xa5   : > { %912 = vmatmul.f32.gmra.mxu1 %v3616_v6  ;;  %v2889_v6 = vld [vmem:[%s4535_s4 + $0x3d0] sm:$0xff] }
  0xa6   : > { %1703 = vmatpush.msra.mxu1 %v2889_v6  ;;  %v2902_v6 = vld [vmem:[%s4535_s4 + $0x138] sm:$0xff] }
  0xa7   : > { %1075 = vmatmul.f32.gmra.mxu2 %v3754_v53 }
  0xa8   : > { %1704 = vmatpush.msra.mxu1 %v2888_v38 }
  0xa9   : > { %1532 = vmatmul.f32.gmra.mxu0 %v3593_v49 }
  0xaa   : > { %1705 = vmatpush.msra.mxu1 %v2887_v27 }
  0xab   : > { %1341 = vmatmul.f32.gmra.mxu3 %v3525_v4  ;;  %v2921_v4 = vld [vmem:[%s4535_s4 + $0x2d0] sm:$0xff] }
  0xac   : > { %2163 = vmatpush.msra.mxu3 %v2921_v4 }
  0xad   : > { %915 = vmatmul.f32.gmra.mxu1 %v3672_v55  ;;  %v2904_v55 = vld [vmem:[%s4535_s4 + $0x148] sm:$0xff] }
  0xae   : > { %1970 = vmatpush.msra.mxu2 %v2904_v55  ;;  %v2886_v55 = vld [vmem:[%s4535_s4 + $0x3b8] sm:$0xff] }
  0xaf   : > { %1078 = vmatmul.f32.gmra.mxu2 %v3201_v25  ;;  %v3830_v25 = vpop.f32.mrf.mxu1  ;;  %1706 = vmatpush.msra.mxu1 %v2886_v55  ;;  %v2933_v55 = vld [vmem:[%s4535_s4 + $0x430] sm:$0xff] }
  0xb0   : > { %1971 = vmatpush.msra.mxu2 %v2903_v5 }
  0xb1   : > { %1535 = vmatmul.f32.gmra.mxu0 %v3658_v39 }
  0xb2   : > { %1972 = vmatpush.msra.mxu2 %v2902_v6 }
  0xb3   : > { %1344 = vmatmul.f32.gmra.mxu3 %v3593_v49  ;;  %v2937_v49 = vld [vmem:[%s4535_s4 + $0x450] sm:$0xff] }
  0xb4   : > { %2357 = vmatpush.msra.mxu0 %v2937_v49 }
  0xb5   : > { %918 = vmatmul.f32.gmra.mxu1 %v3716_v30 }
  0xb7   : > { %1081 = vmatmul.f32.gmra.mxu2 %v3386_v54 }
  0xb9   : > { %1538 = vmatmul.f32.gmra.mxu0 %v3701_v17 }
  0xbb   : > { %1347 = vmatmul.f32.gmra.mxu3 %v3658_v39  ;;  %v2920_v39 = vld [vmem:[%s4535_s4 + $0x2c8] sm:$0xff] }
  0xbc   : > { %2164 = vmatpush.msra.mxu3 %v2920_v39 }
  0xbd   : > { %921 = vmatmul.f32.gmra.mxu1 %v3745_v46 }
  0xbe   : > { %2165 = vmatpush.msra.mxu3 %v2919_v29  ;;  %v2901_v29 = vld [vmem:[%s4535_s4 + $0x130] sm:$0xff] }
  0xbf   : > { %1084 = vmatmul.f32.gmra.mxu2 %v3447_v28 }
  0xc0   : > { %v3842_v30 = vpop.f32.mrf.mxu2  ;;  %1973 = vmatpush.msra.mxu2 %v2901_v29 }
  0xc1   : > { %1541 = vmatmul.f32.gmra.mxu0 %v3722_v9 }
  0xc2   : > { %v3845_v36 = vpop.f32.mrf.mxu1 }
  0xc3   : > { %1350 = vmatmul.f32.gmra.mxu3 %v3701_v17 }
  0xc5   : > { %924 = vmatmul.f32.gmra.mxu1 %v3754_v53  ;;  %v2936_v53 = vld [vmem:[%s4535_s4 + $0x448] sm:$0xff] }
  0xc6   : > { %v3855_v46 = vpop.f32.mrf.mxu3  ;;  %v3857_v50 = vpop.f32.mrf.mxu0  ;;  %2358 = vmatpush.msra.mxu0 %v2936_v53 }
  0xc7   : > { %1087 = vmatmul.f32.gmra.mxu2 %v3513_v0 }
  0xc8   : > { %2359 = vmatpush.msra.mxu0 %v2935_v2 }
  0xc9   : > { %1544 = vmatmul.f32.gmra.mxu0 %v3859_v52 }
  0xca   : > { %v3863_v59 = vpop.f32.mrf.mxu2  ;;  %v3865_v62 = vpop.f32.mrf.mxu1 }
  0xcb   : > { %1353 = vmatmul.f32.gmra.mxu3 %v3722_v9 }
  0xcd   : > { %927 = vmatmul.f32.gmra.mxu1 %v3009_v63  ;;  %v2934_v63 = vld [vmem:[%s4535_s4 + $0x438] sm:$0xff] }
  0xce   : > { %v3871_v3 = vpop.f32.mrf.mxu3  ;;  %v3873_v15 = vpop.f32.mrf.mxu0  ;;  %2360 = vmatpush.msra.mxu0 %v2934_v63 }
  0xcf   : > { %1090 = vmatmul.f32.gmra.mxu2 %v3581_v45 }
  0xd0   : > { %2361 = vmatpush.msra.mxu0 %v2933_v55  ;;  %v2916_v55 = vld [vmem:[%s4535_s4 + $0x2a8] sm:$0xff] }
  0xd1   : > { %1547 = vmatmul.f32.gmra.mxu0 %v3311_v11 }
  0xd2   : > { %v3880_v19 = vpop.f32.mrf.mxu2  ;;  %v3882_v22 = vpop.f32.mrf.mxu1 }
  0xd3   : > { %1356 = vmatmul.f32.gmra.mxu3 %v3859_v52 }
  0xd5   : > { %930 = vmatmul.f32.gmra.mxu1 %v3386_v54 }
  0xd6   : > { %v3892_v7 = vpop.f32.mrf.mxu3  ;;  %v3894_v57 = vpop.f32.mrf.mxu0 }
  0xd7   : > { %1093 = vmatmul.f32.gmra.mxu2 %v3648_v34 }
  0xd9   : > { %1550 = vmatmul.f32.gmra.mxu0 %v3366_v40 }
  0xda   : > { %v3898_v44 = vpop.f32.mrf.mxu2  ;;  %v3900_v31 = vpop.f32.mrf.mxu1 }
  0xdb   : > { %1359 = vmatmul.f32.gmra.mxu3 %v3311_v11 }
  0xdd   : > { %933 = vmatmul.f32.gmra.mxu1 %v3447_v28  ;;  %v2918_v28 = vld [vmem:[%s4535_s4 + $0x2b8] sm:$0xff] }
  0xde   : > { %v3907_v54 = vpop.f32.mrf.mxu3  ;;  %v3909_v4 = vpop.f32.mrf.mxu0  ;;  %2166 = vmatpush.msra.mxu3 %v2918_v28 }
  0xdf   : > { %1096 = vmatmul.f32.gmra.mxu2 %v3694_v16 }
  0xe1   : > { %1553 = vmatmul.f32.gmra.mxu0 %v3427_v12 }
  0xe2   : > { %v3916_v11 = vpop.f32.mrf.mxu2  ;;  %v3918_v49 = vpop.f32.mrf.mxu1 }
  0xe3   : > { %1362 = vmatmul.f32.gmra.mxu3 %v3366_v40 }
  0xe5   : > { %936 = vmatmul.f32.gmra.mxu1 %v3513_v0 }
  0xe6   : > { %v3928_v39 = vpop.f32.mrf.mxu3  ;;  %v3930_v38 = vpop.f32.mrf.mxu0 }
  0xe7   : > { %4539 = vst [vmem:[#allocation4_spill] sm:$0xff] %v3928_v39  ;;  %1099 = vmatmul.f32.gmra.mxu2 %v3736_v41  ;;  %v4006_v39 = vld [vmem:[#allocation2 + $0xe1] sm:$0xff] }
  0xe9   : > { %1556 = vmatmul.f32.gmra.mxu0 %v3488_v47 }
  0xea   : > { %v3934_v40 = vpop.f32.mrf.mxu2  ;;  %v3936_v53 = vpop.f32.mrf.mxu1 }
  0xeb   : > { %1365 = vmatmul.f32.gmra.mxu3 %v3427_v12 }
  0xed   : > { %939 = vmatmul.f32.gmra.mxu1 %v3581_v45  ;;  %v2917_v45 = vld [vmem:[%s4535_s4 + $0x2b0] sm:$0xff] }
  0xee   : > { %v3943_v0 = vpop.f32.mrf.mxu3  ;;  %v3945_v5 = vpop.f32.mrf.mxu0  ;;  %2167 = vmatpush.msra.mxu3 %v2917_v45 }
  0xef   : > { %4540 = vst [vmem:[#allocation5_spill] sm:$0xff] %v3943_v0  ;;  %1102 = vmatmul.f32.gmra.mxu2 %v3331_v23  ;;  %v2885_v23 = vld [vmem:[%s4535_s4 + $0x3b0] sm:$0xff] }
  0xf0   : > { %1707 = vmatpush.msra.mxu1 %v2885_v23  ;;  %2168 = vmatpush.msra.mxu3 %v2916_v55 }
  0xf1   : > { %1559 = vmatmul.f32.gmra.mxu0 %v3556_v24 }
  0xf2   : > { %v3952_v12 = vpop.f32.mrf.mxu2  ;;  %v3954_v27 = vpop.f32.mrf.mxu1 }
  0xf3   : > { %1368 = vmatmul.f32.gmra.mxu3 %v3488_v47 }
  0xf5   : > { %942 = vmatmul.f32.gmra.mxu1 %v3648_v34 }
  0xf6   : > { %v3964_v2 = vpop.f32.mrf.mxu3  ;;  %v3966_v6 = vpop.f32.mrf.mxu0 }
  0xf7   : > { %4541 = vst [vmem:[#allocation6_spill] sm:$0xff] %v3964_v2  ;;  %1105 = vmatmul.f32.gmra.mxu2 %v3405_v61  ;;  %v3995_v2 = vld [vmem:[#allocation2 + $0xd9] sm:$0xff] }
  0xf9   : > { %1562 = vmatmul.f32.gmra.mxu0 %v3624_v14 }
  0xfa   : > { %v3970_v47 = vpop.f32.mrf.mxu2  ;;  %v898_v28 = vpop.f32.mrf.mxu1 }
  0xfb   : > { %1371 = vmatmul.f32.gmra.mxu3 %v3556_v24  ;;  %v899_v29 = vadd.f32 %v898_v28, %v3857_v50  ;;  %v2900_v24 = vld [vmem:[%s4535_s4 + $0x128] sm:$0xff] }
  0xfc   : > { %1974 = vmatpush.msra.mxu2 %v2900_v24  ;;  %v2884_v50 = vld [vmem:[%s4535_s4 + $0x3a8] sm:$0xff] }
  0xfd   : > { %945 = vmatmul.f32.gmra.mxu1 %v3694_v16 }
  0xfe   : > { %v3977_v34 = vpop.f32.mrf.mxu3  ;;  %v3979_v63 = vpop.f32.mrf.mxu0  ;;  %1708 = vmatpush.msra.mxu1 %v2884_v50  ;;  %v3010_v50 = vld [vmem:[#allocation2 + $0xd8] sm:$0xff] }
  0xff   : > { %4542 = vst [vmem:[#allocation7_spill] sm:$0xff] %v3977_v34  ;;  %1108 = vmatmul.f32.gmra.mxu2 %v3466_v35 }
 0x101   : > { %1565 = vmatmul.f32.gmra.mxu0 %v3679_v60 }
 0x102   : > { %v1061_v45 = vpop.f32.mrf.mxu2  ;;  %v901_v23 = vpop.f32.mrf.mxu1 }
 0x103   : > { %1374 = vmatmul.f32.gmra.mxu3 %v3624_v14  ;;  %v1157_v16 = vadd.f32 %v1061_v45, %v899_v29  ;;  %v902_v14 = vadd.f32 %v901_v23, %v3873_v15 }
 0x105   : > { %948 = vmatmul.f32.gmra.mxu1 %v3736_v41  ;;  %v2932_v41 = vld [vmem:[%s4535_s4 + $0x428] sm:$0xff] }
 0x106   : > { %v1327_v28 = vpop.f32.mrf.mxu3  ;;  %v1521_v34 = vpop.f32.mrf.mxu0  ;;  %2362 = vmatpush.msra.mxu0 %v2932_v41 }
 0x107   : > { %v1423_v24 = vadd.f32 %v1327_v28, %v1157_v16  ;;  %1111 = vmatmul.f32.gmra.mxu2 %v3532_v13 }
 0x109   : > { %v3999_v29 = vadd.f32 %v1521_v34, %v1423_v24  ;;  %1568 = vmatmul.f32.gmra.mxu0 %v3995_v2 }
 0x10a   : > { %v1064_v45 = vpop.f32.mrf.mxu2  ;;  %v904_v0 = vpop.f32.mrf.mxu1 }
 0x10b   : > { %1377 = vmatmul.f32.gmra.mxu3 %v3679_v60  ;;  %v1158_v55 = vadd.f32 %v1064_v45, %v902_v14  ;;  %v905_v34 = vadd.f32 %v904_v0, %v3894_v57  ;;  %v2899_v60 = vld [vmem:[%s4535_s4 + $0x120] sm:$0xff] }
 0x10c   : > { %1975 = vmatpush.msra.mxu2 %v2899_v60  ;;  %v2883_v57 = vld [vmem:[%s4535_s4 + $0x3a0] sm:$0xff] }
 0x10d   : > { %951 = vmatmul.f32.gmra.mxu1 %v3010_v50  ;;  %v4024_v50 = vld [vmem:[#allocation2 + $0xf1] sm:$0xff] }
 0x10e   : > { %v1330_v16 = vpop.f32.mrf.mxu3  ;;  %v1524_v28 = vpop.f32.mrf.mxu0  ;;  %1709 = vmatpush.msra.mxu1 %v2883_v57  ;;  %v4036_v57 = vld [vmem:[#allocation2 + $0xf9] sm:$0xff] }
 0x10f   : > { %v1424_v15 = vadd.f32 %v1330_v16, %v1158_v55  ;;  %1114 = vmatmul.f32.gmra.mxu2 %v3603_v58  ;;  %v2915_v55 = vld [vmem:[%s4535_s4 + $0x2a0] sm:$0xff] }
 0x110   : > { %2169 = vmatpush.msra.mxu3 %v2915_v55 }
 0x111   : > { %v4010_v23 = vadd.f32 %v1524_v28, %v1424_v15  ;;  %1571 = vmatmul.f32.gmra.mxu0 %v4006_v39 }
 0x112   : > { %v1067_v24 = vpop.f32.mrf.mxu2  ;;  %v907_v14 = vpop.f32.mrf.mxu1 }
 0x113   : > { %1380 = vmatmul.f32.gmra.mxu3 %v3995_v2  ;;  %v1159_v45 = vadd.f32 %v1067_v24, %v905_v34  ;;  %v908_v28 = vadd.f32 %v907_v14, %v3909_v4 }
 0x115   : > { %954 = vmatmul.f32.gmra.mxu1 %v3405_v61  ;;  %v2931_v61 = vld [vmem:[%s4535_s4 + $0x420] sm:$0xff] }
 0x116   : > { %v1333_v0 = vpop.f32.mrf.mxu3  ;;  %v1527_v41 = vpop.f32.mrf.mxu0  ;;  %2363 = vmatpush.msra.mxu0 %v2931_v61 }
 0x117   : > { %v1425_v16 = vadd.f32 %v1333_v0, %v1159_v45  ;;  %1117 = vmatmul.f32.gmra.mxu2 %v3662_v43 }
 0x119   : > { %v4028_v15 = vadd.f32 %v1527_v41, %v1425_v16  ;;  %1574 = vmatmul.f32.gmra.mxu0 %v4024_v50  ;;  %v2898_v41 = vld [vmem:[%s4535_s4 + $0x118] sm:$0xff] }
 0x11a   : > { %v1070_v34 = vpop.f32.mrf.mxu2  ;;  %v910_v60 = vpop.f32.mrf.mxu1  ;;  %1976 = vmatpush.msra.mxu2 %v2898_v41 }
 0x11b   : > { %1383 = vmatmul.f32.gmra.mxu3 %v4006_v39  ;;  %v1160_v24 = vadd.f32 %v1070_v34, %v908_v28  ;;  %v911_v14 = vadd.f32 %v910_v60, %v3930_v38  ;;  %v2914_v34 = vld [vmem:[%s4535_s4 + $0x298] sm:$0xff] }
 0x11c   : > { %v2882_v38 = vld [vmem:[%s4535_s4 + $0x398] sm:$0xff]  ;;  %2170 = vmatpush.msra.mxu3 %v2914_v34 }
 0x11d   : > { %957 = vmatmul.f32.gmra.mxu1 %v3466_v35 }
 0x11e   : > { %v1336_v45 = vpop.f32.mrf.mxu3  ;;  %v1530_v55 = vpop.f32.mrf.mxu0  ;;  %1710 = vmatpush.msra.mxu1 %v2882_v38 }
 0x11f   : > { %v1426_v4 = vadd.f32 %v1336_v45, %v1160_v24  ;;  %1120 = vmatmul.f32.gmra.mxu2 %v3704_v20 }
 0x121   : > { %v4040_v0 = vadd.f32 %v1530_v55, %v1426_v4  ;;  %1577 = vmatmul.f32.gmra.mxu0 %v4036_v57 }
 0x122   : > { %v1073_v16 = vpop.f32.mrf.mxu2  ;;  %v913_v28 = vpop.f32.mrf.mxu1 }
 0x123   : > { %1386 = vmatmul.f32.gmra.mxu3 %v4024_v50  ;;  %v1161_v35 = vadd.f32 %v1073_v16, %v911_v14  ;;  %v914_v45 = vadd.f32 %v913_v28, %v3945_v5  ;;  %v3011_v5 = vld [vmem:[#allocation2 + $0x138] sm:$0xff] }
 0x125   : > { %960 = vmatmul.f32.gmra.mxu1 %v3532_v13  ;;  %v2930_v13 = vld [vmem:[%s4535_s4 + $0x418] sm:$0xff] }
 0x126   : > { %v1339_v60 = vpop.f32.mrf.mxu3  ;;  %v1533_v24 = vpop.f32.mrf.mxu0  ;;  %2364 = vmatpush.msra.mxu0 %v2930_v13  ;;  %v3012_v13 = vld [vmem:[#allocation2 + $0x140] sm:$0xff] }
 0x127   : > { %v1427_v61 = vadd.f32 %v1339_v60, %v1161_v35  ;;  %1123 = vmatmul.f32.gmra.mxu2 %v3742_v42  ;;  %v2897_v60 = vld [vmem:[%s4535_s4 + $0x110] sm:$0xff] }
 0x128   : > { %1977 = vmatpush.msra.mxu2 %v2897_v60 }
 0x129   : > { %v4056_v55 = vadd.f32 %v1533_v24, %v1427_v61  ;;  %1580 = vmatmul.f32.gmra.mxu0 %v3500_v56 }
 0x12a   : > { %v1076_v4 = vpop.f32.mrf.mxu2  ;;  %v916_v14 = vpop.f32.mrf.mxu1 }
 0x12b   : > { %1389 = vmatmul.f32.gmra.mxu3 %v4036_v57  ;;  %v1162_v41 = vadd.f32 %v1076_v4, %v914_v45  ;;  %v917_v28 = vadd.f32 %v916_v14, %v3966_v6  ;;  %v2913_v45 = vld [vmem:[%s4535_s4 + $0x290] sm:$0xff] }
 0x12c   : > { %v2881_v6 = vld [vmem:[%s4535_s4 + $0x390] sm:$0xff]  ;;  %2171 = vmatpush.msra.mxu3 %v2913_v45 }
 0x12d   : > { %963 = vmatmul.f32.gmra.mxu1 %v3603_v58 }
 0x12e   : > { %v1342_v16 = vpop.f32.mrf.mxu3  ;;  %v1536_v35 = vpop.f32.mrf.mxu0  ;;  %1711 = vmatpush.msra.mxu1 %v2881_v6 }
 0x12f   : > { %v1428_v34 = vadd.f32 %v1342_v16, %v1162_v41  ;;  %1126 = vmatmul.f32.gmra.mxu2 %v3011_v5 }
 0x131   : > { %v4065_v38 = vadd.f32 %v1536_v35, %v1428_v34  ;;  %1583 = vmatmul.f32.gmra.mxu0 %v3568_v37 }
 0x132   : > { %v1079_v24 = vpop.f32.mrf.mxu2  ;;  %v919_v61 = vpop.f32.mrf.mxu1 }
 0x133   : > { %1392 = vmatmul.f32.gmra.mxu3 %v3500_v56  ;;  %v1163_v58 = vadd.f32 %v1079_v24, %v917_v28  ;;  %v920_v56 = vadd.f32 %v919_v61, %v3979_v63 }
 0x135   : > { %966 = vmatmul.f32.gmra.mxu1 %v3662_v43  ;;  %v2929_v43 = vld [vmem:[%s4535_s4 + $0x410] sm:$0xff] }
 0x136   : > { %v1345_v4 = vpop.f32.mrf.mxu3  ;;  %v1539_v14 = vpop.f32.mrf.mxu0  ;;  %2365 = vmatpush.msra.mxu0 %v2929_v43 }
 0x137   : > { %v1429_v41 = vadd.f32 %v1345_v4, %v1163_v58  ;;  %1129 = vmatmul.f32.gmra.mxu2 %v3012_v13 }
 0x139   : > { %v4080_v16 = vadd.f32 %v1539_v14, %v1429_v41  ;;  %1586 = vmatmul.f32.gmra.mxu0 %v3635_v21  ;;  %v4104_v41 = vld [vmem:[#allocation2 + $0x139] sm:$0xff] }
 0x13a   : > { %v1082_v35 = vpop.f32.mrf.mxu2  ;;  %v922_v34 = vpop.f32.mrf.mxu1 }
 0x13b   : > { %1395 = vmatmul.f32.gmra.mxu3 %v3568_v37  ;;  %v1164_v28 = vadd.f32 %v1082_v35, %v920_v56  ;;  %v923_v63 = vadd.f32 %v922_v34, %v3830_v25  ;;  %v2896_v37 = vld [vmem:[%s4535_s4 + $0x108] sm:$0xff] }
 0x13c   : > { %1978 = vmatpush.msra.mxu2 %v2896_v37  ;;  %v2880_v25 = vld [vmem:[%s4535_s4 + $0x388] sm:$0xff] }
 0x13d   : > { %969 = vmatmul.f32.gmra.mxu1 %v3704_v20 }
 0x13e   : > { %v1348_v60 = vpop.f32.mrf.mxu3  ;;  %v1542_v24 = vpop.f32.mrf.mxu0  ;;  %1712 = vmatpush.msra.mxu1 %v2880_v25  ;;  %v4132_v25 = vld [vmem:[#allocation2 + $0x151] sm:$0xff] }
 0x13f   : > { %v1430_v58 = vadd.f32 %v1348_v60, %v1164_v28  ;;  %1132 = vmatmul.f32.gmra.mxu2 %v3493_v51  ;;  %v2912_v51 = vld [vmem:[%s4535_s4 + $0x288] sm:$0xff] }
 0x140   : > { %2172 = vmatpush.msra.mxu3 %v2912_v51 }
 0x141   : > { %v4090_v61 = vadd.f32 %v1542_v24, %v1430_v58  ;;  %1589 = vmatmul.f32.gmra.mxu0 %v3688_v8 }
 0x142   : > { %v1085_v45 = vpop.f32.mrf.mxu2  ;;  %v925_v6 = vpop.f32.mrf.mxu1 }
 0x143   : > { %1398 = vmatmul.f32.gmra.mxu3 %v3635_v21  ;;  %v1165_v20 = vadd.f32 %v1085_v45, %v923_v63  ;;  %v926_v21 = vadd.f32 %v925_v6, %v3845_v36  ;;  %v2911_v6 = vld [vmem:[%s4535_s4 + $0x280] sm:$0xff] }
 0x144   : > { %2173 = vmatpush.msra.mxu3 %v2911_v6 }
 0x145   : > { %972 = vmatmul.f32.gmra.mxu1 %v3742_v42  ;;  %v2928_v42 = vld [vmem:[%s4535_s4 + $0x408] sm:$0xff] }
 0x146   : > { %v1351_v4 = vpop.f32.mrf.mxu3  ;;  %v1545_v14 = vpop.f32.mrf.mxu0  ;;  %2366 = vmatpush.msra.mxu0 %v2928_v42 }
 0x147   : > { %v1431_v56 = vadd.f32 %v1351_v4, %v1165_v20  ;;  %1135 = vmatmul.f32.gmra.mxu2 %v3561_v32  ;;  %v4115_v32 = vld [vmem:[#allocation2 + $0x141] sm:$0xff] }
 0x149   : > { %v4108_v35 = vadd.f32 %v1545_v14, %v1431_v56  ;;  %1592 = vmatmul.f32.gmra.mxu0 %v4104_v41 }
 0x14a   : > { %v1088_v34 = vpop.f32.mrf.mxu2  ;;  %v928_v28 = vpop.f32.mrf.mxu1 }
 0x14b   : > { %1401 = vmatmul.f32.gmra.mxu3 %v3688_v8  ;;  %v1166_v43 = vadd.f32 %v1088_v34, %v926_v21  ;;  %v929_v58 = vadd.f32 %v928_v28, %v3865_v62  ;;  %v2895_v8 = vld [vmem:[%s4535_s4 + $0x100] sm:$0xff] }
 0x14c   : > { %1979 = vmatpush.msra.mxu2 %v2895_v8  ;;  %v2879_v62 = vld [vmem:[%s4535_s4 + $0x380] sm:$0xff] }
 0x14d   : > { %975 = vmatmul.f32.gmra.mxu1 %v3011_v5 }
 0x14e   : > { %v1354_v60 = vpop.f32.mrf.mxu3  ;;  %v1548_v24 = vpop.f32.mrf.mxu0  ;;  %1713 = vmatpush.msra.mxu1 %v2879_v62 }
 0x14f   : > { %v1432_v36 = vadd.f32 %v1354_v60, %v1166_v43  ;;  %1138 = vmatmul.f32.gmra.mxu2 %v3629_v18  ;;  %v3013_v43 = vld [vmem:[#allocation2 + $0x150] sm:$0xff] }
 0x151   : > { %v4119_v63 = vadd.f32 %v1548_v24, %v1432_v36  ;;  %1595 = vmatmul.f32.gmra.mxu0 %v4115_v32  ;;  %v4143_v24 = vld [vmem:[#allocation2 + $0x159] sm:$0xff] }
 0x152   : > { %v1091_v37 = vpop.f32.mrf.mxu2  ;;  %v931_v45 = vpop.f32.mrf.mxu1 }
 0x153   : > { %1404 = vmatmul.f32.gmra.mxu3 %v4104_v41  ;;  %v1167_v5 = vadd.f32 %v1091_v37, %v929_v58  ;;  %v932_v14 = vadd.f32 %v931_v45, %v3882_v22 }
 0x155   : > { %978 = vmatmul.f32.gmra.mxu1 %v3012_v13  ;;  %v2927_v13 = vld [vmem:[%s4535_s4 + $0x400] sm:$0xff] }
 0x156   : > { %v1357_v20 = vpop.f32.mrf.mxu3  ;;  %v1551_v51 = vpop.f32.mrf.mxu0  ;;  %2367 = vmatpush.msra.mxu0 %v2927_v13 }
 0x157   : > { %v1433_v4 = vadd.f32 %v1357_v20, %v1167_v5  ;;  %1141 = vmatmul.f32.gmra.mxu2 %v3683_v1  ;;  %v3014_v5 = vld [vmem:[#allocation2 + $0x158] sm:$0xff]  ;;  %v4151_v20 = vld [vmem:[#allocation2 + $0x169] sm:$0xff] }
 0x159   : > { %v4136_v56 = vadd.f32 %v1551_v51, %v1433_v4  ;;  %1598 = vmatmul.f32.gmra.mxu0 %v4132_v25 }
 0x15a   : > { %v1094_v21 = vpop.f32.mrf.mxu2  ;;  %v934_v34 = vpop.f32.mrf.mxu1 }
 0x15b   : > { %1407 = vmatmul.f32.gmra.mxu3 %v4115_v32  ;;  %v1168_v28 = vadd.f32 %v1094_v21, %v932_v14  ;;  %v935_v36 = vadd.f32 %v934_v34, %v3900_v31  ;;  %v632_v34 = vld [vmem:[#allocation2 + $0x198] sm:$0xff] }
 0x15d   : > { %981 = vmatmul.f32.gmra.mxu1 %v3013_v43  ;;  %v4160_v43 = vld [vmem:[#allocation2 + $0x171] sm:$0xff] }
 0x15e   : > { %v1360_v42 = vpop.f32.mrf.mxu3  ;;  %v1554_v60 = vpop.f32.mrf.mxu0 }
 0x15f   : > { %v1434_v22 = vadd.f32 %v1360_v42, %v1168_v28  ;;  %1144 = vmatmul.f32.gmra.mxu2 %v3724_v33 }
 0x161   : > { %v4147_v58 = vadd.f32 %v1554_v60, %v1434_v22  ;;  %1601 = vmatmul.f32.gmra.mxu0 %v4143_v24 }
 0x162   : > { %v1097_v8 = vpop.f32.mrf.mxu2  ;;  %v937_v37 = vpop.f32.mrf.mxu1 }
 0x163   : > { %1410 = vmatmul.f32.gmra.mxu3 %v4132_v25  ;;  %v1169_v45 = vadd.f32 %v1097_v8, %v935_v36  ;;  %v938_v33 = vadd.f32 %v937_v37, %v3918_v49  ;;  %v4168_v37 = vld [vmem:[#allocation2 + $0x181] sm:$0xff] }
 0x165   : > { %984 = vmatmul.f32.gmra.mxu1 %v3014_v5 }
 0x166   : > { %v1363_v6 = vpop.f32.mrf.mxu3  ;;  %v1557_v62 = vpop.f32.mrf.mxu0 }
 0x167   : > { %v1435_v51 = vadd.f32 %v1363_v6, %v1169_v45  ;;  %1147 = vmatmul.f32.gmra.mxu2 %v3748_v48 }
 0x169   : > { %v4155_v31 = vadd.f32 %v1557_v62, %v1435_v51  ;;  %1604 = vmatmul.f32.gmra.mxu0 %v4151_v20 }
 0x16a   : > { %v1100_v4 = vpop.f32.mrf.mxu2  ;;  %v940_v14 = vpop.f32.mrf.mxu1 }
 0x16b   : > { %1413 = vmatmul.f32.gmra.mxu3 %v4143_v24  ;;  %v1170_v21 = vadd.f32 %v1100_v4, %v938_v33  ;;  %v941_v48 = vadd.f32 %v940_v14, %v3936_v53  ;;  %v1843_v33 = vld [vmem:[#allocation2 + $0x2] sm:$0xff] }
 0x16d   : > { %987 = vmatmul.f32.gmra.mxu1 %v3629_v18 }
 0x16e   : > { %v1366_v28 = vpop.f32.mrf.mxu3  ;;  %v1560_v13 = vpop.f32.mrf.mxu0 }
 0x16f   : > { %v1436_v42 = vadd.f32 %v1366_v28, %v1170_v21  ;;  %1150 = vmatmul.f32.gmra.mxu2 %v632_v34 }
 0x171   : > { %v4163_v49 = vadd.f32 %v1560_v13, %v1436_v42  ;;  %1607 = vmatmul.f32.gmra.mxu0 %v4160_v43 }
 0x172   : > { %v1103_v60 = vpop.f32.mrf.mxu2  ;;  %v943_v22 = vpop.f32.mrf.mxu1 }
 0x173   : > { %1416 = vmatmul.f32.gmra.mxu3 %v4151_v20  ;;  %v1171_v36 = vadd.f32 %v1103_v60, %v941_v48  ;;  %v944_v53 = vadd.f32 %v943_v22, %v3954_v27  ;;  %v1844_v48 = vld [vmem:[#allocation2 + $0xa] sm:$0xff]  ;;  %v3016_v60 = vld [vmem:[%s3153_s9 + $0x18] sm:$0xff] }
 0x175   : > { %990 = vmatmul.f32.gmra.mxu1 %v3683_v1  ;;  %v3015_v1 = vld [vmem:[%s3153_s9 + $0x10] sm:$0xff] }
 0x176   : > { %v1369_v18 = vpop.f32.mrf.mxu3  ;;  %v1563_v8 = vpop.f32.mrf.mxu0 }
 0x177   : > { %v1437_v45 = vadd.f32 %v1369_v18, %v1171_v36  ;;  %1153 = vmatmul.f32.gmra.mxu2 %v3767_v10  ;;  %v1845_v10 = vld [vmem:[#allocation2 + $0x1a] sm:$0xff]  ;;  %v1847_v18 = vld [vmem:[#allocation2 + $0x32] sm:$0xff] }
 0x179   : > { %v4172_v5 = vadd.f32 %v1563_v8, %v1437_v45  ;;  %1610 = vmatmul.f32.gmra.mxu0 %v4168_v37  ;;  %v1846_v45 = vld [vmem:[#allocation2 + $0x22] sm:$0xff] }
 0x17a   : > { %v1106_v6 = vpop.f32.mrf.mxu2  ;;  %v946_v62 = vpop.f32.mrf.mxu1 }
 0x17b   : > { %1419 = vmatmul.f32.gmra.mxu3 %v4160_v43  ;;  %v1172_v51 = vadd.f32 %v1106_v6, %v944_v53  ;;  %v947_v27 = vadd.f32 %v946_v62, %v3842_v30 }
 0x17d   : > { %1714 = vmatmul.f32.vlgmr.msra.gmra.mxu1 %v3015_v1 }
 0x17e   : > { %v1372_v4 = vpop.f32.mrf.mxu3  ;;  %v1566_v14 = vpop.f32.mrf.mxu0 }
 0x17f   : > { %v1438_v21 = vadd.f32 %v1372_v4, %v1172_v51  ;;  %1980 = vmatmul.f32.vlgmr.msra.gmra.mxu2 %v1843_v33  ;;  %v3017_v51 = vld [vmem:[%s3153_s9 + $0x20] sm:$0xff] }
 0x180   : > { %v1848_v4 = vld [vmem:[#allocation2 + $0x3a] sm:$0xff] }
 0x181   : > { %v4178_v34 = vadd.f32 %v1566_v14, %v1438_v21  ;;  %1613 = vmatmul.f32.gmra.mxu0 %v3711_v26 }
 0x182   : > { %v1109_v28 = vpop.f32.mrf.mxu2  ;;  %v949_v13 = vpop.f32.mrf.mxu1 }
 0x183   : > { %2174 = vmatmul.f32.vlgmr.msra.gmra.mxu3 %v1845_v10  ;;  %v1173_v42 = vadd.f32 %v1109_v28, %v947_v27  ;;  %v950_v30 = vadd.f32 %v949_v13, %v3863_v59 }
 0x185   : > { %1717 = vmatmul.f32.gmra.mxu1 %v3016_v60 }
 0x186   : > { %v1375_v22 = vpop.f32.mrf.mxu3  ;;  %v1569_v36 = vpop.f32.mrf.mxu0 }
 0x187   : > { %v1439_v8 = vadd.f32 %v1375_v22, %v1173_v42  ;;  %1983 = vmatmul.f32.gmra.mxu2 %v1844_v48  ;;  %v3018_v42 = vld [vmem:[%s3153_s9 + $0x28] sm:$0xff] }
 0x188   : > { %v1849_v22 = vld [vmem:[#allocation2 + $0x4a] sm:$0xff] }
 0x189   : > { %v4183_v53 = vadd.f32 %v1569_v36, %v1439_v8  ;;  %2368 = vmatmul.f32.vlgmr.msra.gmra.mxu0 %v1847_v18 }
 0x18a   : > { %v1112_v26 = vpop.f32.mrf.mxu2  ;;  %v952_v6 = vpop.f32.mrf.mxu1 }
 0x18b   : > { %2177 = vmatmul.f32.gmra.mxu3 %v1846_v45  ;;  %v1174_v62 = vadd.f32 %v1112_v26, %v950_v30  ;;  %v953_v21 = vadd.f32 %v952_v6, %v3880_v19 }
 0x18d   : > { %1720 = vmatmul.f32.gmra.mxu1 %v3017_v51  ;;  %v1850_v51 = vld [vmem:[#allocation2 + $0x52] sm:$0xff] }
 0x18e   : > { %v1378_v33 = vpop.f32.mrf.mxu3  ;;  %v1572_v1 = vpop.f32.mrf.mxu0 }
 0x18f   : > { %v1440_v14 = vadd.f32 %v1378_v33, %v1174_v62  ;;  %1986 = vmatmul.f32.gmra.mxu2 %v1845_v10 }
 0x191   : > { %v4187_v27 = vadd.f32 %v1572_v1, %v1440_v14  ;;  %2371 = vmatmul.f32.gmra.mxu0 %v1848_v4 }
 0x192   : > { %v1115_v59 = vpop.f32.mrf.mxu2  ;;  %v955_v28 = vpop.f32.mrf.mxu1 }
 0x193   : > { %2180 = vmatmul.f32.gmra.mxu3 %v1847_v18  ;;  %v1175_v13 = vadd.f32 %v1115_v59, %v953_v21  ;;  %v956_v8 = vadd.f32 %v955_v28, %v3898_v44 }
 0x195   : > { %1723 = vmatmul.f32.gmra.mxu1 %v3018_v42 }
 0x196   : > { %v1381_v48 = vpop.f32.mrf.mxu3  ;;  %v1575_v60 = vpop.f32.mrf.mxu0 }
 0x197   : > { %v1441_v36 = vadd.f32 %v1381_v48, %v1175_v13  ;;  %1989 = vmatmul.f32.gmra.mxu2 %v1846_v45  ;;  %v1851_v13 = vld [vmem:[#allocation2 + $0x62] sm:$0xff] }
 0x199   : > { %v4191_v30 = vadd.f32 %v1575_v60, %v1441_v36  ;;  %2374 = vmatmul.f32.gmra.mxu0 %v1849_v22 }
 0x19a   : > { %v1118_v19 = vpop.f32.mrf.mxu2  ;;  %v958_v10 = vpop.f32.mrf.mxu1 }
 0x19b   : > { %2183 = vmatmul.f32.gmra.mxu3 %v1848_v4  ;;  %v1176_v26 = vadd.f32 %v1118_v19, %v956_v8  ;;  %v959_v1 = vadd.f32 %v958_v10, %v3916_v11 }
 0x19d   : > { %1726 = vmatmul.f32.gmra.mxu1 %v3701_v17 }
 0x19e   : > { %v1384_v6 = vpop.f32.mrf.mxu3  ;;  %v1578_v62 = vpop.f32.mrf.mxu0 }
 0x19f   : > { %v1442_v33 = vadd.f32 %v1384_v6, %v1176_v26  ;;  %1992 = vmatmul.f32.gmra.mxu2 %v1847_v18 }
 0x1a1   : > { %v4195_v14 = vadd.f32 %v1578_v62, %v1442_v33  ;;  %2377 = vmatmul.f32.gmra.mxu0 %v1850_v51  ;;  %v3019_v62 = vld [vmem:[%s3153_s9 + $0x48] sm:$0xff] }
 0x1a2   : > { %v1121_v44 = vpop.f32.mrf.mxu2  ;;  %v961_v45 = vpop.f32.mrf.mxu1 }
 0x1a3   : > { %2186 = vmatmul.f32.gmra.mxu3 %v1849_v22  ;;  %v1177_v21 = vadd.f32 %v1121_v44, %v959_v1  ;;  %v962_v42 = vadd.f32 %v961_v45, %v3934_v40 }
 0x1a5   : > { %1729 = vmatmul.f32.gmra.mxu1 %v3722_v9  ;;  %v1852_v9 = vld [vmem:[#allocation2 + $0x6a] sm:$0xff] }
 0x1a6   : > { %v1387_v59 = vpop.f32.mrf.mxu3  ;;  %v1581_v28 = vpop.f32.mrf.mxu0 }
 0x1a7   : > { %v1443_v17 = vadd.f32 %v1387_v59, %v1177_v21  ;;  %1995 = vmatmul.f32.gmra.mxu2 %v1848_v4 }
 0x1a9   : > { %v4199_v48 = vadd.f32 %v1581_v28, %v1443_v17  ;;  %2380 = vmatmul.f32.gmra.mxu0 %v1851_v13  ;;  %v3020_v28 = vld [vmem:[%s3153_s9 + $0x50] sm:$0xff] }
 0x1aa   : > { %v1124_v11 = vpop.f32.mrf.mxu2  ;;  %v964_v18 = vpop.f32.mrf.mxu1 }
 0x1ab   : > { %2189 = vmatmul.f32.gmra.mxu3 %v1850_v51  ;;  %v1178_v60 = vadd.f32 %v1124_v11, %v962_v42  ;;  %v965_v10 = vadd.f32 %v964_v18, %v3952_v12  ;;  %v1854_v11 = vld [vmem:[#allocation2 + $0x82] sm:$0xff] }
 0x1ad   : > { %1732 = vmatmul.f32.gmra.mxu1 %v3859_v52  ;;  %v1853_v52 = vld [vmem:[#allocation2 + $0x7a] sm:$0xff] }
 0x1ae   : > { %v1390_v36 = vpop.f32.mrf.mxu3  ;;  %v1584_v8 = vpop.f32.mrf.mxu0 }
 0x1af   : > { %v1444_v19 = vadd.f32 %v1390_v36, %v1178_v60  ;;  %1998 = vmatmul.f32.gmra.mxu2 %v1849_v22 }
 0x1b1   : > { %v4203_v4 = vadd.f32 %v1584_v8, %v1444_v19  ;;  %2383 = vmatmul.f32.gmra.mxu0 %v1852_v9  ;;  %v3021_v19 = vld [vmem:[%s3153_s9 + $0x58] sm:$0xff] }
 0x1b2   : > { %v1127_v40 = vpop.f32.mrf.mxu2  ;;  %v967_v26 = vpop.f32.mrf.mxu1 }
 0x1b3   : > { %2192 = vmatmul.f32.gmra.mxu3 %v1851_v13  ;;  %v1179_v6 = vadd.f32 %v1127_v40, %v965_v10  ;;  %v968_v45 = vadd.f32 %v967_v26, %v3970_v47  ;;  %v1855_v26 = vld [vmem:[#allocation2 + $0x92] sm:$0xff] }
 0x1b5   : > { %1735 = vmatmul.f32.gmra.mxu1 %v3019_v62 }
 0x1b6   : > { %v1393_v33 = vpop.f32.mrf.mxu3  ;;  %v1587_v1 = vpop.f32.mrf.mxu0 }
 0x1b7   : > { %v1445_v44 = vadd.f32 %v1393_v33, %v1179_v6  ;;  %2001 = vmatmul.f32.gmra.mxu2 %v1850_v51 }
 0x1b9   : > { %v4207_v22 = vadd.f32 %v1587_v1, %v1445_v44  ;;  %2386 = vmatmul.f32.gmra.mxu0 %v1853_v52  ;;  %v3022_v44 = vld [vmem:[%s3153_s9 + $0x60] sm:$0xff] }
 0x1ba   : > { %v1130_v12 = vpop.f32.mrf.mxu2  ;;  %v970_v21 = vpop.f32.mrf.mxu1 }
 0x1bb   : > { %2195 = vmatmul.f32.gmra.mxu3 %v1852_v9  ;;  %v1180_v59 = vadd.f32 %v1130_v12, %v968_v45  ;;  %v971_v60 = vadd.f32 %v970_v21, %v3855_v46  ;;  %v1856_v21 = vld [vmem:[#allocation2 + $0x9a] sm:$0xff] }
 0x1bd   : > { %1738 = vmatmul.f32.gmra.mxu1 %v3020_v28 }
 0x1be   : > { %v1396_v17 = vpop.f32.mrf.mxu3  ;;  %v1590_v42 = vpop.f32.mrf.mxu0 }
 0x1bf   : > { %v1446_v18 = vadd.f32 %v1396_v17, %v1180_v59  ;;  %2004 = vmatmul.f32.gmra.mxu2 %v1851_v13 }
 0x1c1   : > { %v4211_v51 = vadd.f32 %v1590_v42, %v1446_v18  ;;  %2389 = vmatmul.f32.gmra.mxu0 %v1854_v11  ;;  %v3023_v18 = vld [vmem:[%s3153_s9 + $0x68] sm:$0xff] }
 0x1c2   : > { %v1133_v47 = vpop.f32.mrf.mxu2  ;;  %v973_v36 = vpop.f32.mrf.mxu1 }
 0x1c3   : > { %2198 = vmatmul.f32.gmra.mxu3 %v1853_v52  ;;  %v1181_v8 = vadd.f32 %v1133_v47, %v971_v60  ;;  %v974_v62 = vadd.f32 %v973_v36, %v3871_v3  ;;  %v1857_v36 = vld [vmem:[#allocation2 + $0xaa] sm:$0xff] }
 0x1c5   : > { %1741 = vmatmul.f32.gmra.mxu1 %v3021_v19 }
 0x1c6   : > { %v1399_v10 = vpop.f32.mrf.mxu3  ;;  %v1593_v40 = vpop.f32.mrf.mxu0 }
 0x1c7   : > { %v1447_v6 = vadd.f32 %v1399_v10, %v1181_v8  ;;  %2007 = vmatmul.f32.gmra.mxu2 %v1852_v9 }
 0x1c9   : > { %v4215_v13 = vadd.f32 %v1593_v40, %v1447_v6  ;;  %2392 = vmatmul.f32.gmra.mxu0 %v1855_v26  ;;  %v3024_v6 = vld [vmem:[%s3153_s9 + $0x70] sm:$0xff] }
 0x1ca   : > { %v1136_v46 = vpop.f32.mrf.mxu2  ;;  %v976_v33 = vpop.f32.mrf.mxu1 }
 0x1cb   : > { %2201 = vmatmul.f32.gmra.mxu3 %v1854_v11  ;;  %v1182_v1 = vadd.f32 %v1136_v46, %v974_v62  ;;  %v977_v28 = vadd.f32 %v976_v33, %v3892_v7  ;;  %v1858_v33 = vld [vmem:[#allocation2 + $0xb2] sm:$0xff] }
 0x1cd   : > { %1744 = vmatmul.f32.gmra.mxu1 %v3022_v44  ;;  %v4543_v44 = vld [vmem:[#allocation4_spill] sm:$0xff] }
 0x1ce   : > { %v1402_v45 = vpop.f32.mrf.mxu3  ;;  %v1596_v12 = vpop.f32.mrf.mxu0 }
 0x1cf   : > { %v1448_v59 = vadd.f32 %v1402_v45, %v1182_v1  ;;  %2010 = vmatmul.f32.gmra.mxu2 %v1853_v52 }
 0x1d1   : > { %v4219_v9 = vadd.f32 %v1596_v12, %v1448_v59  ;;  %2395 = vmatmul.f32.gmra.mxu0 %v1856_v21 }
 0x1d2   : > { %v1139_v3 = vpop.f32.mrf.mxu2  ;;  %v979_v17 = vpop.f32.mrf.mxu1 }
 0x1d3   : > { %2204 = vmatmul.f32.gmra.mxu3 %v1855_v26  ;;  %v1183_v42 = vadd.f32 %v1139_v3, %v977_v28  ;;  %v980_v19 = vadd.f32 %v979_v17, %v3907_v54  ;;  %v3025_v28 = vld [vmem:[%s3153_s9 + $0x78] sm:$0xff] }
 0x1d5   : > { %1747 = vmatmul.f32.gmra.mxu1 %v3023_v18 }
 0x1d6   : > { %v1405_v60 = vpop.f32.mrf.mxu3  ;;  %v1599_v47 = vpop.f32.mrf.mxu0 }
 0x1d7   : > { %v1449_v8 = vadd.f32 %v1405_v60, %v1183_v42  ;;  %2013 = vmatmul.f32.gmra.mxu2 %v1854_v11  ;;  %v1859_v42 = vld [vmem:[#allocation2 + $0xc2] sm:$0xff]  ;;  %v4544_v60 = vld [vmem:[#allocation5_spill] sm:$0xff] }
 0x1d9   : > { %v4223_v52 = vadd.f32 %v1599_v47, %v1449_v8  ;;  %2398 = vmatmul.f32.gmra.mxu0 %v1857_v36 }
 0x1da   : > { %v1142_v7 = vpop.f32.mrf.mxu2  ;;  %v982_v10 = vpop.f32.mrf.mxu1 }
 0x1db   : > { %2207 = vmatmul.f32.gmra.mxu3 %v1856_v21  ;;  %v1184_v40 = vadd.f32 %v1142_v7, %v980_v19  ;;  %v983_v45 = vadd.f32 %v982_v10, %v4543_v44 }
 0x1dd   : > { %1750 = vmatmul.f32.gmra.mxu1 %v3024_v6  ;;  %v1860_v6 = vld [vmem:[#allocation2 + $0xca] sm:$0xff] }
 0x1de   : > { %v1408_v62 = vpop.f32.mrf.mxu3  ;;  %v1602_v46 = vpop.f32.mrf.mxu0 }
 0x1df   : > { %v1450_v1 = vadd.f32 %v1408_v62, %v1184_v40  ;;  %2016 = vmatmul.f32.gmra.mxu2 %v1855_v26 }
 0x1e1   : > { %v4227_v11 = vadd.f32 %v1602_v46, %v1450_v1  ;;  %2401 = vmatmul.f32.gmra.mxu0 %v1858_v33  ;;  %v4545_v46 = vld [vmem:[#allocation6_spill] sm:$0xff] }
 0x1e2   : > { %v1145_v54 = vpop.f32.mrf.mxu2  ;;  %v985_v12 = vpop.f32.mrf.mxu1 }
 0x1e3   : > { %2210 = vmatmul.f32.gmra.mxu3 %v1857_v36  ;;  %v1185_v59 = vadd.f32 %v1145_v54, %v983_v45  ;;  %v986_v47 = vadd.f32 %v985_v12, %v4544_v60 }
 0x1e5   : > { %1753 = vmatmul.f32.gmra.mxu1 %v3025_v28  ;;  %v1861_v28 = vld [vmem:[#allocation2 + $0xda] sm:$0xff] }
 0x1e6   : > { %v1411_v3 = vpop.f32.mrf.mxu3  ;;  %v1605_v17 = vpop.f32.mrf.mxu0 }
 0x1e7   : > { %v1451_v18 = vadd.f32 %v1411_v3, %v1185_v59  ;;  %2019 = vmatmul.f32.gmra.mxu2 %v1856_v21  ;;  %v4546_v3 = vld [vmem:[#allocation7_spill] sm:$0xff] }
 0x1e9   : > { %v4231_v8 = vadd.f32 %v1605_v17, %v1451_v18  ;;  %2404 = vmatmul.f32.gmra.mxu0 %v1859_v42 }
 0x1ea   : > { %v1148_v26 = vpop.f32.mrf.mxu2  ;;  %v988_v19 = vpop.f32.mrf.mxu1 }
 0x1eb   : > { %2213 = vmatmul.f32.gmra.mxu3 %v1858_v33  ;;  %v1186_v7 = vadd.f32 %v1148_v26, %v986_v47  ;;  %v989_v1 = vadd.f32 %v988_v19, %v4545_v46 }
 0x1ed   : > { %1756 = vmatmul.f32.gmra.mxu1 %v3995_v2 }
 0x1ee   : > { %v1414_v10 = vpop.f32.mrf.mxu3  ;;  %v1608_v40 = vpop.f32.mrf.mxu0 }
 0x1ef   : > { %v1452_v62 = vadd.f32 %v1414_v10, %v1186_v7  ;;  %2022 = vmatmul.f32.gmra.mxu2 %v1857_v36  ;;  %v1862_v7 = vld [vmem:[#allocation2 + $0xe2] sm:$0xff] }
 0x1f1   : > { %v4235_v44 = vadd.f32 %v1608_v40, %v1452_v62  ;;  %2407 = vmatmul.f32.gmra.mxu0 %v1860_v6 }
 0x1f2   : > { %v1151_v21 = vpop.f32.mrf.mxu2  ;;  %v991_v45 = vpop.f32.mrf.mxu1 }
 0x1f3   : > { %2216 = vmatmul.f32.gmra.mxu3 %v1859_v42  ;;  %v1187_v54 = vadd.f32 %v1151_v21, %v989_v1  ;;  %v992_v17 = vadd.f32 %v991_v45, %v4546_v3  ;;  %v1863_v21 = vld [vmem:[#allocation2 + $0xf2] sm:$0xff]  ;;  %v1864_v3 = vld [vmem:[#allocation2 + $0xfa] sm:$0xff] }
 0x1f5   : > { %1759 = vmatmul.f32.gmra.mxu1 %v4006_v39 }
 0x1f6   : > { %v1417_v12 = vpop.f32.mrf.mxu3  ;;  %v1611_v59 = vpop.f32.mrf.mxu0 }
 0x1f7   : > { %v1453_v2 = vadd.f32 %v1417_v12, %v1187_v54  ;;  %2025 = vmatmul.f32.gmra.mxu2 %v1858_v33 }
 0x1f9   : > { %v4239_v18 = vadd.f32 %v1611_v59, %v1453_v2  ;;  %2410 = vmatmul.f32.gmra.mxu0 %v1861_v28 }
 0x1fa   : > { %v1154_v36 = vpop.f32.mrf.mxu2  ;;  %v1715_v60 = vpop.f32.mrf.mxu1 }
 0x1fb   : > { %2219 = vmatmul.f32.gmra.mxu3 %v1860_v6  ;;  %v1188_v47 = vadd.f32 %v1154_v36, %v992_v17  ;;  %v1811_v10 = vadd.f32 %v1715_v60, %v3999_v29 }
 0x1fd   : > { %1762 = vmatmul.f32.gmra.mxu1 %v4024_v50 }
 0x1fe   : > { %v1420_v26 = vpop.f32.mrf.mxu3  ;;  %v1614_v19 = vpop.f32.mrf.mxu0 }
 0x1ff   : > { %v1454_v39 = vadd.f32 %v1420_v26, %v1188_v47  ;;  %2028 = vmatmul.f32.gmra.mxu2 %v1859_v42 }
 0x201   : > { %v4243_v33 = vadd.f32 %v1614_v19, %v1454_v39  ;;  %2413 = vmatmul.f32.gmra.mxu0 %v1862_v7  ;;  %v3027_v19 = vld [vmem:[%s3153_s9 + $0xa8] sm:$0xff] }
 0x202   : > { %v1981_v40 = vpop.f32.mrf.mxu2  ;;  %v1718_v62 = vpop.f32.mrf.mxu1 }
 0x203   : > { %2222 = vmatmul.f32.gmra.mxu3 %v1861_v28  ;;  %v2077_v46 = vadd.f32 %v1981_v40, %v1811_v10  ;;  %v1812_v29 = vadd.f32 %v1718_v62, %v4010_v23  ;;  %v1865_v40 = vld [vmem:[#allocation2 + $0x10a] sm:$0xff] }
 0x205   : > { %1765 = vmatmul.f32.gmra.mxu1 %v4036_v57 }
 0x206   : > { %v2175_v1 = vpop.f32.mrf.mxu3  ;;  %v2369_v50 = vpop.f32.mrf.mxu0 }
 0x207   : > { %v2271_v45 = vadd.f32 %v2175_v1, %v2077_v46  ;;  %2031 = vmatmul.f32.gmra.mxu2 %v1860_v6  ;;  %v3026_v6 = vld [vmem:[%s3153_s9 + $0xa0] sm:$0xff] }
 0x209   : > { %v4253_v42 = vadd.f32 %v2369_v50, %v2271_v45  ;;  %2416 = vmatmul.f32.gmra.mxu0 %v1863_v21  ;;  %v3028_v45 = vld [vmem:[%s3153_s9 + $0xb0] sm:$0xff] }
 0x20a   : > { %v1984_v54 = vpop.f32.mrf.mxu2  ;;  %v1721_v12 = vpop.f32.mrf.mxu1 }
 0x20b   : > { %2497 = vst [vmem:[%s4250_s20] sm:$0xff] %v4253_v42  ;;  %2225 = vmatmul.f32.gmra.mxu3 %v1862_v7  ;;  %v2078_v57 = vadd.f32 %v1984_v54, %v1812_v29  ;;  %v1813_v23 = vadd.f32 %v1721_v12, %v4028_v15  ;;  %v1866_v12 = vld [vmem:[#allocation2 + $0x112] sm:$0xff] }
 0x20d   : > { %1768 = vmatmul.f32.gmra.mxu1 %v3026_v6 }
 0x20e   : > { %v2178_v59 = vpop.f32.mrf.mxu3  ;;  %v2372_v2 = vpop.f32.mrf.mxu0 }
 0x20f   : > { %v2272_v17 = vadd.f32 %v2178_v59, %v2078_v57  ;;  %2034 = vmatmul.f32.gmra.mxu2 %v1861_v28 }
 0x211   : > { %v4259_v36 = vadd.f32 %v2372_v2, %v2272_v17  ;;  %2419 = vmatmul.f32.gmra.mxu0 %v1864_v3  ;;  %v3029_v17 = vld [vmem:[%s3153_s9 + $0xb8] sm:$0xff] }
 0x212   : > { %v1987_v60 = vpop.f32.mrf.mxu2  ;;  %v1724_v47 = vpop.f32.mrf.mxu1 }
 0x213   : > { %2498 = vst [vmem:[%s4250_s20 + $0x8] sm:$0xff] %v4259_v36  ;;  %2228 = vmatmul.f32.gmra.mxu3 %v1863_v21  ;;  %v2079_v26 = vadd.f32 %v1987_v60, %v1813_v23  ;;  %v1814_v15 = vadd.f32 %v1724_v47, %v4040_v0  ;;  %v1867_v47 = vld [vmem:[#allocation2 + $0x122] sm:$0xff] }
 0x215   : > { %1771 = vmatmul.f32.gmra.mxu1 %v3027_v19 }
 0x216   : > { %v2181_v39 = vpop.f32.mrf.mxu3  ;;  %v2375_v10 = vpop.f32.mrf.mxu0 }
 0x217   : > { %v2273_v62 = vadd.f32 %v2181_v39, %v2079_v26  ;;  %2037 = vmatmul.f32.gmra.mxu2 %v1862_v7 }
 0x219   : > { %v4265_v28 = vadd.f32 %v2375_v10, %v2273_v62  ;;  %2422 = vmatmul.f32.gmra.mxu0 %v1865_v40 }
 0x21a   : > { %v1990_v46 = vpop.f32.mrf.mxu2  ;;  %v1727_v1 = vpop.f32.mrf.mxu1 }
 0x21b   : > { %2499 = vst [vmem:[%s4250_s20 + $0x10] sm:$0xff] %v4265_v28  ;;  %2231 = vmatmul.f32.gmra.mxu3 %v1864_v3  ;;  %v2080_v50 = vadd.f32 %v1990_v46, %v1814_v15  ;;  %v1815_v0 = vadd.f32 %v1727_v1, %v4056_v55  ;;  %v1868_v46 = vld [vmem:[#allocation2 + $0x12a] sm:$0xff] }
 0x21d   : > { %1774 = vmatmul.f32.gmra.mxu1 %v3028_v45 }
 0x21e   : > { %v2184_v29 = vpop.f32.mrf.mxu3  ;;  %v2378_v54 = vpop.f32.mrf.mxu0 }
 0x21f   : > { %v2274_v57 = vadd.f32 %v2184_v29, %v2080_v50  ;;  %2040 = vmatmul.f32.gmra.mxu2 %v1863_v21 }
 0x221   : > { %v4271_v7 = vadd.f32 %v2378_v54, %v2274_v57  ;;  %2425 = vmatmul.f32.gmra.mxu0 %v1866_v12  ;;  %v1869_v57 = vld [vmem:[#allocation2 + $0x13a] sm:$0xff] }
 0x222   : > { %v1993_v6 = vpop.f32.mrf.mxu2  ;;  %v1730_v59 = vpop.f32.mrf.mxu1 }
 0x223   : > { %2500 = vst [vmem:[%s4250_s20 + $0x18] sm:$0xff] %v4271_v7  ;;  %2234 = vmatmul.f32.gmra.mxu3 %v1865_v40  ;;  %v2081_v2 = vadd.f32 %v1993_v6, %v1815_v0  ;;  %v1816_v21 = vadd.f32 %v1730_v59, %v4065_v38 }
 0x225   : > { %1777 = vmatmul.f32.gmra.mxu1 %v3029_v17 }
 0x226   : > { %v2187_v23 = vpop.f32.mrf.mxu3  ;;  %v2381_v60 = vpop.f32.mrf.mxu0 }
 0x227   : > { %v2275_v26 = vadd.f32 %v2187_v23, %v2081_v2  ;;  %2043 = vmatmul.f32.gmra.mxu2 %v1864_v3  ;;  %v1870_v23 = vld [vmem:[#allocation2 + $0x142] sm:$0xff] }
 0x229   : > { %v4277_v55 = vadd.f32 %v2381_v60, %v2275_v26  ;;  %2428 = vmatmul.f32.gmra.mxu0 %v1867_v47 }
 0x22a   : > { %v1996_v19 = vpop.f32.mrf.mxu2  ;;  %v1733_v39 = vpop.f32.mrf.mxu1 }
 0x22b   : > { %2501 = vst [vmem:[%s4250_s20 + $0x20] sm:$0xff] %v4277_v55  ;;  %2237 = vmatmul.f32.gmra.mxu3 %v1866_v12  ;;  %v2082_v10 = vadd.f32 %v1996_v19, %v1816_v21  ;;  %v1817_v3 = vadd.f32 %v1733_v39, %v4080_v16 }
 0x22d   : > { %1780 = vmatmul.f32.gmra.mxu1 %v4104_v41 }
 0x22e   : > { %v2190_v62 = vpop.f32.mrf.mxu3  ;;  %v2384_v15 = vpop.f32.mrf.mxu0 }
 0x22f   : > { %v2276_v1 = vadd.f32 %v2190_v62, %v2082_v10  ;;  %2046 = vmatmul.f32.gmra.mxu2 %v1865_v40  ;;  %v1871_v10 = vld [vmem:[#allocation2 + $0x152] sm:$0xff] }
 0x231   : > { %v4283_v38 = vadd.f32 %v2384_v15, %v2276_v1  ;;  %2431 = vmatmul.f32.gmra.mxu0 %v1868_v46 }
 0x232   : > { %v1999_v50 = vpop.f32.mrf.mxu2  ;;  %v1736_v45 = vpop.f32.mrf.mxu1 }
 0x233   : > { %2502 = vst [vmem:[%s4250_s20 + $0x28] sm:$0xff] %v4283_v38  ;;  %2240 = vmatmul.f32.gmra.mxu3 %v1867_v47  ;;  %v2083_v29 = vadd.f32 %v1999_v50, %v1817_v3  ;;  %v1818_v40 = vadd.f32 %v1736_v45, %v4090_v61  ;;  %v1872_v45 = vld [vmem:[#allocation2 + $0x15a] sm:$0xff] }
 0x235   : > { %1783 = vmatmul.f32.gmra.mxu1 %v4115_v32 }
 0x236   : > { %v2193_v41 = vpop.f32.mrf.mxu3  ;;  %v2387_v54 = vpop.f32.mrf.mxu0 }
 0x237   : > { %v2277_v0 = vadd.f32 %v2193_v41, %v2083_v29  ;;  %2049 = vmatmul.f32.gmra.mxu2 %v1866_v12 }
 0x239   : > { %v4289_v16 = vadd.f32 %v2387_v54, %v2277_v0  ;;  %2434 = vmatmul.f32.gmra.mxu0 %v1869_v57 }
 0x23a   : > { %v2002_v6 = vpop.f32.mrf.mxu2  ;;  %v1739_v59 = vpop.f32.mrf.mxu1 }
 0x23b   : > { %2503 = vst [vmem:[%s4250_s20 + $0x30] sm:$0xff] %v4289_v16  ;;  %2243 = vmatmul.f32.gmra.mxu3 %v1868_v46  ;;  %v2084_v2 = vadd.f32 %v2002_v6, %v1818_v40  ;;  %v1819_v12 = vadd.f32 %v1739_v59, %v4108_v35  ;;  %v1873_v6 = vld [vmem:[#allocation2 + $0x16a] sm:$0xff] }
 0x23d   : > { %1786 = vmatmul.f32.gmra.mxu1 %v4132_v25 }
 0x23e   : > { %v2196_v32 = vpop.f32.mrf.mxu3  ;;  %v2390_v17 = vpop.f32.mrf.mxu0 }
 0x23f   : > { %v2278_v60 = vadd.f32 %v2196_v32, %v2084_v2  ;;  %2052 = vmatmul.f32.gmra.mxu2 %v1867_v47 }
 0x241   : > { %v4295_v61 = vadd.f32 %v2390_v17, %v2278_v60  ;;  %2437 = vmatmul.f32.gmra.mxu0 %v1870_v23 }
 0x242   : > { %v2005_v26 = vpop.f32.mrf.mxu2  ;;  %v1742_v21 = vpop.f32.mrf.mxu1 }
 0x243   : > { %2504 = vst [vmem:[%s4250_s20 + $0x38] sm:$0xff] %v4295_v61  ;;  %2246 = vmatmul.f32.gmra.mxu3 %v1869_v57  ;;  %v2085_v19 = vadd.f32 %v2005_v26, %v1819_v12  ;;  %v1820_v47 = vadd.f32 %v1742_v21, %v4119_v63  ;;  %v1874_v12 = vld [vmem:[#allocation2 + $0x172] sm:$0xff] }
 0x245   : > { %1789 = vmatmul.f32.gmra.mxu1 %v4143_v24 }
 0x246   : > { %v2199_v25 = vpop.f32.mrf.mxu3  ;;  %v2393_v39 = vpop.f32.mrf.mxu0 }
 0x247   : > { %v2279_v62 = vadd.f32 %v2199_v25, %v2085_v19  ;;  %2055 = vmatmul.f32.gmra.mxu2 %v1868_v46 }
 0x249   : > { %v4301_v35 = vadd.f32 %v2393_v39, %v2279_v62  ;;  %2440 = vmatmul.f32.gmra.mxu0 %v1871_v10  ;;  %v3030_v39 = vld [vmem:[%s3153_s9 + $0xf8] sm:$0xff] }
 0x24a   : > { %v2008_v15 = vpop.f32.mrf.mxu2  ;;  %v1745_v1 = vpop.f32.mrf.mxu1 }
 0x24b   : > { %2505 = vst [vmem:[%s4250_s20 + $0x40] sm:$0xff] %v4301_v35  ;;  %2249 = vmatmul.f32.gmra.mxu3 %v1870_v23  ;;  %v2086_v3 = vadd.f32 %v2008_v15, %v1820_v47  ;;  %v1821_v46 = vadd.f32 %v1745_v1, %v4136_v56  ;;  %v1875_v47 = vld [vmem:[#allocation2 + $0x182] sm:$0xff] }
 0x24d   : > { %1792 = vmatmul.f32.gmra.mxu1 %v4151_v20 }
 0x24e   : > { %v2202_v24 = vpop.f32.mrf.mxu3  ;;  %v2396_v50 = vpop.f32.mrf.mxu0 }
 0x24f   : > { %v2280_v29 = vadd.f32 %v2202_v24, %v2086_v3  ;;  %2058 = vmatmul.f32.gmra.mxu2 %v1869_v57  ;;  %v1223_v24 = vld [vmem:[#allocation2 + $0x199] sm:$0xff] }
 0x251   : > { %v4307_v63 = vadd.f32 %v2396_v50, %v2280_v29  ;;  %2443 = vmatmul.f32.gmra.mxu0 %v1872_v45 }
 0x252   : > { %v2011_v41 = vpop.f32.mrf.mxu2  ;;  %v1748_v54 = vpop.f32.mrf.mxu1 }
 0x253   : > { %2506 = vst [vmem:[%s4250_s20 + $0x48] sm:$0xff] %v4307_v63  ;;  %2252 = vmatmul.f32.gmra.mxu3 %v1871_v10  ;;  %v2087_v0 = vadd.f32 %v2011_v41, %v1821_v46  ;;  %v1822_v57 = vadd.f32 %v1748_v54, %v4147_v58  ;;  %v1876_v41 = vld [vmem:[#allocation2 + $0x18a] sm:$0xff] }
 0x255   : > { %1795 = vmatmul.f32.gmra.mxu1 %v4160_v43 }
 0x256   : > { %v2205_v20 = vpop.f32.mrf.mxu3  ;;  %v2399_v40 = vpop.f32.mrf.mxu0 }
 0x257   : > { %v2281_v59 = vadd.f32 %v2205_v20, %v2087_v0  ;;  %2061 = vmatmul.f32.gmra.mxu2 %v1870_v23 }
 0x259   : > { %v4313_v56 = vadd.f32 %v2399_v40, %v2281_v59  ;;  %2446 = vmatmul.f32.gmra.mxu0 %v1873_v6  ;;  %v1224_v40 = vld [vmem:[#allocation2 + $0x1a1] sm:$0xff] }
 0x25a   : > { %v2014_v2 = vpop.f32.mrf.mxu2  ;;  %v1751_v32 = vpop.f32.mrf.mxu1 }
 0x25b   : > { %2507 = vst [vmem:[%s4250_s20 + $0x50] sm:$0xff] %v4313_v56  ;;  %2255 = vmatmul.f32.gmra.mxu3 %v1872_v45  ;;  %v2088_v17 = vadd.f32 %v2014_v2, %v1822_v57  ;;  %v1823_v58 = vadd.f32 %v1751_v32, %v4155_v31  ;;  %v1877_v32 = vld [vmem:[#allocation2 + $0x19a] sm:$0xff] }
 0x25d   : > { %1798 = vmatmul.f32.gmra.mxu1 %v4168_v37 }
 0x25e   : > { %v2208_v43 = vpop.f32.mrf.mxu3  ;;  %v2402_v60 = vpop.f32.mrf.mxu0 }
 0x25f   : > { %v2282_v26 = vadd.f32 %v2208_v43, %v2088_v17  ;;  %2064 = vmatmul.f32.gmra.mxu2 %v1871_v10 }
 0x261   : > { %v4319_v23 = vadd.f32 %v2402_v60, %v2282_v26  ;;  %2449 = vmatmul.f32.gmra.mxu0 %v1874_v12 }
 0x262   : > { %v2017_v21 = vpop.f32.mrf.mxu2  ;;  %v1754_v19 = vpop.f32.mrf.mxu1 }
 0x263   : > { %2508 = vst [vmem:[%s4250_s20 + $0x58] sm:$0xff] %v4319_v23  ;;  %2258 = vmatmul.f32.gmra.mxu3 %v1873_v6  ;;  %v2089_v25 = vadd.f32 %v2017_v21, %v1823_v58  ;;  %v1824_v10 = vadd.f32 %v1754_v19, %v4163_v49  ;;  %v1878_v19 = vld [vmem:[#allocation2 + $0x1a2] sm:$0xff] }
 0x265   : > { %1801 = vmatmul.f32.gmra.mxu1 %v3030_v39 }
 0x266   : > { %v2211_v37 = vpop.f32.mrf.mxu3  ;;  %v2405_v62 = vpop.f32.mrf.mxu0 }
 0x267   : > { %v2283_v15 = vadd.f32 %v2211_v37, %v2089_v25  ;;  %2067 = vmatmul.f32.gmra.mxu2 %v1872_v45 }
 0x269   : > { %v4325_v31 = vadd.f32 %v2405_v62, %v2283_v15  ;;  %2452 = vmatmul.f32.gmra.mxu0 %v1875_v47 }
 0x26a   : > { %v2020_v1 = vpop.f32.mrf.mxu2  ;;  %v1757_v3 = vpop.f32.mrf.mxu1 }
 0x26b   : > { %2509 = vst [vmem:[%s4250_s20 + $0x60] sm:$0xff] %v4325_v31  ;;  %2261 = vmatmul.f32.gmra.mxu3 %v1874_v12  ;;  %v2090_v50 = vadd.f32 %v2020_v1, %v1824_v10  ;;  %v1825_v45 = vadd.f32 %v1757_v3, %v4172_v5 }
 0x26d   : > { %1804 = vmatmul.f32.gmra.mxu1 %v1223_v24 }
 0x26e   : > { %v2214_v29 = vpop.f32.mrf.mxu3  ;;  %v2408_v46 = vpop.f32.mrf.mxu0 }
 0x26f   : > { %v2284_v54 = vadd.f32 %v2214_v29, %v2090_v50  ;;  %2070 = vmatmul.f32.gmra.mxu2 %v1873_v6 }
 0x271   : > { %v4330_v49 = vadd.f32 %v2408_v46, %v2284_v54  ;;  %2455 = vmatmul.f32.gmra.mxu0 %v1876_v41 }
 0x272   : > { %v2023_v0 = vpop.f32.mrf.mxu2  ;;  %v1760_v20 = vpop.f32.mrf.mxu1 }
 0x273   : > { %2510 = vst [vmem:[%s4250_s20 + $0x68] sm:$0xff] %v4330_v49  ;;  %2264 = vmatmul.f32.gmra.mxu3 %v1875_v47  ;;  %v2091_v59 = vadd.f32 %v2023_v0, %v1825_v45  ;;  %v1826_v6 = vadd.f32 %v1760_v20, %v4178_v34 }
 0x275   : > { %1807 = vmatmul.f32.gmra.mxu1 %v1224_v40 }
 0x276   : > { %v2217_v57 = vpop.f32.mrf.mxu3  ;;  %v2411_v2 = vpop.f32.mrf.mxu0 }
 0x277   : > { %v2285_v17 = vadd.f32 %v2217_v57, %v2091_v59  ;;  %2073 = vmatmul.f32.gmra.mxu2 %v1874_v12 }
 0x279   : > { %v4335_v5 = vadd.f32 %v2411_v2, %v2285_v17  ;;  %2458 = vmatmul.f32.gmra.mxu0 %v1877_v32 }
 0x27a   : > { %v2026_v43 = vpop.f32.mrf.mxu2  ;;  %v1763_v60 = vpop.f32.mrf.mxu1 }
 0x27b   : > { %2511 = vst [vmem:[%s4250_s20 + $0x70] sm:$0xff] %v4335_v5  ;;  %2267 = vmatmul.f32.gmra.mxu3 %v1876_v41  ;;  %v2092_v26 = vadd.f32 %v2026_v43, %v1826_v6  ;;  %v1827_v39 = vadd.f32 %v1763_v60, %v4183_v53 }
 0x27e   : > { %v2220_v58 = vpop.f32.mrf.mxu3  ;;  %v2414_v21 = vpop.f32.mrf.mxu0 }
 0x27f   : > { %v2286_v25 = vadd.f32 %v2220_v58, %v2092_v26 }
 0x281   : > { %v4340_v12 = vadd.f32 %v2414_v21, %v2286_v25  ;;  %2461 = vmatmul.f32.gmra.mxu0 %v1878_v19 }
 0x282   : > { %v2029_v34 = vpop.f32.mrf.mxu2  ;;  %v1766_v37 = vpop.f32.mrf.mxu1 }
 0x283   : > { %2512 = vst [vmem:[%s4250_s20 + $0x78] sm:$0xff] %v4340_v12  ;;  %v2093_v62 = vadd.f32 %v2029_v34, %v1827_v39  ;;  %v1828_v1 = vadd.f32 %v1766_v37, %v4187_v27 }
 0x286   : > { %v2223_v47 = vpop.f32.mrf.mxu3  ;;  %v2417_v15 = vpop.f32.mrf.mxu0 }
 0x287   : > { %v2287_v10 = vadd.f32 %v2223_v47, %v2093_v62 }
 0x289   : > { %v4345_v3 = vadd.f32 %v2417_v15, %v2287_v10 }
 0x28a   : > { %v2032_v24 = vpop.f32.mrf.mxu2  ;;  %v1769_v50 = vpop.f32.mrf.mxu1 }
 0x28b   : > { %2513 = vst [vmem:[%s4250_s20 + $0x80] sm:$0xff] %v4345_v3  ;;  %v2094_v53 = vadd.f32 %v2032_v24, %v1828_v1  ;;  %v1829_v54 = vadd.f32 %v1769_v50, %v4191_v30  ;;  %v2529_v50 = vadd.f32 %v4259_v36, %v4253_v42 }
 0x28e   : > { %v2226_v29 = vpop.f32.mrf.mxu3  ;;  %v2420_v46 = vpop.f32.mrf.mxu0 }
 0x28f   : > { %v2288_v41 = vadd.f32 %v2226_v29, %v2094_v53  ;;  %v2530_v29 = vadd.f32 %v2529_v50, %v4265_v28 }
 0x291   : > { %v4350_v45 = vadd.f32 %v2420_v46, %v2288_v41 }
 0x292   : > { %v2035_v0 = vpop.f32.mrf.mxu2  ;;  %v1772_v20 = vpop.f32.mrf.mxu1 }
 0x293   : > { %2514 = vst [vmem:[%s4250_s20 + $0x88] sm:$0xff] %v4350_v45  ;;  %v2095_v27 = vadd.f32 %v2035_v0, %v1829_v54  ;;  %v1830_v2 = vadd.f32 %v1772_v20, %v4195_v14  ;;  %v2531_v0 = vadd.f32 %v2530_v29, %v4271_v7 }
 0x296   : > { %v2229_v40 = vpop.f32.mrf.mxu3  ;;  %v2423_v59 = vpop.f32.mrf.mxu0 }
 0x297   : > { %v2289_v57 = vadd.f32 %v2229_v40, %v2095_v27  ;;  %v2532_v27 = vadd.f32 %v2531_v0, %v4277_v55 }
 0x299   : > { %v4355_v32 = vadd.f32 %v2423_v59, %v2289_v57  ;;  %v2533_v57 = vadd.f32 %v2532_v27, %v4283_v38 }
 0x29a   : > { %v2038_v17 = vpop.f32.mrf.mxu2  ;;  %v1775_v6 = vpop.f32.mrf.mxu1 }
 0x29b   : > { %2515 = vst [vmem:[%s4250_s20 + $0x90] sm:$0xff] %v4355_v32  ;;  %v2096_v30 = vadd.f32 %v2038_v17, %v1830_v2  ;;  %v1831_v58 = vadd.f32 %v1775_v6, %v4199_v48  ;;  %v2534_v17 = vadd.f32 %v2533_v57, %v4289_v16 }
 0x29e   : > { %v2232_v43 = vpop.f32.mrf.mxu3  ;;  %v2426_v60 = vpop.f32.mrf.mxu0 }
 0x29f   : > { %v2290_v26 = vadd.f32 %v2232_v43, %v2096_v30 }
 0x2a1   : > { %v4360_v21 = vadd.f32 %v2426_v60, %v2290_v26  ;;  %v2535_v60 = vadd.f32 %v2534_v17, %v4295_v61 }
 0x2a2   : > { %v2041_v19 = vpop.f32.mrf.mxu2  ;;  %v1778_v25 = vpop.f32.mrf.mxu1 }
 0x2a3   : > { %2516 = vst [vmem:[%s4250_s20 + $0x98] sm:$0xff] %v4360_v21  ;;  %v2097_v14 = vadd.f32 %v2041_v19, %v1831_v58  ;;  %v1832_v62 = vadd.f32 %v1778_v25, %v4203_v4  ;;  %v2536_v58 = vadd.f32 %v2535_v60, %v4301_v35 }
 0x2a6   : > { %v2235_v39 = vpop.f32.mrf.mxu3  ;;  %v2429_v34 = vpop.f32.mrf.mxu0 }
 0x2a7   : > { %v2291_v37 = vadd.f32 %v2235_v39, %v2097_v14  ;;  %v2537_v14 = vadd.f32 %v2536_v58, %v4307_v63 }
 0x2a9   : > { %v4365_v47 = vadd.f32 %v2429_v34, %v2291_v37  ;;  %v2538_v34 = vadd.f32 %v2537_v14, %v4313_v56 }
 0x2aa   : > { %v2044_v15 = vpop.f32.mrf.mxu2  ;;  %v1781_v10 = vpop.f32.mrf.mxu1 }
 0x2ab   : > { %2517 = vst [vmem:[%s4250_s20 + $0xa0] sm:$0xff] %v4365_v47  ;;  %v2098_v48 = vadd.f32 %v2044_v15, %v1832_v62  ;;  %v1833_v46 = vadd.f32 %v1781_v10, %v4207_v22  ;;  %v2539_v10 = vadd.f32 %v2538_v34, %v4319_v23 }
 0x2ae   : > { %v2238_v1 = vpop.f32.mrf.mxu3  ;;  %v2432_v24 = vpop.f32.mrf.mxu0 }
 0x2af   : > { %v2292_v53 = vadd.f32 %v2238_v1, %v2098_v48  ;;  %v2540_v1 = vadd.f32 %v2539_v10, %v4325_v31 }
 0x2b1   : > { %v4373_v41 = vadd.f32 %v2432_v24, %v2292_v53  ;;  %v2541_v53 = vadd.f32 %v2540_v1, %v4330_v49 }
 0x2b2   : > { %v2047_v4 = vpop.f32.mrf.mxu2  ;;  %v1784_v54 = vpop.f32.mrf.mxu1 }
 0x2b3   : > { %2518 = vst [vmem:[%s4250_s20 + $0xa8] sm:$0xff] %v4373_v41  ;;  %v2099_v20 = vadd.f32 %v2047_v4, %v1833_v46  ;;  %v1834_v22 = vadd.f32 %v1784_v54, %v4211_v51  ;;  %v2542_v46 = vadd.f32 %v2541_v53, %v4335_v5 }
 0x2b6   : > { %v2241_v40 = vpop.f32.mrf.mxu3  ;;  %v2435_v59 = vpop.f32.mrf.mxu0 }
 0x2b7   : > { %v2293_v2 = vadd.f32 %v2241_v40, %v2099_v20  ;;  %v2543_v20 = vadd.f32 %v2542_v46, %v4340_v12 }
 0x2b9   : > { %v4382_v6 = vadd.f32 %v2435_v59, %v2293_v2  ;;  %v2544_v40 = vadd.f32 %v2543_v20, %v4345_v3 }
 0x2ba   : > { %v2050_v30 = vpop.f32.mrf.mxu2  ;;  %v1787_v43 = vpop.f32.mrf.mxu1 }
 0x2bb   : > { %2519 = vst [vmem:[%s4250_s20 + $0xb0] sm:$0xff] %v4382_v6  ;;  %v2100_v26 = vadd.f32 %v2050_v30, %v1834_v22  ;;  %v1835_v51 = vadd.f32 %v1787_v43, %v4215_v13  ;;  %v2545_v2 = vadd.f32 %v2544_v40, %v4350_v45 }
 0x2bd   : > { %v2546_v22 = vadd.f32 %v2545_v2, %v4355_v32 }
 0x2be   : > { %v2244_v19 = vpop.f32.mrf.mxu3  ;;  %v2438_v25 = vpop.f32.mrf.mxu0 }
 0x2bf   : > { %v2294_v39 = vadd.f32 %v2244_v19, %v2100_v26  ;;  %v2547_v26 = vadd.f32 %v2546_v22, %v4360_v21 }
 0x2c1   : > { %v4391_v37 = vadd.f32 %v2438_v25, %v2294_v39  ;;  %v2548_v19 = vadd.f32 %v2547_v26, %v4365_v47 }
 0x2c2   : > { %v2053_v62 = vpop.f32.mrf.mxu2  ;;  %v1790_v15 = vpop.f32.mrf.mxu1 }
 0x2c3   : > { %2520 = vst [vmem:[%s4250_s20 + $0xb8] sm:$0xff] %v4391_v37  ;;  %v2101_v48 = vadd.f32 %v2053_v62, %v1835_v51  ;;  %v1836_v13 = vadd.f32 %v1790_v15, %v4219_v9  ;;  %v2549_v39 = vadd.f32 %v2548_v19, %v4373_v41 }
 0x2c5   : > { %v2550_v51 = vadd.f32 %v2549_v39, %v4382_v6 }
 0x2c6   : > { %v2247_v24 = vpop.f32.mrf.mxu3  ;;  %v2441_v50 = vpop.f32.mrf.mxu0 }
 0x2c7   : > { %v2295_v29 = vadd.f32 %v2247_v24, %v2101_v48  ;;  %v2551_v48 = vadd.f32 %v2550_v51, %v4391_v37 }
 0x2c9   : > { %v4400_v4 = vadd.f32 %v2441_v50, %v2295_v29 }
 0x2ca   : > { %v2056_v54 = vpop.f32.mrf.mxu2  ;;  %v1793_v0 = vpop.f32.mrf.mxu1 }
 0x2cb   : > { %2521 = vst [vmem:[%s4250_s20 + $0xc0] sm:$0xff] %v4400_v4  ;;  %v2102_v27 = vadd.f32 %v2056_v54, %v1836_v13  ;;  %v1837_v9 = vadd.f32 %v1793_v0, %v4223_v52  ;;  %v2552_v24 = vadd.f32 %v2551_v48, %v4400_v4 }
 0x2ce   : > { %v2250_v59 = vpop.f32.mrf.mxu3  ;;  %v2444_v57 = vpop.f32.mrf.mxu0 }
 0x2cf   : > { %v2296_v17 = vadd.f32 %v2250_v59, %v2102_v27 }
 0x2d1   : > { %v4409_v30 = vadd.f32 %v2444_v57, %v2296_v17 }
 0x2d2   : > { %v2059_v43 = vpop.f32.mrf.mxu2  ;;  %v1796_v60 = vpop.f32.mrf.mxu1 }
 0x2d3   : > { %2522 = vst [vmem:[%s4250_s20 + $0xc8] sm:$0xff] %v4409_v30  ;;  %v2103_v58 = vadd.f32 %v2059_v43, %v1837_v9  ;;  %v1838_v52 = vadd.f32 %v1796_v60, %v4227_v11  ;;  %v2553_v29 = vadd.f32 %v2552_v24, %v4409_v30 }
 0x2d6   : > { %v2253_v25 = vpop.f32.mrf.mxu3  ;;  %v2447_v14 = vpop.f32.mrf.mxu0 }
 0x2d7   : > { %v2297_v34 = vadd.f32 %v2253_v25, %v2103_v58 }
 0x2d9   : > { %v4418_v62 = vadd.f32 %v2447_v14, %v2297_v34 }
 0x2da   : > { %v2062_v15 = vpop.f32.mrf.mxu2  ;;  %v1799_v10 = vpop.f32.mrf.mxu1 }
 0x2db   : > { %2523 = vst [vmem:[%s4250_s20 + $0xd0] sm:$0xff] %v4418_v62  ;;  %v2104_v1 = vadd.f32 %v2062_v15, %v1838_v52  ;;  %v2554_v11 = vadd.f32 %v2553_v29, %v4418_v62  ;;  %v1839_v13 = vadd.f32 %v1799_v10, %v4231_v8 }
 0x2de   : > { %v2256_v50 = vpop.f32.mrf.mxu3  ;;  %v2450_v53 = vpop.f32.mrf.mxu0 }
 0x2df   : > { %v2298_v46 = vadd.f32 %v2256_v50, %v2104_v1 }
 0x2e1   : > { %v2492_v54 = vadd.f32 %v2450_v53, %v2298_v46 }
 0x2e2   : > { %v2065_v0 = vpop.f32.mrf.mxu2  ;;  %v1802_v20 = vpop.f32.mrf.mxu1 }
 0x2e3   : > { %2524 = vst [vmem:[%s4250_s20 + $0xd8] sm:$0xff] %v2492_v54  ;;  %v2555_v27 = vadd.f32 %v2554_v11, %v2492_v54  ;;  %v2105_v40 = vadd.f32 %v2065_v0, %v1839_v13  ;;  %v1840_v17 = vadd.f32 %v1802_v20, %v4235_v44 }
 0x2e6   : > { %v2259_v59 = vpop.f32.mrf.mxu3  ;;  %v2453_v57 = vpop.f32.mrf.mxu0 }
 0x2e7   : > { %v2299_v2 = vadd.f32 %v2259_v59, %v2105_v40 }
 0x2e9   : > { %v2493_v22 = vadd.f32 %v2453_v57, %v2299_v2 }
 0x2ea   : > { %v2068_v9 = vpop.f32.mrf.mxu2  ;;  %v1805_v26 = vpop.f32.mrf.mxu1 }
 0x2eb   : > { %2525 = vst [vmem:[%s4250_s20 + $0xe0] sm:$0xff] %v2493_v22  ;;  %v2556_v43 = vadd.f32 %v2555_v27, %v2493_v22  ;;  %v2106_v60 = vadd.f32 %v2068_v9, %v1840_v17  ;;  %v1841_v25 = vadd.f32 %v1805_v26, %v4239_v18 }
 0x2ee   : > { %v2262_v58 = vpop.f32.mrf.mxu3  ;;  %v2456_v8 = vpop.f32.mrf.mxu0 }
 0x2ef   : > { %v2300_v19 = vadd.f32 %v2262_v58, %v2106_v60 }
 0x2f1   : > { %v2494_v14 = vadd.f32 %v2456_v8, %v2300_v19 }
 0x2f2   : > { %v2071_v39 = vpop.f32.mrf.mxu2  ;;  %v1808_v52 = vpop.f32.mrf.mxu1 }
 0x2f3   : > { %2526 = vst [vmem:[%s4250_s20 + $0xe8] sm:$0xff] %v2494_v14  ;;  %v2557_v34 = vadd.f32 %v2556_v43, %v2494_v14  ;;  %v2107_v51 = vadd.f32 %v2071_v39, %v1841_v25  ;;  %v1842_v48 = vadd.f32 %v1808_v52, %v4243_v33 }
 0x2f6   : > { %v2265_v44 = vpop.f32.mrf.mxu3  ;;  %v2459_v15 = vpop.f32.mrf.mxu0 }
 0x2f7   : > { %v2301_v10 = vadd.f32 %v2265_v44, %v2107_v51 }
 0x2f9   : > { %v2495_v1 = vadd.f32 %v2459_v15, %v2301_v10 }
 0x2fa   : > { %v2074_v24 = vpop.f32.mrf.mxu2 }
 0x2fb   : > { %2527 = vst [vmem:[%s4250_s20 + $0xf0] sm:$0xff] %v2495_v1  ;;  %v2558_v50 = vadd.f32 %v2557_v34, %v2495_v1  ;;  %v2108_v53 = vadd.f32 %v2074_v24, %v1842_v48 }
 0x2fe   : > { %v2268_v29 = vpop.f32.mrf.mxu3  ;;  %v2462_v18 = vpop.f32.mrf.mxu0 }
 0x2ff   : > { %v2302_v46 = vadd.f32 %v2268_v29, %v2108_v53 }
 0x301   : > { %v2496_v11 = vadd.f32 %v2462_v18, %v2302_v46 }
 0x303   : > { %2528 = vst [vmem:[%s4250_s20 + $0xf8] sm:$0xff] %v2496_v11  ;;  %v2559_v13 = vadd.f32 %v2558_v50, %v2496_v11 }
 0x305   : > { %v2560_v0 = vrot.slane %v2559_v13, 4 }
 0x307   : > { %v2561_v20 = vadd.f32 %v2560_v0, %v2559_v13 }
 0x309   : > { %v2562_v27 = vrot.slane %v2561_v20, 2 }
 0x30b   : > { %v2563_v40 = vadd.f32 %v2562_v27, %v2561_v20 }
 0x30d   : > { %v2564_v59 = vrot.slane %v2563_v40, 1 }
 0x30f   : > { %v2565_v33 = vadd.f32 %v2564_v59, %v2563_v40 }
 0x311   : > { %2599 = vst [vmem:[%s4439_s22] sm:$0x1] %v2565_v33  ;;  %v4442_v57 = vmul.f32 0.00390625, %v2565_v33 }
 0x313   : > { %v4446_v2 = vsub.f32 %v4418_v62, %v4442_v57  ;;  %v4449_v17 = vsub.f32 %v2492_v54, %v4442_v57  ;;  %v4452_v9 = vsub.f32 %v2493_v22, %v4442_v57  ;;  %v4455_v43 = vsub.f32 %v2494_v14, %v4442_v57 }
 0x314   : > { %v4458_v60 = vsub.f32 %v2495_v1, %v4442_v57  ;;  %v4461_v26 = vsub.f32 %v2496_v11, %v4442_v57  ;;  %v2567_v58 = vsub.f32 %v4253_v42, %v4442_v57  ;;  %v2568_v62 = vsub.f32 %v4259_v36, %v4442_v57 }
 0x315   : > { %v2569_v54 = vsub.f32 %v4265_v28, %v4442_v57  ;;  %v2570_v19 = vsub.f32 %v4271_v7, %v4442_v57  ;;  %v2571_v25 = vsub.f32 %v4277_v55, %v4442_v57  ;;  %v2572_v34 = vsub.f32 %v4283_v38, %v4442_v57 }
 0x316   : > { %v2600_v22 = vmul.f32 %v2567_v58, %v2567_v58  ;;  %v2601_v8 = vmul.f32 %v2568_v62, %v2568_v62  ;;  %v2573_v36 = vsub.f32 %v4289_v16, %v4442_v57  ;;  %v2574_v44 = vsub.f32 %v4295_v61, %v4442_v57 }
 0x317   : > { %v2602_v14 = vmul.f32 %v2569_v54, %v2569_v54  ;;  %v2603_v42 = vmul.f32 %v2570_v19, %v2570_v19  ;;  %v2604_v52 = vmul.f32 %v2571_v25, %v2571_v25  ;;  %v2605_v15 = vmul.f32 %v2572_v34, %v2572_v34 }
 0x318   : > { %v2632_v39 = vadd.f32 %v2601_v8, %v2600_v22  ;;  %v2575_v55 = vsub.f32 %v4301_v35, %v4442_v57  ;;  %v2606_v10 = vmul.f32 %v2573_v36, %v2573_v36  ;;  %v2576_v38 = vsub.f32 %v4307_v63, %v4442_v57 }
 0x319   : > { %v2607_v1 = vmul.f32 %v2574_v44, %v2574_v44  ;;  %v2577_v16 = vsub.f32 %v4313_v56, %v4442_v57  ;;  %v2578_v61 = vsub.f32 %v4319_v23, %v4442_v57  ;;  %v2579_v35 = vsub.f32 %v4325_v31, %v4442_v57 }
 0x31a   : > { %v2633_v51 = vadd.f32 %v2632_v39, %v2602_v14  ;;  %v2608_v50 = vmul.f32 %v2575_v55, %v2575_v55  ;;  %v2609_v29 = vmul.f32 %v2576_v38, %v2576_v38  ;;  %v2580_v63 = vsub.f32 %v4330_v49, %v4442_v57 }
 0x31b   : > { %v2610_v46 = vmul.f32 %v2577_v16, %v2577_v16  ;;  %v2611_v13 = vmul.f32 %v2578_v61, %v2578_v61  ;;  %v2581_v56 = vsub.f32 %v4335_v5, %v4442_v57  ;;  %v2612_v20 = vmul.f32 %v2579_v35, %v2579_v35 }
 0x31c   : > { %v2634_v28 = vadd.f32 %v2633_v51, %v2603_v42  ;;  %v2582_v23 = vsub.f32 %v4340_v12, %v4442_v57  ;;  %v2613_v40 = vmul.f32 %v2580_v63, %v2580_v63  ;;  %v2583_v31 = vsub.f32 %v4345_v3, %v4442_v57 }
 0x31d   : > { %v2614_v33 = vmul.f32 %v2581_v56, %v2581_v56  ;;  %v2584_v49 = vsub.f32 %v4350_v45, %v4442_v57  ;;  %v2585_v5 = vsub.f32 %v4355_v32, %v4442_v57  ;;  %v2586_v12 = vsub.f32 %v4360_v21, %v4442_v57 }
 0x31e   : > { %v2635_v7 = vadd.f32 %v2634_v28, %v2604_v52  ;;  %v2615_v62 = vmul.f32 %v2582_v23, %v2582_v23  ;;  %v2616_v22 = vmul.f32 %v2583_v31, %v2583_v31  ;;  %v2587_v3 = vsub.f32 %v4365_v47, %v4442_v57 }
 0x31f   : > { %v2617_v19 = vmul.f32 %v2584_v49, %v2584_v49  ;;  %v2618_v14 = vmul.f32 %v2585_v5, %v2585_v5  ;;  %v2588_v45 = vsub.f32 %v4373_v41, %v4442_v57  ;;  %v2619_v34 = vmul.f32 %v2586_v12, %v2586_v12 }
 0x320   : > { %v2636_v48 = vadd.f32 %v2635_v7, %v2605_v15  ;;  %v2589_v32 = vsub.f32 %v4382_v6, %v4442_v57  ;;  %v2620_v51 = vmul.f32 %v2587_v3, %v2587_v3  ;;  %v2590_v21 = vsub.f32 %v4391_v37, %v4442_v57 }
 0x321   : > { %v2621_v52 = vmul.f32 %v2588_v45, %v2588_v45  ;;  %v2591_v47 = vsub.f32 %v4400_v4, %v4442_v57  ;;  %v2592_v41 = vsub.f32 %v4409_v30, %v4442_v57  ;;  %v2628_v4 = vmul.f32 %v4452_v9, %v4452_v9 }
 0x322   : > { %v2637_v24 = vadd.f32 %v2636_v48, %v2606_v10  ;;  %v2622_v44 = vmul.f32 %v2589_v32, %v2589_v32  ;;  %v2623_v7 = vmul.f32 %v2590_v21, %v2590_v21  ;;  %v2629_v30 = vmul.f32 %v4455_v43, %v4455_v43 }
 0x323   : > { %v2624_v10 = vmul.f32 %v2591_v47, %v2591_v47  ;;  %v2625_v6 = vmul.f32 %v2592_v41, %v2592_v41 }
 0x324   : > { %v2638_v53 = vadd.f32 %v2637_v24, %v2607_v1  ;;  %v2626_v1 = vmul.f32 %v4446_v2, %v4446_v2  ;;  %v2627_v24 = vmul.f32 %v4449_v17, %v4449_v17  ;;  %v2631_v2 = vmul.f32 %v4461_v26, %v4461_v26 }
 0x326   : > { %v2639_v18 = vadd.f32 %v2638_v53, %v2608_v50  ;;  %v2630_v53 = vmul.f32 %v4458_v60, %v4458_v60 }
 0x328   : > { %v2640_v11 = vadd.f32 %v2639_v18, %v2609_v29 }
 0x32a   : > { %v2641_v0 = vadd.f32 %v2640_v11, %v2610_v46 }
 0x32c   : > { %v2642_v27 = vadd.f32 %v2641_v0, %v2611_v13 }
 0x32e   : > { %v2643_v59 = vadd.f32 %v2642_v27, %v2612_v20 }
 0x330   : > { %v2644_v58 = vadd.f32 %v2643_v59, %v2613_v40 }
 0x332   : > { %v2645_v54 = vadd.f32 %v2644_v58, %v2614_v33 }
 0x334   : > { %v2646_v8 = vadd.f32 %v2645_v54, %v2615_v62 }
 0x336   : > { %v2647_v25 = vadd.f32 %v2646_v8, %v2616_v22 }
 0x338   : > { %v2648_v39 = vadd.f32 %v2647_v25, %v2617_v19 }
 0x33a   : > { %v2649_v42 = vadd.f32 %v2648_v39, %v2618_v14 }
 0x33c   : > { %v2650_v36 = vadd.f32 %v2649_v42, %v2619_v34 }
 0x33e   : > { %v2651_v28 = vadd.f32 %v2650_v36, %v2620_v51 }
 0x340   : > { %v2652_v15 = vadd.f32 %v2651_v28, %v2621_v52 }
 0x342   : > { %v2653_v55 = vadd.f32 %v2652_v15, %v2622_v44 }
 0x344   : > { %v2654_v48 = vadd.f32 %v2653_v55, %v2623_v7 }
 0x346   : > { %v2655_v38 = vadd.f32 %v2654_v48, %v2624_v10 }
 0x348   : > { %v2656_v37 = vadd.f32 %v2655_v38, %v2625_v6 }
 0x34a   : > { %v2657_v16 = vadd.f32 %v2656_v37, %v2626_v1 }
 0x34c   : > { %v2658_v50 = vadd.f32 %v2657_v16, %v2627_v24 }
 0x34e   : > { %v2659_v57 = vadd.f32 %v2658_v50, %v2628_v4 }
 0x350   : > { %v2660_v61 = vadd.f32 %v2659_v57, %v2629_v30 }
 0x352   : > { %v2661_v29 = vadd.f32 %v2660_v61, %v2630_v53 }
 0x354   : > { %v2662_v18 = vadd.f32 %v2661_v29, %v2631_v2 }
 0x356   : > { %v2663_v17 = vrot.slane %v2662_v18, 4 }
 0x358   : > { %v2664_v35 = vadd.f32 %v2663_v17, %v2662_v18 }
 0x35a   : > { %v2665_v46 = vrot.slane %v2664_v35, 2 }
 0x35c   : > { %v2666_v11 = vadd.f32 %v2665_v46, %v2664_v35 }
 0x35e   : > { %v2667_v63 = vrot.slane %v2666_v11, 1 }
 0x360   : > { %v2668_v9 = vadd.f32 %v2667_v63, %v2666_v11 }
 0x362   : > { %2669 = vst [vmem:[%s4439_s22 + $0x1] sm:$0x1] %v2668_v9 }
 0x363 PF: > { %s18_s24 = sadd.s32 1, %s3037_s24  }
 0x364   : > { %p15_p4 = scmp.ge.s32.totalorder %s18_s24, 4  }
 0x366   :  { %17 = sbr.rel (!%p15_p4) target bundleno = 1 (0x1), region = 109 }

</bundles_post_ra>
